<compile_context>
chip_gen: v7x
topology: tpu7x:2x2x1
jax: 0.10.0
libtpu: 0.0.40
codegen_flags: <defaults>
</compile_context>

<pallas_src>
import jax
import jax.numpy as jnp
from jax.experimental import pallas as pl
from jax.experimental.pallas import tpu as pltpu

EPS = 1e-5  # PyTorch BatchNorm default eps


def _vmem():
    return pl.BlockSpec(memory_space=pltpu.MemorySpace.VMEM)


# --------------------------------------------------------------------------
# In-kernel helpers (traced inside the fused kernel)
# --------------------------------------------------------------------------
def _conv_bn_relu_im2col(x, w, scale, shift, Ho, Wo):
    """3x3 valid conv via one im2col matmul + folded BN + ReLU.

    x:     (B, Hi, Wi, Cin)  fp32 value (already padded if 'same')
    w:     (9*Cin, Cout)     bf16, rows ordered (dy, dx, cin)
    scale: (1, Cout) fp32    gamma / sqrt(var + eps)
    shift: (1, Cout) fp32    beta + scale * (conv_bias - mean)
    returns (B, Ho, Wo, Cout) fp32
    """
    B, Hi, Wi, Cin = x.shape
    Cout = w.shape[-1]
    cols = []
    for dy in range(3):
        for dx in range(3):
            cols.append(x[:, dy:dy + Ho, dx:dx + Wo, :].reshape(B * Ho * Wo, Cin))
    patches = jnp.concatenate(cols, axis=-1).astype(jnp.bfloat16)   # (M, 9*Cin)
    acc = jnp.dot(patches, w, preferred_element_type=jnp.float32)   # (M, Cout)
    y = jnp.maximum(acc * scale + shift, 0.0)
    return y.reshape(B, Ho, Wo, Cout)


# --------------------------------------------------------------------------
# Fused forward kernel
# --------------------------------------------------------------------------
def gomoku_fused_kernel(x_ref,
                        w1_ref, sc1_ref, sh1_ref,
                        w2_ref, sc2_ref, sh2_ref,
                        w3_ref, sc3_ref, sh3_ref,
                        w4_ref, sc4_ref, sh4_ref,
                        wfc1_ref, sfc1_ref, bfc1_ref,
                        wfc2_ref, sfc2_ref, bfc2_ref,
                        wpi_ref, bpi_ref, wv_ref, bv_ref,
                        pi_ref, v_ref,
                        pad1_ref, pad2_ref):
    B, bx, by, _ = x_ref.shape
    C = w2_ref.shape[-1]

    # ---- conv1 ('same', Cin=1): 9 broadcast-FMAs on the VPU ---------------
    pad1_ref[...] = jnp.zeros(pad1_ref.shape, jnp.float32)
    pad1_ref[:, 1:bx + 1, 1:by + 1, :] = x_ref[...]
    xp = pad1_ref[...]                                   # (B, bx+2, by+2, 1)
    w1 = w1_ref[...]                                     # (9, C) fp32
    acc = jnp.zeros((B, bx, by, C), jnp.float32)
    for dy in range(3):
        for dx in range(3):
            tap = xp[:, dy:dy + bx, dx:dx + by, :]       # (B, bx, by, 1)
            acc = acc + tap * w1[dy * 3 + dx].reshape(1, 1, 1, C)
    y = jnp.maximum(acc * sc1_ref[...].reshape(1, 1, 1, C)
                    + sh1_ref[...].reshape(1, 1, 1, C), 0.0)

    # ---- conv2 ('same'): pad in VMEM scratch, one im2col matmul -----------
    pad2_ref[...] = jnp.zeros(pad2_ref.shape, jnp.float32)
    pad2_ref[:, 1:bx + 1, 1:by + 1, :] = y
    y = _conv_bn_relu_im2col(pad2_ref[...], w2_ref[...],
                             sc2_ref[...], sh2_ref[...], bx, by)

    # ---- conv3, conv4 ('valid') --------------------------------------------
    y = _conv_bn_relu_im2col(y, w3_ref[...], sc3_ref[...], sh3_ref[...],
                             bx - 2, by - 2)
    y = _conv_bn_relu_im2col(y, w4_ref[...], sc4_ref[...], sh4_ref[...],
                             bx - 4, by - 4)             # (B, bx-4, by-4, C)

    # ---- flatten (NHWC order; wfc1 rows were pre-permuted at init) --------
    P = (bx - 4) * (by - 4)
    y = y.reshape(B, P, C)
    h = jnp.concatenate([y[:, p, :] for p in range(P)], axis=-1)  # (B, P*C)

    # ---- fc1 + BN + ReLU ----------------------------------------------------
    h = jnp.dot(h.astype(jnp.bfloat16), wfc1_ref[...],
                preferred_element_type=jnp.float32)
    h = jnp.maximum(h * sfc1_ref[...] + bfc1_ref[...], 0.0)
    # TODO(synk): F.dropout omitted — identity in eval mode (training=False).

    # ---- fc2 + BN + ReLU ----------------------------------------------------
    h = jnp.dot(h.astype(jnp.bfloat16), wfc2_ref[...],
                preferred_element_type=jnp.float32)
    h = jnp.maximum(h * sfc2_ref[...] + bfc2_ref[...], 0.0)

    # ---- policy head (linear + log_softmax) and value head (linear + tanh) -
    hb = h.astype(jnp.bfloat16)
    logits = jnp.dot(hb, wpi_ref[...],
                     preferred_element_type=jnp.float32) + bpi_ref[...]
    m = jnp.max(logits, axis=-1, keepdims=True)
    z = logits - m
    lse = jnp.log(jnp.sum(jnp.exp(z), axis=-1, keepdims=True))
    pi_ref[...] = z - lse

    v = jnp.dot(hb, wv_ref[...],
                preferred_element_type=jnp.float32) + bv_ref[...]
    v_ref[...] = jnp.tanh(v)


# --------------------------------------------------------------------------
# Wrapper: one pallas_call for the whole network
# --------------------------------------------------------------------------
@jax.jit
def gomoku_forward(params, s):
    B, bx, by = s.shape
    C = params["sc1"].shape[-1]
    A = params["wpi"].shape[-1]
    x = s.astype(jnp.float32).reshape(B, bx, by, 1)

    operands = (x,
                params["w1"], params["sc1"], params["sh1"],
                params["w2"], params["sc2"], params["sh2"],
                params["w3"], params["sc3"], params["sh3"],
                params["w4"], params["sc4"], params["sh4"],
                params["wfc1"], params["sfc1"], params["bfc1"],
                params["wfc2"], params["sfc2"], params["bfc2"],
                params["wpi"], params["bpi"], params["wv"], params["bv"])

    return pl.pallas_call(
        gomoku_fused_kernel,
        out_shape=(jax.ShapeDtypeStruct((B, A), jnp.float32),
                   jax.ShapeDtypeStruct((B, 1), jnp.float32)),
        in_specs=[_vmem()] * len(operands),
        out_specs=(_vmem(), _vmem()),
        scratch_shapes=[
            pltpu.VMEM((B, bx + 2, by + 2, 1), jnp.float32),   # padded board
            pltpu.VMEM((B, bx + 2, by + 2, C), jnp.float32),   # padded conv1 out
        ],
    )(*operands)


# --------------------------------------------------------------------------
# Parameter construction (deterministic; BN folded into scale/shift;
# matmul weights in bf16, folded BN params and conv1 weight in fp32)
# --------------------------------------------------------------------------
def init_params(key, C, bx, by, action_size):
    ks = iter(jax.random.split(key, 64))

    def nrm(shape, s=0.1):
        return s * jax.random.normal(next(ks), shape, jnp.float32)

    def bn_stats(c):
        gamma = 1.0 + 0.1 * jax.random.normal(next(ks), (c,), jnp.float32)
        beta = 0.1 * jax.random.normal(next(ks), (c,), jnp.float32)
        mean = 0.1 * jax.random.normal(next(ks), (c,), jnp.float32)
        var = jax.random.uniform(next(ks), (c,), jnp.float32, 0.5, 1.5)
        return gamma, beta, mean, var

    def fold(gamma, beta, mean, var, bias):
        scale = gamma / jnp.sqrt(var + EPS)
        shift = beta + scale * (bias - mean)
        return scale, shift

    p = {}
    # conv1: Cin=1 -> weight kept fp32 as (9, C) for the VPU broadcast path.
    w1 = nrm((3, 3, 1, C)).reshape(9, C)
    b1 = nrm((C,))
    sc, sh = fold(*bn_stats(C), b1)
    p["w1"], p["sc1"], p["sh1"] = w1, sc.reshape(1, C), sh.reshape(1, C)

    # conv2..4: weights stored in im2col layout (9*Cin, Cout), rows (dy,dx,cin), bf16.
    for i in (2, 3, 4):
        w = nrm((3, 3, C, C)).reshape(9 * C, C).astype(jnp.bfloat16)
        b = nrm((C,))
        sc, sh = fold(*bn_stats(C), b)
        p[f"w{i}"] = w
        p[f"sc{i}"], p[f"sh{i}"] = sc.reshape(1, C), sh.reshape(1, C)

    flat = C * (bx - 4) * (by - 4)
    # wfc1 rows are in NHWC-flatten order (h, w, c): this is the fixed row
    # permutation of PyTorch's NCHW view(), folded into the weight at init so
    # no runtime transpose is needed.
    wfc1, bfc1 = nrm((flat, 1024)), nrm((1024,))
    sc, sh = fold(*bn_stats(1024), bfc1)
    p["wfc1"] = wfc1.astype(jnp.bfloat16)
    p["sfc1"], p["bfc1"] = sc.reshape(1, 1024), sh.reshape(1, 1024)

    wfc2, bfc2 = nrm((1024, 512)), nrm((512,))
    sc, sh = fold(*bn_stats(512), bfc2)
    p["wfc2"] = wfc2.astype(jnp.bfloat16)
    p["sfc2"], p["bfc2"] = sc.reshape(1, 512), sh.reshape(1, 512)

    p["wpi"] = nrm((512, action_size)).astype(jnp.bfloat16)
    p["bpi"] = nrm((1, action_size))
    p["wv"] = nrm((512, 1)).astype(jnp.bfloat16)
    p["bv"] = nrm((1, 1))
    return p


if __name__ == "__main__":
    B, BX, BY, C = 2, 8, 8, 32
    ACTION_SIZE = BX * BY + 1                             # board cells + pass

    root = jax.random.PRNGKey(0)
    k_param, k_input = jax.random.split(root)
    params = init_params(k_param, C, BX, BY, ACTION_SIZE)
    # board state with values in {-1, 0, 1}
    s = jax.random.randint(k_input, (B, BX, BY), -1, 2).astype(jnp.float32)

    pi, v = gomoku_forward(params, s)
    jax.block_until_ready((pi, v))

    assert pi.shape == (B, ACTION_SIZE) and v.shape == (B, 1)
    # log_softmax rows must sum to ~1 after exp
    assert bool(jnp.allclose(jnp.exp(pi).sum(axis=1), 1.0, atol=1e-4))
    assert bool(jnp.all(jnp.abs(v) <= 1.0))
    print("KERNEL_OK")
</pallas_src>

<mosaic_0001>
module attributes {stable_mosaic.version = 11 : i64} {
  func.func @gomoku_fused_kernel(%arg0: memref<2x8x8x1xf32, #tpu.memory_space<vmem>>, %arg1: memref<9x32xf32, #tpu.memory_space<vmem>>, %arg2: memref<1x32xf32, #tpu.memory_space<vmem>>, %arg3: memref<1x32xf32, #tpu.memory_space<vmem>>, %arg4: memref<288x32xbf16, #tpu.memory_space<vmem>>, %arg5: memref<1x32xf32, #tpu.memory_space<vmem>>, %arg6: memref<1x32xf32, #tpu.memory_space<vmem>>, %arg7: memref<288x32xbf16, #tpu.memory_space<vmem>>, %arg8: memref<1x32xf32, #tpu.memory_space<vmem>>, %arg9: memref<1x32xf32, #tpu.memory_space<vmem>>, %arg10: memref<288x32xbf16, #tpu.memory_space<vmem>>, %arg11: memref<1x32xf32, #tpu.memory_space<vmem>>, %arg12: memref<1x32xf32, #tpu.memory_space<vmem>>, %arg13: memref<512x1024xbf16, #tpu.memory_space<vmem>>, %arg14: memref<1x1024xf32, #tpu.memory_space<vmem>>, %arg15: memref<1x1024xf32, #tpu.memory_space<vmem>>, %arg16: memref<1024x512xbf16, #tpu.memory_space<vmem>>, %arg17: memref<1x512xf32, #tpu.memory_space<vmem>>, %arg18: memref<1x512xf32, #tpu.memory_space<vmem>>, %arg19: memref<512x65xbf16, #tpu.memory_space<vmem>>, %arg20: memref<1x65xf32, #tpu.memory_space<vmem>>, %arg21: memref<512x1xbf16, #tpu.memory_space<vmem>>, %arg22: memref<1x1xf32, #tpu.memory_space<vmem>>, %arg23: memref<2x65xf32, #tpu.memory_space<vmem>>, %arg24: memref<2x1xf32, #tpu.memory_space<vmem>>, %arg25: memref<2x10x10x1xf32, #tpu.memory_space<vmem>>, %arg26: memref<2x10x10x32xf32, #tpu.memory_space<vmem>>) attributes {dimension_semantics = [], scalar_prefetch = 0 : i64, scratch_operands = 2 : i64, tpu.core_type = #tpu.core_type<tc>} {
    %cst = arith.constant 0.000000e+00 : f32
    %0 = vector.broadcast %cst : f32 to vector<2x10x10x1xf32>
    %c0 = arith.constant 0 : index
    %c0_0 = arith.constant 0 : index
    %c0_1 = arith.constant 0 : index
    %c0_2 = arith.constant 0 : index
    %1 = vector.load %arg25[%c0, %c0_0, %c0_1, %c0_2] : memref<2x10x10x1xf32, #tpu.memory_space<vmem>>, vector<2x10x10x1xf32>
    tpu.vector_store %arg25[%c0, %c0_0, %c0_1, %c0_2], %0 {strides = array<i32>} : memref<2x10x10x1xf32, #tpu.memory_space<vmem>>, vector<2x10x10x1xf32>,
    %c0_3 = arith.constant 0 : index
    %c0_4 = arith.constant 0 : index
    %c0_5 = arith.constant 0 : index
    %c0_6 = arith.constant 0 : index
    %2 = vector.load %arg0[%c0_3, %c0_4, %c0_5, %c0_6] : memref<2x8x8x1xf32, #tpu.memory_space<vmem>>, vector<2x8x8x1xf32>
    %c0_7 = arith.constant 0 : index
    %c1 = arith.constant 1 : index
    %c1_8 = arith.constant 1 : index
    %c0_9 = arith.constant 0 : index
    %3 = vector.load %arg25[%c0_7, %c1, %c1_8, %c0_9] : memref<2x10x10x1xf32, #tpu.memory_space<vmem>>, vector<2x8x8x1xf32>
    tpu.vector_store %arg25[%c0_7, %c1, %c1_8, %c0_9], %2 {strides = array<i32>} : memref<2x10x10x1xf32, #tpu.memory_space<vmem>>, vector<2x8x8x1xf32>,
    %c0_10 = arith.constant 0 : index
    %c0_11 = arith.constant 0 : index
    %c0_12 = arith.constant 0 : index
    %c0_13 = arith.constant 0 : index
    %4 = vector.load %arg25[%c0_10, %c0_11, %c0_12, %c0_13] : memref<2x10x10x1xf32, #tpu.memory_space<vmem>>, vector<2x10x10x1xf32>
    %c0_14 = arith.constant 0 : index
    %c0_15 = arith.constant 0 : index
    %5 = vector.load %arg1[%c0_14, %c0_15] : memref<9x32xf32, #tpu.memory_space<vmem>>, vector<9x32xf32>
    %cst_16 = arith.constant 0.000000e+00 : f32
    %6 = vector.broadcast %cst_16 : f32 to vector<2x8x8x32xf32>
    %7 = vector.extract_strided_slice %4 {offsets = [0, 0, 0, 0], sizes = [2, 8, 8, 1], strides = [1, 1, 1, 1]} : vector<2x10x10x1xf32> to vector<2x8x8x1xf32>
    %8 = vector.extract_strided_slice %5 {offsets = [0, 0], sizes = [1, 32], strides = [1, 1]} : vector<9x32xf32> to vector<1x32xf32>
    %9 = vector.shape_cast %8 : vector<1x32xf32> to vector<32xf32>
    %10 = vector.shape_cast %9 : vector<32xf32> to vector<1x1x1x32xf32>
    %11 = vector.broadcast %7 : vector<2x8x8x1xf32> to vector<2x8x8x32xf32>
    %12 = vector.broadcast %10 : vector<1x1x1x32xf32> to vector<2x8x8x32xf32>
    %13 = arith.mulf %11, %12 : vector<2x8x8x32xf32>
    %14 = arith.addf %6, %13 : vector<2x8x8x32xf32>
    %15 = vector.extract_strided_slice %4 {offsets = [0, 0, 1, 0], sizes = [2, 8, 8, 1], strides = [1, 1, 1, 1]} : vector<2x10x10x1xf32> to vector<2x8x8x1xf32>
    %16 = vector.extract_strided_slice %5 {offsets = [1, 0], sizes = [1, 32], strides = [1, 1]} : vector<9x32xf32> to vector<1x32xf32>
    %17 = vector.shape_cast %16 : vector<1x32xf32> to vector<32xf32>
    %18 = vector.shape_cast %17 : vector<32xf32> to vector<1x1x1x32xf32>
    %19 = vector.broadcast %15 : vector<2x8x8x1xf32> to vector<2x8x8x32xf32>
    %20 = vector.broadcast %18 : vector<1x1x1x32xf32> to vector<2x8x8x32xf32>
    %21 = arith.mulf %19, %20 : vector<2x8x8x32xf32>
    %22 = arith.addf %14, %21 : vector<2x8x8x32xf32>
    %23 = vector.extract_strided_slice %4 {offsets = [0, 0, 2, 0], sizes = [2, 8, 8, 1], strides = [1, 1, 1, 1]} : vector<2x10x10x1xf32> to vector<2x8x8x1xf32>
    %24 = vector.extract_strided_slice %5 {offsets = [2, 0], sizes = [1, 32], strides = [1, 1]} : vector<9x32xf32> to vector<1x32xf32>
    %25 = vector.shape_cast %24 : vector<1x32xf32> to vector<32xf32>
    %26 = vector.shape_cast %25 : vector<32xf32> to vector<1x1x1x32xf32>
    %27 = vector.broadcast %23 : vector<2x8x8x1xf32> to vector<2x8x8x32xf32>
    %28 = vector.broadcast %26 : vector<1x1x1x32xf32> to vector<2x8x8x32xf32>
    %29 = arith.mulf %27, %28 : vector<2x8x8x32xf32>
    %30 = arith.addf %22, %29 : vector<2x8x8x32xf32>
    %31 = vector.extract_strided_slice %4 {offsets = [0, 1, 0, 0], sizes = [2, 8, 8, 1], strides = [1, 1, 1, 1]} : vector<2x10x10x1xf32> to vector<2x8x8x1xf32>
    %32 = vector.extract_strided_slice %5 {offsets = [3, 0], sizes = [1, 32], strides = [1, 1]} : vector<9x32xf32> to vector<1x32xf32>
    %33 = vector.shape_cast %32 : vector<1x32xf32> to vector<32xf32>
    %34 = vector.shape_cast %33 : vector<32xf32> to vector<1x1x1x32xf32>
    %35 = vector.broadcast %31 : vector<2x8x8x1xf32> to vector<2x8x8x32xf32>
    %36 = vector.broadcast %34 : vector<1x1x1x32xf32> to vector<2x8x8x32xf32>
    %37 = arith.mulf %35, %36 : vector<2x8x8x32xf32>
    %38 = arith.addf %30, %37 : vector<2x8x8x32xf32>
    %39 = vector.extract_strided_slice %4 {offsets = [0, 1, 1, 0], sizes = [2, 8, 8, 1], strides = [1, 1, 1, 1]} : vector<2x10x10x1xf32> to vector<2x8x8x1xf32>
    %40 = vector.extract_strided_slice %5 {offsets = [4, 0], sizes = [1, 32], strides = [1, 1]} : vector<9x32xf32> to vector<1x32xf32>
    %41 = vector.shape_cast %40 : vector<1x32xf32> to vector<32xf32>
    %42 = vector.shape_cast %41 : vector<32xf32> to vector<1x1x1x32xf32>
    %43 = vector.broadcast %39 : vector<2x8x8x1xf32> to vector<2x8x8x32xf32>
    %44 = vector.broadcast %42 : vector<1x1x1x32xf32> to vector<2x8x8x32xf32>
    %45 = arith.mulf %43, %44 : vector<2x8x8x32xf32>
    %46 = arith.addf %38, %45 : vector<2x8x8x32xf32>
    %47 = vector.extract_strided_slice %4 {offsets = [0, 1, 2, 0], sizes = [2, 8, 8, 1], strides = [1, 1, 1, 1]} : vector<2x10x10x1xf32> to vector<2x8x8x1xf32>
    %48 = vector.extract_strided_slice %5 {offsets = [5, 0], sizes = [1, 32], strides = [1, 1]} : vector<9x32xf32> to vector<1x32xf32>
    %49 = vector.shape_cast %48 : vector<1x32xf32> to vector<32xf32>
    %50 = vector.shape_cast %49 : vector<32xf32> to vector<1x1x1x32xf32>
    %51 = vector.broadcast %47 : vector<2x8x8x1xf32> to vector<2x8x8x32xf32>
    %52 = vector.broadcast %50 : vector<1x1x1x32xf32> to vector<2x8x8x32xf32>
    %53 = arith.mulf %51, %52 : vector<2x8x8x32xf32>
    %54 = arith.addf %46, %53 : vector<2x8x8x32xf32>
    %55 = vector.extract_strided_slice %4 {offsets = [0, 2, 0, 0], sizes = [2, 8, 8, 1], strides = [1, 1, 1, 1]} : vector<2x10x10x1xf32> to vector<2x8x8x1xf32>
    %56 = vector.extract_strided_slice %5 {offsets = [6, 0], sizes = [1, 32], strides = [1, 1]} : vector<9x32xf32> to vector<1x32xf32>
    %57 = vector.shape_cast %56 : vector<1x32xf32> to vector<32xf32>
    %58 = vector.shape_cast %57 : vector<32xf32> to vector<1x1x1x32xf32>
    %59 = vector.broadcast %55 : vector<2x8x8x1xf32> to vector<2x8x8x32xf32>
    %60 = vector.broadcast %58 : vector<1x1x1x32xf32> to vector<2x8x8x32xf32>
    %61 = arith.mulf %59, %60 : vector<2x8x8x32xf32>
    %62 = arith.addf %54, %61 : vector<2x8x8x32xf32>
    %63 = vector.extract_strided_slice %4 {offsets = [0, 2, 1, 0], sizes = [2, 8, 8, 1], strides = [1, 1, 1, 1]} : vector<2x10x10x1xf32> to vector<2x8x8x1xf32>
    %64 = vector.extract_strided_slice %5 {offsets = [7, 0], sizes = [1, 32], strides = [1, 1]} : vector<9x32xf32> to vector<1x32xf32>
    %65 = vector.shape_cast %64 : vector<1x32xf32> to vector<32xf32>
    %66 = vector.shape_cast %65 : vector<32xf32> to vector<1x1x1x32xf32>
    %67 = vector.broadcast %63 : vector<2x8x8x1xf32> to vector<2x8x8x32xf32>
    %68 = vector.broadcast %66 : vector<1x1x1x32xf32> to vector<2x8x8x32xf32>
    %69 = arith.mulf %67, %68 : vector<2x8x8x32xf32>
    %70 = arith.addf %62, %69 : vector<2x8x8x32xf32>
    %71 = vector.extract_strided_slice %4 {offsets = [0, 2, 2, 0], sizes = [2, 8, 8, 1], strides = [1, 1, 1, 1]} : vector<2x10x10x1xf32> to vector<2x8x8x1xf32>
    %72 = vector.extract_strided_slice %5 {offsets = [8, 0], sizes = [1, 32], strides = [1, 1]} : vector<9x32xf32> to vector<1x32xf32>
    %73 = vector.shape_cast %72 : vector<1x32xf32> to vector<32xf32>
    %74 = vector.shape_cast %73 : vector<32xf32> to vector<1x1x1x32xf32>
    %75 = vector.broadcast %71 : vector<2x8x8x1xf32> to vector<2x8x8x32xf32>
    %76 = vector.broadcast %74 : vector<1x1x1x32xf32> to vector<2x8x8x32xf32>
    %77 = arith.mulf %75, %76 : vector<2x8x8x32xf32>
    %78 = arith.addf %70, %77 : vector<2x8x8x32xf32>
    %c0_17 = arith.constant 0 : index
    %c0_18 = arith.constant 0 : index
    %79 = vector.load %arg2[%c0_17, %c0_18] : memref<1x32xf32, #tpu.memory_space<vmem>>, vector<1x32xf32>
    %80 = vector.shape_cast %79 : vector<1x32xf32> to vector<1x1x1x32xf32>
    %81 = vector.broadcast %80 : vector<1x1x1x32xf32> to vector<2x8x8x32xf32>
    %82 = arith.mulf %78, %81 : vector<2x8x8x32xf32>
    %c0_19 = arith.constant 0 : index
    %c0_20 = arith.constant 0 : index
    %83 = vector.load %arg3[%c0_19, %c0_20] : memref<1x32xf32, #tpu.memory_space<vmem>>, vector<1x32xf32>
    %84 = vector.shape_cast %83 : vector<1x32xf32> to vector<1x1x1x32xf32>
    %85 = vector.broadcast %84 : vector<1x1x1x32xf32> to vector<2x8x8x32xf32>
    %86 = arith.addf %82, %85 : vector<2x8x8x32xf32>
    %cst_21 = arith.constant 0.000000e+00 : f32
    %87 = vector.broadcast %cst_21 : f32 to vector<2x8x8x32xf32>
    %88 = arith.maximumf %86, %87 : vector<2x8x8x32xf32>
    %cst_22 = arith.constant 0.000000e+00 : f32
    %89 = vector.broadcast %cst_22 : f32 to vector<2x10x10x32xf32>
    %c0_23 = arith.constant 0 : index
    %c0_24 = arith.constant 0 : index
    %c0_25 = arith.constant 0 : index
    %c0_26 = arith.constant 0 : index
    %90 = vector.load %arg26[%c0_23, %c0_24, %c0_25, %c0_26] : memref<2x10x10x32xf32, #tpu.memory_space<vmem>>, vector<2x10x10x32xf32>
    tpu.vector_store %arg26[%c0_23, %c0_24, %c0_25, %c0_26], %89 {strides = array<i32>} : memref<2x10x10x32xf32, #tpu.memory_space<vmem>>, vector<2x10x10x32xf32>,
    %c0_27 = arith.constant 0 : index
    %c1_28 = arith.constant 1 : index
    %c1_29 = arith.constant 1 : index
    %c0_30 = arith.constant 0 : index
    %91 = vector.load %arg26[%c0_27, %c1_28, %c1_29, %c0_30] : memref<2x10x10x32xf32, #tpu.memory_space<vmem>>, vector<2x8x8x32xf32>
    tpu.vector_store %arg26[%c0_27, %c1_28, %c1_29, %c0_30], %88 {strides = array<i32>} : memref<2x10x10x32xf32, #tpu.memory_space<vmem>>, vector<2x8x8x32xf32>,
    %c0_31 = arith.constant 0 : index
    %c0_32 = arith.constant 0 : index
    %c0_33 = arith.constant 0 : index
    %c0_34 = arith.constant 0 : index
    %92 = vector.load %arg26[%c0_31, %c0_32, %c0_33, %c0_34] : memref<2x10x10x32xf32, #tpu.memory_space<vmem>>, vector<2x10x10x32xf32>
    %c0_35 = arith.constant 0 : index
    %c0_36 = arith.constant 0 : index
    %93 = vector.load %arg4[%c0_35, %c0_36] : memref<288x32xbf16, #tpu.memory_space<vmem>>, vector<288x32xbf16>
    %c0_37 = arith.constant 0 : index
    %c0_38 = arith.constant 0 : index
    %94 = vector.load %arg5[%c0_37, %c0_38] : memref<1x32xf32, #tpu.memory_space<vmem>>, vector<1x32xf32>
    %c0_39 = arith.constant 0 : index
    %c0_40 = arith.constant 0 : index
    %95 = vector.load %arg6[%c0_39, %c0_40] : memref<1x32xf32, #tpu.memory_space<vmem>>, vector<1x32xf32>
    %96 = vector.extract_strided_slice %92 {offsets = [0, 0, 0, 0], sizes = [2, 8, 8, 32], strides = [1, 1, 1, 1]} : vector<2x10x10x32xf32> to vector<2x8x8x32xf32>
    %97 = vector.shape_cast %96 : vector<2x8x8x32xf32> to vector<128x32xf32>
    %98 = vector.extract_strided_slice %92 {offsets = [0, 0, 1, 0], sizes = [2, 8, 8, 32], strides = [1, 1, 1, 1]} : vector<2x10x10x32xf32> to vector<2x8x8x32xf32>
    %99 = vector.shape_cast %98 : vector<2x8x8x32xf32> to vector<128x32xf32>
    %100 = vector.extract_strided_slice %92 {offsets = [0, 0, 2, 0], sizes = [2, 8, 8, 32], strides = [1, 1, 1, 1]} : vector<2x10x10x32xf32> to vector<2x8x8x32xf32>
    %101 = vector.shape_cast %100 : vector<2x8x8x32xf32> to vector<128x32xf32>
    %102 = vector.extract_strided_slice %92 {offsets = [0, 1, 0, 0], sizes = [2, 8, 8, 32], strides = [1, 1, 1, 1]} : vector<2x10x10x32xf32> to vector<2x8x8x32xf32>
    %103 = vector.shape_cast %102 : vector<2x8x8x32xf32> to vector<128x32xf32>
    %104 = vector.extract_strided_slice %92 {offsets = [0, 1, 1, 0], sizes = [2, 8, 8, 32], strides = [1, 1, 1, 1]} : vector<2x10x10x32xf32> to vector<2x8x8x32xf32>
    %105 = vector.shape_cast %104 : vector<2x8x8x32xf32> to vector<128x32xf32>
    %106 = vector.extract_strided_slice %92 {offsets = [0, 1, 2, 0], sizes = [2, 8, 8, 32], strides = [1, 1, 1, 1]} : vector<2x10x10x32xf32> to vector<2x8x8x32xf32>
    %107 = vector.shape_cast %106 : vector<2x8x8x32xf32> to vector<128x32xf32>
    %108 = vector.extract_strided_slice %92 {offsets = [0, 2, 0, 0], sizes = [2, 8, 8, 32], strides = [1, 1, 1, 1]} : vector<2x10x10x32xf32> to vector<2x8x8x32xf32>
    %109 = vector.shape_cast %108 : vector<2x8x8x32xf32> to vector<128x32xf32>
    %110 = vector.extract_strided_slice %92 {offsets = [0, 2, 1, 0], sizes = [2, 8, 8, 32], strides = [1, 1, 1, 1]} : vector<2x10x10x32xf32> to vector<2x8x8x32xf32>
    %111 = vector.shape_cast %110 : vector<2x8x8x32xf32> to vector<128x32xf32>
    %112 = vector.extract_strided_slice %92 {offsets = [0, 2, 2, 0], sizes = [2, 8, 8, 32], strides = [1, 1, 1, 1]} : vector<2x10x10x32xf32> to vector<2x8x8x32xf32>
    %113 = vector.shape_cast %112 : vector<2x8x8x32xf32> to vector<128x32xf32>
    %114 = tpu.concatenate %97, %99, %101, %103, %105, %107, %109, %111, %113 in 1 : vector<128x32xf32>, vector<128x32xf32>, vector<128x32xf32>, vector<128x32xf32>, vector<128x32xf32>, vector<128x32xf32>, vector<128x32xf32>, vector<128x32xf32>, vector<128x32xf32> -> vector<128x288xf32>
    %115 = arith.truncf %114 : vector<128x288xf32> to vector<128x288xbf16>
    %cst_41 = arith.constant dense<0.000000e+00> : vector<128x32xf32>
    %116 = tpu.matmul %115, %93, %cst_41 {dimension_numbers = #tpu.dot_dimension_numbers<[1], [0], [0], [1], [0, 0, 1, 1], [], []>} : vector<128x288xbf16>, vector<288x32xbf16>, vector<128x32xf32> -> vector<128x32xf32>
    %117 = vector.broadcast %94 : vector<1x32xf32> to vector<128x32xf32>
    %118 = arith.mulf %116, %117 : vector<128x32xf32>
    %119 = vector.broadcast %95 : vector<1x32xf32> to vector<128x32xf32>
    %120 = arith.addf %118, %119 : vector<128x32xf32>
    %cst_42 = arith.constant 0.000000e+00 : f32
    %121 = vector.broadcast %cst_42 : f32 to vector<128x32xf32>
    %122 = arith.maximumf %120, %121 : vector<128x32xf32>
    %123 = vector.shape_cast %122 : vector<128x32xf32> to vector<2x8x8x32xf32>
    %c0_43 = arith.constant 0 : index
    %c0_44 = arith.constant 0 : index
    %124 = vector.load %arg7[%c0_43, %c0_44] : memref<288x32xbf16, #tpu.memory_space<vmem>>, vector<288x32xbf16>
    %c0_45 = arith.constant 0 : index
    %c0_46 = arith.constant 0 : index
    %125 = vector.load %arg8[%c0_45, %c0_46] : memref<1x32xf32, #tpu.memory_space<vmem>>, vector<1x32xf32>
    %c0_47 = arith.constant 0 : index
    %c0_48 = arith.constant 0 : index
    %126 = vector.load %arg9[%c0_47, %c0_48] : memref<1x32xf32, #tpu.memory_space<vmem>>, vector<1x32xf32>
    %127 = vector.extract_strided_slice %123 {offsets = [0, 0, 0, 0], sizes = [2, 6, 6, 32], strides = [1, 1, 1, 1]} : vector<2x8x8x32xf32> to vector<2x6x6x32xf32>
    %128 = vector.shape_cast %127 : vector<2x6x6x32xf32> to vector<72x32xf32>
    %129 = vector.extract_strided_slice %123 {offsets = [0, 0, 1, 0], sizes = [2, 6, 6, 32], strides = [1, 1, 1, 1]} : vector<2x8x8x32xf32> to vector<2x6x6x32xf32>
    %130 = vector.shape_cast %129 : vector<2x6x6x32xf32> to vector<72x32xf32>
    %131 = vector.extract_strided_slice %123 {offsets = [0, 0, 2, 0], sizes = [2, 6, 6, 32], strides = [1, 1, 1, 1]} : vector<2x8x8x32xf32> to vector<2x6x6x32xf32>
    %132 = vector.shape_cast %131 : vector<2x6x6x32xf32> to vector<72x32xf32>
    %133 = vector.extract_strided_slice %123 {offsets = [0, 1, 0, 0], sizes = [2, 6, 6, 32], strides = [1, 1, 1, 1]} : vector<2x8x8x32xf32> to vector<2x6x6x32xf32>
    %134 = vector.shape_cast %133 : vector<2x6x6x32xf32> to vector<72x32xf32>
    %135 = vector.extract_strided_slice %123 {offsets = [0, 1, 1, 0], sizes = [2, 6, 6, 32], strides = [1, 1, 1, 1]} : vector<2x8x8x32xf32> to vector<2x6x6x32xf32>
    %136 = vector.shape_cast %135 : vector<2x6x6x32xf32> to vector<72x32xf32>
    %137 = vector.extract_strided_slice %123 {offsets = [0, 1, 2, 0], sizes = [2, 6, 6, 32], strides = [1, 1, 1, 1]} : vector<2x8x8x32xf32> to vector<2x6x6x32xf32>
    %138 = vector.shape_cast %137 : vector<2x6x6x32xf32> to vector<72x32xf32>
    %139 = vector.extract_strided_slice %123 {offsets = [0, 2, 0, 0], sizes = [2, 6, 6, 32], strides = [1, 1, 1, 1]} : vector<2x8x8x32xf32> to vector<2x6x6x32xf32>
    %140 = vector.shape_cast %139 : vector<2x6x6x32xf32> to vector<72x32xf32>
    %141 = vector.extract_strided_slice %123 {offsets = [0, 2, 1, 0], sizes = [2, 6, 6, 32], strides = [1, 1, 1, 1]} : vector<2x8x8x32xf32> to vector<2x6x6x32xf32>
    %142 = vector.shape_cast %141 : vector<2x6x6x32xf32> to vector<72x32xf32>
    %143 = vector.extract_strided_slice %123 {offsets = [0, 2, 2, 0], sizes = [2, 6, 6, 32], strides = [1, 1, 1, 1]} : vector<2x8x8x32xf32> to vector<2x6x6x32xf32>
    %144 = vector.shape_cast %143 : vector<2x6x6x32xf32> to vector<72x32xf32>
    %145 = tpu.concatenate %128, %130, %132, %134, %136, %138, %140, %142, %144 in 1 : vector<72x32xf32>, vector<72x32xf32>, vector<72x32xf32>, vector<72x32xf32>, vector<72x32xf32>, vector<72x32xf32>, vector<72x32xf32>, vector<72x32xf32>, vector<72x32xf32> -> vector<72x288xf32>
    %146 = arith.truncf %145 : vector<72x288xf32> to vector<72x288xbf16>
    %cst_49 = arith.constant dense<0.000000e+00> : vector<72x32xf32>
    %147 = tpu.matmul %146, %124, %cst_49 {dimension_numbers = #tpu.dot_dimension_numbers<[1], [0], [0], [1], [0, 0, 1, 1], [], []>} : vector<72x288xbf16>, vector<288x32xbf16>, vector<72x32xf32> -> vector<72x32xf32>
    %148 = vector.broadcast %125 : vector<1x32xf32> to vector<72x32xf32>
    %149 = arith.mulf %147, %148 : vector<72x32xf32>
    %150 = vector.broadcast %126 : vector<1x32xf32> to vector<72x32xf32>
    %151 = arith.addf %149, %150 : vector<72x32xf32>
    %cst_50 = arith.constant 0.000000e+00 : f32
    %152 = vector.broadcast %cst_50 : f32 to vector<72x32xf32>
    %153 = arith.maximumf %151, %152 : vector<72x32xf32>
    %154 = vector.shape_cast %153 : vector<72x32xf32> to vector<2x6x6x32xf32>
    %c0_51 = arith.constant 0 : index
    %c0_52 = arith.constant 0 : index
    %155 = vector.load %arg10[%c0_51, %c0_52] : memref<288x32xbf16, #tpu.memory_space<vmem>>, vector<288x32xbf16>
    %c0_53 = arith.constant 0 : index
    %c0_54 = arith.constant 0 : index
    %156 = vector.load %arg11[%c0_53, %c0_54] : memref<1x32xf32, #tpu.memory_space<vmem>>, vector<1x32xf32>
    %c0_55 = arith.constant 0 : index
    %c0_56 = arith.constant 0 : index
    %157 = vector.load %arg12[%c0_55, %c0_56] : memref<1x32xf32, #tpu.memory_space<vmem>>, vector<1x32xf32>
    %158 = vector.extract_strided_slice %154 {offsets = [0, 0, 0, 0], sizes = [2, 4, 4, 32], strides = [1, 1, 1, 1]} : vector<2x6x6x32xf32> to vector<2x4x4x32xf32>
    %159 = vector.shape_cast %158 : vector<2x4x4x32xf32> to vector<32x32xf32>
    %160 = vector.extract_strided_slice %154 {offsets = [0, 0, 1, 0], sizes = [2, 4, 4, 32], strides = [1, 1, 1, 1]} : vector<2x6x6x32xf32> to vector<2x4x4x32xf32>
    %161 = vector.shape_cast %160 : vector<2x4x4x32xf32> to vector<32x32xf32>
    %162 = vector.extract_strided_slice %154 {offsets = [0, 0, 2, 0], sizes = [2, 4, 4, 32], strides = [1, 1, 1, 1]} : vector<2x6x6x32xf32> to vector<2x4x4x32xf32>
    %163 = vector.shape_cast %162 : vector<2x4x4x32xf32> to vector<32x32xf32>
    %164 = vector.extract_strided_slice %154 {offsets = [0, 1, 0, 0], sizes = [2, 4, 4, 32], strides = [1, 1, 1, 1]} : vector<2x6x6x32xf32> to vector<2x4x4x32xf32>
    %165 = vector.shape_cast %164 : vector<2x4x4x32xf32> to vector<32x32xf32>
    %166 = vector.extract_strided_slice %154 {offsets = [0, 1, 1, 0], sizes = [2, 4, 4, 32], strides = [1, 1, 1, 1]} : vector<2x6x6x32xf32> to vector<2x4x4x32xf32>
    %167 = vector.shape_cast %166 : vector<2x4x4x32xf32> to vector<32x32xf32>
    %168 = vector.extract_strided_slice %154 {offsets = [0, 1, 2, 0], sizes = [2, 4, 4, 32], strides = [1, 1, 1, 1]} : vector<2x6x6x32xf32> to vector<2x4x4x32xf32>
    %169 = vector.shape_cast %168 : vector<2x4x4x32xf32> to vector<32x32xf32>
    %170 = vector.extract_strided_slice %154 {offsets = [0, 2, 0, 0], sizes = [2, 4, 4, 32], strides = [1, 1, 1, 1]} : vector<2x6x6x32xf32> to vector<2x4x4x32xf32>
    %171 = vector.shape_cast %170 : vector<2x4x4x32xf32> to vector<32x32xf32>
    %172 = vector.extract_strided_slice %154 {offsets = [0, 2, 1, 0], sizes = [2, 4, 4, 32], strides = [1, 1, 1, 1]} : vector<2x6x6x32xf32> to vector<2x4x4x32xf32>
    %173 = vector.shape_cast %172 : vector<2x4x4x32xf32> to vector<32x32xf32>
    %174 = vector.extract_strided_slice %154 {offsets = [0, 2, 2, 0], sizes = [2, 4, 4, 32], strides = [1, 1, 1, 1]} : vector<2x6x6x32xf32> to vector<2x4x4x32xf32>
    %175 = vector.shape_cast %174 : vector<2x4x4x32xf32> to vector<32x32xf32>
    %176 = tpu.concatenate %159, %161, %163, %165, %167, %169, %171, %173, %175 in 1 : vector<32x32xf32>, vector<32x32xf32>, vector<32x32xf32>, vector<32x32xf32>, vector<32x32xf32>, vector<32x32xf32>, vector<32x32xf32>, vector<32x32xf32>, vector<32x32xf32> -> vector<32x288xf32>
    %177 = arith.truncf %176 : vector<32x288xf32> to vector<32x288xbf16>
    %cst_57 = arith.constant dense<0.000000e+00> : vector<32x32xf32>
    %178 = tpu.matmul %177, %155, %cst_57 {dimension_numbers = #tpu.dot_dimension_numbers<[1], [0], [0], [1], [0, 0, 1, 1], [], []>} : vector<32x288xbf16>, vector<288x32xbf16>, vector<32x32xf32> -> vector<32x32xf32>
    %179 = vector.broadcast %156 : vector<1x32xf32> to vector<32x32xf32>
    %180 = arith.mulf %178, %179 : vector<32x32xf32>
    %181 = vector.broadcast %157 : vector<1x32xf32> to vector<32x32xf32>
    %182 = arith.addf %180, %181 : vector<32x32xf32>
    %cst_58 = arith.constant 0.000000e+00 : f32
    %183 = vector.broadcast %cst_58 : f32 to vector<32x32xf32>
    %184 = arith.maximumf %182, %183 : vector<32x32xf32>
    %185 = vector.shape_cast %184 : vector<32x32xf32> to vector<2x4x4x32xf32>
    %186 = vector.shape_cast %185 : vector<2x4x4x32xf32> to vector<2x16x32xf32>
    %187 = vector.extract_strided_slice %186 {offsets = [0, 0, 0], sizes = [2, 1, 32], strides = [1, 1, 1]} : vector<2x16x32xf32> to vector<2x1x32xf32>
    %188 = vector.shape_cast %187 : vector<2x1x32xf32> to vector<2x32xf32>
    %189 = vector.extract_strided_slice %186 {offsets = [0, 1, 0], sizes = [2, 1, 32], strides = [1, 1, 1]} : vector<2x16x32xf32> to vector<2x1x32xf32>
    %190 = vector.shape_cast %189 : vector<2x1x32xf32> to vector<2x32xf32>
    %191 = vector.extract_strided_slice %186 {offsets = [0, 2, 0], sizes = [2, 1, 32], strides = [1, 1, 1]} : vector<2x16x32xf32> to vector<2x1x32xf32>
    %192 = vector.shape_cast %191 : vector<2x1x32xf32> to vector<2x32xf32>
    %193 = vector.extract_strided_slice %186 {offsets = [0, 3, 0], sizes = [2, 1, 32], strides = [1, 1, 1]} : vector<2x16x32xf32> to vector<2x1x32xf32>
    %194 = vector.shape_cast %193 : vector<2x1x32xf32> to vector<2x32xf32>
    %195 = vector.extract_strided_slice %186 {offsets = [0, 4, 0], sizes = [2, 1, 32], strides = [1, 1, 1]} : vector<2x16x32xf32> to vector<2x1x32xf32>
    %196 = vector.shape_cast %195 : vector<2x1x32xf32> to vector<2x32xf32>
    %197 = vector.extract_strided_slice %186 {offsets = [0, 5, 0], sizes = [2, 1, 32], strides = [1, 1, 1]} : vector<2x16x32xf32> to vector<2x1x32xf32>
    %198 = vector.shape_cast %197 : vector<2x1x32xf32> to vector<2x32xf32>
    %199 = vector.extract_strided_slice %186 {offsets = [0, 6, 0], sizes = [2, 1, 32], strides = [1, 1, 1]} : vector<2x16x32xf32> to vector<2x1x32xf32>
    %200 = vector.shape_cast %199 : vector<2x1x32xf32> to vector<2x32xf32>
    %201 = vector.extract_strided_slice %186 {offsets = [0, 7, 0], sizes = [2, 1, 32], strides = [1, 1, 1]} : vector<2x16x32xf32> to vector<2x1x32xf32>
    %202 = vector.shape_cast %201 : vector<2x1x32xf32> to vector<2x32xf32>
    %203 = vector.extract_strided_slice %186 {offsets = [0, 8, 0], sizes = [2, 1, 32], strides = [1, 1, 1]} : vector<2x16x32xf32> to vector<2x1x32xf32>
    %204 = vector.shape_cast %203 : vector<2x1x32xf32> to vector<2x32xf32>
    %205 = vector.extract_strided_slice %186 {offsets = [0, 9, 0], sizes = [2, 1, 32], strides = [1, 1, 1]} : vector<2x16x32xf32> to vector<2x1x32xf32>
    %206 = vector.shape_cast %205 : vector<2x1x32xf32> to vector<2x32xf32>
    %207 = vector.extract_strided_slice %186 {offsets = [0, 10, 0], sizes = [2, 1, 32], strides = [1, 1, 1]} : vector<2x16x32xf32> to vector<2x1x32xf32>
    %208 = vector.shape_cast %207 : vector<2x1x32xf32> to vector<2x32xf32>
    %209 = vector.extract_strided_slice %186 {offsets = [0, 11, 0], sizes = [2, 1, 32], strides = [1, 1, 1]} : vector<2x16x32xf32> to vector<2x1x32xf32>
    %210 = vector.shape_cast %209 : vector<2x1x32xf32> to vector<2x32xf32>
    %211 = vector.extract_strided_slice %186 {offsets = [0, 12, 0], sizes = [2, 1, 32], strides = [1, 1, 1]} : vector<2x16x32xf32> to vector<2x1x32xf32>
    %212 = vector.shape_cast %211 : vector<2x1x32xf32> to vector<2x32xf32>
    %213 = vector.extract_strided_slice %186 {offsets = [0, 13, 0], sizes = [2, 1, 32], strides = [1, 1, 1]} : vector<2x16x32xf32> to vector<2x1x32xf32>
    %214 = vector.shape_cast %213 : vector<2x1x32xf32> to vector<2x32xf32>
    %215 = vector.extract_strided_slice %186 {offsets = [0, 14, 0], sizes = [2, 1, 32], strides = [1, 1, 1]} : vector<2x16x32xf32> to vector<2x1x32xf32>
    %216 = vector.shape_cast %215 : vector<2x1x32xf32> to vector<2x32xf32>
    %217 = vector.extract_strided_slice %186 {offsets = [0, 15, 0], sizes = [2, 1, 32], strides = [1, 1, 1]} : vector<2x16x32xf32> to vector<2x1x32xf32>
    %218 = vector.shape_cast %217 : vector<2x1x32xf32> to vector<2x32xf32>
    %219 = tpu.concatenate %188, %190, %192, %194, %196, %198, %200, %202, %204, %206, %208, %210, %212, %214, %216, %218 in 1 : vector<2x32xf32>, vector<2x32xf32>, vector<2x32xf32>, vector<2x32xf32>, vector<2x32xf32>, vector<2x32xf32>, vector<2x32xf32>, vector<2x32xf32>, vector<2x32xf32>, vector<2x32xf32>, vector<2x32xf32>, vector<2x32xf32>, vector<2x32xf32>, vector<2x32xf32>, vector<2x32xf32>, vector<2x32xf32> -> vector<2x512xf32>
    %220 = arith.truncf %219 : vector<2x512xf32> to vector<2x512xbf16>
    %c0_59 = arith.constant 0 : index
    %c0_60 = arith.constant 0 : index
    %221 = vector.load %arg13[%c0_59, %c0_60] : memref<512x1024xbf16, #tpu.memory_space<vmem>>, vector<512x1024xbf16>
    %cst_61 = arith.constant dense<0.000000e+00> : vector<2x1024xf32>
    %222 = tpu.matmul %220, %221, %cst_61 {dimension_numbers = #tpu.dot_dimension_numbers<[1], [0], [0], [1], [0, 0, 1, 1], [], []>} : vector<2x512xbf16>, vector<512x1024xbf16>, vector<2x1024xf32> -> vector<2x1024xf32>
    %c0_62 = arith.constant 0 : index
    %c0_63 = arith.constant 0 : index
    %223 = vector.load %arg14[%c0_62, %c0_63] : memref<1x1024xf32, #tpu.memory_space<vmem>>, vector<1x1024xf32>
    %224 = vector.broadcast %223 : vector<1x1024xf32> to vector<2x1024xf32>
    %225 = arith.mulf %222, %224 : vector<2x1024xf32>
    %c0_64 = arith.constant 0 : index
    %c0_65 = arith.constant 0 : index
    %226 = vector.load %arg15[%c0_64, %c0_65] : memref<1x1024xf32, #tpu.memory_space<vmem>>, vector<1x1024xf32>
    %227 = vector.broadcast %226 : vector<1x1024xf32> to vector<2x1024xf32>
    %228 = arith.addf %225, %227 : vector<2x1024xf32>
    %cst_66 = arith.constant 0.000000e+00 : f32
    %229 = vector.broadcast %cst_66 : f32 to vector<2x1024xf32>
    %230 = arith.maximumf %228, %229 : vector<2x1024xf32>
    %231 = arith.truncf %230 : vector<2x1024xf32> to vector<2x1024xbf16>
    %c0_67 = arith.constant 0 : index
    %c0_68 = arith.constant 0 : index
    %232 = vector.load %arg16[%c0_67, %c0_68] : memref<1024x512xbf16, #tpu.memory_space<vmem>>, vector<1024x512xbf16>
    %cst_69 = arith.constant dense<0.000000e+00> : vector<2x512xf32>
    %233 = tpu.matmul %231, %232, %cst_69 {dimension_numbers = #tpu.dot_dimension_numbers<[1], [0], [0], [1], [0, 0, 1, 1], [], []>} : vector<2x1024xbf16>, vector<1024x512xbf16>, vector<2x512xf32> -> vector<2x512xf32>
    %c0_70 = arith.constant 0 : index
    %c0_71 = arith.constant 0 : index
    %234 = vector.load %arg17[%c0_70, %c0_71] : memref<1x512xf32, #tpu.memory_space<vmem>>, vector<1x512xf32>
    %235 = vector.broadcast %234 : vector<1x512xf32> to vector<2x512xf32>
    %236 = arith.mulf %233, %235 : vector<2x512xf32>
    %c0_72 = arith.constant 0 : index
    %c0_73 = arith.constant 0 : index
    %237 = vector.load %arg18[%c0_72, %c0_73] : memref<1x512xf32, #tpu.memory_space<vmem>>, vector<1x512xf32>
    %238 = vector.broadcast %237 : vector<1x512xf32> to vector<2x512xf32>
    %239 = arith.addf %236, %238 : vector<2x512xf32>
    %cst_74 = arith.constant 0.000000e+00 : f32
    %240 = vector.broadcast %cst_74 : f32 to vector<2x512xf32>
    %241 = arith.maximumf %239, %240 : vector<2x512xf32>
    %242 = arith.truncf %241 : vector<2x512xf32> to vector<2x512xbf16>
    %c0_75 = arith.constant 0 : index
    %c0_76 = arith.constant 0 : index
    %243 = vector.load %arg19[%c0_75, %c0_76] : memref<512x65xbf16, #tpu.memory_space<vmem>>, vector<512x65xbf16>
    %cst_77 = arith.constant dense<0.000000e+00> : vector<2x65xf32>
    %244 = tpu.matmul %242, %243, %cst_77 {dimension_numbers = #tpu.dot_dimension_numbers<[1], [0], [0], [1], [0, 0, 1, 1], [], []>} : vector<2x512xbf16>, vector<512x65xbf16>, vector<2x65xf32> -> vector<2x65xf32>
    %c0_78 = arith.constant 0 : index
    %c0_79 = arith.constant 0 : index
    %245 = vector.load %arg20[%c0_78, %c0_79] : memref<1x65xf32, #tpu.memory_space<vmem>>, vector<1x65xf32>
    %246 = vector.broadcast %245 : vector<1x65xf32> to vector<2x65xf32>
    %247 = arith.addf %244, %246 : vector<2x65xf32>
    %cst_80 = arith.constant dense<0xFF800000> : vector<2xf32>
    %248 = vector.multi_reduction <maximumf>, %247, %cst_80 [1] : vector<2x65xf32> to vector<2xf32>
    %249 = vector.shape_cast %248 : vector<2xf32> to vector<2x1xf32>
    %250 = vector.broadcast %249 : vector<2x1xf32> to vector<2x65xf32>
    %251 = arith.subf %247, %250 : vector<2x65xf32>
    %252 = math.exp %251 : vector<2x65xf32>
    %cst_81 = arith.constant dense<0.000000e+00> : vector<2xf32>
    %253 = vector.multi_reduction <add>, %252, %cst_81 [1] : vector<2x65xf32> to vector<2xf32>
    %254 = vector.shape_cast %253 : vector<2xf32> to vector<2x1xf32>
    %255 = math.log %254 : vector<2x1xf32>
    %256 = vector.broadcast %255 : vector<2x1xf32> to vector<2x65xf32>
    %257 = arith.subf %251, %256 : vector<2x65xf32>
    %c0_82 = arith.constant 0 : index
    %c0_83 = arith.constant 0 : index
    %258 = vector.load %arg23[%c0_82, %c0_83] : memref<2x65xf32, #tpu.memory_space<vmem>>, vector<2x65xf32>
    tpu.vector_store %arg23[%c0_82, %c0_83], %257 {strides = array<i32>} : memref<2x65xf32, #tpu.memory_space<vmem>>, vector<2x65xf32>,
    %c0_84 = arith.constant 0 : index
    %c0_85 = arith.constant 0 : index
    %259 = vector.load %arg21[%c0_84, %c0_85] : memref<512x1xbf16, #tpu.memory_space<vmem>>, vector<512x1xbf16>
    %cst_86 = arith.constant dense<0.000000e+00> : vector<2x1xf32>
    %260 = tpu.matmul %242, %259, %cst_86 {dimension_numbers = #tpu.dot_dimension_numbers<[1], [0], [0], [1], [0, 0, 1, 1], [], []>} : vector<2x512xbf16>, vector<512x1xbf16>, vector<2x1xf32> -> vector<2x1xf32>
    %c0_87 = arith.constant 0 : index
    %c0_88 = arith.constant 0 : index
    %261 = vector.load %arg22[%c0_87, %c0_88] : memref<1x1xf32, #tpu.memory_space<vmem>>, vector<1x1xf32>
    %262 = vector.broadcast %261 : vector<1x1xf32> to vector<2x1xf32>
    %263 = arith.addf %260, %262 : vector<2x1xf32>
    %264 = math.tanh %263 : vector<2x1xf32>
    %c0_89 = arith.constant 0 : index
    %c0_90 = arith.constant 0 : index
    %265 = vector.load %arg24[%c0_89, %c0_90] : memref<2x1xf32, #tpu.memory_space<vmem>>, vector<2x1xf32>
    tpu.vector_store %arg24[%c0_89, %c0_90], %264 {strides = array<i32>} : memref<2x1xf32, #tpu.memory_space<vmem>>, vector<2x1xf32>,
    return
  }
}

</mosaic_0001>

<bundles_post_ra>
// kernel: gomoku_forward.1
= control target key start
LH: loop header
LB: loop body
LE: loop exit
PB: predicated region body
PF: predicated region fallthrough
CT: control target
= control target key end

     0   :  { %s16547_s0 = inlined_call_operand.vmem [shape: f32[2,8,8,1], index: 0, kind: input, shape index: {}]   ;;  %s16548_s1 = inlined_call_operand.vmem [shape: f32[9,32], index: 1, kind: input, shape index: {}]   ;;  %s16549_s2 = inlined_call_operand.vmem [shape: f32[1,32], index: 2, kind: input, shape index: {}]   ;;  %s16550_s3 = inlined_call_operand.vmem [shape: f32[1,32], index: 3, kind: input, shape index: {}]   ;;  %s16551_s4 = inlined_call_operand.vmem [shape: bf16[288,32], index: 4, kind: input, shape index: {}]   ;;  %s16552_s5 = inlined_call_operand.vmem [shape: f32[1,32], index: 5, kind: input, shape index: {}]   ;;  %s16553_s6 = inlined_call_operand.vmem [shape: f32[1,32], index: 6, kind: input, shape index: {}]   ;;  %s16554_s7 = inlined_call_operand.vmem [shape: bf16[288,32], index: 7, kind: input, shape index: {}]   ;;  %s16555_s8 = inlined_call_operand.vmem [shape: f32[1,32], index: 8, kind: input, shape index: {}]   ;;  %s16556_s9 = inlined_call_operand.vmem [shape: f32[1,32], index: 9, kind: input, shape index: {}]   ;;  %s16557_s10 = inlined_call_operand.vmem [shape: bf16[288,32], index: 10, kind: input, shape index: {}]   ;;  %s16558_s11 = inlined_call_operand.vmem [shape: f32[1,32], index: 11, kind: input, shape index: {}]   ;;  %s16559_s12 = inlined_call_operand.vmem [shape: f32[1,32], index: 12, kind: input, shape index: {}]   ;;  %s16560_s13 = inlined_call_operand.hbm [shape: bf16[512,1024], index: 13, kind: input, shape index: {}]   ;;  %s16561_s14 = inlined_call_operand.vmem [shape: f32[1,1024], index: 14, kind: input, shape index: {}]   ;;  %s16562_s15 = inlined_call_operand.vmem [shape: f32[1,1024], index: 15, kind: input, shape index: {}]   ;;  %s16563_s16 = inlined_call_operand.hbm [shape: bf16[1024,512], index: 16, kind: input, shape index: {}]   ;;  %s16564_s17 = inlined_call_operand.vmem [shape: f32[1,512], index: 17, kind: input, shape index: {}]   ;;  %s16565_s18 = inlined_call_operand.vmem [shape: f32[1,512], index: 18, kind: input, shape index: {}]   ;;  %s16566_s19 = inlined_call_operand.vmem [shape: bf16[512,65], index: 19, kind: input, shape index: {}]   ;;  %s16567_s20 = inlined_call_operand.vmem [shape: f32[1,65], index: 20, kind: input, shape index: {}]   ;;  %s16568_s21 = inlined_call_operand.vmem [shape: bf16[512,1], index: 21, kind: input, shape index: {}]   ;;  %s16569_s22 = inlined_call_operand.<no memory space> [shape: f32[1,1], index: 22, kind: input, shape index: {}]   ;;  %s16570_s23 = inlined_call_operand.hbm [shape: f32[2,65], index: 23, kind: output, shape index: {0}]   ;;  %s16571_s24 = inlined_call_operand.vmem [shape: f32[2,1], index: 24, kind: output, shape index: {1}]  }
   0x1   :  { %16634 = sst [smem:[#allocation58_spill]] %s16547_s0  ;;  %v30_v0 = vstv %s16569_s22 }
   0x2   :  { %16635 = sst [smem:[#allocation59_spill]] %s16548_s1  ;;  %31 = vst [vmem:[#allocation4] sm:$0x1] %v30_v0 }
   0x3   :  { %16636 = sst [smem:[#allocation60_spill]] %s16549_s2 }
   0x4   :  { %16637 = sst [smem:[#allocation61_spill]] %s16550_s3 }
   0x5   :  { %16638 = sst [smem:[#allocation62_spill]] %s16551_s4 }
   0x6   :  { %16639 = sst [smem:[#allocation63_spill]] %s16552_s5 }
   0x7   :  { %16640 = sst [smem:[#allocation64_spill]] %s16553_s6 }
   0x8   :  { %16641 = sst [smem:[#allocation65_spill]] %s16554_s7 }
   0x9   :  { %16642 = sst [smem:[#allocation66_spill]] %s16555_s8 }
   0xa   :  { %32 = vsyncpa [#allocation6], 0 }
   0xb   :  { %33 = vsyncpa [#allocation9], 0 }
   0xc   :  { %34 = vsyncpa [#allocation7], 0  ;;  %s12451_s27 = smov [#allocation5]   ;;  %s12379_s29 = scalar_lea.hbm %s16560_s13, 32768 }
   0xd   :  { %s66_s28 = sshll.u32 %s12451_s27, 4  ;;  %p12380_p0 = scmp.ne.s32.totalorder %s16560_s13, %s12379_s29  ;;  %s67_s28 = int_to_ptr.vmem [resolvable:$true] %s66_s28 }
   0xe   :  { %p12383_p1 = scmp.lt.u32.totalorder %s12379_s29, %s16560_s13 }
  0x10   :  { %p12385_p2 = pnand %p12383_p1, %p12380_p0 }
  0x12   :  { %12388 = shalt.err (!%p12385_p2)
}
  0x13   :  { %s12389_s22 = scalar_lea.vmem %s67_s28, 32768  ;;  %p12394_p4 = scmp.lt.s32.totalorder %s67_s28, %s67_s28 }
  0x14   :  { %p12390_p3 = scmp.ne.s32.totalorder %s67_s28, %s12389_s22  ;;  %p12395_p5 = scmp.lt.s32.totalorder %s12389_s22, %s12389_s22 }
  0x16   :  { %p12396_p6 = por %p12395_p5, %p12394_p4 }
  0x18   :  { %p12397_p7 = pnand %p12396_p6, %p12390_p3 }
  0x1a   :  { %12400 = shalt.err (!%p12397_p7)
}
  0x1b   :  { %s12452_s25 = smov 512   ;;  %s12453_s8 = smov 32  }
  0x1c   :  { %72 = dma.hbm_to_vmem [thread:$0]  %s16560_s13, 32768, %s67_s28, [#allocation6], %s12452_s25, %s12452_s25, %s12453_s8  }
  0x1d   :  { %s12454_s5 = smov [#allocation8]   ;;  %s12401_s2 = scalar_lea.hbm %s16563_s16, 32768 }
  0x1e   :  { %s82_s26 = sshll.u32 %s12454_s5, 4  ;;  %p12402_p8 = scmp.ne.s32.totalorder %s16563_s16, %s12401_s2  ;;  %s83_s26 = int_to_ptr.vmem [resolvable:$true] %s82_s26 }
  0x1f   :  { %p12405_p9 = scmp.lt.u32.totalorder %s12401_s2, %s16563_s16 }
  0x21   :  { %p12407_p10 = pnand %p12405_p9, %p12402_p8 }
  0x23   :  { %12410 = shalt.err (!%p12407_p10)
}
  0x24   :  { %s12411_s3 = scalar_lea.vmem %s83_s26, 32768  ;;  %p12416_p12 = scmp.lt.s32.totalorder %s83_s26, %s83_s26 }
  0x25   :  { %p12412_p11 = scmp.ne.s32.totalorder %s83_s26, %s12411_s3  ;;  %p12417_p13 = scmp.lt.s32.totalorder %s12411_s3, %s12411_s3 }
  0x27   :  { %p12418_p0 = por %p12417_p13, %p12416_p12 }
  0x29   :  { %p12419_p1 = pnand %p12418_p0, %p12412_p11 }
  0x2b   :  { %12422 = shalt.err (!%p12419_p1)
}
  0x2c   :  { %s12455_s13 = smov 256   ;;  %s12456_s28 = smov 16  }
  0x2d   :  { %88 = dma.hbm_to_vmem [thread:$0]  %s16563_s16, 32768, %s83_s26, [#allocation9], %s12455_s13, %s12455_s13, %s12456_s28  }
  0x2e   :  { %12445 = dma.done.wait [#allocation6], 32768  }
  0x2f   :  { %12446 = vsyncadd [#allocation6], 4294934528 }
  0x30   :  { %12447 = dma.done.wait [#allocation9], 32768  }
  0x31   :  { %12448 = vsyncadd [#allocation9], 4294934528  ;;  %vm110_vm0 = vcmask 1024   ;;  %vm108_vm1 = vcmask 7168   ;;  %v12457_v1 = vmov 0   ;;  %v16578_v2 = vmov 0.0  }
  0x32   :  { %11394 = vset.pattern.permute.xlu1 %v12457_v1  ;;  %11393 = vset.pattern.permute.xlu0 %v12457_v1  ;;  %111 = vst.msk [vmem:[#allocation2 + $0x8] sm:$0x3] %vm110_vm0, %v16578_v2  ;;  %113 = vst.msk [vmem:[#allocation2 + $0x18] sm:$0x3] %vm110_vm0, %v16578_v2  ;;  %s16643_s1 = sld [smem:[#allocation58_spill]]  ;;  %vm1485_vm2 = vcmask 261120   ;;  %v305_v59 = vlaneseq }
  0x33   :  { %115 = vst.msk [vmem:[#allocation2 + $0x28] sm:$0x3] %vm110_vm0, %v16578_v2  ;;  %117 = vst.msk [vmem:[#allocation2 + $0x38] sm:$0x3] %vm110_vm0, %v16578_v2  ;;  %vm1487_vm3 = vcmask 254976   ;;  %s16645_s4 = sld [smem:[#allocation59_spill]] }
  0x34   :  { %119 = vst.msk [vmem:[#allocation2 + $0x48] sm:$0x3] %vm110_vm0, %v16578_v2  ;;  %121 = vst.msk [vmem:[#allocation2 + $0x58] sm:$0x3] %vm110_vm0, %v16578_v2  ;;  %v12841_v60 = vshrl.u32 %v305_v59, 7  ;;  %s16649_s27 = sld [smem:[#allocation62_spill]] }
  0x35   :  { %123 = vst.msk [vmem:[#allocation2 + $0x68] sm:$0x3] %vm110_vm0, %v16578_v2  ;;  %125 = vst.msk [vmem:[#allocation2 + $0x78] sm:$0x3] %vm110_vm0, %v16578_v2  ;;  %vm489_vm4 = vcmask 1046528   ;;  %vm638_vm5 = vcmask 1045504  }
  0x36   :  { %127 = vst.msk [vmem:[#allocation2 + $0x88] sm:$0x3] %vm110_vm0, %v16578_v2  ;;  %129 = vst.msk [vmem:[#allocation2 + $0x98] sm:$0x3] %vm110_vm0, %v16578_v2  ;;  %v12847_v62 = vsub.s32 1, %v12841_v60  ;;  %v12850_v63 = vsub.s32 2, %v12841_v60 }
  0x37   :  { %131 = vst.msk [vmem:[#allocation2 + $0xa8] sm:$0x3] %vm110_vm0, %v16578_v2  ;;  %133 = vst.msk [vmem:[#allocation2 + $0xb8] sm:$0x3] %vm110_vm0, %v16578_v2  ;;  %v12853_v0 = vsub.s32 0, %v12841_v60  ;;  %s16655_s3 = sld [smem:[#allocation60_spill]] }
  0x38   :  { %135 = vst.msk [vmem:[#allocation2 + $0xc8] sm:$0x3] %vm110_vm0, %v16578_v2  ;;  %137 = vst.msk [vmem:[#allocation2 + $0xd8] sm:$0x3] %vm110_vm0, %v16578_v2  ;;  %v150_v3 = vld [vmem:[%s16643_s1] sm:$0xff]  ;;  %v151_v4 = vld [vmem:[%s16643_s1 + $0x8] sm:$0xff] }
  0x39   :  { %139 = vst.msk [vmem:[#allocation2 + $0xe8] sm:$0x3] %vm110_vm0, %v16578_v2  ;;  %141 = vst.msk [vmem:[#allocation2 + $0xf8] sm:$0x3] %vm110_vm0, %v16578_v2  ;;  %v152_v5 = vld [vmem:[%s16643_s1 + $0x10] sm:$0xff]  ;;  %v153_v8 = vld [vmem:[%s16643_s1 + $0x18] sm:$0xff] }
  0x3a   :  { %143 = vst.msk [vmem:[#allocation2 + $0x108] sm:$0x3] %vm110_vm0, %v16578_v2  ;;  %145 = vst.msk [vmem:[#allocation2 + $0x118] sm:$0x3] %vm110_vm0, %v16578_v2  ;;  %v184_v6 = vld [vmem:[#allocation2 + $0x8] sm:$0x3] }
  0x3b   :  { %147 = vst.msk [vmem:[#allocation2 + $0x128] sm:$0x3] %vm110_vm0, %v16578_v2  ;;  %149 = vst.msk [vmem:[#allocation2 + $0x138] sm:$0x3] %vm110_vm0, %v16578_v2  ;;  %343 = vperm.xlu1 %11394, %v184_v6   ;;  %v154_v9 = vld [vmem:[%s16643_s1 + $0x20] sm:$0xff]  ;;  %v155_v10 = vld [vmem:[%s16643_s1 + $0x28] sm:$0xff] }
  0x3c   :  { %109 = vst.msk [vmem:[#allocation2] sm:$0xff] %vm108_vm1, %v16578_v2  ;;  %112 = vst.msk [vmem:[#allocation2 + $0x10] sm:$0xff] %vm108_vm1, %v16578_v2  ;;  %v156_v11 = vld [vmem:[%s16643_s1 + $0x30] sm:$0xff]  ;;  %v157_v12 = vld [vmem:[%s16643_s1 + $0x38] sm:$0xff]  ;;  %s16656_s22 = sld [smem:[#allocation61_spill]]  ;;  %s12459_s25 = smov 64  }
  0x3d   :  { %114 = vst.msk [vmem:[#allocation2 + $0x20] sm:$0xff] %vm108_vm1, %v16578_v2  ;;  %116 = vst.msk [vmem:[#allocation2 + $0x30] sm:$0xff] %vm108_vm1, %v16578_v2  ;;  %v158_v13 = vld [vmem:[%s16643_s1 + $0x40] sm:$0xff]  ;;  %v159_v14 = vld [vmem:[%s16643_s1 + $0x48] sm:$0xff]  ;;  %vm2118_vm6 = vcmask 523264   ;;  %vm2135_vm7 = vcmask 785408  }
  0x3e   :  { %118 = vst.msk [vmem:[#allocation2 + $0x40] sm:$0xff] %vm108_vm1, %v16578_v2  ;;  %120 = vst.msk [vmem:[#allocation2 + $0x50] sm:$0xff] %vm108_vm1, %v16578_v2  ;;  %v160_v15 = vld [vmem:[%s16643_s1 + $0x50] sm:$0xff]  ;;  %v161_v16 = vld [vmem:[%s16643_s1 + $0x58] sm:$0xff]  ;;  %s16669_s30 = sld [smem:[#allocation63_spill]]  ;;  %s16670_s28 = sld [smem:[#allocation64_spill]] }
  0x3f   :  { %122 = vst.msk [vmem:[#allocation2 + $0x60] sm:$0xff] %vm108_vm1, %v16578_v2  ;;  %124 = vst.msk [vmem:[#allocation2 + $0x70] sm:$0xff] %vm108_vm1, %v16578_v2  ;;  %v162_v17 = vld [vmem:[%s16643_s1 + $0x60] sm:$0xff]  ;;  %v163_v18 = vld [vmem:[%s16643_s1 + $0x68] sm:$0xff]  ;;  %vm2864_vm8 = vcmask 1040384   ;;  %vm2865_vm9 = vcmask 1042434  }
  0x40   :  { %126 = vst.msk [vmem:[#allocation2 + $0x80] sm:$0xff] %vm108_vm1, %v16578_v2  ;;  %128 = vst.msk [vmem:[#allocation2 + $0x90] sm:$0xff] %vm108_vm1, %v16578_v2  ;;  %v164_v19 = vld [vmem:[%s16643_s1 + $0x70] sm:$0xff]  ;;  %v165_v20 = vld [vmem:[%s16643_s1 + $0x78] sm:$0xff]  ;;  %vm2867_vm11 = vcmask 1044484   ;;  %vm2869_vm13 = vcmask 1046534  }
  0x41   :  { %130 = vst.msk [vmem:[#allocation2 + $0xa0] sm:$0xff] %vm108_vm1, %v16578_v2  ;;  %132 = vst.msk [vmem:[#allocation2 + $0xb0] sm:$0xff] %vm108_vm1, %v16578_v2  ;;  %v204_v40 = vld [vmem:[#allocation2 + $0xa8] sm:$0x3]  ;;  %v202_v43 = vld [vmem:[#allocation2 + $0x98] sm:$0x3] }
  0x42   :  { %134 = vst.msk [vmem:[#allocation2 + $0xc0] sm:$0xff] %vm108_vm1, %v16578_v2  ;;  %136 = vst.msk [vmem:[#allocation2 + $0xd0] sm:$0xff] %vm108_vm1, %v16578_v2  ;;  %v222_v57 = vld [vmem:[#allocation2 + $0x138] sm:$0x3]  ;;  %v223_v61 = vld [vmem:[%s16645_s4] sm:$0xff]  ;;  %s16681_s16 = sld [smem:[#allocation65_spill]] }
  0x43   :  { %138 = vst.msk [vmem:[#allocation2 + $0xe0] sm:$0xff] %vm108_vm1, %v16578_v2  ;;  %140 = vst.msk [vmem:[#allocation2 + $0xf0] sm:$0xff] %vm108_vm1, %v16578_v2  ;;  %v183_v7 = vld [vmem:[#allocation2] sm:$0xff]  ;;  %v12856_v1 = vrot.slane %v223_v61, %v12847_v62  ;;  %vm12462_vm15 = vmmov 0   ;;  %s12463_s0 = smov [#allocation10]  }
  0x44   :  { %142 = vst.msk [vmem:[#allocation2 + $0x100] sm:$0xff] %vm108_vm1, %v16578_v2  ;;  %144 = vst.msk [vmem:[#allocation2 + $0x110] sm:$0xff] %vm108_vm1, %v16578_v2  ;;  %227 = vperm.xlu0 %11393, %v183_v7   ;;  %v12868_v7 = vsub.s32 4, %v12841_v60 }
  0x45   :  { %146 = vst.msk [vmem:[#allocation2 + $0x120] sm:$0xff] %vm108_vm1, %v16578_v2  ;;  %148 = vst.msk [vmem:[#allocation2 + $0x130] sm:$0xff] %vm108_vm1, %v16578_v2 }
  0x46   :  { %167 = vst.msk [vmem:[#allocation2 + $0x11] sm:$0xff] %vm108_vm1, %v150_v3  ;;  %168 = vst.msk [vmem:[#allocation2 + $0x21] sm:$0xff] %vm108_vm1, %v151_v4  ;;  %v12859_v3 = vrot.slane %v223_v61, %v12850_v63  ;;  %v11860_v4 = vld [vmem:[%s16649_s27 + $0x80] sm:$0xff]  }
  0x47   :  { %169 = vst.msk [vmem:[#allocation2 + $0x31] sm:$0xff] %vm108_vm1, %v152_v5  ;;  %170 = vst.msk [vmem:[#allocation2 + $0x41] sm:$0xff] %vm108_vm1, %v153_v8  ;;  %v201_v44 = vld [vmem:[#allocation2 + $0x90] sm:$0xff]  ;;  %v12865_v5 = vrot.slane %v223_v61, %v12853_v0  ;;  %11288 = vmatprep.subr.bf16.mxu1 %v11860_v4  ;;  %v12871_v8 = vsub.s32 5, %v12841_v60 }
  0x48   :  { %171 = vst.msk [vmem:[#allocation2 + $0x51] sm:$0xff] %vm108_vm1, %v154_v9  ;;  %172 = vst.msk [vmem:[#allocation2 + $0x61] sm:$0xff] %vm108_vm1, %v155_v10  ;;  %v203_v38 = vld [vmem:[#allocation2 + $0xa0] sm:$0xff]  ;;  %11289 = vmatpush3.bf16.msra.mxu1 %v11860_v4 }
  0x49   :  { %173 = vst.msk [vmem:[#allocation2 + $0x71] sm:$0xff] %vm108_vm1, %v156_v11  ;;  %174 = vst.msk [vmem:[#allocation2 + $0x81] sm:$0xff] %vm108_vm1, %v157_v12  ;;  %v12876_v12 = vsub.s32 7, %v12841_v60 }
  0x4a   :  { %175 = vst.msk [vmem:[#allocation2 + $0xb1] sm:$0xff] %vm108_vm1, %v158_v13  ;;  %176 = vst.msk [vmem:[#allocation2 + $0xc1] sm:$0xff] %vm108_vm1, %v159_v14 }
  0x4b   :  { %177 = vst.msk [vmem:[#allocation2 + $0xd1] sm:$0xff] %vm108_vm1, %v160_v15  ;;  %178 = vst.msk [vmem:[#allocation2 + $0xe1] sm:$0xff] %vm108_vm1, %v161_v16  ;;  %v11861_v15 = vld [vmem:[%s16649_s27 + $0x88] sm:$0xff]  }
  0x4c   :  { %179 = vst.msk [vmem:[#allocation2 + $0xf1] sm:$0xff] %vm108_vm1, %v162_v17  ;;  %180 = vst.msk [vmem:[#allocation2 + $0x101] sm:$0xff] %vm108_vm1, %v163_v18  ;;  %v221_v58 = vld [vmem:[#allocation2 + $0x130] sm:$0xff]  ;;  %v12887_v18 = vsub.s32 3, %v12841_v60  ;;  %11290 = vmatprep.subr.bf16.mxu1 %v11861_v15 }
  0x4d   :  { %181 = vst.msk [vmem:[#allocation2 + $0x111] sm:$0xff] %vm108_vm1, %v164_v19  ;;  %v186_v21 = vld [vmem:[#allocation2 + $0x18] sm:$0x3]  ;;  %v185_v22 = vld [vmem:[#allocation2 + $0x10] sm:$0xff]  ;;  %182 = vst.msk [vmem:[#allocation2 + $0x121] sm:$0xff] %vm108_vm1, %v165_v20  ;;  %v12890_v19 = vsub.s32 6, %v12841_v60  ;;  %11291 = vmatpush3.bf16.msra.mxu1 %v11861_v15 }
  0x4e   :  { %348 = vperm.xlu1 %11394, %v186_v21   ;;  %232 = vperm.xlu0 %11393, %v185_v22   ;;  %v188_v23 = vld [vmem:[#allocation2 + $0x28] sm:$0x3]  ;;  %v187_v24 = vld [vmem:[#allocation2 + $0x20] sm:$0xff]  ;;  %v190_v25 = vld [vmem:[#allocation2 + $0x38] sm:$0x3]  ;;  %1501 = vst.msk [vmem:[#allocation3 + $0x70] sm:$0xff] %vm1485_vm2, %v16578_v2 }
  0x4f   :  { %v189_v26 = vld [vmem:[#allocation2 + $0x30] sm:$0xff]  ;;  %v192_v27 = vld [vmem:[#allocation2 + $0x48] sm:$0x3]  ;;  %v191_v28 = vld [vmem:[#allocation2 + $0x40] sm:$0xff]  ;;  %1502 = vst.msk [vmem:[#allocation3 + $0x78] sm:$0x3] %vm1487_vm3, %v16578_v2 }
  0x50   :  { %v194_v29 = vld [vmem:[#allocation2 + $0x58] sm:$0x3]  ;;  %v193_v30 = vld [vmem:[#allocation2 + $0x50] sm:$0xff]  ;;  %v196_v31 = vld [vmem:[#allocation2 + $0x68] sm:$0x3]  ;;  %1486 = vst.msk [vmem:[#allocation3] sm:$0xff] %vm1485_vm2, %v16578_v2 }
  0x51   :  { %v195_v32 = vld [vmem:[#allocation2 + $0x60] sm:$0xff]  ;;  %v198_v33 = vld [vmem:[#allocation2 + $0x78] sm:$0x3]  ;;  %v197_v34 = vld [vmem:[#allocation2 + $0x70] sm:$0xff]  ;;  %1488 = vst.msk [vmem:[#allocation3 + $0x8] sm:$0x3] %vm1487_vm3, %v16578_v2 }
  0x52   :  { %353 = vperm.xlu1 %11394, %v188_v23   ;;  %237 = vperm.xlu0 %11393, %v187_v24   ;;  %v200_v35 = vld [vmem:[#allocation2 + $0x88] sm:$0x3]  ;;  %v199_v36 = vld [vmem:[#allocation2 + $0x80] sm:$0xff]  ;;  %v205_v37 = vld [vmem:[#allocation2 + $0xb0] sm:$0xff]  ;;  %1489 = vst.msk [vmem:[#allocation3 + $0x10] sm:$0xff] %vm1485_vm2, %v16578_v2  ;;  %v12895_v24 = vrot.slane %v223_v61, %v12868_v7  ;;  %vm5615_vm1 = vcmask 1041409  }
  0x53   :  { %v206_v39 = vld [vmem:[#allocation2 + $0xb8] sm:$0x3]  ;;  %v208_v41 = vld [vmem:[#allocation2 + $0xc8] sm:$0x3]  ;;  %v207_v42 = vld [vmem:[#allocation2 + $0xc0] sm:$0xff]  ;;  %1491 = vst.msk [vmem:[#allocation3 + $0x20] sm:$0xff] %vm1485_vm2, %v16578_v2 }
  0x54   :  { %v210_v45 = vld [vmem:[#allocation2 + $0xd8] sm:$0x3]  ;;  %v209_v46 = vld [vmem:[#allocation2 + $0xd0] sm:$0xff]  ;;  %v212_v47 = vld [vmem:[#allocation2 + $0xe8] sm:$0x3]  ;;  %1493 = vst.msk [vmem:[#allocation3 + $0x30] sm:$0xff] %vm1485_vm2, %v16578_v2 }
  0x55   :  { %v211_v48 = vld [vmem:[#allocation2 + $0xe0] sm:$0xff]  ;;  %v214_v49 = vld [vmem:[#allocation2 + $0xf8] sm:$0x3]  ;;  %v213_v50 = vld [vmem:[#allocation2 + $0xf0] sm:$0xff]  ;;  %1490 = vst.msk [vmem:[#allocation3 + $0x18] sm:$0x3] %vm1487_vm3, %v16578_v2 }
  0x56   :  { %358 = vperm.xlu1 %11394, %v190_v25   ;;  %242 = vperm.xlu0 %11393, %v189_v26   ;;  %v216_v51 = vld [vmem:[#allocation2 + $0x108] sm:$0x3]  ;;  %v215_v52 = vld [vmem:[#allocation2 + $0x100] sm:$0xff]  ;;  %v218_v53 = vld [vmem:[#allocation2 + $0x118] sm:$0x3]  ;;  %1495 = vst.msk [vmem:[#allocation3 + $0x40] sm:$0xff] %vm1485_vm2, %v16578_v2  ;;  %v12898_v26 = vrot.slane %v223_v61, %v12871_v8 }
  0x57   :  { %v217_v54 = vld [vmem:[#allocation2 + $0x110] sm:$0xff]  ;;  %v220_v55 = vld [vmem:[#allocation2 + $0x128] sm:$0x3]  ;;  %v219_v56 = vld [vmem:[#allocation2 + $0x120] sm:$0xff]  ;;  %1492 = vst.msk [vmem:[#allocation3 + $0x28] sm:$0x3] %vm1487_vm3, %v16578_v2 }
  0x58   :  { %1494 = vst.msk [vmem:[#allocation3 + $0x38] sm:$0x3] %vm1487_vm3, %v16578_v2  ;;  %1496 = vst.msk [vmem:[#allocation3 + $0x48] sm:$0x3] %vm1487_vm3, %v16578_v2  ;;  %v12879_v14 = vld [vmem:[#allocation3] sm:$0xff] }
  0x59   :  { %1497 = vst.msk [vmem:[#allocation3 + $0x50] sm:$0xff] %vm1485_vm2, %v16578_v2  ;;  %1499 = vst.msk [vmem:[#allocation3 + $0x60] sm:$0xff] %vm1485_vm2, %v16578_v2  ;;  %v12892_v20 = vld [vmem:[#allocation3 + $0x8] sm:$0x3] }
  0x5a   :  { %363 = vperm.xlu1 %11394, %v192_v27   ;;  %247 = vperm.xlu0 %11393, %v191_v28   ;;  %1498 = vst.msk [vmem:[#allocation3 + $0x58] sm:$0x3] %vm1487_vm3, %v16578_v2  ;;  %1500 = vst.msk [vmem:[#allocation3 + $0x68] sm:$0x3] %vm1487_vm3, %v16578_v2  ;;  %v12901_v27 = vrot.slane %v223_v61, %v12876_v12 }
  0x5b   :  { %1503 = vst.msk [vmem:[#allocation3 + $0x80] sm:$0xff] %vm1485_vm2, %v16578_v2  ;;  %1505 = vst.msk [vmem:[#allocation3 + $0x90] sm:$0xff] %vm1485_vm2, %v16578_v2 }
  0x5c   :  { %1504 = vst.msk [vmem:[#allocation3 + $0x88] sm:$0x3] %vm1487_vm3, %v16578_v2  ;;  %1506 = vst.msk [vmem:[#allocation3 + $0x98] sm:$0x3] %vm1487_vm3, %v16578_v2 }
  0x5d   :  { %1507 = vst.msk [vmem:[#allocation3 + $0xa0] sm:$0xff] %vm1485_vm2, %v16578_v2  ;;  %1509 = vst.msk [vmem:[#allocation3 + $0xb0] sm:$0xff] %vm1485_vm2, %v16578_v2 }
  0x5e   :  { %368 = vperm.xlu1 %11394, %v194_v29   ;;  %252 = vperm.xlu0 %11393, %v193_v30   ;;  %1508 = vst.msk [vmem:[#allocation3 + $0xa8] sm:$0x3] %vm1487_vm3, %v16578_v2  ;;  %1510 = vst.msk [vmem:[#allocation3 + $0xb8] sm:$0x3] %vm1487_vm3, %v16578_v2 }
  0x5f   :  { %1511 = vst.msk [vmem:[#allocation3 + $0xc0] sm:$0xff] %vm1485_vm2, %v16578_v2  ;;  %1513 = vst.msk [vmem:[#allocation3 + $0xd0] sm:$0xff] %vm1485_vm2, %v16578_v2 }
  0x60   :  { %1512 = vst.msk [vmem:[#allocation3 + $0xc8] sm:$0x3] %vm1487_vm3, %v16578_v2  ;;  %1514 = vst.msk [vmem:[#allocation3 + $0xd8] sm:$0x3] %vm1487_vm3, %v16578_v2 }
  0x61   :  { %1515 = vst.msk [vmem:[#allocation3 + $0xe0] sm:$0xff] %vm1485_vm2, %v16578_v2  ;;  %1517 = vst.msk [vmem:[#allocation3 + $0xf0] sm:$0xff] %vm1485_vm2, %v16578_v2 }
  0x62   :  { %373 = vperm.xlu1 %11394, %v196_v31   ;;  %257 = vperm.xlu0 %11393, %v195_v32   ;;  %1516 = vst.msk [vmem:[#allocation3 + $0xe8] sm:$0x3] %vm1487_vm3, %v16578_v2  ;;  %1518 = vst.msk [vmem:[#allocation3 + $0xf8] sm:$0x3] %vm1487_vm3, %v16578_v2  ;;  %v12906_v31 = vrot.slane %v223_v61, %v12887_v18  ;;  %v1654_v32 = vrot.slane %v12879_v14, 1 }
  0x63   :  { %1519 = vst.msk [vmem:[#allocation3 + $0x100] sm:$0xff] %vm1485_vm2, %v16578_v2  ;;  %1521 = vst.msk [vmem:[#allocation3 + $0x110] sm:$0xff] %vm1485_vm2, %v16578_v2 }
  0x64   :  { %1520 = vst.msk [vmem:[#allocation3 + $0x108] sm:$0x3] %vm1487_vm3, %v16578_v2  ;;  %1522 = vst.msk [vmem:[#allocation3 + $0x118] sm:$0x3] %vm1487_vm3, %v16578_v2 }
  0x65   :  { %1523 = vst.msk [vmem:[#allocation3 + $0x120] sm:$0xff] %vm1485_vm2, %v16578_v2  ;;  %1525 = vst.msk [vmem:[#allocation3 + $0x130] sm:$0xff] %vm1485_vm2, %v16578_v2 }
  0x66   :  { %378 = vperm.xlu1 %11394, %v198_v33   ;;  %262 = vperm.xlu0 %11393, %v197_v34   ;;  %1524 = vst.msk [vmem:[#allocation3 + $0x128] sm:$0x3] %vm1487_vm3, %v16578_v2  ;;  %1526 = vst.msk [vmem:[#allocation3 + $0x138] sm:$0x3] %vm1487_vm3, %v16578_v2 }
  0x67   :  { %16644 = vst [vmem:[#allocation14_spill] sm:$0xff] %v12841_v60  ;;  %16646 = vst [vmem:[#allocation15_spill] sm:$0xff] %v12847_v62 }
  0x68   :  { %16647 = vst [vmem:[#allocation16_spill] sm:$0xff] %v12850_v63  ;;  %16648 = vst [vmem:[#allocation17_spill] sm:$0xff] %v12853_v0 }
  0x69   :  { %16650 = vst [vmem:[#allocation18_spill] sm:$0xff] %v12868_v7  ;;  %16651 = vst [vmem:[#allocation19_spill] sm:$0xff] %v12871_v8 }
  0x6a   :  { %767 = vperm.xlu1 %11394, %v200_v35   ;;  %721 = vperm.xlu0 %11393, %v199_v36   ;;  %16652 = vst [vmem:[#allocation20_spill] sm:$0xff] %v12876_v12  ;;  %16653 = vst [vmem:[#allocation21_spill] sm:$0xff] %v12887_v18  ;;  %v12910_v35 = vrot.slane %v223_v61, %v12890_v19  ;;  %v1655_v36 = vrot.slane %v12892_v20, 1 }
  0x6b   :  { %16654 = vst [vmem:[#allocation22_spill] sm:$0xff] %v12890_v19  ;;  %vm2866_vm10 = vmor %vm2864_vm8, %vm2865_vm9 }
  0x6c   :  { %vm2868_vm12 = vmor %vm2866_vm10, %vm2867_vm11 }
  0x6d   :  { %vm14256_vm14 = vmor %vm2868_vm12, %vm2869_vm13 }
  0x6e   :  { %272 = vperm.xlu1 %11394, %v205_v37   ;;  %267 = vperm.xlu0 %11393, %v203_v38   ;;  %v1703_v37 = vrot.slane %v12892_v20, 2  ;;  %v1702_v38 = vrot.slane %v12879_v14, 2 }
  0x72   :  { %388 = vperm.xlu1 %11394, %v206_v39   ;;  %383 = vperm.xlu0 %11393, %v204_v40  }
  0x76   :  { %393 = vperm.xlu1 %11394, %v208_v41   ;;  %277 = vperm.xlu0 %11393, %v207_v42  }
  0x7a   :  { %1119 = vperm.xlu1 %11394, %v202_v43   ;;  %1073 = vperm.xlu0 %11393, %v201_v44  }
  0x7e   :  { %398 = vperm.xlu1 %11394, %v210_v45   ;;  %282 = vperm.xlu0 %11393, %v209_v46  }
  0x82   :  { %403 = vperm.xlu1 %11394, %v212_v47   ;;  %287 = vperm.xlu0 %11393, %v211_v48  }
  0x86   :  { %408 = vperm.xlu1 %11394, %v214_v49   ;;  %292 = vperm.xlu0 %11393, %v213_v50  }
  0x8a   :  { %413 = vperm.xlu1 %11394, %v216_v51   ;;  %297 = vperm.xlu0 %11393, %v215_v52  }
  0x8e   :  { %418 = vperm.xlu1 %11394, %v218_v53   ;;  %302 = vperm.xlu0 %11393, %v217_v54  }
  0x92   :  { %772 = vperm.xlu1 %11394, %v220_v55   ;;  %726 = vperm.xlu0 %11393, %v219_v56   ;;  %v12927_v55 = vld [vmem:[%s16645_s4 + $0x8] ss:$0 sm:$0xff] }
  0x96   :  { %1124 = vperm.xlu1 %11394, %v222_v57   ;;  %1078 = vperm.xlu0 %11393, %v221_v58  }
  0xba   :  { %v344_v6 = vpop.permute.xlu1 %343 }
  0xbb   :  { %v426_v10 = vmul.f32 %v12856_v1, %v344_v6  ;;  %v575_v11 = vmul.f32 %v12859_v3, %v344_v6 }
  0xbd   :  { %v491_v21 = vrot.slane %v426_v10, 1  ;;  %v640_v22 = vrot.slane %v575_v11, 2 }
  0xc3   :  { %v228_v9 = vpop.permute.xlu0 %227 }
  0xc4   :  { %v425_v13 = vmul.f32 %v12856_v1, %v228_v9  ;;  %v309_v16 = vmul.f32 %v12865_v5, %v228_v9  ;;  %v574_v17 = vmul.f32 %v12859_v3, %v228_v9 }
  0xc6   :  { %v490_v23 = vrot.slane %v425_v13, 1  ;;  %v639_v25 = vrot.slane %v574_v17, 2 }
  0xc8   :  { %v492_v28 = vsel %vm489_vm4, %v490_v23, %v491_v21  ;;  %v641_v30 = vsel %vm638_vm5, %v639_v25, %v640_v22 }
  0xc9   :  { %v554_v29 = vadd.f32 %v492_v28, %v309_v16 }
  0xcb   :  { %v703_v39 = vadd.f32 %v641_v30, %v554_v29 }
  0xcd   :  { %v349_v33 = vpop.permute.xlu1 %348  ;;  %v233_v34 = vpop.permute.xlu0 %232 }
  0xce   :  { %v428_v40 = vmul.f32 %v12856_v1, %v349_v33  ;;  %v577_v41 = vmul.f32 %v12859_v3, %v349_v33  ;;  %v780_v42 = vmul.f32 %v12895_v24, %v349_v33  ;;  %v928_v43 = vmul.f32 %v12898_v26, %v349_v33 }
  0xcf   :  { %v310_v44 = vmul.f32 %v12865_v5, %v233_v34  ;;  %v427_v45 = vmul.f32 %v12856_v1, %v233_v34  ;;  %v576_v46 = vmul.f32 %v12859_v3, %v233_v34  ;;  %v733_v50 = vmul.f32 %v12906_v31, %v233_v34 }
  0xd0   :  { %v494_v47 = vrot.slane %v428_v40, 1  ;;  %v643_v48 = vrot.slane %v577_v41, 2  ;;  %v844_v49 = vrot.slane %v780_v42, 1  ;;  %v992_v51 = vrot.slane %v928_v43, 2 }
  0xd1   :  { %v493_v52 = vrot.slane %v427_v45, 1  ;;  %v642_v53 = vrot.slane %v576_v46, 2  ;;  %v779_v54 = vmul.f32 %v12895_v24, %v233_v34  ;;  %v354_v56 = vpop.permute.xlu1 %353  ;;  %v749_v57 = vadd.f32 %v733_v50, %v703_v39  ;;  %v238_v17 = vpop.permute.xlu0 %237 }
  0xd2   :  { %v927_v58 = vmul.f32 %v12898_v26, %v233_v34  ;;  %v430_v59 = vmul.f32 %v12856_v1, %v354_v56  ;;  %v579_v61 = vmul.f32 %v12859_v3, %v354_v56  ;;  %v782_v10 = vmul.f32 %v12895_v24, %v354_v56 }
  0xd3   :  { %v495_v4 = vsel %vm489_vm4, %v493_v52, %v494_v47  ;;  %v644_v6 = vsel %vm638_vm5, %v642_v53, %v643_v48  ;;  %v843_v9 = vrot.slane %v779_v54, 1  ;;  %v930_v23 = vmul.f32 %v12898_v26, %v354_v56 }
  0xd4   :  { %v555_v11 = vadd.f32 %v495_v4, %v310_v44  ;;  %v991_v13 = vrot.slane %v927_v58, 2  ;;  %v497_v15 = vrot.slane %v430_v59, 1  ;;  %v646_v16 = vrot.slane %v579_v61, 2 }
  0xd5   :  { %v845_v21 = vsel %vm489_vm4, %v843_v9, %v844_v49  ;;  %v847_v22 = vrot.slane %v782_v10, 1  ;;  %v1132_v25 = vmul.f32 %v12901_v27, %v354_v56  ;;  %v1280_v33 = vmul.f32 %v12927_v55, %v354_v56  ;;  %v359_v50 = vpop.permute.xlu1 %358 }
  0xd6   :  { %v704_v28 = vadd.f32 %v644_v6, %v555_v11  ;;  %v907_v29 = vadd.f32 %v845_v21, %v749_v57  ;;  %v993_v30 = vsel %vm638_vm5, %v991_v13, %v992_v51  ;;  %v995_v34 = vrot.slane %v930_v23, 2 }
  0xd7   :  { %v1196_v39 = vrot.slane %v1132_v25, 1  ;;  %v311_v40 = vmul.f32 %v12865_v5, %v238_v17  ;;  %v429_v41 = vmul.f32 %v12856_v1, %v238_v17  ;;  %v1344_v43 = vrot.slane %v1280_v33, 2 }
  0xd8   :  { %v1055_v42 = vadd.f32 %v993_v30, %v907_v29  ;;  %v578_v44 = vmul.f32 %v12859_v3, %v238_v17  ;;  %v734_v45 = vmul.f32 %v12906_v31, %v238_v17  ;;  %v781_v47 = vmul.f32 %v12895_v24, %v238_v17 }
  0xd9   :  { %v496_v46 = vrot.slane %v429_v41, 1  ;;  %v929_v48 = vmul.f32 %v12898_v26, %v238_v17  ;;  %v1085_v49 = vmul.f32 %v12910_v35, %v238_v17  ;;  %v1131_v53 = vmul.f32 %v12901_v27, %v238_v17  ;;  %v12971_v41 = vld [vmem:[%s16656_s22] ss:$0 sm:$0xff] }
  0xda   :  { %v645_v51 = vrot.slane %v578_v44, 2  ;;  %v750_v52 = vadd.f32 %v734_v45, %v704_v28  ;;  %v1279_v54 = vmul.f32 %v12927_v55, %v238_v17  ;;  %v846_v57 = vrot.slane %v781_v47, 1 }
  0xdb   :  { %v498_v56 = vsel %vm489_vm4, %v496_v46, %v497_v15  ;;  %v994_v58 = vrot.slane %v929_v48, 2  ;;  %v1101_v59 = vadd.f32 %v1085_v49, %v1055_v42  ;;  %v1195_v4 = vrot.slane %v1131_v53, 1  ;;  %v12962_v15 = vld [vmem:[%s16655_s3] ss:$0 sm:$0xff] }
  0xdc   :  { %v556_v61 = vadd.f32 %v498_v56, %v311_v40  ;;  %v1343_v6 = vrot.slane %v1279_v54, 2  ;;  %v432_v9 = vmul.f32 %v12856_v1, %v359_v50  ;;  %v848_v10 = vsel %vm489_vm4, %v846_v57, %v847_v22  ;;  %v243_v22 = vpop.permute.xlu0 %242 }
  0xdd   :  { %v12953_v11 = vmul.f32 %v12859_v3, %v359_v50  ;;  %v784_v13 = vmul.f32 %v12895_v24, %v359_v50  ;;  %v12957_v21 = vmul.f32 %v12898_v26, %v359_v50  ;;  %v908_v17 = vadd.f32 %v848_v10, %v750_v52 }
  0xde   :  { %v1197_v23 = vsel %vm489_vm4, %v1195_v4, %v1196_v39  ;;  %v1345_v25 = vsel %vm638_vm5, %v1343_v6, %v1344_v43  ;;  %v500_v28 = vrot.slane %v432_v9, 1  ;;  %v1134_v42 = vmul.f32 %v12901_v27, %v359_v50 }
  0xdf   :  { %v1259_v29 = vadd.f32 %v1197_v23, %v1101_v59  ;;  %v649_v30 = vrot.slane %v12953_v11, 2  ;;  %v850_v33 = vrot.slane %v784_v13, 1  ;;  %v998_v40 = vrot.slane %v12957_v21, 2 }
  0xe0   :  { %v1282_v44 = vmul.f32 %v12927_v55, %v359_v50  ;;  %v647_v39 = vsel %vm638_vm5, %v645_v51, %v646_v16  ;;  %v996_v43 = vsel %vm638_vm5, %v994_v58, %v995_v34  ;;  %v312_v48 = vmul.f32 %v12865_v5, %v243_v22 }
  0xe1   :  { %v1407_v45 = vadd.f32 %v1345_v25, %v1259_v29  ;;  %v705_v46 = vadd.f32 %v647_v39, %v556_v61  ;;  %v1056_v47 = vadd.f32 %v996_v43, %v908_v17  ;;  %v1199_v49 = vrot.slane %v1134_v42, 1  ;;  %v364_v61 = vpop.permute.xlu1 %363 }
  0xe2   :  { %v1347_v52 = vrot.slane %v1282_v44, 2  ;;  %v431_v53 = vmul.f32 %v12856_v1, %v243_v22  ;;  %v580_v54 = vmul.f32 %v12859_v3, %v243_v22  ;;  %v735_v57 = vmul.f32 %v12906_v31, %v243_v22 }
  0xe3   :  { %v1430_v56 = vmul.f32 %v12962_v15, %v1407_v45  ;;  %v783_v50 = vmul.f32 %v12895_v24, %v243_v22  ;;  %v931_v16 = vmul.f32 %v12898_v26, %v243_v22  ;;  %v1086_v58 = vmul.f32 %v12910_v35, %v243_v22 }
  0xe4   :  { %v499_v34 = vrot.slane %v431_v53, 1  ;;  %v648_v51 = vrot.slane %v580_v54, 2  ;;  %v1133_v59 = vmul.f32 %v12901_v27, %v243_v22  ;;  %v751_v6 = vadd.f32 %v735_v57, %v705_v46 }
  0xe5   :  { %v1453_v4 = vadd.f32 %v12971_v41, %v1430_v56  ;;  %v849_v9 = vrot.slane %v783_v50, 1  ;;  %v997_v10 = vrot.slane %v931_v16, 2  ;;  %v1102_v13 = vadd.f32 %v1086_v58, %v1056_v47  ;;  %v248_v56 = vpop.permute.xlu0 %247 }
  0xe6   :  { %v501_v11 = vsel %vm489_vm4, %v499_v34, %v500_v28  ;;  %v1198_v21 = vrot.slane %v1133_v59, 1  ;;  %v1281_v17 = vmul.f32 %v12927_v55, %v243_v22  ;;  %v434_v42 = vmul.f32 %v12856_v1, %v364_v61 }
  0xe7   :  { %v1469_v23 = vmax.f32 %v1453_v4, 0.0  ;;  %v557_v25 = vadd.f32 %v501_v11, %v312_v48  ;;  %v851_v29 = vsel %vm489_vm4, %v849_v9, %v850_v33  ;;  %v583_v45 = vmul.f32 %v12859_v3, %v364_v61 }
  0xe8   :  { %v909_v44 = vadd.f32 %v851_v29, %v751_v6  ;;  %v1200_v39 = vsel %vm489_vm4, %v1198_v21, %v1199_v49  ;;  %v1346_v43 = vrot.slane %v1281_v17, 2  ;;  %v503_v53 = vrot.slane %v434_v42, 1 }
  0xe9   :  { %v1260_v46 = vadd.f32 %v1200_v39, %v1102_v13  ;;  %v786_v28 = vmul.f32 %v12895_v24, %v364_v61  ;;  %v934_v47 = vmul.f32 %v12898_v26, %v364_v61  ;;  %1528 = vst.msk [vmem:[#allocation3 + $0x11] sm:$0xff] %vm1485_vm2, %v1469_v23  ;;  %v652_v48 = vrot.slane %v583_v45, 2  ;;  %v369_v23 = vpop.permute.xlu1 %368 }
  0xea   :  { %v1348_v22 = vsel %vm638_vm5, %v1346_v43, %v1347_v52  ;;  %v1136_v33 = vmul.f32 %v12901_v27, %v364_v61  ;;  %v1284_v54 = vmul.f32 %v12927_v55, %v364_v61  ;;  %v650_v16 = vsel %vm638_vm5, %v648_v51, %v649_v30 }
  0xeb   :  { %v1408_v49 = vadd.f32 %v1348_v22, %v1260_v46  ;;  %v853_v57 = vrot.slane %v786_v28, 1  ;;  %v1001_v50 = vrot.slane %v934_v47, 2  ;;  %v706_v59 = vadd.f32 %v650_v16, %v557_v25 }
  0xec   :  { %v1202_v34 = vrot.slane %v1136_v33, 1  ;;  %v1350_v58 = vrot.slane %v1284_v54, 2  ;;  %v999_v4 = vsel %vm638_vm5, %v997_v10, %v998_v40  ;;  %v313_v52 = vmul.f32 %v12865_v5, %v248_v56 }
  0xed   :  { %v1431_v6 = vmul.f32 %v12962_v15, %v1408_v49  ;;  %v1057_v9 = vadd.f32 %v999_v4, %v909_v44  ;;  %v433_v11 = vmul.f32 %v12856_v1, %v248_v56  ;;  %v582_v61 = vmul.f32 %v12859_v3, %v248_v56 }
  0xee   :  { %v736_v13 = vmul.f32 %v12906_v31, %v248_v56  ;;  %v785_v21 = vmul.f32 %v12895_v24, %v248_v56  ;;  %v933_v30 = vmul.f32 %v12898_v26, %v248_v56  ;;  %v1087_v40 = vmul.f32 %v12910_v35, %v248_v56 }
  0xef   :  { %v1454_v51 = vadd.f32 %v12971_v41, %v1431_v6  ;;  %v502_v17 = vrot.slane %v433_v11, 1  ;;  %v1135_v10 = vmul.f32 %v12901_v27, %v248_v56  ;;  %v651_v25 = vrot.slane %v582_v61, 2 }
  0xf0   :  { %v752_v29 = vadd.f32 %v736_v13, %v706_v59  ;;  %v852_v42 = vrot.slane %v785_v21, 1  ;;  %v1000_v44 = vrot.slane %v933_v30, 2  ;;  %v1103_v45 = vadd.f32 %v1087_v40, %v1057_v9 }
  0xf1   :  { %v1470_v39 = vmax.f32 %v1454_v51, 0.0  ;;  %v504_v43 = vsel %vm489_vm4, %v502_v17, %v503_v53  ;;  %v1201_v46 = vrot.slane %v1135_v10, 1  ;;  %v1283_v22 = vmul.f32 %v12927_v55, %v248_v56 }
  0xf2   :  { %v558_v28 = vadd.f32 %v504_v43, %v313_v52  ;;  %v854_v47 = vsel %vm489_vm4, %v852_v42, %v853_v57  ;;  %v436_v33 = vmul.f32 %v12856_v1, %v369_v23  ;;  %v13017_v16 = vmul.f32 %v12859_v3, %v369_v23 }
  0xf3   :  { %v910_v54 = vadd.f32 %v854_v47, %v752_v29  ;;  %v1203_v49 = vsel %vm489_vm4, %v1201_v46, %v1202_v34  ;;  %v788_v59 = vmul.f32 %v12895_v24, %v369_v23  ;;  %1529 = vst.msk [vmem:[#allocation3 + $0x21] sm:$0xff] %vm1485_vm2, %v1470_v39  ;;  %v1349_v4 = vrot.slane %v1283_v22, 2  ;;  %v253_v34 = vpop.permute.xlu0 %252 }
  0xf4   :  { %v1261_v53 = vadd.f32 %v1203_v49, %v1103_v45  ;;  %v506_v6 = vrot.slane %v436_v33, 1  ;;  %v936_v9 = vmul.f32 %v12898_v26, %v369_v23  ;;  %v655_v57 = vrot.slane %v13017_v16, 2 }
  0xf5   :  { %v856_v56 = vrot.slane %v788_v59, 1  ;;  %v1138_v52 = vmul.f32 %v12901_v27, %v369_v23  ;;  %v1286_v11 = vmul.f32 %v12927_v55, %v369_v23  ;;  %v1351_v61 = vsel %vm638_vm5, %v1349_v4, %v1350_v58 }
  0xf6   :  { %v1004_v13 = vrot.slane %v936_v9, 2  ;;  %v653_v21 = vsel %vm638_vm5, %v651_v25, %v652_v48  ;;  %v1002_v30 = vsel %vm638_vm5, %v1000_v44, %v1001_v50  ;;  %v1409_v51 = vadd.f32 %v1351_v61, %v1261_v53 }
  0xf7   :  { %v1205_v17 = vrot.slane %v1138_v52, 1  ;;  %v1353_v40 = vrot.slane %v1286_v11, 2  ;;  %v707_v10 = vadd.f32 %v653_v21, %v558_v28  ;;  %v1058_v29 = vadd.f32 %v1002_v30, %v910_v54  ;;  %v374_v28 = vpop.permute.xlu1 %373 }
  0xf8   :  { %v314_v42 = vmul.f32 %v12865_v5, %v253_v34  ;;  %v435_v39 = vmul.f32 %v12856_v1, %v253_v34  ;;  %v584_v43 = vmul.f32 %v12859_v3, %v253_v34  ;;  %v1432_v23 = vmul.f32 %v12962_v15, %v1409_v51 }
  0xf9   :  { %v737_v58 = vmul.f32 %v12906_v31, %v253_v34  ;;  %v787_v45 = vmul.f32 %v12895_v24, %v253_v34  ;;  %v935_v48 = vmul.f32 %v12898_v26, %v253_v34  ;;  %v1088_v44 = vmul.f32 %v12910_v35, %v253_v34 }
  0xfa   :  { %v505_v50 = vrot.slane %v435_v39, 1  ;;  %v654_v25 = vrot.slane %v584_v43, 2  ;;  %v1137_v46 = vmul.f32 %v12901_v27, %v253_v34  ;;  %v1455_v47 = vadd.f32 %v12971_v41, %v1432_v23  ;;  %v13056_v43 = vpop.permute.xlu0 %257 }
  0xfb   :  { %v753_v22 = vadd.f32 %v737_v58, %v707_v10  ;;  %v855_v33 = vrot.slane %v787_v45, 1  ;;  %v1003_v54 = vrot.slane %v935_v48, 2  ;;  %v1104_v16 = vadd.f32 %v1088_v44, %v1058_v29 }
  0xfc   :  { %v507_v49 = vsel %vm489_vm4, %v505_v50, %v506_v6  ;;  %v1204_v59 = vrot.slane %v1137_v46, 1  ;;  %v1285_v53 = vmul.f32 %v12927_v55, %v253_v34  ;;  %v1471_v4 = vmax.f32 %v1455_v47, 0.0 }
  0xfd   :  { %v559_v9 = vadd.f32 %v507_v49, %v314_v42  ;;  %v857_v52 = vsel %vm489_vm4, %v855_v33, %v856_v56  ;;  %v13042_v11 = vmul.f32 %v12856_v1, %v374_v28  ;;  %v13046_v51 = vmul.f32 %v12859_v3, %v374_v28 }
  0xfe   :  { %v911_v61 = vadd.f32 %v857_v52, %v753_v22  ;;  %v1206_v21 = vsel %vm489_vm4, %v1204_v59, %v1205_v17  ;;  %v1352_v30 = vrot.slane %v1285_v53, 2  ;;  %v790_v29 = vmul.f32 %v12895_v24, %v374_v28  ;;  %1530 = vst.msk [vmem:[#allocation3 + $0x31] sm:$0xff] %vm1485_vm2, %v1471_v4 }
  0xff   :  { %v1262_v10 = vadd.f32 %v1206_v21, %v1104_v16  ;;  %v509_v6 = vrot.slane %v13042_v11, 1  ;;  %v938_v34 = vmul.f32 %v12898_v26, %v374_v28  ;;  %v658_v42 = vrot.slane %v13046_v51, 2 }
 0x100   :  { %v1354_v56 = vsel %vm638_vm5, %v1352_v30, %v1353_v40  ;;  %v1140_v39 = vmul.f32 %v12901_v27, %v374_v28  ;;  %v1288_v17 = vmul.f32 %v12927_v55, %v374_v28  ;;  %v859_v58 = vrot.slane %v790_v29, 1 }
 0x101   :  { %v1410_v23 = vadd.f32 %v1354_v56, %v1262_v10  ;;  %v1007_v45 = vrot.slane %v938_v34, 2  ;;  %v656_v48 = vsel %vm638_vm5, %v654_v25, %v655_v57  ;;  %v1005_v47 = vsel %vm638_vm5, %v1003_v54, %v1004_v13  ;;  %v379_v54 = vpop.permute.xlu1 %378 }
 0x102   :  { %v1208_v50 = vrot.slane %v1140_v39, 1  ;;  %v1356_v44 = vrot.slane %v1288_v17, 2  ;;  %v708_v46 = vadd.f32 %v656_v48, %v559_v9  ;;  %v1059_v22 = vadd.f32 %v1005_v47, %v911_v61 }
 0x103   :  { %v1433_v40 = vmul.f32 %v12962_v15, %v1410_v23  ;;  %v13063_v33 = vmul.f32 %v12856_v1, %v13056_v43  ;;  %v13067_v28 = vmul.f32 %v12859_v3, %v13056_v43  ;;  %v738_v49 = vmul.f32 %v12906_v31, %v13056_v43 }
 0x104   :  { %v789_v57 = vmul.f32 %v12895_v24, %v13056_v43  ;;  %v937_v13 = vmul.f32 %v12898_v26, %v13056_v43  ;;  %v1089_v25 = vmul.f32 %v12910_v35, %v13056_v43  ;;  %v1139_v4 = vmul.f32 %v12901_v27, %v13056_v43 }
 0x105   :  { %v1456_v16 = vadd.f32 %v12971_v41, %v1433_v40  ;;  %v508_v59 = vrot.slane %v13063_v33, 1  ;;  %v657_v53 = vrot.slane %v13067_v28, 2  ;;  %v754_v9 = vadd.f32 %v738_v49, %v708_v46  ;;  %v13102_v40 = vpop.permute.xlu0 %262 }
 0x106   :  { %v858_v52 = vrot.slane %v789_v57, 1  ;;  %v1006_v61 = vrot.slane %v937_v13, 2  ;;  %v1105_v21 = vadd.f32 %v1089_v25, %v1059_v22  ;;  %v1207_v10 = vrot.slane %v1139_v4, 1 }
 0x107   :  { %v1472_v30 = vmax.f32 %v1456_v16, 0.0  ;;  %v1287_v29 = vmul.f32 %v12927_v55, %v13056_v43  ;;  %v13085_v34 = vmul.f32 %v12856_v1, %v379_v54  ;;  %v13089_v39 = vmul.f32 %v12859_v3, %v379_v54 }
 0x108   :  { %v860_v56 = vsel %vm489_vm4, %v858_v52, %v859_v58  ;;  %v13096_v17 = vsel %vm489_vm4, %v1654_v32, %v1655_v36  ;;  %v1209_v48 = vsel %vm489_vm4, %v1207_v10, %v1208_v50  ;;  %v13100_v47 = vmul.f32 %v12895_v24, %v379_v54  ;;  %v768_v32 = vpop.permute.xlu1 %767 }
 0x109   :  { %v912_v23 = vadd.f32 %v860_v56, %v754_v9  ;;  %v1355_v46 = vrot.slane %v1287_v29, 2  ;;  %1531 = vst.msk [vmem:[#allocation3 + $0x41] sm:$0xff] %vm1485_vm2, %v1472_v30  ;;  %v1263_v58 = vadd.f32 %v1209_v48, %v1105_v21  ;;  %v512_v22 = vrot.slane %v13085_v34, 1  ;;  %v722_v14 = vpop.permute.xlu0 %721 }
 0x10a   :  { %v13108_v49 = vmul.f32 %v12898_v26, %v379_v54  ;;  %v1142_v50 = vmul.f32 %v12901_v27, %v379_v54  ;;  %v1290_v57 = vmul.f32 %v12927_v55, %v379_v54  ;;  %v1008_v13 = vsel %vm638_vm5, %v1006_v61, %v1007_v45 }
 0x10b   :  { %v1357_v36 = vsel %vm638_vm5, %v1355_v46, %v1356_v44  ;;  %v1060_v16 = vadd.f32 %v1008_v13, %v912_v23  ;;  %v1090_v4 = vmul.f32 %v12910_v35, %v13102_v40  ;;  %v1141_v9 = vmul.f32 %v12901_v27, %v13102_v40 }
 0x10c   :  { %v1411_v25 = vadd.f32 %v1357_v36, %v1263_v58  ;;  %v1211_v52 = vrot.slane %v1142_v50, 1  ;;  %v1359_v21 = vrot.slane %v1290_v57, 2  ;;  %v1289_v30 = vmul.f32 %v12927_v55, %v13102_v40 }
 0x10d   :  { %v13121_v44 = vmul.f32 %v12895_v24, %v768_v32  ;;  %v1106_v10 = vadd.f32 %v1090_v4, %v1060_v16  ;;  %v1210_v45 = vrot.slane %v1141_v9, 1  ;;  %v13125_v61 = vmul.f32 %v12898_v26, %v768_v32 }
 0x10e   :  { %v1434_v54 = vmul.f32 %v12962_v15, %v1411_v25  ;;  %v862_v29 = vrot.slane %v13100_v47, 1  ;;  %v1358_v56 = vrot.slane %v1289_v30, 2  ;;  %v1144_v23 = vmul.f32 %v12901_v27, %v768_v32 }
 0x10f   :  { %v13134_v48 = vsel %vm638_vm5, %v1702_v38, %v1703_v37  ;;  %v1010_v58 = vrot.slane %v13108_v49, 2  ;;  %v1212_v36 = vsel %vm489_vm4, %v1210_v45, %v1211_v52  ;;  %v1292_v50 = vmul.f32 %v12927_v55, %v768_v32 }
 0x110   :  { %v1457_v46 = vadd.f32 %v12971_v41, %v1434_v54  ;;  %v1264_v57 = vadd.f32 %v1212_v36, %v1106_v10  ;;  %v865_v47 = vrot.slane %v13121_v44, 1  ;;  %v315_v20 = vmul.f32 %v12865_v5, %v13056_v43  ;;  %v268_v36 = vpop.permute.xlu0 %267 }
 0x111   :  { %v1360_v37 = vsel %vm638_vm5, %v1358_v56, %v1359_v21  ;;  %v1214_v38 = vrot.slane %v1144_v23, 1  ;;  %v510_v49 = vsel %vm489_vm4, %v508_v59, %v509_v6  ;;  %v791_v32 = vmul.f32 %v12895_v24, %v13102_v40  ;;  %v13162_v59 = vpop.permute.xlu1 %272 }
 0x112   :  { %v1473_v25 = vmax.f32 %v1457_v46, 0.0  ;;  %v1412_v16 = vadd.f32 %v1360_v37, %v1264_v57  ;;  %v560_v4 = vadd.f32 %v510_v49, %v315_v20  ;;  %v939_v9 = vmul.f32 %v12898_v26, %v13102_v40 }
 0x113   :  { %v1362_v52 = vrot.slane %v1292_v50, 2  ;;  %v659_v43 = vsel %vm638_vm5, %v657_v53, %v658_v42  ;;  %v739_v11 = vmul.f32 %v12906_v31, %v13102_v40  ;;  %v13160_v6 = vmul.f32 %v12906_v31, %v722_v14 }
 0x114   :  { %1532 = vst.msk [vmem:[#allocation3 + $0x51] sm:$0xff] %vm1485_vm2, %v1473_v25  ;;  %v1435_v21 = vmul.f32 %v12962_v15, %v1412_v16  ;;  %v709_v30 = vadd.f32 %v659_v43, %v560_v4  ;;  %v861_v54 = vrot.slane %v791_v32, 1  ;;  %v13167_v51 = vmul.f32 %v12895_v24, %v722_v14  ;;  %v384_v2 = vpop.permute.xlu0 %383 }
 0x115   :  { %v1009_v28 = vrot.slane %v939_v9, 2  ;;  %v13170_v42 = vmul.f32 %v12898_v26, %v722_v14  ;;  %v1143_v53 = vmul.f32 %v12901_v27, %v722_v14  ;;  %v1291_v10 = vmul.f32 %v12927_v55, %v722_v14 }
 0x116   :  { %v1458_v45 = vadd.f32 %v12971_v41, %v1435_v21  ;;  %v755_v56 = vadd.f32 %v739_v11, %v709_v30  ;;  %v863_v23 = vsel %vm489_vm4, %v861_v54, %v862_v29  ;;  %v1091_v46 = vmul.f32 %v12910_v35, %v722_v14  ;;  %v1546_v29 = vld [vmem:[#allocation3 + $0x10] sm:$0xff]  ;;  %v1547_v14 = vld [vmem:[#allocation3 + $0x18] sm:$0x3]  ;;  %v389_v11 = vpop.permute.xlu1 %388 }
 0x117   :  { %v1213_v50 = vrot.slane %v1143_v53, 1  ;;  %v1361_v57 = vrot.slane %v1291_v10, 2  ;;  %v443_v20 = vmul.f32 %v12856_v1, %v13162_v59  ;;  %v592_v25 = vmul.f32 %v12859_v3, %v13162_v59 }
 0x118   :  { %v1474_v37 = vmax.f32 %v1458_v45, 0.0  ;;  %v913_v49 = vadd.f32 %v863_v23, %v755_v56  ;;  %v795_v55 = vmul.f32 %v12895_v24, %v13162_v59  ;;  %v13185_v16 = vmul.f32 %v12898_v26, %v13162_v59 }
 0x119   :  { %v1011_v4 = vsel %vm638_vm5, %v1009_v28, %v1010_v58  ;;  %v1215_v9 = vsel %vm489_vm4, %v1213_v50, %v1214_v38  ;;  %v318_v43 = vmul.f32 %v12865_v5, %v13162_v59  ;;  %v1363_v30 = vsel %vm638_vm5, %v1361_v57, %v1362_v52 }
 0x11a   :  { %v1061_v21 = vadd.f32 %v1011_v4, %v913_v49  ;;  %v517_v54 = vrot.slane %v443_v20, 1  ;;  %v666_v53 = vrot.slane %v592_v25, 2  ;;  %1533 = vst.msk [vmem:[#allocation3 + $0x61] sm:$0xff] %vm1485_vm2, %v1474_v37  ;;  %v867_v10 = vrot.slane %v795_v55, 1 }
 0x11b   :  { %v1015_v45 = vrot.slane %v13185_v16, 2  ;;  %v1657_v56 = vrot.slane %v1546_v29, 1  ;;  %v1658_v58 = vrot.slane %v1547_v14, 1  ;;  %v441_v23 = vmul.f32 %v12856_v1, %v268_v36 }
 0x11c   :  { %v1107_v28 = vadd.f32 %v1091_v46, %v1061_v21  ;;  %v444_v38 = vmul.f32 %v12856_v1, %v389_v11  ;;  %v593_v50 = vmul.f32 %v12859_v3, %v389_v11  ;;  %v317_v49 = vmul.f32 %v12865_v5, %v268_v36 }
 0x11d   :  { %v590_v52 = vmul.f32 %v12859_v3, %v268_v36  ;;  %v13201_v57 = vsel %vm489_vm4, %v1657_v56, %v1658_v58  ;;  %v796_v20 = vmul.f32 %v12895_v24, %v389_v11  ;;  %v1706_v16 = vrot.slane %v1547_v14, 2 }
 0x11e   :  { %16657 = vst [vmem:[#allocation23_spill] sm:$0xff] %v13201_v57  ;;  %v1265_v25 = vadd.f32 %v1215_v9, %v1107_v28  ;;  %v11395_v46 = vpack.i.bf16 %v13201_v57, %v13096_v17  ;;  %v518_v37 = vrot.slane %v444_v38, 1  ;;  %v667_v55 = vrot.slane %v593_v50, 2  ;;  %v394_v9 = vpop.permute.xlu1 %393 }
 0x11f   :  { %v868_v4 = vrot.slane %v796_v20, 1  ;;  %v944_v21 = vmul.f32 %v12898_v26, %v389_v11  ;;  %v442_v13 = vmul.f32 %v12856_v1, %v384_v2  ;;  %v514_v32 = vrot.slane %v441_v23, 1 }
 0x120   :  { %v1413_v33 = vadd.f32 %v1363_v30, %v1265_v25  ;;  %11396 = vrot.lane.b32.xlu1 %v11395_v46, %s12453_s8  ;;  %v519_v36 = vsel %vm489_vm4, %v517_v54, %v518_v37  ;;  %v591_v56 = vmul.f32 %v12859_v3, %v384_v2  ;;  %v663_v58 = vrot.slane %v590_v52, 2 }
 0x121   :  { %v563_v28 = vadd.f32 %v519_v36, %v318_v43  ;;  %v741_v17 = vmul.f32 %v12906_v31, %v13162_v59  ;;  %v515_v14 = vrot.slane %v442_v13, 1  ;;  %v668_v11 = vsel %vm638_vm5, %v666_v53, %v667_v55 }
 0x122   :  { %v1436_v38 = vmul.f32 %v12962_v15, %v1413_v33  ;;  %v664_v50 = vrot.slane %v591_v56, 2  ;;  %v1705_v30 = vrot.slane %v1546_v29, 2  ;;  %v869_v23 = vsel %vm489_vm4, %v867_v10, %v868_v4  ;;  %v278_v33 = vpop.permute.xlu0 %277  ;;  %v13238_v4 = vld [vmem:[%s16645_s4 + $0x8] ss:$0 sm:$0xff]  ;;  %s12460_s4 = smov 96  }
 0x123   :  { %v1016_v20 = vrot.slane %v944_v21, 2  ;;  %v516_v54 = vsel %vm489_vm4, %v514_v32, %v515_v14  ;;  %v446_v2 = vmul.f32 %v12856_v1, %v394_v9  ;;  %v13223_v13 = vmul.f32 %v12859_v3, %v394_v9 }
 0x124   :  { %v1459_v52 = vadd.f32 %v12971_v41, %v1436_v38  ;;  %v562_v43 = vadd.f32 %v516_v54, %v317_v49  ;;  %v13220_v25 = vsel %vm638_vm5, %v1705_v30, %v1706_v16  ;;  %v712_v59 = vadd.f32 %v668_v11, %v563_v28  ;;  %v1120_v54 = vpop.permute.xlu1 %1119 }
 0x125   :  { %v665_v29 = vsel %vm638_vm5, %v663_v58, %v664_v50  ;;  %v11400_v53 = vpack.i.bf16 %v13220_v25, %v13134_v48  ;;  %v798_v32 = vmul.f32 %v12895_v24, %v394_v9  ;;  %v13230_v37 = vmul.f32 %v12898_v26, %v394_v9 }
 0x126   :  { %v1475_v10 = vmax.f32 %v1459_v52, 0.0  ;;  %v711_v46 = vadd.f32 %v665_v29, %v562_v43  ;;  %v1148_v49 = vmul.f32 %v12901_v27, %v394_v9  ;;  %v1017_v55 = vsel %vm638_vm5, %v1015_v45, %v1016_v20 }
 0x127   :  { %11401 = vrot.lane.b32.xlu1 %v11400_v53, %s12459_s25  ;;  %v521_v16 = vrot.slane %v446_v2, 1  ;;  %v1296_v48 = vmul.f32 %v13238_v4, %v394_v9  ;;  %v445_v21 = vmul.f32 %v12856_v1, %v278_v33  ;;  %v670_v56 = vrot.slane %v13223_v13, 2 }
 0x128   :  { %1534 = vst.msk [vmem:[#allocation3 + $0x71] sm:$0xff] %vm1485_vm2, %v1475_v10  ;;  %v757_v36 = vadd.f32 %v741_v17, %v711_v46  ;;  %v871_v58 = vrot.slane %v798_v32, 1  ;;  %v319_v45 = vmul.f32 %v12865_v5, %v278_v33  ;;  %v13247_v38 = vmul.f32 %v12859_v3, %v278_v33  ;;  %v13254_v17 = vld [vmem:[#allocation3 + $0x30] sm:$0xff]  ;;  %v13260_v46 = vld [vmem:[#allocation3 + $0x20] sm:$0xff] }
 0x129   :  { %v520_v14 = vrot.slane %v445_v21, 1  ;;  %v797_v11 = vmul.f32 %v12895_v24, %v278_v33  ;;  %v1220_v9 = vrot.slane %v1148_v49, 1  ;;  %v742_v30 = vmul.f32 %v12906_v31, %v278_v33 }
 0x12a   :  { %v915_v50 = vadd.f32 %v869_v23, %v757_v36  ;;  %v13252_v20 = vmul.f32 %v12898_v26, %v278_v33  ;;  %v1368_v2 = vrot.slane %v1296_v48, 2  ;;  %v1147_v29 = vmul.f32 %v12901_v27, %v278_v33 }
 0x12b   :  { %v522_v52 = vsel %vm489_vm4, %v520_v14, %v521_v16  ;;  %v870_v43 = vrot.slane %v797_v11, 1  ;;  %v758_v32 = vadd.f32 %v742_v30, %v712_v59  ;;  %v1093_v10 = vmul.f32 %v12910_v35, %v278_v33 }
 0x12c   :  { %v1063_v53 = vadd.f32 %v1017_v55, %v915_v50  ;;  %v1295_v23 = vmul.f32 %v13238_v4, %v278_v33  ;;  %v1219_v21 = vrot.slane %v1147_v29, 1  ;;  %v11415_v36 = vpack.i.bf16 %v13254_v17, %v13260_v46  ;;  %v1074_v29 = vpop.permute.xlu0 %1073 }
 0x12d   :  { %v1146_v48 = vmul.f32 %v12901_v27, %v1120_v54  ;;  %v13266_v16 = vadd.f32 %v522_v52, %v319_v45  ;;  %v1018_v14 = vrot.slane %v13252_v20, 2  ;;  %v872_v11 = vsel %vm489_vm4, %v870_v43, %v871_v58 }
 0x12e   :  { %v1109_v55 = vadd.f32 %v1093_v10, %v1063_v53  ;;  %v1367_v59 = vrot.slane %v1295_v23, 2  ;;  %v1221_v33 = vsel %vm489_vm4, %v1219_v21, %v1220_v9  ;;  %11416 = vrot.lane.b32.xlu0 %v11415_v36, %s12459_s25  ;;  %v1294_v50 = vmul.f32 %v13238_v4, %v1120_v54 }
 0x12f   :  { %v439_v30 = vmul.f32 %v12856_v1, %v13102_v40  ;;  %v916_v28 = vadd.f32 %v872_v11, %v758_v32  ;;  %v1217_v45 = vrot.slane %v1146_v48, 1  ;;  %v588_v52 = vmul.f32 %v12859_v3, %v13102_v40  ;;  %v13283_v32 = vld [vmem:[#allocation3 + $0x28] sm:$0x3] }
 0x130   :  { %v1267_v49 = vadd.f32 %v1221_v33, %v1109_v55  ;;  %v1369_v53 = vsel %vm638_vm5, %v1367_v59, %v1368_v2  ;;  %v316_v58 = vmul.f32 %v12865_v5, %v13102_v40  ;;  %v1012_v43 = vrot.slane %v13170_v42, 2 }
 0x131   :  { %v511_v9 = vrot.slane %v439_v30, 1  ;;  %v660_v54 = vrot.slane %v588_v52, 2  ;;  %v1145_v23 = vmul.f32 %v12901_v27, %v1074_v29  ;;  %v1293_v21 = vmul.f32 %v13238_v4, %v1074_v29 }
 0x132   :  { %v1415_v10 = vadd.f32 %v1369_v53, %v1267_v49  ;;  %v1365_v36 = vrot.slane %v1294_v50, 2  ;;  %v16658_v40 = vrot.slane %v13167_v51, 1  ;;  %v1092_v42 = vmul.f32 %v12910_v35, %v1074_v29  ;;  %v13294_v49 = vld [vmem:[#allocation3 + $0x38] sm:$0x3]  ;;  %v399_v50 = vpop.permute.xlu1 %398 }
 0x133   :  { %v513_v48 = vsel %vm489_vm4, %v511_v9, %v512_v22  ;;  %v16659_v11 = vrot.slane %v13089_v39, 2  ;;  %v1216_v34 = vrot.slane %v1145_v23, 1  ;;  %v1364_v22 = vrot.slane %v1293_v21, 2 }
 0x134   :  { %v866_v2 = vsel %vm489_vm4, %v16658_v40, %v865_v47  ;;  %v1438_v55 = vmul.f32 %v12962_v15, %v1415_v10  ;;  %v561_v59 = vadd.f32 %v513_v48, %v316_v58  ;;  %v1708_v44 = vrot.slane %v13260_v46, 2  ;;  %v283_v40 = vpop.permute.xlu0 %282 }
 0x135   :  { %v662_v33 = vsel %vm638_vm5, %v660_v54, %v16659_v11  ;;  %v1709_v51 = vrot.slane %v13283_v32, 2  ;;  %v1711_v47 = vrot.slane %v13254_v17, 2  ;;  %v16660_v52 = vrot.slane %v13125_v61, 2 }
 0x136   :  { %v1461_v30 = vadd.f32 %v12971_v41, %v1438_v55  ;;  %v710_v29 = vadd.f32 %v662_v33, %v561_v59  ;;  %v1712_v39 = vrot.slane %v13294_v49, 2  ;;  %v1218_v53 = vsel %vm489_vm4, %v1216_v34, %v1217_v45 }
 0x137   :  { %v1014_v15 = vsel %vm638_vm5, %v1012_v43, %v16660_v52  ;;  %v13310_v58 = vsel %vm638_vm5, %v1708_v44, %v1709_v51  ;;  %v448_v9 = vmul.f32 %v12856_v1, %v399_v50  ;;  %v13314_v10 = vmul.f32 %v12859_v3, %v399_v50 }
 0x138   :  { %v1477_v54 = vmax.f32 %v1461_v30, 0.0  ;;  %v756_v41 = vadd.f32 %v13160_v6, %v710_v29  ;;  %v13318_v23 = vsel %vm638_vm5, %v1711_v47, %v1712_v39  ;;  %v800_v61 = vmul.f32 %v12895_v24, %v399_v50 }
 0x139   :  { %v1366_v43 = vsel %vm638_vm5, %v1364_v22, %v1365_v36  ;;  %v2202_v45 = vpack.c.bf16 %v13318_v23, %v13310_v58  ;;  %v524_v21 = vrot.slane %v448_v9, 1  ;;  %v13325_v48 = vmul.f32 %v12898_v26, %v399_v50 }
 0x13a   :  { %1536 = vst.msk [vmem:[#allocation3 + $0xb1] sm:$0xff] %vm1485_vm2, %v1477_v54  ;;  %v914_v55 = vadd.f32 %v866_v2, %v756_v41  ;;  %v673_v6 = vrot.slane %v13314_v10, 2  ;;  %v874_v59 = vrot.slane %v800_v61, 1  ;;  %v1150_v11 = vmul.f32 %v12901_v27, %v399_v50  ;;  %v404_v54 = vpop.permute.xlu1 %403 }
 0x13b   :  { %11292 = vmatprep.mubr.msk.bf16.mxu1 %vm1485_vm2, %v2202_v45  ;;  %v1022_v36 = vrot.slane %v13325_v48, 2  ;;  %v1298_v33 = vmul.f32 %v13238_v4, %v399_v50  ;;  %v16661_v34 = vrot.slane %v13247_v38, 2  ;;  %v16662_v44 = vrot.slane %v13230_v37, 2 }
 0x13c   :  { %v1062_v51 = vadd.f32 %v1014_v15, %v914_v55  ;;  %v1223_v47 = vrot.slane %v1150_v11, 1  ;;  %v320_v29 = vmul.f32 %v12865_v5, %v283_v40  ;;  %v447_v50 = vmul.f32 %v12856_v1, %v283_v40  ;;  %v13351_v15 = vld [vmem:[#allocation3 + $0x50] sm:$0xff]  ;;  %v13354_v11 = vld [vmem:[#allocation3 + $0x40] sm:$0xff] }
 0x13d   :  { %v671_v22 = vsel %vm638_vm5, %v16661_v34, %v670_v56  ;;  %v1020_v2 = vsel %vm638_vm5, %v1018_v14, %v16662_v44  ;;  %v596_v13 = vmul.f32 %v12859_v3, %v283_v40  ;;  %v743_v38 = vmul.f32 %v12906_v31, %v283_v40 }
 0x13e   :  { %v713_v30 = vadd.f32 %v671_v22, %v13266_v16  ;;  %v1064_v52 = vadd.f32 %v1020_v2, %v916_v28  ;;  %v1108_v56 = vadd.f32 %v1092_v42, %v1062_v51  ;;  %v799_v37 = vmul.f32 %v12895_v24, %v283_v40 }
 0x13f   :  { %v947_v20 = vmul.f32 %v12898_v26, %v283_v40  ;;  %v1094_v14 = vmul.f32 %v12910_v35, %v283_v40  ;;  %v1371_v39 = vrot.slane %v1298_v33, 2  ;;  %v523_v16 = vrot.slane %v447_v50, 1 }
 0x140   :  { %v672_v9 = vrot.slane %v596_v13, 2  ;;  %v1149_v28 = vmul.f32 %v12901_v27, %v283_v40  ;;  %v1266_v41 = vadd.f32 %v1218_v53, %v1108_v56  ;;  %v759_v61 = vadd.f32 %v743_v38, %v713_v30 }
 0x141   :  { %v873_v45 = vrot.slane %v799_v37, 1  ;;  %v1110_v55 = vadd.f32 %v1094_v14, %v1064_v52  ;;  %v525_v42 = vsel %vm489_vm4, %v523_v16, %v524_v21  ;;  %v1297_v22 = vmul.f32 %v13238_v4, %v283_v40  ;;  %v13370_v40 = vld [vmem:[%s16655_s3] ss:$0 sm:$0xff] }
 0x142   :  { %v1222_v34 = vrot.slane %v1149_v28, 1  ;;  %v11425_v44 = vpack.i.bf16 %v13351_v15, %v13354_v11  ;;  %v1414_v33 = vadd.f32 %v1366_v43, %v1266_v41  ;;  %v1021_v51 = vrot.slane %v947_v20, 2  ;;  %v13382_v20 = vld [vmem:[%s16656_s22] ss:$0 sm:$0xff]  ;;  %s16773_s22 = sld [smem:[#allocation66_spill]] }
 0x143   :  { %v875_v2 = vsel %vm489_vm4, %v873_v45, %v874_v59  ;;  %v450_v50 = vmul.f32 %v12856_v1, %v404_v54  ;;  %v565_v53 = vadd.f32 %v525_v42, %v320_v29  ;;  %v1370_v52 = vrot.slane %v1297_v22, 2 }
 0x144   :  { %v1224_v30 = vsel %vm489_vm4, %v1222_v34, %v1223_v47  ;;  %11426 = vrot.lane.b32.xlu0 %v11425_v44, %s12459_s25  ;;  %v13365_v21 = vmul.f32 %v12859_v3, %v404_v54  ;;  %v1437_v43 = vmul.f32 %v13370_v40, %v1414_v33  ;;  %v917_v59 = vadd.f32 %v875_v2, %v759_v61  ;;  %v288_v61 = vpop.permute.xlu0 %287 }
 0x145   :  { %v1268_v13 = vadd.f32 %v1224_v30, %v1110_v55  ;;  %v802_v38 = vmul.f32 %v12895_v24, %v404_v54  ;;  %v1372_v29 = vsel %vm638_vm5, %v1370_v52, %v1371_v39  ;;  %v527_v47 = vrot.slane %v450_v50, 1 }
 0x146   :  { %v13376_v56 = vmul.f32 %v12898_v26, %v404_v54  ;;  %v1152_v37 = vmul.f32 %v12901_v27, %v404_v54  ;;  %v1460_v14 = vadd.f32 %v13382_v20, %v1437_v43  ;;  %v676_v28 = vrot.slane %v13365_v21, 2  ;;  %v13405_v43 = vld [vmem:[#allocation3 + $0x48] sm:$0x3] }
 0x147   :  { %v1416_v16 = vadd.f32 %v1372_v29, %v1268_v13  ;;  %v1300_v41 = vmul.f32 %v13238_v4, %v404_v54  ;;  %v877_v39 = vrot.slane %v802_v38, 1  ;;  %v674_v42 = vsel %vm638_vm5, %v672_v9, %v673_v6 }
 0x148   :  { %v1025_v45 = vrot.slane %v13376_v56, 2  ;;  %v1226_v55 = vrot.slane %v1152_v37, 1  ;;  %v1476_v34 = vmax.f32 %v1460_v14, 0.0  ;;  %v714_v44 = vadd.f32 %v674_v42, %v565_v53  ;;  %v13409_v42 = vld [vmem:[#allocation3 + $0x58] sm:$0x3] }
 0x149   :  { %v1439_v22 = vmul.f32 %v13370_v40, %v1416_v16  ;;  %v1023_v33 = vsel %vm638_vm5, %v1021_v51, %v1022_v36  ;;  %v1374_v2 = vrot.slane %v1300_v41, 2  ;;  %v449_v54 = vmul.f32 %v12856_v1, %v288_v61 }
 0x14a   :  { %v1065_v50 = vadd.f32 %v1023_v33, %v917_v59  ;;  %v598_v30 = vmul.f32 %v12859_v3, %v288_v61  ;;  %1535 = vst.msk [vmem:[#allocation3 + $0x81] sm:$0xff] %vm1485_vm2, %v1476_v34  ;;  %v744_v6 = vmul.f32 %v12906_v31, %v288_v61  ;;  %v801_v9 = vmul.f32 %v12895_v24, %v288_v61  ;;  %v409_v34 = vpop.permute.xlu1 %408 }
 0x14b   :  { %v1462_v10 = vadd.f32 %v13382_v20, %v1439_v22  ;;  %v949_v53 = vmul.f32 %v12898_v26, %v288_v61  ;;  %v321_v48 = vmul.f32 %v12865_v5, %v288_v61  ;;  %v526_v52 = vrot.slane %v449_v54, 1 }
 0x14c   :  { %v1095_v36 = vmul.f32 %v12910_v35, %v288_v61  ;;  %v1151_v51 = vmul.f32 %v12901_v27, %v288_v61  ;;  %v675_v13 = vrot.slane %v598_v30, 2  ;;  %v760_v38 = vadd.f32 %v744_v6, %v714_v44 }
 0x14d   :  { %v1478_v59 = vmax.f32 %v1462_v10, 0.0  ;;  %v876_v29 = vrot.slane %v801_v9, 1  ;;  %v528_v37 = vsel %vm489_vm4, %v526_v52, %v527_v47  ;;  %v1299_v41 = vmul.f32 %v13238_v4, %v288_v61 }
 0x14e   :  { %v1111_v14 = vadd.f32 %v1095_v36, %v1065_v50  ;;  %v1225_v16 = vrot.slane %v1151_v51, 1  ;;  %v566_v22 = vadd.f32 %v528_v37, %v321_v48  ;;  %v1024_v33 = vrot.slane %v949_v53, 2 }
 0x14f   :  { %1537 = vst.msk [vmem:[#allocation3 + $0xc1] sm:$0xff] %vm1485_vm2, %v1478_v59  ;;  %v1714_v54 = vrot.slane %v13354_v11, 2  ;;  %v1715_v10 = vrot.slane %v13405_v43, 2  ;;  %v878_v44 = vsel %vm489_vm4, %v876_v29, %v877_v39  ;;  %v1373_v47 = vrot.slane %v1299_v41, 2  ;;  %v293_v29 = vpop.permute.xlu0 %292 }
 0x150   :  { %v1227_v30 = vsel %vm489_vm4, %v1225_v16, %v1226_v55  ;;  %v1717_v50 = vrot.slane %v13351_v15, 2  ;;  %v918_v6 = vadd.f32 %v878_v44, %v760_v38  ;;  %v1718_v9 = vrot.slane %v13409_v42, 2 }
 0x151   :  { %v1269_v61 = vadd.f32 %v1227_v30, %v1111_v14  ;;  %v452_v52 = vmul.f32 %v12856_v1, %v409_v34  ;;  %v1375_v48 = vsel %vm638_vm5, %v1373_v47, %v1374_v2  ;;  %v13421_v53 = vmul.f32 %v12859_v3, %v409_v34 }
 0x152   :  { %v804_v36 = vmul.f32 %v12895_v24, %v409_v34  ;;  %v952_v39 = vmul.f32 %v12898_v26, %v409_v34  ;;  %v13426_v55 = vsel %vm638_vm5, %v1714_v54, %v1715_v10  ;;  %v13429_v59 = vsel %vm638_vm5, %v1717_v50, %v1718_v9 }
 0x153   :  { %v1417_v51 = vadd.f32 %v1375_v48, %v1269_v61  ;;  %v1154_v38 = vmul.f32 %v12901_v27, %v409_v34  ;;  %v2205_v2 = vpack.c.bf16 %v13429_v59, %v13426_v55  ;;  %v530_v37 = vrot.slane %v452_v52, 1 }
 0x154   :  { %v679_v14 = vrot.slane %v13421_v53, 2  ;;  %v880_v16 = vrot.slane %v804_v36, 1  ;;  %v1028_v44 = vrot.slane %v952_v39, 2  ;;  %v1302_v30 = vmul.f32 %v13238_v4, %v409_v34  ;;  %v13453_v36 = vld [vmem:[#allocation3 + $0x70] sm:$0xff] }
 0x155   :  { %v1440_v41 = vmul.f32 %v13370_v40, %v1417_v51  ;;  %v677_v54 = vsel %vm638_vm5, %v675_v13, %v676_v28  ;;  %11293 = vmatmul.mubr.msk.bf16.vlgmr.msra.gmra.mrb[0].mxu1 %vm1485_vm2, %v2205_v2  ;;  %v1229_v10 = vrot.slane %v1154_v38, 1  ;;  %v1026_v50 = vsel %vm638_vm5, %v1024_v33, %v1025_v45 }
 0x156   :  { %v715_v47 = vadd.f32 %v677_v54, %v566_v22  ;;  %v451_v61 = vmul.f32 %v12856_v1, %v293_v29  ;;  %v1066_v52 = vadd.f32 %v1026_v50, %v918_v6  ;;  %v322_v48 = vmul.f32 %v12865_v5, %v293_v29  ;;  %v414_v6 = vpop.permute.xlu1 %413 }
 0x157   :  { %v1463_v9 = vadd.f32 %v13382_v20, %v1440_v41  ;;  %v600_v34 = vmul.f32 %v12859_v3, %v293_v29  ;;  %v745_v28 = vmul.f32 %v12906_v31, %v293_v29  ;;  %v803_v13 = vmul.f32 %v12895_v24, %v293_v29 }
 0x158   :  { %v529_v21 = vrot.slane %v451_v61, 1  ;;  %v951_v22 = vmul.f32 %v12898_v26, %v293_v29  ;;  %v1377_v56 = vrot.slane %v1302_v30, 2  ;;  %v1096_v45 = vmul.f32 %v12910_v35, %v293_v29  ;;  %v13458_v30 = vld [vmem:[#allocation3 + $0x60] sm:$0xff] }
 0x159   :  { %v1479_v53 = vmax.f32 %v1463_v9, 0.0  ;;  %v1153_v33 = vmul.f32 %v12901_v27, %v293_v29  ;;  %v678_v51 = vrot.slane %v600_v34, 2  ;;  %v761_v38 = vadd.f32 %v745_v28, %v715_v47 }
 0x15a   :  { %v531_v39 = vsel %vm489_vm4, %v529_v21, %v530_v37  ;;  %v879_v2 = vrot.slane %v803_v13, 1  ;;  %v1027_v41 = vrot.slane %v951_v22, 2  ;;  %v1112_v54 = vadd.f32 %v1096_v45, %v1066_v52  ;;  %v13480_v45 = vpop.permute.xlu0 %297 }
 0x15b   :  { %1538 = vst.msk [vmem:[#allocation3 + $0xd1] sm:$0xff] %vm1485_vm2, %v1479_v53  ;;  %v1228_v50 = vrot.slane %v1153_v33, 1  ;;  %v1301_v61 = vmul.f32 %v13238_v4, %v293_v29  ;;  %v567_v9 = vadd.f32 %v531_v39, %v322_v48  ;;  %v11435_v12 = vpack.i.bf16 %v13453_v36, %v13458_v30 }
 0x15c   :  { %v881_v19 = vsel %vm489_vm4, %v879_v2, %v880_v16  ;;  %v13464_v37 = vmul.f32 %v12856_v1, %v414_v6  ;;  %v13468_v52 = vmul.f32 %v12859_v3, %v414_v6  ;;  %v806_v29 = vmul.f32 %v12895_v24, %v414_v6 }
 0x15d   :  { %v919_v47 = vadd.f32 %v881_v19, %v761_v38  ;;  %v1230_v34 = vsel %vm489_vm4, %v1228_v50, %v1229_v10  ;;  %v1376_v21 = vrot.slane %v1301_v61, 2  ;;  %11436 = vrot.lane.b32.xlu0 %v11435_v12, %s12459_s25  ;;  %v13473_v16 = vmul.f32 %v12898_v26, %v414_v6 }
 0x15e   :  { %v1270_v28 = vadd.f32 %v1230_v34, %v1112_v54  ;;  %v1156_v13 = vmul.f32 %v12901_v27, %v414_v6  ;;  %v1304_v19 = vmul.f32 %v13238_v4, %v414_v6  ;;  %v680_v10 = vsel %vm638_vm5, %v678_v51, %v679_v14 }
 0x15f   :  { %v1378_v48 = vsel %vm638_vm5, %v1376_v21, %v1377_v56  ;;  %v1029_v53 = vsel %vm638_vm5, %v1027_v41, %v1028_v44  ;;  %v716_v39 = vadd.f32 %v680_v10, %v567_v9  ;;  %v883_v56 = vrot.slane %v806_v29, 1  ;;  %v13494_v41 = vld [vmem:[#allocation3 + $0x68] sm:$0x3]  ;;  %v13503_v21 = vld [vmem:[#allocation3 + $0x78] sm:$0x3] }
 0x160   :  { %v1418_v22 = vadd.f32 %v1378_v48, %v1270_v28  ;;  %v1067_v38 = vadd.f32 %v1029_v53, %v919_v47  ;;  %v1031_v54 = vrot.slane %v13473_v16, 2  ;;  %v1232_v50 = vrot.slane %v1156_v13, 1  ;;  %v419_v13 = vpop.permute.xlu1 %418 }
 0x161   :  { %v746_v6 = vmul.f32 %v12906_v31, %v13480_v45  ;;  %v805_v14 = vmul.f32 %v12895_v24, %v13480_v45  ;;  %v1097_v44 = vmul.f32 %v12910_v35, %v13480_v45  ;;  %v1155_v51 = vmul.f32 %v12901_v27, %v13480_v45 }
 0x162   :  { %v1441_v2 = vmul.f32 %v13370_v40, %v1418_v22  ;;  %v1380_v9 = vrot.slane %v1304_v19, 2  ;;  %v13499_v47 = vmul.f32 %v12856_v1, %v13480_v45  ;;  %v953_v34 = vmul.f32 %v12898_v26, %v13480_v45 }
 0x163   :  { %v762_v28 = vadd.f32 %v746_v6, %v716_v39  ;;  %v882_v29 = vrot.slane %v805_v14, 1  ;;  %v1113_v16 = vadd.f32 %v1097_v44, %v1067_v38  ;;  %v1231_v48 = vrot.slane %v1155_v51, 1 }
 0x164   :  { %v1464_v61 = vadd.f32 %v13382_v20, %v1441_v2  ;;  %v1303_v10 = vmul.f32 %v13238_v4, %v13480_v45  ;;  %v1720_v19 = vrot.slane %v13458_v30, 2  ;;  %v1721_v53 = vrot.slane %v13494_v41, 2 }
 0x165   :  { %v13511_v2 = vmul.f32 %v12859_v3, %v13480_v45  ;;  %v1233_v33 = vsel %vm489_vm4, %v1231_v48, %v1232_v50  ;;  %v1723_v39 = vrot.slane %v13453_v36, 2  ;;  %v1724_v38 = vrot.slane %v13503_v21, 2 }
 0x166   :  { %v1480_v22 = vmax.f32 %v1464_v61, 0.0  ;;  %v884_v6 = vsel %vm489_vm4, %v882_v29, %v883_v56  ;;  %v1030_v14 = vrot.slane %v953_v34, 2  ;;  %v1271_v44 = vadd.f32 %v1233_v33, %v1113_v16  ;;  %v13532_v56 = vpop.permute.xlu0 %302 }
 0x167   :  { %v1379_v51 = vrot.slane %v1303_v10, 2  ;;  %v532_v61 = vrot.slane %v13499_v47, 1  ;;  %v920_v12 = vadd.f32 %v884_v6, %v762_v28  ;;  %v13520_v8 = vsel %vm638_vm5, %v1720_v19, %v1721_v53 }
 0x168   :  { %1539 = vst.msk [vmem:[#allocation3 + $0xe1] sm:$0xff] %vm1485_vm2, %v1480_v22  ;;  %v13523_v7 = vsel %vm638_vm5, %v1723_v39, %v1724_v38  ;;  %v13529_v22 = vmul.f32 %v12856_v1, %v419_v13  ;;  %v1158_v33 = vmul.f32 %v12901_v27, %v419_v13  ;;  %v681_v47 = vrot.slane %v13511_v2, 2  ;;  %v11862_v2 = vld [vmem:[%s16649_s27 + $0x40] sm:$0xff]   ;;  %v11864_v38 = vld [vmem:[%s16649_s27 + $0x48] sm:$0xff]  }
 0x169   :  { %v1381_v50 = vsel %vm638_vm5, %v1379_v51, %v1380_v9  ;;  %v2208_v48 = vpack.c.bf16 %v13523_v7, %v13520_v8  ;;  %v13536_v28 = vmul.f32 %v12859_v3, %v419_v13  ;;  %v13539_v29 = vmul.f32 %v12895_v24, %v419_v13  ;;  %v773_v9 = vpop.permute.xlu1 %772  ;;  %v11863_v39 = vld [vmem:[%s16649_s27] sm:$0xff]   ;;  %11041 = vmatprep.subr.bf16.mxu0 %v11862_v2 }
 0x16a   :  { %v1419_v34 = vadd.f32 %v1381_v50, %v1271_v44  ;;  %v13543_v16 = vmul.f32 %v12898_v26, %v419_v13  ;;  %v1235_v10 = vrot.slane %v1158_v33, 1  ;;  %v1306_v19 = vmul.f32 %v13238_v4, %v419_v13  ;;  %11042 = vmatpush3.bf16.msra.mxu0 %v11863_v39 }
 0x16b   :  { %11296 = vmatprep.mubr.msk.bf16.mxu1 %vm1485_vm2, %v2208_v48  ;;  %v1032_v53 = vsel %vm638_vm5, %v1030_v14, %v1031_v54  ;;  %v1098_v13 = vmul.f32 %v12910_v35, %v13532_v56  ;;  %v1157_v54 = vmul.f32 %v12901_v27, %v13532_v56  ;;  %v1305_v51 = vmul.f32 %v13238_v4, %v13532_v56 }
 0x16c   :  { %v1442_v6 = vmul.f32 %v13370_v40, %v1419_v34  ;;  %v1068_v44 = vadd.f32 %v1032_v53, %v920_v12  ;;  %v13565_v50 = vmul.f32 %v12895_v24, %v773_v9  ;;  %v13568_v48 = vmul.f32 %v12898_v26, %v773_v9  ;;  %11043 = vmatprep.subr.bf16.mxu0 %v11864_v38 }
 0x16d   :  { %v1383_v33 = vrot.slane %v1306_v19, 2  ;;  %v1234_v53 = vrot.slane %v1157_v54, 1  ;;  %v685_v63 = vrot.slane %v13536_v28, 2  ;;  %v886_v14 = vrot.slane %v13539_v29, 1  ;;  %v727_v19 = vpop.permute.xlu0 %726 }
 0x16e   :  { %v1465_v12 = vadd.f32 %v13382_v20, %v1442_v6  ;;  %v1114_v34 = vadd.f32 %v1098_v13, %v1068_v44  ;;  %v1034_v18 = vrot.slane %v13543_v16, 2  ;;  %v1382_v62 = vrot.slane %v1305_v51, 2 }
 0x16f   :  { %v1236_v60 = vsel %vm489_vm4, %v1234_v53, %v1235_v10  ;;  %v1160_v57 = vmul.f32 %v12901_v27, %v773_v9  ;;  %v323_v2 = vmul.f32 %v12865_v5, %v13480_v45  ;;  %v16663_v29 = vrot.slane %v13464_v37, 1 }
 0x170   :  { %v1481_v0 = vmax.f32 %v1465_v12, 0.0  ;;  %v1272_v6 = vadd.f32 %v1236_v60, %v1114_v34  ;;  %v1384_v38 = vsel %vm638_vm5, %v1382_v62, %v1383_v33  ;;  %v1308_v10 = vmul.f32 %v13238_v4, %v773_v9  ;;  %v13594_v12 = vld [vmem:[#allocation3 + $0x80] sm:$0xff] }
 0x171   :  { %v534_v16 = vsel %vm489_vm4, %v532_v61, %v16663_v29  ;;  %v807_v45 = vmul.f32 %v12895_v24, %v13532_v56  ;;  %v16664_v60 = vrot.slane %v13468_v52, 2  ;;  %v955_v37 = vmul.f32 %v12898_v26, %v13532_v56 }
 0x172   :  { %1540 = vst.msk [vmem:[#allocation3 + $0xf1] sm:$0xff] %vm1485_vm2, %v1481_v0  ;;  %v568_v13 = vadd.f32 %v534_v16, %v323_v2  ;;  %v1420_v54 = vadd.f32 %v1384_v38, %v1272_v6  ;;  %v1159_v61 = vmul.f32 %v12901_v27, %v727_v19  ;;  %v13596_v0 = vld [vmem:[#allocation3 + $0x90] sm:$0xff]  ;;  %v747_v9 = vmul.f32 %v12906_v31, %v13532_v56  ;;  %v1125_v6 = vpop.permute.xlu1 %1124 }
 0x173   :  { %v683_v51 = vsel %vm638_vm5, %v681_v47, %v16664_v60  ;;  %v885_v33 = vrot.slane %v807_v45, 1  ;;  %v1307_v34 = vmul.f32 %v13238_v4, %v727_v19  ;;  %v1238_v53 = vrot.slane %v1160_v57, 1 }
 0x174   :  { %v717_v62 = vadd.f32 %v683_v51, %v568_v13  ;;  %v1443_v52 = vmul.f32 %v13370_v40, %v1420_v54  ;;  %v1033_v47 = vrot.slane %v955_v37, 2  ;;  %v1237_v2 = vrot.slane %v1159_v61, 1 }
 0x175   :  { %v1386_v29 = vrot.slane %v1308_v10, 2  ;;  %v1385_v38 = vrot.slane %v1307_v34, 2  ;;  %v11445_v60 = vpack.i.bf16 %v13596_v0, %v13594_v12  ;;  %v887_v51 = vsel %vm489_vm4, %v885_v33, %v886_v14 }
 0x176   :  { %v763_v16 = vadd.f32 %v747_v9, %v717_v62  ;;  %v1466_v13 = vadd.f32 %v13382_v20, %v1443_v52  ;;  %v1099_v45 = vmul.f32 %v12910_v35, %v727_v19  ;;  %v1792_v44 = vrot.slane %v13596_v0, 2  ;;  %v1079_v9 = vpop.permute.xlu0 %1078 }
 0x177   :  { %v1035_v57 = vsel %vm638_vm5, %v1033_v47, %v1034_v18  ;;  %11446 = vrot.lane.b32.xlu0 %v11445_v60, %s12459_s25  ;;  %v13611_v10 = vmul.f32 %v12901_v27, %v1125_v6  ;;  %v13614_v54 = vmul.f32 %v13238_v4, %v1125_v6  ;;  %v1239_v61 = vsel %vm489_vm4, %v1237_v2, %v1238_v53 }
 0x178   :  { %v921_v39 = vadd.f32 %v887_v51, %v763_v16  ;;  %v1482_v37 = vmax.f32 %v1466_v13, 0.0  ;;  %v455_v14 = vmul.f32 %v12856_v1, %v13532_v56  ;;  %v604_v62 = vmul.f32 %v12859_v3, %v13532_v56  ;;  %v13633_v16 = vld [vmem:[#allocation3 + $0x88] sm:$0x3] }
 0x179   :  { %v1387_v18 = vsel %vm638_vm5, %v1385_v38, %v1386_v29  ;;  %v1776_v34 = vrot.slane %v13594_v12, 2  ;;  %v324_v52 = vmul.f32 %v12865_v5, %v13532_v56  ;;  %v809_v53 = vmul.f32 %v12895_v24, %v727_v19  ;;  %v13635_v38 = vld [vmem:[#allocation3 + $0x98] sm:$0x3]  ;;  %v11865_v13 = vld [vmem:[%s16649_s27 + $0x8] sm:$0xff]  }
 0x17a   :  { %v1069_v33 = vadd.f32 %v1035_v57, %v921_v39  ;;  %1541 = vst.msk [vmem:[#allocation3 + $0x101] sm:$0xff] %vm1485_vm2, %v1482_v37  ;;  %v535_v47 = vrot.slane %v455_v14, 1  ;;  %v684_v6 = vrot.slane %v604_v62, 2  ;;  %v957_v1 = vmul.f32 %v12898_v26, %v727_v19  ;;  %v13653_v37 = vld [vmem:[#allocation3 + $0xa0] sm:$0xff]  ;;  %11044 = vmatpush3.bf16.msra.mxu0 %v11865_v13 }
 0x17b   :  { %v1241_v3 = vrot.slane %v13611_v10, 1  ;;  %v1389_v39 = vrot.slane %v13614_v54, 2  ;;  %v13631_v29 = vmul.f32 %v12901_v27, %v1079_v9  ;;  %v16665_v5 = vrot.slane %v13529_v22, 1  ;;  %v11866_v27 = vld [vmem:[%s16649_s27 + $0x50] sm:$0xff]   ;;  %v11872_v10 = vld [vmem:[%s16649_s27 + $0x68] sm:$0xff]  }
 0x17c   :  { %v1115_v2 = vadd.f32 %v1099_v45, %v1069_v33  ;;  %v748_v24 = vmul.f32 %v12906_v31, %v727_v19  ;;  %v888_v60 = vrot.slane %v809_v53, 1  ;;  %v1036_v26 = vrot.slane %v957_v1, 2  ;;  %v1565_v31 = vld [vmem:[#allocation3 + $0xa8] sm:$0x3]  ;;  %v13661_v33 = vld [vmem:[#allocation3 + $0xb0] sm:$0xff]  ;;  %11045 = vmatprep.subr.bf16.mxu0 %v11866_v27 }
 0x17d   :  { %v537_v56 = vsel %vm489_vm4, %v535_v47, %v16665_v5  ;;  %v13648_v57 = vmul.f32 %v12910_v35, %v1079_v9  ;;  %v13651_v22 = vmul.f32 %v13238_v4, %v1079_v9  ;;  %v686_v19 = vsel %vm638_vm5, %v684_v6, %v685_v63  ;;  %v1567_v63 = vld [vmem:[#allocation3 + $0xb8] sm:$0x3] }
 0x17e   :  { %v1273_v51 = vadd.f32 %v1239_v61, %v1115_v2  ;;  %v569_v45 = vadd.f32 %v537_v56, %v324_v52  ;;  %v1240_v14 = vrot.slane %v13631_v29, 1  ;;  %v1777_v62 = vrot.slane %v13633_v16, 2  ;;  %v13685_v56 = vld [vmem:[#allocation3 + $0xc0] sm:$0xff] }
 0x17f   :  { %v1793_v61 = vrot.slane %v13635_v38, 2  ;;  %v16666_v4 = vrot.slane %v13565_v50, 1  ;;  %v16667_v47 = vrot.slane %v13568_v48, 2  ;;  %v1678_v1 = vrot.slane %v13653_v37, 1  ;;  %v11867_v50 = vld [vmem:[%s16649_s27 + $0x10] sm:$0xff]   ;;  %v11868_v48 = vld [vmem:[%s16649_s27 + $0x58] sm:$0xff]  }
 0x180   :  { %v1421_v35 = vadd.f32 %v1387_v18, %v1273_v51  ;;  %v718_v52 = vadd.f32 %v686_v19, %v569_v45  ;;  %v13670_v6 = vsel %vm638_vm5, %v1776_v34, %v1777_v62  ;;  %v1679_v2 = vrot.slane %v1565_v31, 1  ;;  %v13674_v18 = vld [vmem:[#allocation3 + $0xd0] sm:$0xff]  ;;  %11046 = vmatpush3.bf16.msra.mxu0 %v11867_v50  ;;  %v11869_v45 = vld [vmem:[%s16649_s27 + $0x18] sm:$0xff]   ;;  %v13712_v50 = vld [vmem:[#allocation3 + $0xe0] sm:$0xff] }
 0x181   :  { %v890_v9 = vsel %vm489_vm4, %v888_v60, %v16666_v4  ;;  %v1038_v28 = vsel %vm638_vm5, %v1036_v26, %v16667_v47  ;;  %v1794_v53 = vsel %vm638_vm5, %v1792_v44, %v1793_v61  ;;  %v1681_v44 = vrot.slane %v13661_v33, 1  ;;  %v13687_v60 = vld [vmem:[#allocation3 + $0xc8] sm:$0x3]  ;;  %11047 = vmatprep.subr.bf16.mxu0 %v11868_v48  ;;  %v13714_v48 = vld [vmem:[#allocation3 + $0xf0] sm:$0xff] }
 0x182   :  { %v1444_v29 = vmul.f32 %v13370_v40, %v1421_v35  ;;  %v764_v5 = vadd.f32 %v748_v24, %v718_v52  ;;  %v2211_v34 = vpack.c.bf16 %v1794_v53, %v13670_v6  ;;  %v1680_v26 = vsel %vm489_vm4, %v1678_v1, %v1679_v2  ;;  %v13698_v35 = vld [vmem:[#allocation3 + $0xd8] sm:$0x3] }
 0x183   :  { %v1682_v13 = vrot.slane %v1567_v63, 1  ;;  %v1727_v27 = vrot.slane %v1565_v31, 2  ;;  %v1730_v51 = vrot.slane %v1567_v63, 2  ;;  %v11455_v62 = vpack.i.bf16 %v13674_v18, %v13685_v56 }
 0x184   :  { %v1467_v24 = vadd.f32 %v13382_v20, %v1444_v29  ;;  %v922_v19 = vadd.f32 %v890_v9, %v764_v5  ;;  %11297 = vmatmul.mubr.msk.bf16.gmra.mrb[4].mxu1 %vm1485_vm2, %v2211_v34  ;;  %v1726_v61 = vrot.slane %v13653_v37, 2  ;;  %v1729_v52 = vrot.slane %v13661_v33, 2  ;;  %v11870_v9 = vld [vmem:[%s16649_s27 + $0x60] sm:$0xff]   ;;  %11048 = vmatpush3.bf16.msra.mxu0 %v11869_v45  ;;  %v13737_v45 = vld [vmem:[#allocation3 + $0xf8] sm:$0x3] }
 0x185   :  { %v13701_v31 = vsel %vm489_vm4, %v1681_v44, %v1682_v13  ;;  %v1732_v4 = vrot.slane %v13685_v56, 2  ;;  %v1733_v47 = vrot.slane %v13687_v60, 2  ;;  %11456 = vrot.lane.b32.xlu0 %v11455_v62, %s12459_s25  ;;  %v1388_v29 = vrot.slane %v13651_v22, 2  ;;  %11049 = vmatprep.subr.bf16.mxu0 %v11870_v9 }
 0x186   :  { %v1483_v63 = vmax.f32 %v1467_v24, 0.0  ;;  %v1070_v53 = vadd.f32 %v1038_v28, %v922_v19  ;;  %v11405_v1 = vpack.i.bf16 %v13701_v31, %v1680_v26  ;;  %v1728_v2 = vsel %vm638_vm5, %v1726_v61, %v1727_v27  ;;  %v13722_v28 = vld [vmem:[#allocation3 + $0xe8] sm:$0x3]  ;;  %v11871_v26 = vld [vmem:[%s16649_s27 + $0x20] sm:$0xff]  }
 0x187   :  { %v13718_v5 = vsel %vm638_vm5, %v1729_v52, %v1730_v51  ;;  %v1735_v34 = vrot.slane %v13674_v18, 2  ;;  %v1736_v44 = vrot.slane %v13698_v35, 2  ;;  %v1664_v13 = vrot.slane %v13294_v49, 1  ;;  %v13753_v52 = vld [vmem:[#allocation3 + $0x100] sm:$0xff] }
 0x188   :  { %1542 = vst.msk [vmem:[#allocation3 + $0x111] sm:$0xff] %vm1485_vm2, %v1483_v63  ;;  %v1116_v22 = vadd.f32 %v13648_v57, %v1070_v53  ;;  %v1242_v27 = vsel %vm489_vm4, %v1240_v14, %v1241_v3  ;;  %11406 = vrot.lane.b32.xlu1 %v11405_v1, %s12453_s8  ;;  %v13735_v51 = vsel %vm638_vm5, %v1732_v4, %v1733_v47  ;;  %v1738_v57 = vrot.slane %v13712_v50, 2  ;;  %v13755_v4 = vld [vmem:[#allocation3 + $0x108] sm:$0x3] }
 0x189   :  { %v11410_v24 = vpack.i.bf16 %v13718_v5, %v1728_v2  ;;  %v13741_v19 = vsel %vm638_vm5, %v1735_v34, %v1736_v44  ;;  %v11465_v49 = vpack.i.bf16 %v13714_v48, %v13712_v50  ;;  %v1739_v62 = vrot.slane %v13722_v28, 2  ;;  %11050 = vmatpush3.bf16.msra.mxu0 %v11871_v26  ;;  %v11873_v53 = vld [vmem:[%s16649_s27 + $0x28] sm:$0xff]   ;;  %v11874_v26 = vld [vmem:[%s16649_s27 + $0x70] sm:$0xff]  }
 0x18a   :  { %v1274_v3 = vadd.f32 %v1242_v27, %v1116_v22  ;;  %v2214_v14 = vpack.c.bf16 %v13741_v19, %v13735_v51  ;;  %v1741_v61 = vrot.slane %v13714_v48, 2  ;;  %v1661_v47 = vrot.slane %v13283_v32, 1  ;;  %11051 = vmatprep.subr.bf16.mxu0 %v11872_v10  ;;  %v13784_v22 = vld [vmem:[#allocation3 + $0x10] sm:$0xff] }
 0x18b   :  { %v1390_v9 = vsel %vm638_vm5, %v1388_v29, %v1389_v39  ;;  %11466 = vrot.lane.b32.xlu0 %v11465_v49, %s12459_s25  ;;  %v1742_v63 = vrot.slane %v13737_v45, 2  ;;  %v11470_v32 = vpack.i.bf16 %v13310_v58, %v13220_v25  ;;  %v1660_v54 = vrot.slane %v13260_v46, 1 }
 0x18c   :  { %v1422_v1 = vadd.f32 %v1390_v9, %v1274_v3  ;;  %11411 = vrot.lane.b32.xlu1 %v11410_v24, %s12459_s25  ;;  %11300 = vmatprep.mubr.msk.bf16.mxu1 %vm1485_vm2, %v2214_v14  ;;  %v1663_v39 = vrot.slane %v13254_v17, 1  ;;  %v13773_v2 = vsel %vm638_vm5, %v1738_v57, %v1739_v62  ;;  %v1744_v34 = vrot.slane %v13753_v52, 2  ;;  %v11875_v14 = vld [vmem:[%s16649_s27 + $0x30] sm:$0xff]  }
 0x18d   :  { %v13776_v29 = vsel %vm638_vm5, %v1741_v61, %v1742_v63  ;;  %v1745_v44 = vrot.slane %v13755_v4, 2  ;;  %v11420_v27 = vpack.i.bf16 %v13260_v46, %v13784_v22  ;;  %11052 = vmatpush3.bf16.msra.mxu0 %v11873_v53  ;;  %v13802_v46 = vsel %vm489_vm4, %v1660_v54, %v1661_v47  ;;  %v11876_v47 = vld [vmem:[%s16649_s27 + $0x78] sm:$0xff]  }
 0x18e   :  { %v1445_v25 = vmul.f32 %v13370_v40, %v1422_v1  ;;  %v2217_v24 = vpack.c.bf16 %v13776_v29, %v13773_v2  ;;  %v13791_v49 = vsel %vm489_vm4, %v1663_v39, %v1664_v13  ;;  %v11430_v62 = vpack.i.bf16 %v13354_v11, %v13254_v17  ;;  %11053 = vmatprep.subr.bf16.mxu0 %v11874_v26  ;;  %v13831_v54 = vld [vmem:[#allocation3 + $0x138] sm:$0x3] }
 0x18f   :  { %11471 = vrot.lane.b32.xlu0 %v11470_v32, %s12453_s8  ;;  %v13794_v57 = vld [vmem:[#allocation3 + $0x110] sm:$0xff]  ;;  %v13796_v10 = vld [vmem:[#allocation3 + $0x118] sm:$0x3]  ;;  %v13814_v61 = vsel %vm638_vm5, %v1744_v34, %v1745_v44  ;;  %v1669_v53 = vrot.slane %v13351_v15, 1  ;;  %v1670_v1 = vrot.slane %v13409_v42, 1  ;;  %v1666_v39 = vrot.slane %v13354_v11, 1 }
 0x190   :  { %v1468_v40 = vadd.f32 %v13382_v20, %v1445_v25  ;;  %11421 = vrot.lane.b32.xlu1 %v11420_v27, %s12460_s4  ;;  %11301 = vmatmul.mubr.msk.bf16.gmra.mrb[8].mxu1 %vm1485_vm2, %v2217_v24  ;;  %v1747_v13 = vrot.slane %v13794_v57, 2  ;;  %v1748_v3 = vrot.slane %v13796_v10, 2  ;;  %v11475_v20 = vpack.i.bf16 %v13791_v49, %v13802_v46  ;;  %v13829_v32 = vld [vmem:[#allocation3 + $0x130] sm:$0xff]  ;;  %v11877_v44 = vld [vmem:[%s16649_s27 + $0x38] sm:$0xff]  }
 0x191   :  { %v1667_v34 = vrot.slane %v13405_v43, 1  ;;  %11054 = vmatpush3.bf16.msra.mxu0 %v11875_v14  ;;  %v11480_v42 = vpack.i.bf16 %v13426_v55, %v13318_v23  ;;  %v11440_v26 = vpack.i.bf16 %v13458_v30, %v13351_v15  ;;  %v13844_v25 = vsel %vm489_vm4, %v1669_v53, %v1670_v1 }
 0x192   :  { %v1484_v9 = vmax.f32 %v1468_v40, 0.0  ;;  %v13820_v63 = vsel %vm638_vm5, %v1747_v13, %v1748_v3  ;;  %11055 = vmatprep.subr.bf16.mxu0 %v11876_v47  ;;  %v11530_v11 = vpack.i.bf16 %v13523_v7, %v13520_v8  ;;  %v1795_v43 = vrot.slane %v13829_v32, 2 }
 0x193   :  { %11476 = vrot.lane.b32.xlu0 %v11475_v20, %s12460_s4  ;;  %v2220_v17 = vpack.c.bf16 %v13820_v63, %v13814_v61  ;;  %v1796_v27 = vrot.slane %v13831_v54, 2  ;;  %v13853_v24 = vsel %vm489_vm4, %v1666_v39, %v1667_v34  ;;  %v11450_v40 = vpack.i.bf16 %v13594_v12, %v13453_v36 }
 0x194   :  { %1543 = vst.msk [vmem:[#allocation3 + $0x121] sm:$0xff] %vm1485_vm2, %v1484_v9  ;;  %11431 = vrot.lane.b32.xlu1 %v11430_v62, %s12460_s4  ;;  %v11495_v15 = vpack.i.bf16 %v13844_v25, %v13853_v24  ;;  %v1675_v13 = vrot.slane %v13453_v36, 1  ;;  %v1676_v3 = vrot.slane %v13503_v21, 1  ;;  %v1672_v1 = vrot.slane %v13458_v30, 1 }
 0x195   :  { %11304 = vmatprep.mubr.msk.bf16.mxu1 %vm1485_vm2, %v2220_v17  ;;  %11056 = vmatpush3.bf16.msra.mxu0 %v11877_v44  ;;  %v1797_v47 = vsel %vm638_vm5, %v1795_v43, %v1796_v27  ;;  %v1673_v36 = vrot.slane %v13494_v41, 1  ;;  %v11500_v21 = vpack.i.bf16 %v13520_v8, %v13429_v59  ;;  %v11460_v17 = vpack.i.bf16 %v13685_v56, %v13661_v33 }
 0x196   :  { %v13880_v34 = vsel %vm489_vm4, %v1675_v13, %v1676_v3  ;;  %v11600_v30 = vpack.i.bf16 %v13776_v29, %v13773_v2  ;;  %v11620_v44 = vpack.i.bf16 %v13820_v63, %v13814_v61  ;;  %v11490_v43 = vpack.i.bf16 %v13318_v23, %v13310_v58 }
 0x197   :  { %11481 = vrot.lane.b32.xlu0 %v11480_v42, %s12453_s8  ;;  %v13888_v8 = vsel %vm489_vm4, %v1672_v1, %v1673_v36  ;;  %v1786_v27 = vrot.slane %v13596_v0, 1  ;;  %v1754_v13 = vrot.slane %v13594_v12, 1  ;;  %v1755_v3 = vrot.slane %v13633_v16, 1 }
 0x198   :  { %11441 = vrot.lane.b32.xlu1 %v11440_v26, %s12460_s4  ;;  %v11515_v41 = vpack.i.bf16 %v13880_v34, %v13888_v8  ;;  %v11520_v26 = vpack.i.bf16 %v13670_v6, %v13523_v7  ;;  %v11510_v58 = vpack.i.bf16 %v13429_v59, %v13426_v55  ;;  %v1687_v16 = vrot.slane %v13674_v18, 1 }
 0x199   :  { %v13916_v23 = vsel %vm489_vm4, %v1754_v13, %v1755_v3  ;;  %v1684_v55 = vrot.slane %v13685_v56, 1  ;;  %v1685_v59 = vrot.slane %v13687_v60, 1  ;;  %v11560_v6 = vpack.i.bf16 %v13735_v51, %v13718_v5 }
 0x19a   :  { %v1693_v60 = vrot.slane %v13714_v48, 1  ;;  %v1694_v5 = vrot.slane %v13737_v45, 1  ;;  %v11570_v1 = vpack.i.bf16 %v13773_v2, %v13741_v19  ;;  %v11545_v36 = vpack.i.bf16 %v13753_v52, %v13714_v48  ;;  %v11397_v2 = vpop.permute.xlu1 %11396 }
 0x19b   :  { %v13861_v14 = vld [vmem:[#allocation3 + $0x120] sm:$0xff]  ;;  %v13863_v62 = vld [vmem:[#allocation3 + $0x128] sm:$0x3]  ;;  %11496 = vrot.lane.b32.xlu0 %v11495_v15, %s12460_s4 }
 0x19c   :  { %11451 = vrot.lane.b32.xlu1 %v11450_v40, %s12460_s4  ;;  %v1779_v9 = vrot.slane %v13861_v14, 2  ;;  %v1780_v53 = vrot.slane %v13863_v62, 2  ;;  %v11540_v40 = vpack.i.bf16 %v13794_v57, %v13753_v52  ;;  %v11550_v7 = vpack.i.bf16 %v13829_v32, %v13861_v14 }
 0x19d   :  { %v1758_v3 = vrot.slane %v13863_v62, 1 }
 0x19e   :  { %v13877_v39 = vsel %vm638_vm5, %v1779_v9, %v1780_v53  ;;  %v11535_v9 = vpack.i.bf16 %v13712_v50, %v13674_v18  ;;  %v1690_v53 = vrot.slane %v13712_v50, 1 }
 0x19f   :  { %v2223_v42 = vpack.c.bf16 %v1797_v47, %v13877_v39  ;;  %11501 = vrot.lane.b32.xlu0 %v11500_v21, %s12453_s8  ;;  %v13953_v21 = vsel %vm489_vm4, %v1693_v60, %v1694_v5 }
 0x1a0   :  { %11461 = vrot.lane.b32.xlu1 %v11460_v17, %s12460_s4  ;;  %v11417_v62 = vpop.permute.xlu0 %11416 }
 0x1a1   :  { %11305 = vmatmul.mubr.msk.bf16.gmra.mrb[12].mxu1 %vm1485_vm2, %v2223_v42  ;;  %v1700_v42 = vrot.slane %v13796_v10, 1 }
 0x1a3   :  { %11516 = vrot.lane.b32.xlu0 %v11515_v41, %s12460_s4 }
 0x1a4   :  { %11486 = vrot.lane.b32.xlu1 %v11475_v20, %s12453_s8  ;;  %v1787_v20 = vrot.slane %v13635_v38, 1  ;;  %v1688_v38 = vrot.slane %v13698_v35, 1  ;;  %v13936_v35 = vsel %vm489_vm4, %v1684_v55, %v1685_v59 }
 0x1a6   :  { %v1788_v0 = vsel %vm489_vm4, %v1786_v27, %v1787_v20  ;;  %v11580_v27 = vpack.i.bf16 %v13741_v19, %v13735_v51  ;;  %v1789_v20 = vrot.slane %v13829_v32, 1  ;;  %v1790_v51 = vrot.slane %v13831_v54, 1 }
 0x1a7   :  { %11521 = vrot.lane.b32.xlu0 %v11520_v26, %s12453_s8  ;;  %v11555_v12 = vpack.i.bf16 %v1788_v0, %v13916_v23  ;;  %v1697_v26 = vrot.slane %v13755_v4, 1  ;;  %v1757_v4 = vrot.slane %v13861_v14, 1  ;;  %v11610_v19 = vpack.i.bf16 %v13877_v39, %v13820_v63  ;;  %v11402_v0 = vpop.permute.xlu1 %11401 }
 0x1a8   :  { %11491 = vrot.lane.b32.xlu1 %v11490_v43, %s12459_s25  ;;  %v11590_v43 = vpack.i.bf16 %v13814_v61, %v13776_v29  ;;  %v11630_v54 = vpack.i.bf16 %v13861_v14, %v13794_v57  ;;  %v11399_v63 = vunpack.i.h.bf16 %v11397_v2  ;;  %v11398_v14 = vunpack.i.l.bf16 %v11397_v2 }
 0x1a9   :  { %v11404_v55 = vunpack.i.h.bf16 %v11402_v0  ;;  %v11403_v59 = vunpack.i.l.bf16 %v11402_v0 }
 0x1ab   :  { %11541 = vrot.lane.b32.xlu0 %v11540_v40, %s12459_s25 }
 0x1ac   :  { %11506 = vrot.lane.b32.xlu1 %v11495_v15, %s12453_s8  ;;  %v13931_v15 = vsel %vm489_vm4, %v1687_v16, %v1688_v38 }
 0x1ad   :  { %v11565_v47 = vpack.i.bf16 %v13931_v15, %v13936_v35 }
 0x1af   :  { %11551 = vrot.lane.b32.xlu0 %v11550_v7, %s12459_s25  ;;  %v13991_v7 = vsel %vm489_vm4, %v1757_v4, %v1758_v3 }
 0x1b0   :  { %11511 = vrot.lane.b32.xlu1 %v11510_v58, %s12459_s25  ;;  %v1791_v58 = vsel %vm489_vm4, %v1789_v20, %v1790_v51 }
 0x1b1   :  { %v11625_v32 = vpack.i.bf16 %v1791_v58, %v13991_v7 }
 0x1b3   :  { %11556 = vrot.lane.b32.xlu0 %v11555_v12, %s12460_s4 }
 0x1b4   :  { %11526 = vrot.lane.b32.xlu1 %v11515_v41, %s12453_s8  ;;  %v1696_v41 = vrot.slane %v13753_v52, 1 }
 0x1b6   :  { %v13978_v10 = vsel %vm489_vm4, %v1696_v41, %v1697_v26  ;;  %v11427_v39 = vpop.permute.xlu0 %11426  ;;  %v11418_v41 = vunpack.i.l.bf16 %v11417_v62 }
 0x1b7   :  { %11561 = vrot.lane.b32.xlu0 %v11560_v6, %s12453_s8 }
 0x1b8   :  { %11531 = vrot.lane.b32.xlu1 %v11530_v11, %s12459_s25  ;;  %v1691_v11 = vrot.slane %v13722_v28, 1  ;;  %v1699_v28 = vrot.slane %v13794_v57, 1 }
 0x1ba   :  { %v13958_v45 = vsel %vm489_vm4, %v1690_v53, %v1691_v11  ;;  %v13973_v40 = vsel %vm489_vm4, %v1699_v28, %v1700_v42  ;;  %v16668_v53 = vld [vmem:[#allocation23_spill] sm:$0xff]  ;;  %v11419_v42 = vunpack.i.h.bf16 %v11417_v62 }
 0x1bb   :  { %11566 = vrot.lane.b32.xlu0 %v11565_v47, %s12460_s4  ;;  %v11585_v17 = vpack.i.bf16 %v13953_v21, %v13958_v45  ;;  %v11605_v13 = vpack.i.bf16 %v13973_v40, %v13978_v10 }
 0x1bc   :  { %11536 = vrot.lane.b32.xlu1 %v11535_v9, %s12460_s4 }
 0x1bf   :  { %11571 = vrot.lane.b32.xlu0 %v11570_v1, %s12453_s8 }
 0x1c0   :  { %11546 = vrot.lane.b32.xlu1 %v11545_v36, %s12460_s4  ;;  %v2103_v36 = vsel %vm1485_vm2, %v13784_v22, %v11399_v63 }
 0x1c3   :  { %11586 = vrot.lane.b32.xlu0 %v11585_v17, %s12460_s4 }
 0x1c4   :  { %11576 = vrot.lane.b32.xlu1 %v11565_v47, %s12453_s8 }
 0x1c7   :  { %11591 = vrot.lane.b32.xlu0 %v11590_v43, %s12453_s8 }
 0x1c8   :  { %11581 = vrot.lane.b32.xlu1 %v11580_v27, %s12459_s25  ;;  %v2120_v27 = vsel %vm2118_vm6, %v2103_v36, %v11404_v55  ;;  %v11429_v55 = vunpack.i.h.bf16 %v11427_v39 }
 0x1cb   :  { %11606 = vrot.lane.b32.xlu0 %v11605_v13, %s12460_s4 }
 0x1cc   :  { %11596 = vrot.lane.b32.xlu1 %v11585_v17, %s12453_s8  ;;  %v12372_v17 = vld [vmem:[#allocation3] sm:$0xff] }
 0x1cd   :  { %v2102_v28 = vsel %vm1485_vm2, %v12372_v17, %v11398_v14 }
 0x1ce   :  { %v2119_v43 = vsel %vm2118_vm6, %v2102_v28, %v11403_v59  ;;  %v11428_v59 = vunpack.i.l.bf16 %v11427_v39 }
 0x1cf   :  { %11611 = vrot.lane.b32.xlu0 %v11610_v19, %s12453_s8  ;;  %v14009_v29 = vpop.permute.xlu0 %11436 }
 0x1d0   :  { %11601 = vrot.lane.b32.xlu1 %v11600_v30, %s12459_s25 }
 0x1d3   :  { %11626 = vrot.lane.b32.xlu0 %v11625_v32, %s12460_s4 }
 0x1d4   :  { %11616 = vrot.lane.b32.xlu1 %v11605_v13, %s12453_s8 }
 0x1d8   :  { %11621 = vrot.lane.b32.xlu1 %v11620_v44, %s12459_s25 }
 0x1dc   :  { %11631 = vrot.lane.b32.xlu1 %v11630_v54, %s12460_s4 }
 0x1e9   :  { %v14011_v30 = vpop.permute.xlu0 %11446 }
 0x1f7   :  { %v14013_v12 = vpop.permute.xlu0 %11456 }
 0x1fa   :  { %v14015_v16 = vpop.permute.xlu1 %11406 }
 0x1fd   :  { %v14017_v38 = vpop.permute.xlu0 %11466 }
 0x1fe   :  { %v14019_v61 = vpop.permute.xlu1 %11411 }
 0x201   :  { %v11472_v44 = vpop.permute.xlu0 %11471 }
 0x202   :  { %v11422_v6 = vpop.permute.xlu1 %11421  ;;  %v11474_v47 = vunpack.i.h.bf16 %v11472_v44  ;;  %v11473_v9 = vunpack.i.l.bf16 %v11472_v44 }
 0x203   :  { %v11424_v60 = vunpack.i.h.bf16 %v11422_v6  ;;  %v11423_v5 = vunpack.i.l.bf16 %v11422_v6 }
 0x204   :  { %v2152_v11 = vsel %vm1485_vm2, %v16668_v53, %v11473_v9  ;;  %v2153_v1 = vsel %vm1485_vm2, %v13802_v46, %v11474_v47 }
 0x205   :  { %v11477_v26 = vpop.permute.xlu0 %11476  ;;  %v2168_v20 = vsel %vm2118_vm6, %v2152_v11, %v11418_v41  ;;  %v2169_v46 = vsel %vm2118_vm6, %v2153_v1, %v11419_v42  ;;  %v2136_v22 = vsel %vm2135_vm7, %v2119_v43, %v11423_v5  ;;  %v2137_v51 = vsel %vm2135_vm7, %v2120_v27, %v11424_v60 }
 0x206   :  { %v14030_v13 = vpop.permute.xlu1 %11431  ;;  %v11479_v4 = vunpack.i.h.bf16 %v11477_v26  ;;  %v11478_v3 = vunpack.i.l.bf16 %v11477_v26  ;;  %v2200_v63 = vpack.c.bf16 %v2137_v51, %v2136_v22 }
 0x208   :  { %v2184_v19 = vsel %vm2135_vm7, %v2168_v20, %v11478_v3  ;;  %v2185_v58 = vsel %vm2135_vm7, %v2169_v46, %v11479_v4  ;;  %v11439_v4 = vunpack.i.h.bf16 %v14009_v29  ;;  %v11438_v3 = vunpack.i.l.bf16 %v14009_v29 }
 0x209   :  { %v11482_v32 = vpop.permute.xlu0 %11481  ;;  %v2201_v54 = vpack.c.bf16 %v2185_v58, %v2184_v19 }
 0x20a   :  { %v14038_v62 = vpop.permute.xlu1 %11441  ;;  %v11484_v2 = vunpack.i.h.bf16 %v11482_v32  ;;  %v11483_v0 = vunpack.i.l.bf16 %v11482_v32 }
 0x20b   :  { %2388 = vmatprep.mubr.bf16.mxu0 %v2201_v54 }
 0x20c   :  { %v2155_v14 = vsel %vm1485_vm2, %v13853_v24, %v11484_v2  ;;  %v2154_v44 = vsel %vm1485_vm2, %v13791_v49, %v11483_v0  ;;  %2389 = vmatmul.mubr.bf16.vlgmr.msra.gmra.mrb[0].mxu0 %v2200_v63  ;;  %v11434_v2 = vunpack.i.h.bf16 %v14030_v13  ;;  %v11433_v0 = vunpack.i.l.bf16 %v14030_v13  ;;  %v12373_v63 = vld [vmem:[#allocation3 + $0x30] sm:$0xff] }
 0x20d   :  { %v11497_v6 = vpop.permute.xlu0 %11496  ;;  %v2170_v5 = vsel %vm2118_vm6, %v2154_v44, %v11428_v59  ;;  %v2171_v53 = vsel %vm2118_vm6, %v2155_v14, %v11429_v55  ;;  %v12374_v14 = vld [vmem:[#allocation3 + $0x20] sm:$0xff] }
 0x20e   :  { %v14044_v47 = vpop.permute.xlu1 %11451  ;;  %v11499_v9 = vunpack.i.h.bf16 %v11497_v6  ;;  %v11498_v60 = vunpack.i.l.bf16 %v11497_v6 }
 0x210   :  { %v2186_v11 = vsel %vm2135_vm7, %v2170_v5, %v11498_v60  ;;  %v2187_v1 = vsel %vm2135_vm7, %v2171_v53, %v11499_v9 }
 0x211   :  { %v11502_v24 = vpop.permute.xlu0 %11501  ;;  %v2204_v36 = vpack.c.bf16 %v2187_v1, %v2186_v11 }
 0x212   :  { %v14050_v17 = vpop.permute.xlu1 %11461  ;;  %v11504_v49 = vunpack.i.h.bf16 %v11502_v24  ;;  %v11503_v28 = vunpack.i.l.bf16 %v11502_v24 }
 0x213   :  { %2396 = vmatprep.mubr.bf16.mxu0 %v2204_v36 }
 0x214   :  { %v2157_v41 = vsel %vm1485_vm2, %v13888_v8, %v11504_v49  ;;  %v2156_v26 = vsel %vm1485_vm2, %v13844_v25, %v11503_v28 }
 0x215   :  { %v11517_v39 = vpop.permute.xlu0 %11516  ;;  %v2172_v19 = vsel %vm2118_vm6, %v2156_v26, %v11438_v3  ;;  %v2173_v58 = vsel %vm2118_vm6, %v2157_v41, %v11439_v4  ;;  %v12376_v4 = vld [vmem:[#allocation3 + $0x40] sm:$0xff] }
 0x216   :  { %v11487_v42 = vpop.permute.xlu1 %11486  ;;  %v11519_v43 = vunpack.i.h.bf16 %v11517_v39  ;;  %v11518_v27 = vunpack.i.l.bf16 %v11517_v39  ;;  %v11444_v39 = vunpack.i.h.bf16 %v14038_v62 }
 0x217   :  { %v11489_v20 = vunpack.i.h.bf16 %v11487_v42  ;;  %v11488_v46 = vunpack.i.l.bf16 %v11487_v42  ;;  %v11443_v42 = vunpack.i.l.bf16 %v14038_v62 }
 0x218   :  { %v2188_v8 = vsel %vm2135_vm7, %v2172_v19, %v11518_v27  ;;  %v2189_v25 = vsel %vm2135_vm7, %v2173_v58, %v11519_v43  ;;  %v12375_v43 = vld [vmem:[#allocation3 + $0x50] sm:$0xff] }
 0x219   :  { %v11522_v22 = vpop.permute.xlu0 %11521  ;;  %v2105_v29 = vsel %vm1485_vm2, %v12373_v63, %v11489_v20  ;;  %v2104_v44 = vsel %vm1485_vm2, %v12374_v14, %v11488_v46  ;;  %v2207_v53 = vpack.c.bf16 %v2189_v25, %v2188_v8 }
 0x21a   :  { %v11492_v51 = vpop.permute.xlu1 %11491  ;;  %v11524_v24 = vunpack.i.h.bf16 %v11522_v22  ;;  %v11523_v36 = vunpack.i.l.bf16 %v11522_v22  ;;  %v11449_v22 = vunpack.i.h.bf16 %v14011_v30 }
 0x21b   :  { %v11494_v32 = vunpack.i.h.bf16 %v11492_v51  ;;  %v11493_v54 = vunpack.i.l.bf16 %v11492_v51  ;;  %v11448_v51 = vunpack.i.l.bf16 %v14011_v30 }
 0x21c   :  { %v2159_v20 = vsel %vm1485_vm2, %v13916_v23, %v11524_v24  ;;  %v2158_v46 = vsel %vm1485_vm2, %v13880_v34, %v11523_v36  ;;  %v11454_v36 = vunpack.i.h.bf16 %v14044_v47 }
 0x21d   :  { %v2121_v55 = vsel %vm2118_vm6, %v2104_v44, %v11493_v54  ;;  %v2122_v59 = vsel %vm2118_vm6, %v2105_v29, %v11494_v32  ;;  %v14068_v6 = vpop.permute.xlu0 %11541  ;;  %v2175_v34 = vsel %vm2118_vm6, %v2159_v20, %v11449_v22  ;;  %v11408_v20 = vunpack.i.l.bf16 %v14015_v16 }
 0x21e   :  { %v11507_v9 = vpop.permute.xlu1 %11506  ;;  %v2138_v60 = vsel %vm2135_vm7, %v2121_v55, %v11433_v0  ;;  %v2139_v5 = vsel %vm2135_vm7, %v2122_v59, %v11434_v2  ;;  %v2174_v0 = vsel %vm2118_vm6, %v2158_v46, %v11448_v51  ;;  %v11459_v55 = vunpack.i.h.bf16 %v14013_v12 }
 0x21f   :  { %v2203_v11 = vpack.c.bf16 %v2139_v5, %v2138_v60  ;;  %v11509_v13 = vunpack.i.h.bf16 %v11507_v9  ;;  %v11508_v1 = vunpack.i.l.bf16 %v11507_v9  ;;  %v11409_v5 = vunpack.i.h.bf16 %v14015_v16 }
 0x221   :  { %2397 = vmatmul.mubr.bf16.gmra.mrb[4].mxu0 %v2203_v11  ;;  %v14072_v49 = vpop.permute.xlu0 %11551  ;;  %v2107_v27 = vsel %vm1485_vm2, %v12375_v43, %v11509_v13  ;;  %v2106_v3 = vsel %vm1485_vm2, %v12376_v4, %v11508_v1 }
 0x222   :  { %v11512_v28 = vpop.permute.xlu1 %11511  ;;  %2404 = vmatprep.mubr.bf16.mxu0 %v2207_v53  ;;  %v11458_v53 = vunpack.i.l.bf16 %v14013_v12 }
 0x223   :  { %v11514_v41 = vunpack.i.h.bf16 %v11512_v28  ;;  %v11513_v26 = vunpack.i.l.bf16 %v11512_v28  ;;  %v11453_v28 = vunpack.i.l.bf16 %v14044_v47  ;;  %v11414_v47 = vunpack.i.h.bf16 %v14019_v61 }
 0x225   :  { %v2123_v62 = vsel %vm2118_vm6, %v2106_v3, %v11513_v26  ;;  %v2124_v19 = vsel %vm2118_vm6, %v2107_v27, %v11514_v41  ;;  %v11557_v58 = vpop.permute.xlu0 %11556  ;;  %v12377_v26 = vld [vmem:[#allocation3 + $0x70] sm:$0xff]  ;;  %v12378_v27 = vld [vmem:[#allocation3 + $0x60] sm:$0xff] }
 0x226   :  { %v11527_v32 = vpop.permute.xlu1 %11526  ;;  %v2140_v54 = vsel %vm2135_vm7, %v2123_v62, %v11443_v42  ;;  %v2141_v8 = vsel %vm2135_vm7, %v2124_v19, %v11444_v39  ;;  %v11559_v25 = vunpack.i.h.bf16 %v11557_v58  ;;  %v11558_v2 = vunpack.i.l.bf16 %v11557_v58 }
 0x227   :  { %v2206_v23 = vpack.c.bf16 %v2141_v8, %v2140_v54  ;;  %v11529_v63 = vunpack.i.h.bf16 %v11527_v32  ;;  %v11528_v29 = vunpack.i.l.bf16 %v11527_v32  ;;  %v11413_v54 = vunpack.i.l.bf16 %v14019_v61 }
 0x228   :  { %v2190_v30 = vsel %vm2135_vm7, %v2174_v0, %v11558_v2  ;;  %v2191_v14 = vsel %vm2135_vm7, %v2175_v34, %v11559_v25  ;;  %v14092_v44 = vpop.f32.mrb[0].mxu1  ;;  %v11464_v25 = vunpack.i.h.bf16 %v14050_v17  ;;  %v11463_v2 = vunpack.i.l.bf16 %v14050_v17 }
 0x229   :  { %2405 = vmatmul.mubr.bf16.gmra.mrb[8].mxu0 %v2206_v23  ;;  %v11562_v59 = vpop.permute.xlu0 %11561  ;;  %v2210_v9 = vpack.c.bf16 %v2191_v14, %v2190_v30  ;;  %v14095_v60 = vpop.f32.mrb[1].mxu1  ;;  %v2109_v43 = vsel %vm1485_vm2, %v12377_v26, %v11529_v63  ;;  %v2108_v12 = vsel %vm1485_vm2, %v12378_v27, %v11528_v29  ;;  %v2111_v29 = vsel %vm1485_vm2, %v13661_v33, %v11409_v5 }
 0x22a   :  { %v11532_v11 = vpop.permute.xlu1 %11531  ;;  %v11564_v13 = vunpack.i.h.bf16 %v11562_v59  ;;  %v11563_v1 = vunpack.i.l.bf16 %v11562_v59  ;;  %v14099_v24 = vpop.f32.mrb[2].mxu1  ;;  %v2110_v61 = vsel %vm1485_vm2, %v13653_v37, %v11408_v20  ;;  %v2128_v17 = vsel %vm2118_vm6, %v2111_v29, %v11414_v47 }
 0x22b   :  { %v11534_v39 = vunpack.i.h.bf16 %v11532_v11  ;;  %v11533_v42 = vunpack.i.l.bf16 %v11532_v11  ;;  %2412 = vmatprep.mubr.bf16.mxu0 %v2210_v9  ;;  %v14103_v41 = vpop.f32.mrb[3].mxu1  ;;  %v2127_v59 = vsel %vm2118_vm6, %v2110_v61, %v11413_v54  ;;  %v2145_v5 = vsel %vm2135_vm7, %v2128_v17, %v11464_v25 }
 0x22c   :  { %v2161_v4 = vsel %vm1485_vm2, %v13936_v35, %v11564_v13  ;;  %v2160_v3 = vsel %vm1485_vm2, %v13701_v31, %v11563_v1  ;;  %v2144_v33 = vsel %vm2135_vm7, %v2127_v59, %v11463_v2  ;;  %v11469_v37 = vunpack.i.h.bf16 %v14017_v38 }
 0x22d   :  { %v2125_v46 = vsel %vm2118_vm6, %v2108_v12, %v11533_v42  ;;  %v2126_v22 = vsel %vm2118_vm6, %v2109_v43, %v11534_v39  ;;  %v11567_v51 = vpop.permute.xlu0 %11566  ;;  %v2176_v16 = vsel %vm2118_vm6, %v2160_v3, %v11458_v53  ;;  %v2177_v8 = vsel %vm2118_vm6, %v2161_v4, %v11459_v55 }
 0x22e   :  { %v14115_v62 = vpop.permute.xlu1 %11536  ;;  %v2142_v19 = vsel %vm2135_vm7, %v2125_v46, %v11453_v28  ;;  %v2143_v58 = vsel %vm2135_vm7, %v2126_v22, %v11454_v36  ;;  %v11569_v32 = vunpack.i.h.bf16 %v11567_v51  ;;  %v11568_v35 = vunpack.i.l.bf16 %v11567_v51 }
 0x22f   :  { %v2209_v31 = vpack.c.bf16 %v2143_v58, %v2142_v19  ;;  %v11468_v11 = vunpack.i.l.bf16 %v14017_v38  ;;  %v2212_v39 = vpack.c.bf16 %v2145_v5, %v2144_v33  ;;  %v11539_v47 = vunpack.i.h.bf16 %v14115_v62 }
 0x230   :  { %v2192_v23 = vsel %vm2135_vm7, %v2176_v16, %v11568_v35  ;;  %v2193_v0 = vsel %vm2135_vm7, %v2177_v8, %v11569_v32  ;;  %v11538_v46 = vunpack.i.l.bf16 %v14115_v62  ;;  %v11544_v54 = vunpack.i.h.bf16 %v14068_v6 }
 0x231   :  { %2413 = vmatmul.mubr.bf16.gmra.mrb[12].mxu0 %v2209_v31  ;;  %v11572_v34 = vpop.permute.xlu0 %11571  ;;  %v2213_v63 = vpack.c.bf16 %v2193_v0, %v2192_v23  ;;  %v11543_v31 = vunpack.i.l.bf16 %v14068_v6 }
 0x232   :  { %v14130_v30 = vpop.permute.xlu1 %11546  ;;  %v11574_v14 = vunpack.i.h.bf16 %v11572_v34  ;;  %v11573_v55 = vunpack.i.l.bf16 %v11572_v34 }
 0x233   :  { %2420 = vmatprep.mubr.bf16.mxu0 %v2213_v63 }
 0x234   :  { %v2163_v9 = vsel %vm1485_vm2, %v13958_v45, %v11574_v14  ;;  %v2162_v53 = vsel %vm1485_vm2, %v13931_v15, %v11573_v55 }
 0x235   :  { %v11587_v13 = vpop.permute.xlu0 %11586  ;;  %v2178_v42 = vsel %vm2118_vm6, %v2162_v53, %v11468_v11  ;;  %v2179_v45 = vsel %vm2118_vm6, %v2163_v9, %v11469_v37  ;;  %v11549_v9 = vunpack.i.h.bf16 %v14130_v30  ;;  %v11548_v53 = vunpack.i.l.bf16 %v14130_v30 }
 0x236   :  { %v11577_v1 = vpop.permute.xlu1 %11576  ;;  %v11589_v36 = vunpack.i.h.bf16 %v11587_v13  ;;  %v11588_v28 = vunpack.i.l.bf16 %v11587_v13 }
 0x237   :  { %v11579_v26 = vunpack.i.h.bf16 %v11577_v1  ;;  %v11578_v43 = vunpack.i.l.bf16 %v11577_v1 }
 0x238   :  { %v2194_v15 = vsel %vm2135_vm7, %v2178_v42, %v11588_v28  ;;  %v2195_v27 = vsel %vm2135_vm7, %v2179_v45, %v11589_v36  ;;  %v11554_v36 = vunpack.i.h.bf16 %v14072_v49  ;;  %v11553_v28 = vunpack.i.l.bf16 %v14072_v49 }
 0x239   :  { %2421 = vmatmul.mubr.bf16.gmra.mrb[16].mxu0 %v2212_v39  ;;  %v11592_v12 = vpop.permute.xlu0 %11591  ;;  %v2216_v4 = vpack.c.bf16 %v2195_v27, %v2194_v15  ;;  %v2113_v19 = vsel %vm1485_vm2, %v13674_v18, %v11579_v26  ;;  %v2112_v58 = vsel %vm1485_vm2, %v13685_v56, %v11578_v43 }
 0x23a   :  { %v11582_v3 = vpop.permute.xlu1 %11581  ;;  %v11594_v38 = vunpack.i.h.bf16 %v11592_v12  ;;  %v11593_v20 = vunpack.i.l.bf16 %v11592_v12 }
 0x23b   :  { %v11584_v22 = vunpack.i.h.bf16 %v11582_v3  ;;  %v11583_v51 = vunpack.i.l.bf16 %v11582_v3  ;;  %2428 = vmatprep.mubr.bf16.mxu0 %v2216_v4 }
 0x23c   :  { %v2165_v32 = vsel %vm1485_vm2, %v13978_v10, %v11594_v38  ;;  %v2164_v35 = vsel %vm1485_vm2, %v13953_v21, %v11593_v20 }
 0x23d   :  { %v2129_v62 = vsel %vm2118_vm6, %v2112_v58, %v11583_v51  ;;  %v2130_v16 = vsel %vm2118_vm6, %v2113_v19, %v11584_v22  ;;  %v11607_v8 = vpop.permute.xlu0 %11606  ;;  %v2180_v0 = vsel %vm2118_vm6, %v2164_v35, %v11543_v31  ;;  %v2181_v21 = vsel %vm2118_vm6, %v2165_v32, %v11544_v54 }
 0x23e   :  { %v11597_v25 = vpop.permute.xlu1 %11596  ;;  %v2146_v18 = vsel %vm2135_vm7, %v2129_v62, %v11538_v46  ;;  %v2147_v56 = vsel %vm2135_vm7, %v2130_v16, %v11539_v47  ;;  %v11609_v2 = vunpack.i.h.bf16 %v11607_v8  ;;  %v11608_v23 = vunpack.i.l.bf16 %v11607_v8 }
 0x23f   :  { %v2215_v10 = vpack.c.bf16 %v2147_v56, %v2146_v18  ;;  %v11599_v34 = vunpack.i.h.bf16 %v11597_v25  ;;  %v11598_v63 = vunpack.i.l.bf16 %v11597_v25 }
 0x240   :  { %v2196_v6 = vsel %vm2135_vm7, %v2180_v0, %v11608_v23  ;;  %v2197_v29 = vsel %vm2135_vm7, %v2181_v21, %v11609_v2 }
 0x241   :  { %2429 = vmatmul.mubr.bf16.gmra.mrb[20].mxu0 %v2215_v10  ;;  %v11612_v61 = vpop.permute.xlu0 %11611  ;;  %v2219_v14 = vpack.c.bf16 %v2197_v29, %v2196_v6  ;;  %v2115_v37 = vsel %vm1485_vm2, %v13714_v48, %v11599_v34  ;;  %v2114_v11 = vsel %vm1485_vm2, %v13712_v50, %v11598_v63  ;;  %v12461_v34 = vmov 1983009808  }
 0x242   :  { %v11602_v55 = vpop.permute.xlu1 %11601  ;;  %v11614_v59 = vunpack.i.h.bf16 %v11612_v61  ;;  %v11613_v17 = vunpack.i.l.bf16 %v11612_v61  ;;  %v2662_v63 = vunpack.c.l.s4 %v12461_v34 }
 0x243   :  { %v11604_v33 = vunpack.i.h.bf16 %v11602_v55  ;;  %v11603_v5 = vunpack.i.l.bf16 %v11602_v55  ;;  %2436 = vmatprep.mubr.bf16.mxu0 %v2219_v14  ;;  %v14221_v55 = vld [vmem:[%s16669_s30] ss:$0 sm:$0xff] }
 0x244   :  { %v2167_v13 = vsel %vm1485_vm2, %v13991_v7, %v11614_v59  ;;  %v2166_v1 = vsel %vm1485_vm2, %v13973_v40, %v11613_v17  ;;  %v2663_v17 = vunpack.c.0.s8 %v2662_v63 }
 0x245   :  { %v2131_v30 = vsel %vm2118_vm6, %v2114_v11, %v11603_v5  ;;  %v2132_v39 = vsel %vm2118_vm6, %v2115_v37, %v11604_v33  ;;  %v11627_v42 = vpop.permute.xlu0 %11626  ;;  %v2182_v15 = vsel %vm2118_vm6, %v2166_v1, %v11553_v28  ;;  %v2183_v40 = vsel %vm2118_vm6, %v2167_v13, %v11554_v36  ;;  %v14227_v33 = vld [vmem:[%s16670_s28] ss:$0 sm:$0xff]  ;;  %v16671_v11 = vld [vmem:[#allocation14_spill] sm:$0xff] }
 0x246   :  { %v11617_v45 = vpop.permute.xlu1 %11616  ;;  %v2148_v48 = vsel %vm2135_vm7, %v2131_v30, %v11548_v53  ;;  %v2149_v50 = vsel %vm2135_vm7, %v2132_v39, %v11549_v9  ;;  %v11629_v26 = vunpack.i.h.bf16 %v11627_v42  ;;  %v11628_v43 = vunpack.i.l.bf16 %v11627_v42 }
 0x247   :  { %v2218_v7 = vpack.c.bf16 %v2149_v50, %v2148_v48  ;;  %v11619_v3 = vunpack.i.h.bf16 %v11617_v45  ;;  %v11618_v38 = vunpack.i.l.bf16 %v11617_v45  ;;  %v14232_v13 = vsub.s32 %v2663_v17, %v16671_v11 }
 0x248   :  { %v2198_v27 = vsel %vm2135_vm7, %v2182_v15, %v11628_v43  ;;  %v2199_v49 = vsel %vm2135_vm7, %v2183_v40, %v11629_v26 }
 0x249   :  { %2437 = vmatmul.mubr.bf16.gmra.mrb[24].mxu0 %v2218_v7  ;;  %v2222_v12 = vpack.c.bf16 %v2199_v49, %v2198_v27  ;;  %v2117_v22 = vsel %vm1485_vm2, %v13794_v57, %v11619_v3  ;;  %v2116_v51 = vsel %vm1485_vm2, %v13753_v52, %v11618_v38 }
 0x24a   :  { %v11622_v4 = vpop.permute.xlu1 %11621 }
 0x24b   :  { %2444 = vmatprep.mubr.bf16.mxu0 %v2222_v12  ;;  %v11624_v20 = vunpack.i.h.bf16 %v11622_v4  ;;  %v11623_v47 = vunpack.i.l.bf16 %v11622_v4 }
 0x24d   :  { %v2133_v32 = vsel %vm2118_vm6, %v2116_v51, %v11623_v47  ;;  %v2134_v35 = vsel %vm2118_vm6, %v2117_v22, %v11624_v20 }
 0x24e   :  { %v11632_v46 = vpop.permute.xlu1 %11631 }
 0x24f   :  { %v11634_v19 = vunpack.i.h.bf16 %v11632_v46  ;;  %v11633_v58 = vunpack.i.l.bf16 %v11632_v46 }
 0x251   :  { %v2150_v54 = vsel %vm2135_vm7, %v2133_v32, %v11633_v58  ;;  %v2151_v31 = vsel %vm2135_vm7, %v2134_v35, %v11634_v19 }
 0x252   :  { %v2221_v62 = vpack.c.bf16 %v2151_v31, %v2150_v54 }
 0x254   :  { %2445 = vmatmul.mubr.bf16.gmra.mrb[28].mxu0 %v2221_v62 }
 0x257   :  { %v14194_v16 = vpop.f32.mrb[4].mxu1 }
 0x258   :  { %v14196_v8 = vpop.f32.mrb[5].mxu1 }
 0x259   :  { %v14198_v57 = vpop.f32.mrb[6].mxu1 }
 0x25a   :  { %v14200_v25 = vpop.f32.mrb[7].mxu1 }
 0x263   :  { %v14202_v52 = vpop.f32.mrb[8].mxu1 }
 0x264   :  { %v14204_v18 = vpop.f32.mrb[9].mxu1 }
 0x265   :  { %v14206_v56 = vpop.f32.mrb[10].mxu1 }
 0x266   :  { %v14208_v2 = vpop.f32.mrb[11].mxu1 }
 0x274   :  { %v14210_v23 = vpop.f32.mrb[12].mxu1 }
 0x275   :  { %v14212_v10 = vpop.f32.mrb[13].mxu1 }
 0x276   :  { %v14214_v0 = vpop.f32.mrb[14].mxu1 }
 0x277   :  { %v14216_v21 = vpop.f32.mrb[15].mxu1 }
 0x2df   :  { %v11057_v6 = vpop.f32.mrb[0].mxu0 }
 0x2e0   :  { %v11058_v29 = vpop.f32.mrb[1].mxu0 }
 0x2e1   :  { %v11059_v61 = vadd.f32 %v11058_v29, %v11057_v6  ;;  %v11060_v14 = vpop.f32.mrb[2].mxu0 }
 0x2e2   :  { %v11061_v59 = vpop.f32.mrb[3].mxu0 }
 0x2e3   :  { %v2488_v9 = vadd.f32 %v11059_v61, %v14095_v60  ;;  %v11062_v53 = vadd.f32 %v11061_v59, %v11060_v14 }
 0x2e5   :  { %v2556_v5 = vmul.f32 %v14221_v55, %v2488_v9  ;;  %v2491_v37 = vadd.f32 %v11062_v53, %v14103_v41 }
 0x2e7   :  { %v2578_v1 = vadd.f32 %v14227_v33, %v2556_v5  ;;  %v2557_v36 = vmul.f32 %v14221_v55, %v2491_v37 }
 0x2e9   :  { %v2594_v28 = vmax.f32 %v2578_v1, 0.0  ;;  %v2579_v60 = vadd.f32 %v14227_v33, %v2557_v36 }
 0x2eb   :  { %v2660_v30 = vcombine.high %v2594_v28, %v2594_v28  ;;  %v2667_v39 = vrot.slane %v2594_v28, %v14232_v13  ;;  %v2595_v42 = vmax.f32 %v2579_v60, 0.0 }
 0x2ed   :  { %v2674_v41 = vrot.slane %v2660_v30, %v14232_v13  ;;  %v2675_v45 = vcombine.high %v2667_v39, %v2667_v39  ;;  %v2676_v48 = vcombine.high %v2595_v42, %v2595_v42  ;;  %v14240_v50 = vrot.slane %v2595_v42, %v14232_v13 }
 0x2ee   :  { %v10374_v46 = vrot.slane %v2667_v39, 9 }
 0x2ef   :  { %v3103_v26 = vcombine.low %v2667_v39, %v2675_v45  ;;  %v3445_v43 = vcombine.low %v2675_v45, %v2674_v41  ;;  %v10390_v7 = vcombine.high %v2674_v41, %v14240_v50  ;;  %v14245_v15 = vcombine.high %v14240_v50, %v14240_v50 }
 0x2f0   :  { %v2852_v40 = vcombine.high %v2674_v41, %v2674_v41  ;;  %v2873_v27 = vrot.slane %v2675_v45, 7  ;;  %v2876_v49 = vrot.slane %v2674_v41, 7  ;;  %v14248_v12 = vrot.slane %v2676_v48, %v14232_v13 }
 0x2f1   :  { %v14251_v4 = vrot.slane %v3445_v43, %v14232_v13  ;;  %v14254_v3 = vrot.slane %v10390_v7, %v14232_v13  ;;  %v10375_v32 = vrot.slane %v14240_v50, 9  ;;  %v2883_v35 = vrot.slane %v14245_v15, 7 }
 0x2f2   :  { %v2875_v20 = vrot.slane %v2873_v27, 2  ;;  %v2878_v22 = vrot.slane %v2876_v49, 2  ;;  %v2879_v51 = vrot.slane %v2852_v40, 7  ;;  %v2874_v31 = vsel %vm14256_vm14, %v10374_v46, %v2873_v27 }
 0x2f3   :  { %v3461_v47 = vcombine.low %v14251_v4, %v14254_v3  ;;  %v2886_v34 = vrot.slane %v14248_v12, 7  ;;  %v14273_v29 = vsel %vm14256_vm14, %v10375_v32, %v2883_v35  ;;  %v2885_v61 = vrot.slane %v2883_v35, 2 }
 0x2f4   :  { %v11063_v19 = vpop.f32.mrb[4].mxu0  ;;  %v2877_v58 = vsel %vm14256_vm14, %v2875_v20, %v2876_v49  ;;  %v2880_v62 = vsel %vm14256_vm14, %v2878_v22, %v2879_v51  ;;  %16674 = vst [vmem:[#allocation23_spill] sm:$0xff] %v14273_v29  ;;  %v3104_v9 = vcombine.low %v2674_v41, %v14240_v50  ;;  %v14278_v53 = vrot.slane %v3103_v26, %v14232_v13 }
 0x2f5   :  { %v11064_v54 = vpop.f32.mrb[5].mxu0  ;;  %v3265_v14 = vcombine.low %v2874_v31, %v2877_v58  ;;  %v3266_v17 = vcombine.low %v2880_v62, %v14273_v29  ;;  %v14283_v11 = vsel %vm14256_vm14, %v2885_v61, %v2886_v34  ;;  %v2853_v36 = vcombine.high %v14248_v12, %v14248_v12  ;;  %v11891_v29 = vld [vmem:[%s16681_s16 + $0x30] sm:$0xff]  }
 0x2f6   :  { %v11065_v63 = vadd.f32 %v11064_v54, %v11063_v19  ;;  %v11066_v6 = vpop.f32.mrb[6].mxu0  ;;  %16675 = vst [vmem:[#allocation14_spill] sm:$0xff] %v14278_v53  ;;  %16676 = vst [vmem:[#allocation24_spill] sm:$0xff] %v14283_v11  ;;  %v14292_v30 = vrot.slane %v3104_v9, %v14232_v13  ;;  %v3120_v40 = vcombine.low %v14245_v15, %v14248_v12  ;;  %v2888_v27 = vrot.slane %v2886_v34, 2 }
 0x2f7   :  { %v11067_v59 = vpop.f32.mrb[7].mxu0  ;;  %v3273_v1 = vrot.slane %v3265_v14, %v14232_v13  ;;  %v3280_v28 = vrot.slane %v3266_v17, %v14232_v13  ;;  %v3462_v7 = vcombine.low %v14248_v12, %v2853_v36  ;;  %v2889_v49 = vrot.slane %v2853_v36, 7 }
 0x2f8   :  { %v2496_v5 = vadd.f32 %v14092_v44, %v11065_v63  ;;  %v11068_v37 = vadd.f32 %v11067_v59, %v11066_v6  ;;  %16677 = vst [vmem:[#allocation25_spill] sm:$0xff] %v14292_v30  ;;  %v3625_v19 = vcombine.low %v14240_v50, %v14245_v15  ;;  %v14314_v34 = vrot.slane %v3120_v40, %v14232_v13 }
 0x2f9   :  { %v14296_v42 = vcombine.low %v3273_v1, %v3280_v28  ;;  %v3470_v62 = vrot.slane %v3462_v7, %v14232_v13  ;;  %v14318_v63 = vsel %vm14256_vm14, %v2888_v27, %v2889_v49 }
 0x2fa   :  { %v2558_v44 = vmul.f32 %v14221_v55, %v2496_v5  ;;  %v2499_v39 = vadd.f32 %v14099_v24, %v11068_v37  ;;  %16678 = vst [vmem:[#allocation26_spill] sm:$0xff] %v14314_v34  ;;  %v3282_v7 = vcombine.low %v14283_v11, %v14318_v63 }
 0x2fc   :  { %v2580_v45 = vadd.f32 %v14227_v33, %v2558_v44  ;;  %v2559_v48 = vmul.f32 %v14221_v55, %v2499_v39  ;;  %v11069_v26 = vpop.f32.mrb[8].mxu0 }
 0x2fd   :  { %v11070_v43 = vpop.f32.mrb[9].mxu0 }
 0x2fe   :  { %v2596_v20 = vmax.f32 %v2580_v45, 0.0  ;;  %v2581_v24 = vadd.f32 %v14227_v33, %v2559_v48  ;;  %v11071_v46 = vadd.f32 %v11070_v43, %v11069_v26  ;;  %v11072_v22 = vpop.f32.mrb[10].mxu0 }
 0x2ff   :  { %v11073_v51 = vpop.f32.mrb[11].mxu0 }
 0x300   :  { %v2692_v58 = vcombine.high %v2596_v20, %v2596_v20  ;;  %v14309_v32 = vrot.slane %v2596_v20, %v14232_v13  ;;  %v2597_v35 = vmax.f32 %v2581_v24, 0.0  ;;  %v2504_v54 = vadd.f32 %v11071_v46, %v14196_v8 }
 0x301   :  { %v11074_v31 = vadd.f32 %v11073_v51, %v11072_v22 }
 0x302   :  { %v14321_v6 = vrot.slane %v2692_v58, %v14232_v13  ;;  %v2708_v50 = vcombine.high %v2597_v35, %v2597_v35  ;;  %v14324_v15 = vrot.slane %v2597_v35, %v14232_v13  ;;  %v2560_v61 = vmul.f32 %v14221_v55, %v2504_v54 }
 0x303   :  { %v2507_v8 = vadd.f32 %v11074_v31, %v14200_v25  ;;  %v14330_v14 = vcombine.high %v14309_v32, %v14309_v32  ;;  %v10396_v59 = vcombine.high %v14248_v12, %v14309_v32  ;;  %v3626_v17 = vcombine.low %v14248_v12, %v14309_v32 }
 0x304   :  { %v14337_v9 = vrot.slane %v2708_v50, %v14232_v13  ;;  %v2582_v5 = vadd.f32 %v14227_v33, %v2560_v61  ;;  %v11075_v37 = vpop.f32.mrb[12].mxu0  ;;  %v14342_v1 = vcombine.high %v14324_v15, %v14324_v15  ;;  %v14346_v25 = vcombine.high %v14321_v6, %v14321_v6 }
 0x305   :  { %v2561_v36 = vmul.f32 %v14221_v55, %v2507_v8  ;;  %v11076_v28 = vpop.f32.mrb[13].mxu0  ;;  %v3463_v12 = vcombine.low %v14330_v14, %v14321_v6  ;;  %v3121_v44 = vcombine.low %v14309_v32, %v14330_v14  ;;  %v3942_v39 = vrot.slane %v10396_v59, %v14232_v13 }
 0x306   :  { %v14354_v45 = vmax.f32 %v2582_v5, 0.0  ;;  %v11077_v48 = vadd.f32 %v11076_v28, %v11075_v37  ;;  %v11078_v26 = vpop.f32.mrb[14].mxu0  ;;  %v3138_v43 = vcombine.low %v14342_v1, %v14337_v9  ;;  %v3633_v58 = vrot.slane %v3625_v19, %v14232_v13  ;;  %v11878_v19 = vld [vmem:[%s16681_s16 + $0x40] sm:$0xff]   ;;  %v11880_v28 = vld [vmem:[%s16681_s16 + $0x48] sm:$0xff]  }
 0x307   :  { %v2583_v40 = vadd.f32 %v14227_v33, %v2561_v36  ;;  %v11079_v27 = vpop.f32.mrb[15].mxu0  ;;  %v14362_v49 = vrot.slane %v3463_v12, %v14232_v13  ;;  %v14365_v20 = vrot.slane %v3121_v44, %v14232_v13  ;;  %v3943_v24 = vcombine.low %v14314_v34, %v3942_v39  ;;  %11115 = vmatprep.subr.bf16.mxu1 %v11878_v19 }
 0x308   :  { %v14370_v46 = vrot.slane %v14354_v45, %v14232_v13  ;;  %v2512_v22 = vadd.f32 %v14194_v16, %v11077_v48  ;;  %v11080_v51 = vadd.f32 %v11079_v27, %v11078_v26  ;;  %v14378_v31 = vrot.slane %v3138_v43, %v14232_v13 }
 0x309   :  { %16679 = vst [vmem:[#allocation27_spill] sm:$0xff] %v14365_v20  ;;  %v14374_v35 = vmax.f32 %v2583_v40, 0.0  ;;  %v3478_v54 = vcombine.low %v3470_v62, %v14362_v49  ;;  %v3944_v50 = vcombine.low %v14321_v6, %v14346_v25  ;;  %v14387_v59 = vrot.slane %v3282_v7, %v14232_v13  ;;  %v11879_v62 = vld [vmem:[%s16681_s16] sm:$0xff]  }
 0x30a   :  { %16680 = vst [vmem:[#allocation28_spill] sm:$0xff] %v14378_v31  ;;  %v2562_v61 = vmul.f32 %v14221_v55, %v2512_v22  ;;  %v2515_v8 = vadd.f32 %v14198_v57, %v11080_v51  ;;  %v2724_v5 = vcombine.high %v14354_v45, %v14354_v45  ;;  %v2899_v37 = vrot.slane %v14346_v25, 7  ;;  %11116 = vmatpush3.bf16.msra.mxu1 %v11879_v62  ;;  %v11881_v51 = vld [vmem:[%s16681_s16 + $0x8] sm:$0xff]  }
 0x30b   :  { %v11635_v57 = vpack.i.bf16 %v3478_v54, %v3461_v47  ;;  %v3951_v36 = vrot.slane %v3944_v50, %v14232_v13  ;;  %v3640_v39 = vrot.slane %v3626_v17, %v14232_v13  ;;  %v3642_v45 = vcombine.low %v14324_v15, %v14342_v1  ;;  %11117 = vmatprep.subr.bf16.mxu1 %v11880_v28 }
 0x30c   :  { %v2584_v12 = vadd.f32 %v14227_v33, %v2562_v61  ;;  %v2563_v44 = vmul.f32 %v14221_v55, %v2515_v8  ;;  %v11081_v48 = vpop.f32.mrb[16].mxu0  ;;  %v2740_v4 = vcombine.high %v14374_v35, %v14374_v35  ;;  %v14416_v26 = vcombine.high %v14370_v46, %v14370_v46 }
 0x30d   :  { %11636 = vrot.lane.b32.xlu1 %v11635_v57, %s12459_s25  ;;  %v3952_v3 = vcombine.low %v3951_v36, %v14378_v31  ;;  %v11082_v47 = vpop.f32.mrb[17].mxu0  ;;  %v3137_v17 = vcombine.low %v14321_v6, %v14324_v15  ;;  %v3641_v40 = vcombine.low %v3633_v58, %v3640_v39  ;;  %v3649_v27 = vrot.slane %v3642_v45, %v14232_v13  ;;  %v11882_v58 = vld [vmem:[%s16681_s16 + $0x50] sm:$0xff]  }
 0x30e   :  { %v2600_v43 = vmax.f32 %v2584_v12, 0.0  ;;  %v2585_v7 = vadd.f32 %v14227_v33, %v2563_v44  ;;  %v11084_v22 = vpop.f32.mrb[18].mxu0  ;;  %v11083_v50 = vadd.f32 %v11082_v47, %v11081_v48  ;;  %v3154_v19 = vcombine.low %v14370_v46, %v14416_v26  ;;  %11118 = vmatpush3.bf16.msra.mxu1 %v11881_v51 }
 0x30f   :  { %v11640_v54 = vpack.i.bf16 %v3952_v3, %v3943_v24  ;;  %v11085_v61 = vpop.f32.mrb[19].mxu0  ;;  %v14426_v8 = vrot.slane %v3137_v17, %v14232_v13  ;;  %v3650_v24 = vcombine.low %v14362_v49, %v3649_v27  ;;  %v14445_v45 = vrot.slane %v2724_v5, %v14232_v13  ;;  %11119 = vmatprep.subr.bf16.mxu1 %v11882_v58 }
 0x310   :  { %v2993_v57 = vcombine.high %v2600_v43, %v2600_v43  ;;  %v14434_v62 = vrot.slane %v2600_v43, %v14232_v13  ;;  %v2601_v36 = vmax.f32 %v2585_v7, 0.0  ;;  %v2520_v12 = vadd.f32 %v11083_v50, %v14204_v18  ;;  %v11883_v18 = vld [vmem:[%s16681_s16 + $0x10] sm:$0xff]  }
 0x311   :  { %16682 = vst [vmem:[#allocation29_spill] sm:$0xff] %v14426_v8  ;;  %11641 = vrot.lane.b32.xlu0 %v11640_v54, %s12453_s8  ;;  %v11086_v44 = vadd.f32 %v11085_v61, %v11084_v22  ;;  %v14440_v39 = vrot.slane %v3154_v19, %v14232_v13  ;;  %v4067_v28 = vcombine.low %v14365_v20, %v14426_v8  ;;  %v10376_v58 = vrot.slane %v14309_v32, 9 }
 0x312   :  { %v14449_v48 = vrot.slane %v14374_v35, %v14232_v13  ;;  %v3049_v3 = vcombine.high %v2601_v36, %v2601_v36  ;;  %v14452_v47 = vrot.slane %v2601_v36, %v14232_v13  ;;  %v11645_v17 = vpack.i.bf16 %v3650_v24, %v3641_v40  ;;  %v11884_v35 = vld [vmem:[%s16681_s16 + $0x58] sm:$0xff]   ;;  %11120 = vmatpush3.bf16.msra.mxu1 %v11883_v18  ;;  %v11886_v18 = vld [vmem:[%s16681_s16 + $0x60] sm:$0xff]  }
 0x313   :  { %16683 = vst [vmem:[#allocation30_spill] sm:$0xff] %v14440_v39  ;;  %v2564_v43 = vmul.f32 %v14221_v55, %v2520_v12  ;;  %v2523_v7 = vadd.f32 %v11086_v44, %v14208_v2  ;;  %v4068_v5 = vcombine.low %v14378_v31, %v14440_v39  ;;  %v14465_v27 = vrot.slane %v2740_v4, %v14232_v13  ;;  %v11885_v44 = vld [vmem:[%s16681_s16 + $0x18] sm:$0xff]  }
 0x314   :  { %16684 = vst [vmem:[#allocation31_spill] sm:$0xff] %v14452_v47  ;;  %v14468_v22 = vrot.slane %v2993_v57, %v14232_v13  ;;  %v14472_v40 = vcombine.high %v14434_v62, %v14434_v62  ;;  %v14476_v51 = vpop.f32.mrb[20].mxu0  ;;  %v14479_v54 = vrot.slane %v3049_v3, %v14232_v13  ;;  %11646 = vrot.lane.b32.xlu1 %v11645_v17, %s12460_s4  ;;  %v2893_v57 = vrot.slane %v14330_v14, 7 }
 0x315   :  { %v2586_v4 = vadd.f32 %v14227_v33, %v2564_v43  ;;  %v2565_v50 = vmul.f32 %v14221_v55, %v2523_v7  ;;  %v11655_v61 = vpack.i.bf16 %v4068_v5, %v4067_v28  ;;  %v14484_v19 = vpop.f32.mrb[21].mxu0  ;;  %v2896_v36 = vrot.slane %v14321_v6, 7  ;;  %11121 = vmatprep.subr.bf16.mxu1 %v11884_v35 }
 0x316   :  { %16685 = vst [vmem:[#allocation32_spill] sm:$0xff] %v14468_v22  ;;  %v14491_v24 = vcombine.high %v14337_v9, %v14337_v9  ;;  %v14493_v12 = vpop.f32.mrb[22].mxu0  ;;  %v14500_v28 = vcombine.high %v14452_v47, %v14452_v47  ;;  %v10391_v3 = vcombine.high %v14321_v6, %v14324_v15  ;;  %v14513_v43 = vsel %vm14256_vm14, %v10376_v58, %v2893_v57 }
 0x317   :  { %v2602_v32 = vmax.f32 %v2586_v4, 0.0  ;;  %v2587_v14 = vadd.f32 %v14227_v33, %v2565_v50  ;;  %11656 = vrot.lane.b32.xlu0 %v11655_v61, %s12459_s25  ;;  %v14506_v17 = vpop.f32.mrb[23].mxu0  ;;  %v2895_v7 = vrot.slane %v2893_v57, 2  ;;  %v2898_v5 = vrot.slane %v2896_v36, 2  ;;  %11122 = vmatpush3.bf16.msra.mxu1 %v11885_v44  ;;  %v11888_v44 = vld [vmem:[%s16681_s16 + $0x68] sm:$0xff]  }
 0x318   :  { %v3496_v4 = vcombine.low %v14416_v26, %v14445_v45  ;;  %v3480_v57 = vcombine.low %v14337_v9, %v14491_v24  ;;  %11123 = vmatprep.subr.bf16.mxu1 %v11886_v18  ;;  %v10377_v53 = vrot.slane %v14324_v15, 9  ;;  %v2913_v34 = vrot.slane %v14416_v26, 7 }
 0x319   :  { %v2756_v50 = vcombine.high %v2602_v32, %v2602_v32  ;;  %v14518_v61 = vrot.slane %v2602_v32, %v14232_v13  ;;  %v14520_v6 = vmax.f32 %v2587_v14, 0.0  ;;  %v14526_v2 = vsel %vm14256_vm14, %v2895_v7, %v2896_v36  ;;  %v11887_v14 = vld [vmem:[%s16681_s16 + $0x20] sm:$0xff]  }
 0x31a   :  { %16687 = vst [vmem:[#allocation34_spill] sm:$0xff] %v14526_v2  ;;  %v14532_v58 = vsel %vm14256_vm14, %v2898_v5, %v2899_v37  ;;  %v3487_v32 = vrot.slane %v10391_v3, %v14232_v13  ;;  %v14542_v36 = vcombine.high %v14479_v54, %v14479_v54  ;;  %v2909_v7 = vrot.slane %v14491_v24, 7 }
 0x31b   :  { %16686 = vst [vmem:[#allocation33_spill] sm:$0xff] %v14518_v61  ;;  %16688 = vst [vmem:[#allocation35_spill] sm:$0xff] %v14532_v58  ;;  %v14547_v37 = vcombine.high %v14518_v61, %v14518_v61  ;;  %v14554_v3 = vrot.slane %v2756_v50, %v14232_v13  ;;  %v3283_v41 = vcombine.low %v14513_v43, %v14526_v2  ;;  %11124 = vmatpush3.bf16.msra.mxu1 %v11887_v14 }
 0x31c   :  { %v14561_v60 = vpop.f32.mrb[24].mxu0  ;;  %v3494_v25 = vrot.slane %v3480_v57, %v14232_v13  ;;  %v10392_v50 = vcombine.high %v14445_v45, %v14449_v48  ;;  %v14574_v35 = vrot.slane %v14520_v6, %v14232_v13  ;;  %v14580_v31 = vrot.slane %v3496_v4, %v14232_v13  ;;  %v11889_v57 = vld [vmem:[%s16681_s16 + $0x28] sm:$0xff]   ;;  %11125 = vmatprep.subr.bf16.mxu1 %v11888_v44 }
 0x31d   :  { %16689 = vst [vmem:[#allocation36_spill] sm:$0xff] %v14547_v37  ;;  %v14570_v5 = vpop.f32.mrb[25].mxu0  ;;  %v14577_v16 = vrot.slane %v3283_v41, %v14232_v13  ;;  %v4235_v24 = vcombine.low %v14362_v49, %v3487_v32  ;;  %v2903_v41 = vrot.slane %v14342_v1, 7  ;;  %v11890_v49 = vld [vmem:[%s16681_s16 + $0x70] sm:$0xff]  }
 0x31e   :  { %v14583_v18 = vpop.f32.mrb[26].mxu0  ;;  %v3495_v8 = vcombine.low %v3487_v32, %v3494_v25  ;;  %v14589_v30 = vrot.slane %v10392_v50, %v14232_v13  ;;  %v4236_v14 = vcombine.low %v3494_v25, %v14580_v31  ;;  %v2906_v32 = vrot.slane %v14337_v9, 7 }
 0x31f   :  { %v14593_v20 = vpop.f32.mrb[27].mxu0  ;;  %v3298_v4 = vcombine.low %v14387_v59, %v14577_v16  ;;  %v10378_v50 = vrot.slane %v14370_v46, 9  ;;  %v14607_v1 = vsel %vm14256_vm14, %v10377_v53, %v2903_v41  ;;  %v2905_v44 = vrot.slane %v2903_v41, 2  ;;  %11126 = vmatpush3.bf16.msra.mxu1 %v11889_v57 }
 0x320   :  { %16690 = vst [vmem:[#allocation37_spill] sm:$0xff] %v14589_v30  ;;  %v3512_v15 = vcombine.low %v14580_v31, %v14589_v30  ;;  %16691 = vst [vmem:[#allocation38_spill] sm:$0xff] %v14607_v1  ;;  %v14611_v11 = vpack.c.bf16 %v4236_v14, %v4235_v24  ;;  %v2908_v59 = vrot.slane %v2906_v32, 2  ;;  %v2916_v25 = vrot.slane %v14445_v45, 7  ;;  %11127 = vmatprep.subr.bf16.mxu1 %v11890_v49  ;;  %v11892_v24 = vld [vmem:[%s16681_s16 + $0x78] sm:$0xff]  }
 0x321   :  { %v11650_v2 = vpack.i.bf16 %v3298_v4, %v14296_v42  ;;  %v14619_v53 = vsel %vm14256_vm14, %v2905_v44, %v2906_v32  ;;  %v14623_v26 = vsel %vm14256_vm14, %v10378_v50, %v2913_v34  ;;  %v2915_v42 = vrot.slane %v2913_v34, 2 }
 0x322   :  { %16692 = vst [vmem:[#allocation39_spill] sm:$0xff] %v14611_v11  ;;  %v11660_v30 = vpack.i.bf16 %v3512_v15, %v3495_v8  ;;  %16693 = vst [vmem:[#allocation40_spill] sm:$0xff] %v14619_v53  ;;  %v14631_v57 = vsel %vm14256_vm14, %v2908_v59, %v2909_v7  ;;  %v3299_v8 = vcombine.low %v14532_v58, %v14607_v1  ;;  %v2918_v59 = vrot.slane %v2916_v25, 2 }
 0x323   :  { %16694 = vst [vmem:[#allocation41_spill] sm:$0xff] %v14623_v26  ;;  %11651 = vrot.lane.b32.xlu1 %v11650_v2, %s12453_s8  ;;  %16695 = vst [vmem:[#allocation42_spill] sm:$0xff] %v14631_v57  ;;  %v11089_v34 = vadd.f32 %v14484_v19, %v14476_v51  ;;  %v14641_v49 = vsel %vm14256_vm14, %v2915_v42, %v2916_v25  ;;  %v3300_v2 = vcombine.low %v14619_v53, %v14631_v57 }
 0x324   :  { %v11092_v4 = vadd.f32 %v14506_v17, %v14493_v12  ;;  %v14650_v14 = vrot.slane %v3299_v8, %v14232_v13  ;;  %v3316_v32 = vcombine.low %v14623_v26, %v14641_v49  ;;  %v14657_v19 = vcombine.high %v14449_v48, %v14449_v48  ;;  %11128 = vmatpush3.bf16.msra.mxu1 %v11891_v29 }
 0x325   :  { %v2528_v51 = vadd.f32 %v14202_v52, %v11089_v34  ;;  %v14660_v50 = vrot.slane %v3300_v2, %v14232_v13  ;;  %v14665_v12 = vcombine.high %v14445_v45, %v14445_v45  ;;  %v14669_v17 = vcombine.high %v14465_v27, %v14465_v27  ;;  %11129 = vmatprep.subr.bf16.mxu1 %v11892_v24 }
 0x326   :  { %v2531_v15 = vadd.f32 %v14206_v56, %v11092_v4  ;;  %v3324_v52 = vrot.slane %v3316_v32, %v14232_v13  ;;  %v4151_v29 = vcombine.low %v14577_v16, %v14650_v14  ;;  %v10379_v2 = vrot.slane %v14449_v48, 9 }
 0x327   :  { %v14671_v44 = vpop.f32.mrb[28].mxu0  ;;  %11661 = vrot.lane.b32.xlu1 %v11660_v30, %s12459_s25  ;;  %v2566_v56 = vmul.f32 %v14221_v55, %v2528_v51  ;;  %v2919_v34 = vrot.slane %v14665_v12, 7  ;;  %v2923_v24 = vrot.slane %v14657_v19, 7  ;;  %v2926_v16 = vrot.slane %v14465_v27, 7 }
 0x328   :  { %v14678_v42 = vpop.f32.mrb[29].mxu0  ;;  %v2567_v8 = vmul.f32 %v14221_v55, %v2531_v15  ;;  %v4152_v30 = vcombine.low %v14660_v50, %v3324_v52  ;;  %v2929_v25 = vrot.slane %v14669_v17, 7  ;;  %v10386_v1 = vrot.slane %v14434_v62, 9 }
 0x329   :  { %v14684_v4 = vpop.f32.mrb[30].mxu0  ;;  %v2588_v32 = vadd.f32 %v14227_v33, %v2566_v56  ;;  %v14695_v7 = vsel %vm14256_vm14, %v2918_v59, %v2919_v34  ;;  %v14699_v41 = vsel %vm14256_vm14, %v10379_v2, %v2923_v24  ;;  %v2925_v11 = vrot.slane %v2923_v24, 2  ;;  %v11893_v56 = vld [vmem:[%s16681_s16 + $0x38] sm:$0xff]  }
 0x32a   :  { %v14690_v51 = vpop.f32.mrb[31].mxu0  ;;  %v2589_v15 = vadd.f32 %v14227_v33, %v2567_v8  ;;  %v11665_v26 = vpack.i.bf16 %v4152_v30, %v4151_v29  ;;  %v2928_v53 = vrot.slane %v2926_v16, 2  ;;  %v3029_v59 = vrot.slane %v14472_v40, 7  ;;  %11130 = vmatpush3.bf16.msra.mxu1 %v11893_v56 }
 0x32b   :  { %v2604_v57 = vmax.f32 %v2588_v32, 0.0  ;;  %v14707_v8 = vsel %vm14256_vm14, %v2925_v11, %v2926_v16  ;;  %v3315_v34 = vcombine.low %v14650_v14, %v14660_v50  ;;  %v3317_v11 = vcombine.low %v14695_v7, %v14699_v41 }
 0x32c   :  { %v2605_v58 = vmax.f32 %v2589_v15, 0.0  ;;  %16696 = vst [vmem:[#allocation43_spill] sm:$0xff] %v14707_v8  ;;  %11666 = vrot.lane.b32.xlu0 %v11665_v26, %s12460_s4  ;;  %v14718_v24 = vsel %vm14256_vm14, %v2928_v53, %v2929_v25  ;;  %v16698_v30 = vcombine.low %v14318_v63, %v14513_v43  ;;  %v14730_v26 = vsel %vm14256_vm14, %v10386_v1, %v3029_v59 }
 0x32d   :  { %v2788_v2 = vcombine.high %v2604_v57, %v2604_v57  ;;  %v14714_v29 = vrot.slane %v2604_v57, %v14232_v13  ;;  %16697 = vst [vmem:[#allocation44_spill] sm:$0xff] %v14718_v24  ;;  %v3333_v57 = vcombine.low %v14707_v8, %v14718_v24  ;;  %v16699_v50 = vmov 0.0  }
 0x32e   :  { %v14726_v32 = vrot.slane %v16698_v30, %v14232_v13  ;;  %v2804_v14 = vcombine.high %v2605_v58, %v2605_v58  ;;  %11308 = vmatprep.subr.bf16.mxu1 %v16699_v50  ;;  %v16700_v53 = vcombine.high %v14520_v6, %v14520_v6  ;;  %v14742_v63 = vrot.slane %v2605_v58, %v14232_v13 }
 0x32f   :  { %v14745_v43 = vrot.slane %v3317_v11, %v14232_v13  ;;  %v14750_v25 = vrot.slane %v2788_v2, %v14232_v13  ;;  %v14753_v15 = vrot.slane %v3333_v57, %v14232_v13  ;;  %v14761_v58 = vcombine.high %v14714_v29, %v14714_v29 }
 0x330   :  { %v14739_v16 = vrot.slane %v16700_v53, %v14232_v13  ;;  %v3171_v30 = vcombine.low %v14657_v19, %v14465_v27  ;;  %v10397_v2 = vcombine.high %v14337_v9, %v14370_v46  ;;  %v14769_v57 = vrot.slane %v2804_v14, %v14232_v13 }
 0x331   :  { %v3332_v11 = vcombine.low %v3324_v52, %v14745_v43  ;;  %v3954_v56 = vcombine.low %v14445_v45, %v14665_v12  ;;  %v10398_v6 = vcombine.high %v14465_v27, %v14434_v62  ;;  %v3651_v24 = vcombine.low %v14337_v9, %v14370_v46 }
 0x332   :  { %v14778_v52 = vrot.slane %v3171_v30, %v14232_v13  ;;  %v3961_v50 = vrot.slane %v10397_v2, %v14232_v13  ;;  %v3660_v53 = vcombine.low %v14449_v48, %v14657_v19  ;;  %v3661_v12 = vcombine.low %v14465_v27, %v14434_v62 }
 0x333   :  { %v11670_v1 = vpack.i.bf16 %v3332_v11, %v3315_v34  ;;  %v3968_v14 = vrot.slane %v3954_v56, %v14232_v13  ;;  %v3977_v8 = vrot.slane %v10398_v6, %v14232_v13  ;;  %v3658_v34 = vrot.slane %v3651_v24, %v14232_v13 }
 0x334   :  { %16701 = vst [vmem:[#allocation45_spill] sm:$0xff] %v14778_v52  ;;  %v11095_v11 = vadd.f32 %v14570_v5, %v14561_v60  ;;  %v3155_v9 = vcombine.low %v14445_v45, %v14449_v48  ;;  %v4070_v46 = vcombine.low %v14434_v62, %v14472_v40  ;;  %v3668_v19 = vrot.slane %v3660_v53, %v14232_v13 }
 0x335   :  { %11671 = vrot.lane.b32.xlu1 %v11670_v1, %s12453_s8  ;;  %v3969_v6 = vcombine.low %v3961_v50, %v3968_v14  ;;  %v3978_v56 = vcombine.low %v14778_v52, %v3977_v8  ;;  %v3675_v30 = vrot.slane %v3661_v12, %v14232_v13  ;;  %v3659_v1 = vcombine.low %v3658_v34, %v14580_v31 }
 0x336   :  { %v2536_v24 = vadd.f32 %v11095_v11, %v14212_v10  ;;  %v14803_v2 = vrot.slane %v3155_v9, %v14232_v13  ;;  %v4071_v60 = vcombine.low %v14468_v22, %v14452_v47  ;;  %v4078_v62 = vrot.slane %v4070_v46, %v14232_v13 }
 0x337   :  { %v11675_v45 = vpack.i.bf16 %v3978_v56, %v3969_v6  ;;  %v3676_v48 = vcombine.low %v3668_v19, %v3675_v30  ;;  %v11098_v5 = vadd.f32 %v14593_v20, %v14583_v18  ;;  %v14820_v12 = vcombine.high %v14468_v22, %v14468_v22 }
 0x338   :  { %16702 = vst [vmem:[#allocation46_spill] sm:$0xff] %v14803_v2  ;;  %v2568_v8 = vmul.f32 %v14221_v55, %v2536_v24  ;;  %v4069_v31 = vcombine.low %v14803_v2, %v14778_v52  ;;  %v4085_v10 = vrot.slane %v4071_v60, %v14232_v13  ;;  %v3031_v20 = vrot.slane %v3029_v59, 2 }
 0x339   :  { %11676 = vrot.lane.b32.xlu0 %v11675_v45, %s12453_s8  ;;  %v11680_v53 = vpack.i.bf16 %v3676_v48, %v3659_v1  ;;  %v2539_v14 = vadd.f32 %v11098_v5, %v14216_v21  ;;  %v3032_v11 = vrot.slane %v14468_v22, 7  ;;  %v3085_v9 = vrot.slane %v14500_v28, 7 }
 0x33a   :  { %v2590_v18 = vadd.f32 %v14227_v33, %v2568_v8  ;;  %v4086_v34 = vcombine.low %v4078_v62, %v4085_v10  ;;  %v3035_v6 = vrot.slane %v14820_v12, 7  ;;  %v11101_v21 = vadd.f32 %v14678_v42, %v14671_v44 }
 0x33b   :  { %11681 = vrot.lane.b32.xlu1 %v11680_v53, %s12460_s4  ;;  %v2569_v46 = vmul.f32 %v14221_v55, %v2539_v14  ;;  %v11104_v56 = vadd.f32 %v14690_v51, %v14684_v4  ;;  %v14834_v30 = vsel %vm14256_vm14, %v3031_v20, %v3032_v11  ;;  %v3034_v1 = vrot.slane %v3032_v11, 2 }
 0x33c   :  { %v2606_v59 = vmax.f32 %v2590_v18, 0.0  ;;  %v11685_v19 = vpack.i.bf16 %v4086_v34, %v4069_v31  ;;  %16703 = vst [vmem:[#allocation47_spill] sm:$0xff] %v14834_v30  ;;  %v16704_v60 = vrot.slane %v14452_v47, 9  ;;  %v4154_v44 = vcombine.low %v14730_v26, %v14834_v30 }
 0x33d   :  { %v2591_v24 = vadd.f32 %v14227_v33, %v2569_v46  ;;  %v2544_v42 = vadd.f32 %v14210_v23, %v11101_v21  ;;  %v14852_v48 = vsel %vm14256_vm14, %v3034_v1, %v3035_v6  ;;  %v2547_v62 = vadd.f32 %v14214_v0, %v11104_v56 }
 0x33e   :  { %v3086_v45 = vsel %vm14256_vm14, %v16704_v60, %v3085_v9  ;;  %v2820_v4 = vcombine.high %v2606_v59, %v2606_v59  ;;  %v14847_v51 = vrot.slane %v2606_v59, %v14232_v13  ;;  %11686 = vrot.lane.b32.xlu0 %v11685_v19, %s12459_s25  ;;  %16705 = vst [vmem:[#allocation48_spill] sm:$0xff] %v14852_v48 }
 0x33f   :  { %v2607_v5 = vmax.f32 %v2591_v24, 0.0  ;;  %v4155_v8 = vcombine.low %v14852_v48, %v3086_v45  ;;  %v4162_v31 = vrot.slane %v4154_v44, %v14232_v13  ;;  %v2570_v10 = vmul.f32 %v14221_v55, %v2544_v42 }
 0x340   :  { %v14859_v23 = vrot.slane %v2820_v4, %v14232_v13  ;;  %v2571_v53 = vmul.f32 %v14221_v55, %v2547_v62  ;;  %v2859_v14 = vcombine.high %v14739_v16, %v14739_v16  ;;  %v3513_v20 = vcombine.low %v14465_v27, %v14669_v17 }
 0x341   :  { %v2836_v18 = vcombine.high %v2607_v5, %v2607_v5  ;;  %v14867_v0 = vrot.slane %v2607_v5, %v14232_v13  ;;  %v4169_v34 = vrot.slane %v4155_v8, %v14232_v13  ;;  %v2592_v11 = vadd.f32 %v14227_v33, %v2570_v10 }
 0x342   :  { %v2593_v46 = vadd.f32 %v14227_v33, %v2571_v53  ;;  %v3514_v6 = vcombine.low %v14547_v37, %v14554_v3  ;;  %v14875_v55 = vrot.slane %v3513_v20, %v14232_v13  ;;  %v10393_v21 = vcombine.high %v14554_v3, %v14574_v35 }
 0x343   :  { %v14880_v27 = vrot.slane %v2836_v18, %v14232_v13  ;;  %v4170_v17 = vcombine.low %v4162_v31, %v4169_v34  ;;  %v2608_v56 = vmax.f32 %v2592_v11, 0.0  ;;  %v3531_v59 = vcombine.low %v14739_v16, %v2859_v14 }
 0x344   :  { %16706 = vst [vmem:[#allocation49_spill] sm:$0xff] %v14875_v55  ;;  %v2609_v19 = vmax.f32 %v2593_v46, 0.0  ;;  %v3528_v1 = vrot.slane %v3514_v6, %v14232_v13  ;;  %v3538_v33 = vrot.slane %v10393_v21, %v14232_v13  ;;  %v14887_v24 = vcombine.high %v14574_v35, %v14574_v35 }
 0x345   :  { %v16707_v60 = vcombine.low %v14745_v43, %v14753_v15  ;;  %v3009_v44 = vcombine.high %v2608_v56, %v2608_v56  ;;  %v14893_v42 = vrot.slane %v2608_v56, %v14232_v13  ;;  %v3545_v4 = vrot.slane %v3531_v59, %v14232_v13 }
 0x346   :  { %v3065_v62 = vcombine.high %v2609_v19, %v2609_v19  ;;  %v14897_v5 = vrot.slane %v2609_v19, %v14232_v13  ;;  %v3529_v8 = vcombine.low %v14875_v55, %v3528_v1  ;;  %v2858_v31 = vcombine.high %v14554_v3, %v14554_v3 }
 0x347   :  { %v11690_v45 = vpack.i.bf16 %v4170_v17, %v16707_v60  ;;  %v14904_v43 = vrot.slane %v3009_v44, %v14232_v13  ;;  %v3546_v10 = vcombine.low %v3538_v33, %v3545_v4  ;;  %v2933_v53 = vrot.slane %v14547_v37, 7 }
 0x348   :  { %v2936_v20 = vrot.slane %v14554_v3, 7  ;;  %v14909_v18 = vrot.slane %v3065_v62, %v14232_v13  ;;  %v2939_v11 = vrot.slane %v2858_v31, 7  ;;  %v10381_v46 = vrot.slane %v14574_v35, 9 }
 0x349   :  { %11691 = vrot.lane.b32.xlu0 %v11690_v45, %s12460_s4  ;;  %v11695_v6 = vpack.i.bf16 %v3546_v10, %v3529_v8  ;;  %v16709_v21 = vrot.slane %v14518_v61, 9  ;;  %v2935_v56 = vrot.slane %v2933_v53, 2  ;;  %v2943_v1 = vrot.slane %v14887_v24, 7 }
 0x34a   :  { %16708 = vst [vmem:[#allocation50_spill] sm:$0xff] %v14909_v18  ;;  %v2938_v59 = vrot.slane %v2936_v20, 2  ;;  %v14919_v19 = vcombine.high %v14909_v18, %v14909_v18  ;;  %v2946_v33 = vrot.slane %v14739_v16, 7  ;;  %v2949_v60 = vrot.slane %v2859_v14, 7 }
 0x34b   :  { %v2934_v17 = vsel %vm14256_vm14, %v16709_v21, %v2933_v53  ;;  %11696 = vrot.lane.b32.xlu1 %v11695_v6, %s12459_s25  ;;  %v2937_v45 = vsel %vm14256_vm14, %v2935_v56, %v2936_v20  ;;  %v10382_v4 = vrot.slane %v14714_v29, 9  ;;  %v2953_v62 = vrot.slane %v14761_v58, 7 }
 0x34c   :  { %16710 = vst [vmem:[#allocation51_spill] sm:$0xff] %v14919_v19  ;;  %v2940_v44 = vsel %vm14256_vm14, %v2938_v59, %v2939_v11  ;;  %v14932_v8 = vsel %vm14256_vm14, %v10381_v46, %v2943_v1  ;;  %v2945_v31 = vrot.slane %v2943_v1, 2  ;;  %v2948_v10 = vrot.slane %v2946_v33, 2 }
 0x34d   :  { %16711 = vst [vmem:[#allocation52_spill] sm:$0xff] %v14932_v8  ;;  %v3334_v53 = vcombine.low %v2934_v17, %v2937_v45  ;;  %v14936_v14 = vsel %vm14256_vm14, %v10382_v4, %v2953_v62  ;;  %v3350_v20 = vcombine.low %v2940_v44, %v14932_v8  ;;  %v14941_v11 = vcombine.high %v14750_v25, %v14750_v25 }
 0x34e   :  { %v3188_v6 = vcombine.low %v14554_v3, %v14574_v35  ;;  %v14947_v46 = vsel %vm14256_vm14, %v2945_v31, %v2946_v33  ;;  %v14951_v21 = vsel %vm14256_vm14, %v2948_v10, %v2949_v60  ;;  %v3189_v56 = vcombine.low %v14887_v24, %v14739_v16 }
 0x34f   :  { %16712 = vst [vmem:[#allocation53_spill] sm:$0xff] %v14947_v46  ;;  %v3348_v17 = vrot.slane %v3334_v53, %v14232_v13  ;;  %v3351_v59 = vcombine.low %v14947_v46, %v14951_v21  ;;  %v3358_v1 = vrot.slane %v3350_v20, %v14232_v13  ;;  %v3979_v10 = vcombine.low %v14468_v22, %v14820_v12 }
 0x350   :  { %v14966_v44 = vrot.slane %v3188_v6, %v14232_v13  ;;  %v14969_v4 = vrot.slane %v3189_v56, %v14232_v13  ;;  %v10399_v53 = vcombine.high %v14739_v16, %v14714_v29  ;;  %v3989_v20 = vcombine.low %v14750_v25, %v14941_v11 }
 0x351   :  { %v3349_v45 = vcombine.low %v14753_v15, %v3348_v17  ;;  %v3365_v31 = vrot.slane %v3351_v59, %v14232_v13  ;;  %v3547_v6 = vcombine.low %v14761_v58, %v14750_v25  ;;  %v3677_v17 = vcombine.low %v14472_v40, %v14468_v22 }
 0x352   :  { %16713 = vst [vmem:[#allocation54_spill] sm:$0xff] %v14966_v44  ;;  %16714 = vst [vmem:[#allocation55_spill] sm:$0xff] %v14969_v4  ;;  %v3678_v56 = vcombine.low %v14574_v35, %v14887_v24  ;;  %v3986_v12 = vrot.slane %v3979_v10, %v14232_v13  ;;  %v3996_v3 = vrot.slane %v10399_v53, %v14232_v13  ;;  %v3088_v55 = vrot.slane %v14479_v54, 7 }
 0x353   :  { %v3366_v59 = vcombine.low %v3358_v1, %v3365_v31  ;;  %v4003_v50 = vrot.slane %v3989_v20, %v14232_v13  ;;  %v14990_v33 = vrot.slane %v3547_v6, %v14232_v13  ;;  %v14993_v15 = vrot.slane %v3677_v17, %v14232_v13 }
 0x354   :  { %v3692_v34 = vrot.slane %v3678_v56, %v14232_v13  ;;  %v3694_v40 = vcombine.low %v14739_v16, %v14714_v29  ;;  %v3987_v35 = vcombine.low %v3986_v12, %v14969_v4  ;;  %v15001_v1 = vcombine.high %v14742_v63, %v14742_v63 }
 0x355   :  { %16715 = vst [vmem:[#allocation56_spill] sm:$0xff] %v14990_v33  ;;  %16716 = vst [vmem:[#allocation57_spill] sm:$0xff] %v14993_v15  ;;  %v11700_v60 = vpack.i.bf16 %v3366_v59, %v3349_v45  ;;  %v4004_v24 = vcombine.low %v3996_v3, %v4003_v50  ;;  %v3205_v53 = vcombine.low %v14714_v29, %v14761_v58  ;;  %v3101_v2 = vrot.slane %v14919_v19, 7 }
 0x356   :  { %v3693_v31 = vcombine.low %v14993_v15, %v3692_v34  ;;  %v3701_v10 = vrot.slane %v3694_v40, %v14232_v13  ;;  %v3206_v20 = vcombine.low %v14750_v25, %v14742_v63  ;;  %v3222_v50 = vcombine.low %v15001_v1, %v14769_v57 }
 0x357   :  { %11701 = vrot.lane.b32.xlu1 %v11700_v60, %s12453_s8  ;;  %v11710_v16 = vpack.i.bf16 %v4004_v24, %v3987_v35  ;;  %v4087_v3 = vcombine.low %v14500_v28, %v14479_v54  ;;  %v15016_v34 = vcombine.high %v14847_v51, %v14847_v51  ;;  %v15020_v29 = vrot.slane %v3205_v53, %v14232_v13 }
 0x358   :  { %v3702_v45 = vcombine.low %v3701_v10, %v14990_v33  ;;  %v15023_v58 = vrot.slane %v3206_v20, %v14232_v13  ;;  %v2861_v60 = vcombine.high %v14769_v57, %v14769_v57  ;;  %v15029_v6 = vrot.slane %v3222_v50, %v14232_v13 }
 0x359   :  { %11711 = vrot.lane.b32.xlu0 %v11710_v16, %s12453_s8  ;;  %v4094_v17 = vrot.slane %v4087_v3, %v14232_v13  ;;  %v10394_v56 = vcombine.high %v14750_v25, %v14742_v63  ;;  %v3565_v59 = vcombine.low %v15016_v34, %v14859_v23  ;;  %v2955_v24 = vrot.slane %v2953_v62, 2 }
 0x35a   :  { %v11705_v12 = vpack.i.bf16 %v3702_v45, %v3693_v31  ;;  %v2969_v40 = vrot.slane %v2861_v60, 7  ;;  %v3564_v35 = vcombine.low %v14769_v57, %v2861_v60  ;;  %v4096_v53 = vcombine.low %v15023_v58, %v15029_v6 }
 0x35b   :  { %v4095_v10 = vcombine.low %v4094_v17, %v15020_v29  ;;  %v15041_v20 = vrot.slane %v10394_v56, %v14232_v13  ;;  %v15044_v16 = vrot.slane %v3565_v59, %v14232_v13  ;;  %v2956_v31 = vrot.slane %v14750_v25, 7 }
 0x35c   :  { %11706 = vrot.lane.b32.xlu1 %v11705_v12, %s12460_s4  ;;  %v15048_v50 = vrot.slane %v3564_v35, %v14232_v13  ;;  %v10383_v62 = vrot.slane %v14742_v63, 9  ;;  %v2963_v3 = vrot.slane %v15001_v1, 7  ;;  %v2966_v17 = vrot.slane %v14769_v57, 7 }
 0x35d   :  { %v11715_v45 = vpack.i.bf16 %v4096_v53, %v4095_v10  ;;  %v3563_v60 = vcombine.low %v14990_v33, %v15041_v20  ;;  %v3087_v56 = vrot.slane %v3085_v9, 2  ;;  %v15062_v12 = vsel %vm14256_vm14, %v2955_v24, %v2956_v31 }
 0x35e   :  { %v3580_v59 = vcombine.low %v15048_v50, %v15044_v16  ;;  %v2958_v25 = vrot.slane %v2956_v31, 2  ;;  %v15066_v35 = vsel %vm14256_vm14, %v10383_v62, %v2963_v3  ;;  %v2965_v10 = vrot.slane %v2963_v3, 2 }
 0x35f   :  { %11716 = vrot.lane.b32.xlu0 %v11715_v45, %s12459_s25  ;;  %v2968_v53 = vrot.slane %v2966_v17, 2  ;;  %v3091_v28 = vrot.slane %v14542_v36, 7  ;;  %v16717_v15 = vrot.slane %v14941_v11, 7  ;;  %v3367_v31 = vcombine.low %v14936_v14, %v15062_v12 }
 0x360   :  { %v11725_v9 = vpack.i.bf16 %v3580_v59, %v3563_v60  ;;  %v2862_v62 = vcombine.high %v14859_v23, %v14859_v23  ;;  %v15083_v3 = vsel %vm14256_vm14, %v2965_v10, %v2966_v17  ;;  %v3089_v11 = vsel %vm14256_vm14, %v3087_v56, %v3088_v55 }
 0x361   :  { %v15075_v24 = vsel %vm14256_vm14, %v2958_v25, %v16717_v15  ;;  %v15087_v45 = vsel %vm14256_vm14, %v2968_v53, %v2969_v40  ;;  %v3090_v60 = vrot.slane %v3088_v55, 2  ;;  %v3375_v59 = vrot.slane %v3367_v31, %v14232_v13 }
 0x362   :  { %11726 = vrot.lane.b32.xlu1 %v11725_v9, %s12459_s25  ;;  %v3368_v15 = vcombine.low %v15075_v24, %v15066_v35  ;;  %v3384_v25 = vcombine.low %v15083_v3, %v15087_v45  ;;  %v10384_v17 = vrot.slane %v14847_v51, 9  ;;  %v2973_v10 = vrot.slane %v15016_v34, 7 }
 0x363   :  { %v3092_v40 = vsel %vm14256_vm14, %v3090_v60, %v3091_v28  ;;  %v2976_v56 = vrot.slane %v14859_v23, 7  ;;  %v2979_v55 = vrot.slane %v2862_v62, 7  ;;  %v15106_v31 = vcombine.high %v14867_v0, %v14867_v0 }
 0x364   :  { %v3382_v53 = vrot.slane %v3368_v15, %v14232_v13  ;;  %v3392_v9 = vrot.slane %v3384_v25, %v14232_v13  ;;  %v4171_v22 = vcombine.low %v3089_v11, %v3092_v40  ;;  %v15110_v47 = vsel %vm14256_vm14, %v10384_v17, %v2973_v10 }
 0x365   :  { %v2975_v46 = vrot.slane %v2973_v10, 2  ;;  %v2978_v28 = vrot.slane %v2976_v56, 2  ;;  %v10400_v60 = vcombine.high %v14769_v57, %v14847_v51  ;;  %v3240_v40 = vcombine.low %v15106_v31, %v14880_v27 }
 0x366   :  { %v4178_v8 = vrot.slane %v4171_v22, %v14232_v13  ;;  %v4180_v30 = vcombine.low %v3382_v53, %v3392_v9  ;;  %v3383_v15 = vcombine.low %v3375_v59, %v3382_v53  ;;  %v4014_v11 = vcombine.low %v14859_v23, %v2862_v62 }
 0x367   :  { %v15119_v25 = vsel %vm14256_vm14, %v2975_v46, %v2976_v56  ;;  %v15123_v17 = vsel %vm14256_vm14, %v2978_v28, %v2979_v55  ;;  %v4012_v10 = vrot.slane %v10400_v60, %v14232_v13  ;;  %v15134_v46 = vrot.slane %v3240_v40, %v14232_v13 }
 0x368   :  { %v4179_v48 = vcombine.low %v4178_v8, %v3375_v59  ;;  %v3385_v22 = vcombine.low %v15110_v47, %v15119_v25  ;;  %v3703_v55 = vcombine.low %v14742_v63, %v15001_v1  ;;  %v3704_v28 = vcombine.low %v14769_v57, %v14847_v51 }
 0x369   :  { %v4013_v56 = vcombine.low %v15029_v6, %v4012_v10  ;;  %v4021_v60 = vrot.slane %v4014_v11, %v14232_v13  ;;  %v3720_v62 = vcombine.low %v14867_v0, %v15106_v31  ;;  %v15151_v10 = vcombine.high %v14893_v42, %v14893_v42 }
 0x36a   :  { %v11720_v8 = vpack.i.bf16 %v4180_v30, %v4179_v48  ;;  %v15142_v59 = vrot.slane %v3385_v22, %v14232_v13  ;;  %v3711_v40 = vrot.slane %v3703_v55, %v14232_v13  ;;  %v3718_v53 = vrot.slane %v3704_v28, %v14232_v13 }
 0x36b   :  { %v3223_v63 = vcombine.low %v14847_v51, %v15016_v34  ;;  %v4022_v30 = vcombine.low %v4021_v60, %v15134_v46  ;;  %v3727_v48 = vrot.slane %v3720_v62, %v14232_v13  ;;  %v3239_v1 = vcombine.low %v14859_v23, %v14867_v0 }
 0x36c   :  { %11721 = vrot.lane.b32.xlu0 %v11720_v8, %s12460_s4  ;;  %v3400_v57 = vcombine.low %v3392_v9, %v15142_v59  ;;  %v3719_v11 = vcombine.low %v3711_v40, %v3718_v53  ;;  %v4098_v55 = vcombine.low %v14893_v42, %v15151_v10  ;;  %v2863_v51 = vcombine.high %v14880_v27, %v14880_v27 }
 0x36d   :  { %v15162_v22 = vrot.slane %v3223_v63, %v14232_v13  ;;  %v11730_v28 = vpack.i.bf16 %v4022_v30, %v4013_v56  ;;  %v3728_v9 = vcombine.low %v15044_v16, %v3727_v48  ;;  %v15170_v8 = vrot.slane %v3239_v1, %v14232_v13 }
 0x36e   :  { %v11735_v34 = vpack.i.bf16 %v3400_v57, %v3383_v15  ;;  %v4105_v60 = vrot.slane %v4098_v55, %v14232_v13  ;;  %v2989_v62 = vrot.slane %v2863_v51, 7  ;;  %v3080_v53 = vcombine.high %v14897_v5, %v14897_v5 }
 0x36f   :  { %v10395_v40 = vcombine.high %v14859_v23, %v14867_v0  ;;  %v11740_v15 = vpack.i.bf16 %v3728_v9, %v3719_v11  ;;  %v4097_v56 = vcombine.low %v15162_v22, %v15170_v8  ;;  %v3582_v63 = vcombine.low %v14880_v27, %v2863_v51 }
 0x370   :  { %11736 = vrot.lane.b32.xlu1 %v11735_v34, %s12453_s8  ;;  %11731 = vrot.lane.b32.xlu0 %v11730_v28, %s12453_s8  ;;  %v10385_v57 = vrot.slane %v14867_v0, 9  ;;  %v4106_v30 = vcombine.low %v15134_v46, %v4105_v60  ;;  %v3095_v48 = vrot.slane %v3080_v53, 7  ;;  %v4107_v23 = vcombine.low %v14904_v43, %v14897_v5 }
 0x371   :  { %v15185_v1 = vrot.slane %v10395_v40, %v14232_v13  ;;  %v15190_v55 = vrot.slane %v3582_v63, %v14232_v13  ;;  %v4108_v11 = vcombine.low %v3080_v53, %v14909_v18  ;;  %v2983_v34 = vrot.slane %v15106_v31, 7 }
 0x372   :  { %v2986_v51 = vrot.slane %v14880_v27, 7  ;;  %v11745_v28 = vpack.i.bf16 %v4106_v30, %v4097_v56  ;;  %v4115_v0 = vrot.slane %v4107_v23, %v14232_v13  ;;  %v10387_v9 = vrot.slane %v14893_v42, 9 }
 0x373   :  { %v3039_v60 = vrot.slane %v15151_v10, 7  ;;  %v3597_v40 = vcombine.low %v15185_v1, %v15190_v55  ;;  %v4122_v63 = vrot.slane %v4108_v11, %v14232_v13  ;;  %v15204_v53 = vsel %vm14256_vm14, %v10385_v57, %v2983_v34 }
 0x374   :  { %11741 = vrot.lane.b32.xlu1 %v11740_v15, %s12460_s4  ;;  %v2985_v31 = vrot.slane %v2983_v34, 2  ;;  %11746 = vrot.lane.b32.xlu0 %v11745_v28, %s12459_s25  ;;  %v2988_v56 = vrot.slane %v2986_v51, 2  ;;  %v3042_v15 = vrot.slane %v14904_v43, 7  ;;  %v3401_v57 = vcombine.low %v15123_v17, %v15204_v53 }
 0x375   :  { %v15209_v30 = vsel %vm14256_vm14, %v10387_v9, %v3039_v60  ;;  %v3041_v23 = vrot.slane %v3039_v60, 2  ;;  %v4123_v4 = vcombine.low %v4115_v0, %v4122_v63  ;;  %v3026_v11 = vcombine.high %v14904_v43, %v14904_v43 }
 0x376   :  { %v15214_v44 = vsel %vm14256_vm14, %v2985_v31, %v2986_v51  ;;  %v15222_v34 = vsel %vm14256_vm14, %v2988_v56, %v2989_v62  ;;  %v10401_v0 = vcombine.high %v14880_v27, %v14893_v42  ;;  %v3044_v9 = vrot.slane %v3042_v15, 2 }
 0x377   :  { %v15226_v28 = vsel %vm14256_vm14, %v3041_v23, %v3042_v15  ;;  %v11760_v51 = vpack.i.bf16 %v3597_v40, %v4123_v4  ;;  %v3402_v60 = vcombine.low %v15214_v44, %v15222_v34  ;;  %v3409_v63 = vrot.slane %v3401_v57, %v14232_v13 }
 0x378   :  { %v4182_v31 = vcombine.low %v15209_v30, %v15226_v28  ;;  %v3045_v52 = vrot.slane %v3026_v11, 7  ;;  %v4024_v62 = vcombine.low %v14904_v43, %v3026_v11  ;;  %v4031_v56 = vrot.slane %v10401_v0, %v14232_v13 }
 0x379   :  { %v16718_v23 = vrot.slane %v14897_v5, 9  ;;  %11761 = vrot.lane.b32.xlu1 %v11760_v51, %s12459_s25  ;;  %v3416_v4 = vrot.slane %v3402_v60, %v14232_v13  ;;  %v4181_v40 = vcombine.low %v15142_v59, %v3409_v63  ;;  %v3097_v57 = vrot.slane %v3095_v48, 2  ;;  %v16719_v60 = vld [vmem:[#allocation23_spill] sm:$0xff] }
 0x37a   :  { %v4189_v15 = vrot.slane %v4182_v31, %v14232_v13  ;;  %v4038_v61 = vrot.slane %v4024_v62, %v14232_v13  ;;  %v3046_v11 = vsel %vm14256_vm14, %v3044_v9, %v3045_v52  ;;  %v3098_v0 = vrot.slane %v14909_v18, 7 }
 0x37b   :  { %v3096_v37 = vsel %vm14256_vm14, %v16718_v23, %v3095_v48  ;;  %v3417_v23 = vcombine.low %v3409_v63, %v3416_v4  ;;  %v3729_v51 = vcombine.low %v14880_v27, %v14893_v42  ;;  %v3730_v59 = vcombine.low %v15151_v10, %v14904_v43  ;;  %v16720_v48 = vld [vmem:[#allocation24_spill] sm:$0xff]  ;;  %v16722_v42 = vld [vmem:[#allocation34_spill] sm:$0xff]  ;;  %v16723_v10 = vld [vmem:[#allocation35_spill] sm:$0xff] }
 0x37c   :  { %v4190_v39 = vcombine.low %v3416_v4, %v4189_v15  ;;  %v16721_v31 = vcombine.low %v16719_v60, %v16720_v48  ;;  %v4039_v33 = vcombine.low %v4031_v56, %v4038_v61  ;;  %v3099_v52 = vsel %vm14256_vm14, %v3097_v57, %v3098_v0 }
 0x37d   :  { %v3100_v9 = vrot.slane %v3098_v0, 2  ;;  %v3737_v63 = vrot.slane %v3729_v51, %v14232_v13  ;;  %v3744_v4 = vrot.slane %v3730_v59, %v14232_v13  ;;  %v4191_v27 = vcombine.low %v3046_v11, %v3096_v37  ;;  %v16726_v0 = vld [vmem:[#allocation38_spill] sm:$0xff]  ;;  %v16727_v51 = vld [vmem:[#allocation40_spill] sm:$0xff] }
 0x37e   :  { %v15258_v62 = vrot.slane %v16721_v31, %v14232_v13  ;;  %v11750_v18 = vpack.i.bf16 %v4190_v39, %v4181_v40  ;;  %v16724_v15 = vcombine.low %v16722_v42, %v16723_v10  ;;  %v16725_v61 = vcombine.low %v14641_v49, %v14695_v7  ;;  %v16729_v49 = vld [vmem:[#allocation43_spill] sm:$0xff] }
 0x37f   :  { %v11755_v57 = vpack.i.bf16 %v3417_v23, %v4039_v33  ;;  %v3102_v39 = vsel %vm14256_vm14, %v3100_v9, %v3101_v2  ;;  %v3745_v40 = vcombine.low %v3737_v63, %v3744_v4  ;;  %v16728_v59 = vcombine.low %v16726_v0, %v16727_v51  ;;  %v16731_v2 = vld [vmem:[#allocation42_spill] sm:$0xff] }
 0x380   :  { %v15268_v19 = vrot.slane %v16724_v15, %v14232_v13  ;;  %v15274_v56 = vrot.slane %v16725_v61, %v14232_v13  ;;  %11751 = vrot.lane.b32.xlu0 %v11750_v18, %s12460_s4  ;;  %v4192_v37 = vcombine.low %v3099_v52, %v3102_v39  ;;  %v3789_v48 = vcombine.low %v15258_v62, %v14726_v32  ;;  %v16732_v18 = vld [vmem:[#allocation41_spill] sm:$0xff]  ;;  %v16734_v52 = vld [vmem:[#allocation44_spill] sm:$0xff]  ;;  %v11895_v62 = vld [vmem:[%s16681_s16 + $0x88] sm:$0xff]  }
 0x381   :  { %v15283_v60 = vrot.slane %v16728_v59, %v14232_v13  ;;  %v16730_v7 = vcombine.low %v14699_v41, %v16729_v49  ;;  %v16733_v23 = vcombine.low %v16731_v2, %v16732_v18  ;;  %v16735_v9 = vcombine.low %v16734_v52, %v14730_v26  ;;  %v16739_v52 = vld [vmem:[#allocation51_spill] sm:$0xff] }
 0x382   :  { %v4199_v42 = vrot.slane %v4191_v27, %v14232_v13  ;;  %v4206_v10 = vrot.slane %v4192_v37, %v14232_v13  ;;  %v3859_v26 = vcombine.low %v15062_v12, %v15075_v24  ;;  %v3221_v27 = vcombine.low %v15020_v29, %v15023_v58 }
 0x383   :  { %v15291_v33 = vrot.slane %v16730_v7, %v14232_v13  ;;  %v15297_v31 = vrot.slane %v16733_v23, %v14232_v13  ;;  %v15303_v63 = vrot.slane %v16735_v9, %v14232_v13  ;;  %v3806_v41 = vcombine.low %v15268_v19, %v15283_v60  ;;  %v16740_v9 = vld [vmem:[#allocation50_spill] sm:$0xff] }
 0x384   :  { %11756 = vrot.lane.b32.xlu0 %v11755_v57, %s12453_s8  ;;  %v4207_v39 = vcombine.low %v4199_v42, %v4206_v10  ;;  %v3238_v37 = vcombine.low %v15029_v6, %v15162_v22  ;;  %v16736_v51 = vcombine.low %v14951_v21, %v14936_v14  ;;  %v15327_v49 = vrot.slane %v3859_v26, %v14232_v13  ;;  %v11637_v14 = vpop.permute.xlu1 %11636  ;;  %v11894_v19 = vld [vmem:[%s16681_s16 + $0x80] sm:$0xff]   ;;  %s10329_s16 = sshll.u32 %s12463_s0, 4  ;;  %s10330_s16 = int_to_ptr.vmem [resolvable:$true] %s10329_s16 }
 0x385   :  { %v3823_v15 = vcombine.low %v15297_v31, %v15274_v56  ;;  %v3840_v61 = vcombine.low %v15291_v33, %v15303_v63  ;;  %v3875_v57 = vcombine.low %v15066_v35, %v15083_v3  ;;  %v16737_v12 = vcombine.low %v15087_v45, %v15110_v47  ;;  %v16755_v63 = vld [vmem:[#allocation33_spill] sm:$0xff]  ;;  %s12423_s27 = scalar_lea.vmem %s10330_s16, 32  ;;  %p12428_p3 = scmp.lt.s32.totalorder %s10330_s16, %s10330_s16 }
 0x386   :  { %v11765_v0 = vpack.i.bf16 %v3745_v40, %v4207_v39  ;;  %v15324_v59 = vrot.slane %v16736_v51, %v14232_v13  ;;  %v3893_v40 = vcombine.low %v15204_v53, %v15214_v44  ;;  %v16738_v21 = vcombine.low %v15119_v25, %v15123_v17  ;;  %p12424_p2 = scmp.ne.s32.totalorder %s10330_s16, %s12423_s27  ;;  %p12429_p4 = scmp.lt.s32.totalorder %s12423_s27, %s12423_s27 }
 0x387   :  { %v15335_v24 = vrot.slane %v16737_v12, %v14232_v13  ;;  %v3255_v35 = vcombine.low %v15170_v8, %v15134_v46  ;;  %v15351_v3 = vrot.slane %v3875_v57, %v14232_v13  ;;  %v3909_v45 = vcombine.low %v15222_v34, %v15209_v30 }
 0x388   :  { %11766 = vrot.lane.b32.xlu0 %v11765_v0, %s12460_s4  ;;  %v15344_v7 = vrot.slane %v16738_v21, %v14232_v13  ;;  %v3874_v47 = vcombine.low %v15324_v59, %v15327_v49  ;;  %v15354_v44 = vrot.slane %v3893_v40, %v14232_v13  ;;  %v3910_v53 = vcombine.low %v15226_v28, %v3046_v11  ;;  %v11647_v10 = vpop.permute.xlu1 %11646  ;;  %v16742_v21 = vld [vmem:[#allocation26_spill] sm:$0xff]  ;;  %p12430_p5 = por %p12429_p4, %p12428_p3 }
 0x389   :  { %v3891_v25 = vcombine.low %v15351_v3, %v15335_v24  ;;  %v15364_v2 = vrot.slane %v3909_v45, %v14232_v13  ;;  %v4247_v23 = vcombine.low %v14479_v54, %v14542_v36  ;;  %v4256_v30 = vcombine.low %v15041_v20, %v15048_v50  ;;  %v16741_v50 = vld [vmem:[#allocation56_spill] sm:$0xff]  ;;  %v16743_v45 = vld [vmem:[#allocation27_spill] sm:$0xff] }
 0x38a   :  { %v3908_v17 = vcombine.low %v15344_v7, %v15354_v44  ;;  %v15367_v18 = vrot.slane %v3910_v53, %v14232_v13  ;;  %v4257_v34 = vcombine.low %v15044_v16, %v15185_v1  ;;  %v4258_v28 = vcombine.low %v15190_v55, %v3744_v4  ;;  %p12431_p6 = pnand %p12430_p5, %p12424_p2 }
 0x38b   :  { %v10403_v11 = vcombine.high %v14904_v43, %v14897_v5  ;;  %v4260_v42 = vcombine.low %v16740_v9, %v16739_v52  ;;  %v4254_v54 = vrot.slane %v4247_v23, %v14232_v13  ;;  %v11642_v43 = vpop.permute.xlu0 %11641  ;;  %v11639_v51 = vunpack.i.h.bf16 %v11637_v14 }
 0x38c   :  { %v3925_v39 = vcombine.low %v15364_v2, %v15367_v18  ;;  %v15383_v36 = vpack.c.bf16 %v4258_v28, %v4257_v34  ;;  %v11638_v57 = vunpack.i.l.bf16 %v11637_v14  ;;  %v11649_v12 = vunpack.i.h.bf16 %v11647_v10  ;;  %v16745_v34 = vld [vmem:[#allocation14_spill] sm:$0xff]  ;;  %v16746_v28 = vld [vmem:[#allocation25_spill] sm:$0xff]  ;;  %v16767_v2 = vld [vmem:[#allocation31_spill] sm:$0xff] }
 0x38d   :  { %v4267_v20 = vrot.slane %v10403_v11, %v14232_v13  ;;  %v4274_v16 = vrot.slane %v4260_v42, %v14232_v13  ;;  %v4255_v1 = vcombine.low %v4254_v54, %v16741_v50  ;;  %v11648_v40 = vunpack.i.l.bf16 %v11647_v10  ;;  %v16768_v18 = vld [vmem:[#allocation32_spill] sm:$0xff] }
 0x38e   :  { %v16744_v53 = vcombine.low %v16742_v21, %v16743_v45  ;;  %v16747_v11 = vcombine.low %v16745_v34, %v16746_v28  ;;  %v16748_v60 = vmov 0.0   ;;  %v16750_v34 = vld [vmem:[#allocation46_spill] sm:$0xff] }
 0x38f   :  { %v15388_v55 = vcombine.low %v4267_v20, %v4274_v16  ;;  %v15390_v5 = vpack.c.bf16 %v4256_v30, %v4255_v1  ;;  %v11657_v30 = vpop.permute.xlu0 %11656  ;;  %v11644_v20 = vunpack.i.h.bf16 %v11642_v43  ;;  %v11643_v16 = vunpack.i.l.bf16 %v11642_v43 }
 0x390   :  { %v11659_v50 = vunpack.i.h.bf16 %v11657_v30  ;;  %v11658_v1 = vunpack.i.l.bf16 %v11657_v30  ;;  %v16753_v30 = vld [vmem:[#allocation28_spill] sm:$0xff] }
 0x395   :  { %v11652_v4 = vpop.permute.xlu1 %11651 }
 0x396   :  { %v11654_v26 = vunpack.i.h.bf16 %v11652_v4  ;;  %v11653_v0 = vunpack.i.l.bf16 %v11652_v4 }
 0x398   :  { %v4286_v23 = vsel %vm1485_vm2, %v16744_v53, %v11654_v26  ;;  %v4285_v52 = vsel %vm1485_vm2, %v16747_v11, %v11653_v0  ;;  %v4313_v26 = vsel %vm1485_vm2, %v3806_v41, %v11644_v20  ;;  %v4312_v0 = vsel %vm1485_vm2, %v3789_v48, %v11643_v16 }
 0x399   :  { %v4295_v9 = vsel %vm2118_vm6, %v4286_v23, %v11639_v51  ;;  %v4294_v42 = vsel %vm2118_vm6, %v4285_v52, %v11638_v57  ;;  %v11662_v43 = vpop.permute.xlu1 %11661  ;;  %v16749_v23 = vld [vmem:[#allocation30_spill] sm:$0xff]  ;;  %v16752_v52 = vld [vmem:[#allocation29_spill] sm:$0xff] }
 0x39a   :  { %v4304_v54 = vsel %vm2135_vm7, %v4295_v9, %v11649_v12  ;;  %v4303_v14 = vsel %vm2135_vm7, %v4294_v42, %v11648_v40  ;;  %v4321_v12 = vsel %vm2118_vm6, %v4312_v0, %v11658_v1  ;;  %v4322_v40 = vsel %vm2118_vm6, %v4313_v26, %v11659_v50 }
 0x39b   :  { %v4339_v10 = vpack.c.bf16 %v4304_v54, %v4303_v14  ;;  %v16751_v28 = vcombine.low %v16749_v23, %v16750_v34  ;;  %v16754_v9 = vcombine.low %v16752_v52, %v16753_v30  ;;  %v11664_v54 = vunpack.i.h.bf16 %v11662_v43  ;;  %v16758_v30 = vld [vmem:[#allocation45_spill] sm:$0xff] }
 0x39c   :  { %v11663_v14 = vunpack.i.l.bf16 %v11662_v43 }
 0x39e   :  { %v11667_v4 = vpop.permute.xlu0 %11666 }
 0x39f   :  { %v11669_v51 = vunpack.i.h.bf16 %v11667_v4  ;;  %v11668_v57 = vunpack.i.l.bf16 %v11667_v4 }
 0x3a1   :  { %v4330_v21 = vsel %vm2135_vm7, %v4321_v12, %v11668_v57  ;;  %v4331_v45 = vsel %vm2135_vm7, %v4322_v40, %v11669_v51 }
 0x3a2   :  { %v4340_v53 = vpack.c.bf16 %v4331_v45, %v4330_v21 }
 0x3a4   :  { %4509 = vmatprep.mubr.bf16.mxu1 %v4340_v53 }
 0x3a5   :  { %4510 = vmatmul.mubr.bf16.vlgmr.msra.gmra.mrb[16].mxu1 %v4339_v10 }
 0x3a6   :  { %11309 = vmatpush3.bf16.msra.mxu1 %v11894_v19 }
 0x3a7   :  { %v11672_v32 = vpop.permute.xlu1 %11671  ;;  %11310 = vmatprep.subr.bf16.mxu1 %v16748_v60 }
 0x3a8   :  { %v11674_v48 = vunpack.i.h.bf16 %v11672_v32  ;;  %v11673_v41 = vunpack.i.l.bf16 %v11672_v32 }
 0x3aa   :  { %11311 = vmatpush3.bf16.msra.mxu1 %v11895_v62  ;;  %v4288_v11 = vsel %vm1485_vm2, %v16751_v28, %v11674_v48  ;;  %v4287_v42 = vsel %vm1485_vm2, %v16754_v9, %v11673_v41 }
 0x3ab   :  { %v11677_v10 = vpop.permute.xlu0 %11676  ;;  %v4296_v1 = vsel %vm2118_vm6, %v4287_v42, %v11663_v14  ;;  %v4297_v4 = vsel %vm2118_vm6, %v4288_v11, %v11664_v54  ;;  %v16759_v42 = vld [vmem:[#allocation54_spill] sm:$0xff]  ;;  %v16760_v54 = vld [vmem:[#allocation55_spill] sm:$0xff] }
 0x3ac   :  { %v11679_v12 = vunpack.i.h.bf16 %v11677_v10  ;;  %v11678_v40 = vunpack.i.l.bf16 %v11677_v10  ;;  %v16761_v14 = vcombine.low %v16759_v42, %v16760_v54 }
 0x3ad   :  { %v11682_v20 = vpop.permute.xlu1 %11681 }
 0x3ae   :  { %v11684_v16 = vunpack.i.h.bf16 %v11682_v20  ;;  %v11683_v50 = vunpack.i.l.bf16 %v11682_v20  ;;  %v4315_v43 = vsel %vm1485_vm2, %v3840_v61, %v11679_v12  ;;  %v4314_v19 = vsel %vm1485_vm2, %v3823_v15, %v11678_v40  ;;  %v16756_v61 = vld [vmem:[#allocation36_spill] sm:$0xff] }
 0x3af   :  { %v16757_v56 = vcombine.low %v16755_v63, %v16756_v61 }
 0x3b0   :  { %v4305_v26 = vsel %vm2135_vm7, %v4296_v1, %v11683_v50  ;;  %v4306_v0 = vsel %vm2135_vm7, %v4297_v4, %v11684_v16  ;;  %v11687_v57 = vpop.permute.xlu0 %11686 }
 0x3b1   :  { %v4342_v51 = vpack.c.bf16 %v4306_v0, %v4305_v26  ;;  %v11689_v21 = vunpack.i.h.bf16 %v11687_v57  ;;  %v11688_v45 = vunpack.i.l.bf16 %v11687_v57  ;;  %v3186_v31 = vrot.slane %v16757_v56, %v14232_v13 }
 0x3b3   :  { %v4323_v48 = vsel %vm2118_vm6, %v4314_v19, %v11688_v45  ;;  %v4324_v41 = vsel %vm2118_vm6, %v4315_v43, %v11689_v21  ;;  %v3187_v9 = vcombine.low %v16758_v30, %v3186_v31  ;;  %v16762_v45 = vld [vmem:[#allocation48_spill] sm:$0xff] }
 0x3bb   :  { %v11692_v53 = vpop.permute.xlu0 %11691 }
 0x3bc   :  { %v11694_v32 = vunpack.i.h.bf16 %v11692_v53  ;;  %v11693_v62 = vunpack.i.l.bf16 %v11692_v53  ;;  %v16763_v53 = vld [vmem:[#allocation47_spill] sm:$0xff] }
 0x3bd   :  { %v11697_v33 = vpop.permute.xlu1 %11696  ;;  %v3841_v43 = vcombine.low %v16763_v53, %v16762_v45 }
 0x3be   :  { %v4332_v23 = vsel %vm2135_vm7, %v4323_v48, %v11693_v62  ;;  %v4333_v34 = vsel %vm2135_vm7, %v4324_v41, %v11694_v32  ;;  %v11699_v16 = vunpack.i.h.bf16 %v11697_v33  ;;  %v11698_v50 = vunpack.i.l.bf16 %v11697_v33  ;;  %v16764_v32 = vld [vmem:[#allocation52_spill] sm:$0xff]  ;;  %v16765_v62 = vld [vmem:[#allocation53_spill] sm:$0xff] }
 0x3bf   :  { %v4343_v28 = vpack.c.bf16 %v4333_v34, %v4332_v23  ;;  %v16766_v48 = vcombine.low %v16764_v32, %v16765_v62  ;;  %v3849_v23 = vrot.slane %v3841_v43, %v14232_v13 }
 0x3c1   :  { %4517 = vmatprep.mubr.bf16.mxu1 %v4343_v28  ;;  %v3856_v41 = vrot.slane %v16766_v48, %v14232_v13 }
 0x3c2   :  { %4518 = vmatmul.mubr.bf16.gmra.mrb[20].mxu1 %v4342_v51 }
 0x3c3   :  { %v3857_v56 = vcombine.low %v3849_v23, %v3856_v41 }
 0x3c9   :  { %v11702_v15 = vpop.permute.xlu1 %11701 }
 0x3ca   :  { %v11704_v11 = vunpack.i.h.bf16 %v11702_v15  ;;  %v11703_v52 = vunpack.i.l.bf16 %v11702_v15 }
 0x3cb   :  { %v11712_v40 = vpop.permute.xlu0 %11711 }
 0x3cc   :  { %v4290_v10 = vsel %vm1485_vm2, %v16761_v14, %v11704_v11  ;;  %v4289_v20 = vsel %vm1485_vm2, %v3187_v9, %v11703_v52  ;;  %v11714_v34 = vunpack.i.h.bf16 %v11712_v40  ;;  %v11713_v28 = vunpack.i.l.bf16 %v11712_v40 }
 0x3cd   :  { %v4298_v0 = vsel %vm2118_vm6, %v4289_v20, %v11698_v50  ;;  %v4299_v51 = vsel %vm2118_vm6, %v4290_v10, %v11699_v16 }
 0x3ce   :  { %v11707_v1 = vpop.permute.xlu1 %11706  ;;  %v4317_v15 = vsel %vm1485_vm2, %v3874_v47, %v11714_v34  ;;  %v4316_v11 = vsel %vm1485_vm2, %v3857_v56, %v11713_v28 }
 0x3cf   :  { %v11709_v4 = vunpack.i.h.bf16 %v11707_v1  ;;  %v11708_v26 = vunpack.i.l.bf16 %v11707_v1 }
 0x3d1   :  { %v4307_v57 = vsel %vm2135_vm7, %v4298_v0, %v11708_v26  ;;  %v4308_v12 = vsel %vm2135_vm7, %v4299_v51, %v11709_v4  ;;  %v11717_v19 = vpop.permute.xlu0 %11716 }
 0x3d2   :  { %v4345_v21 = vpack.c.bf16 %v4308_v12, %v4307_v57  ;;  %v11719_v33 = vunpack.i.h.bf16 %v11717_v19  ;;  %v11718_v63 = vunpack.i.l.bf16 %v11717_v19 }
 0x3d4   :  { %v11727_v61 = vpop.permute.xlu1 %11726  ;;  %v4325_v9 = vsel %vm2118_vm6, %v4316_v11, %v11718_v63  ;;  %v4326_v42 = vsel %vm2118_vm6, %v4317_v15, %v11719_v33 }
 0x3d5   :  { %v11729_v47 = vunpack.i.h.bf16 %v11727_v61  ;;  %v11728_v1 = vunpack.i.l.bf16 %v11727_v61 }
 0x3de   :  { %v11722_v31 = vpop.permute.xlu0 %11721 }
 0x3df   :  { %v11724_v52 = vunpack.i.h.bf16 %v11722_v31  ;;  %v11723_v30 = vunpack.i.l.bf16 %v11722_v31 }
 0x3e1   :  { %v4334_v54 = vsel %vm2135_vm7, %v4325_v9, %v11723_v30  ;;  %v4335_v14 = vsel %vm2135_vm7, %v4326_v42, %v11724_v52  ;;  %v16769_v30 = vld [vmem:[#allocation39_spill] sm:$0xff]  ;;  %v16770_v9 = vld [vmem:[#allocation57_spill] sm:$0xff] }
 0x3e2   :  { %v11737_v10 = vpop.permute.xlu1 %11736  ;;  %v4346_v20 = vpack.c.bf16 %v4335_v14, %v4334_v54  ;;  %v11732_v4 = vpop.permute.xlu0 %11731  ;;  %v16771_v54 = vld [vmem:[#allocation49_spill] sm:$0xff] }
 0x3e3   :  { %v11739_v16 = vunpack.i.h.bf16 %v11737_v10  ;;  %v11738_v50 = vunpack.i.l.bf16 %v11737_v10  ;;  %v11734_v29 = vunpack.i.h.bf16 %v11732_v4  ;;  %v11733_v58 = vunpack.i.l.bf16 %v11732_v4  ;;  %v16772_v14 = vld [vmem:[#allocation37_spill] sm:$0xff] }
 0x3e4   :  { %4525 = vmatprep.mubr.bf16.mxu1 %v4346_v20  ;;  %v4237_v10 = vcombine.low %v16772_v14, %v16771_v54 }
 0x3e5   :  { %v4292_v59 = vsel %vm1485_vm2, %v3238_v37, %v11739_v16  ;;  %v4291_v49 = vsel %vm1485_vm2, %v3221_v27, %v11738_v50  ;;  %4526 = vmatmul.mubr.bf16.gmra.mrb[24].mxu1 %v4345_v21  ;;  %v4319_v53 = vsel %vm1485_vm2, %v3908_v17, %v11734_v29  ;;  %v4318_v43 = vsel %vm1485_vm2, %v3891_v25, %v11733_v58  ;;  %v11903_v58 = vld [vmem:[%s16557_s10 + $0x18] sm:$0xff]  }
 0x3e6   :  { %v11742_v26 = vpop.permute.xlu1 %11741  ;;  %v4300_v57 = vsel %vm2118_vm6, %v4291_v49, %v11728_v1  ;;  %v4301_v12 = vsel %vm2118_vm6, %v4292_v59, %v11729_v47  ;;  %v11747_v40 = vpop.permute.xlu0 %11746  ;;  %v4353_v16 = vpack.c.bf16 %v15388_v55, %v15388_v55  ;;  %v11897_v55 = vld [vmem:[%s16557_s10] sm:$0xff]  }
 0x3e7   :  { %v11744_v0 = vunpack.i.h.bf16 %v11742_v26  ;;  %v11743_v51 = vunpack.i.l.bf16 %v11742_v26  ;;  %v11749_v27 = vunpack.i.h.bf16 %v11747_v40  ;;  %v11748_v21 = vunpack.i.l.bf16 %v11747_v40  ;;  %v11902_v40 = vld [vmem:[%s16557_s10 + $0x58] sm:$0xff]  }
 0x3e9   :  { %v4309_v6 = vsel %vm2135_vm7, %v4300_v57, %v11743_v51  ;;  %v4310_v22 = vsel %vm2135_vm7, %v4301_v12, %v11744_v0  ;;  %v4327_v62 = vsel %vm2118_vm6, %v4318_v43, %v11748_v21  ;;  %v4328_v48 = vsel %vm2118_vm6, %v4319_v53, %v11749_v27  ;;  %v11904_v21 = vld [vmem:[%s16557_s10 + $0x60] sm:$0xff]  }
 0x3ea   :  { %v4348_v37 = vpack.c.bf16 %v4310_v22, %v4309_v6  ;;  %v11899_v6 = vld [vmem:[%s16557_s10 + $0x8] sm:$0xff]   ;;  %v11900_v22 = vld [vmem:[%s16557_s10 + $0x50] sm:$0xff]  }
 0x3eb   :  { %v11762_v7 = vpop.permute.xlu1 %11761 }
 0x3ec   :  { %v11764_v25 = vunpack.i.h.bf16 %v11762_v7  ;;  %v11763_v33 = vunpack.i.l.bf16 %v11762_v7 }
 0x3f2   :  { %v11752_v45 = vpop.permute.xlu0 %11751 }
 0x3f3   :  { %v11754_v19 = vunpack.i.h.bf16 %v11752_v45  ;;  %v11753_v32 = vunpack.i.l.bf16 %v11752_v45 }
 0x3f5   :  { %v4336_v41 = vsel %vm2135_vm7, %v4327_v62, %v11753_v32  ;;  %v4337_v23 = vsel %vm2135_vm7, %v4328_v48, %v11754_v19  ;;  %v11905_v32 = vld [vmem:[%s16557_s10 + $0x20] sm:$0xff]  }
 0x3f6   :  { %v11757_v34 = vpop.permute.xlu0 %11756  ;;  %v4349_v28 = vpack.c.bf16 %v4337_v23, %v4336_v41 }
 0x3f7   :  { %v11759_v44 = vunpack.i.h.bf16 %v11757_v34  ;;  %v11758_v17 = vunpack.i.l.bf16 %v11757_v34 }
 0x3f8   :  { %4533 = vmatprep.mubr.bf16.mxu1 %v4349_v28 }
 0x3f9   :  { %v4293_v24 = vsel %vm1485_vm2, %v3255_v35, %v11759_v44  ;;  %v4320_v3 = vsel %vm1485_vm2, %v3925_v39, %v11758_v17  ;;  %4534 = vmatmul.mubr.bf16.gmra.mrb[28].mxu1 %v4348_v37  ;;  %v10402_v39 = vcombine.high %v16768_v18, %v16767_v2  ;;  %v11901_v37 = vld [vmem:[%s16557_s10 + $0x10] sm:$0xff]  }
 0x3fa   :  { %v11767_v63 = vpop.permute.xlu0 %11766  ;;  %v4329_v31 = vsel %vm2118_vm6, %v4320_v3, %v11763_v33  ;;  %v4302_v15 = vsel %vm2118_vm6, %v4293_v24, %v11764_v25  ;;  %v15579_v25 = vld [vmem:[%s16773_s22] ss:$0 sm:$0xff] }
 0x3fb   :  { %v11769_v61 = vunpack.i.h.bf16 %v11767_v63  ;;  %v11768_v56 = vunpack.i.l.bf16 %v11767_v63  ;;  %v4245_v52 = vrot.slane %v10402_v39, %v14232_v13 }
 0x3fd   :  { %v4338_v11 = vsel %vm2135_vm7, %v4329_v31, %v11768_v56  ;;  %v4311_v46 = vsel %vm2135_vm7, %v4302_v15, %v11769_v61  ;;  %v4246_v42 = vcombine.low %v16770_v9, %v4245_v52  ;;  %v15584_v56 = vld [vmem:[%s16556_s9] ss:$0 sm:$0xff] }
 0x3fe   :  { %v4352_v8 = vpack.c.bf16 %v4338_v11, %v4338_v11  ;;  %v4351_v35 = vpack.c.bf16 %v4311_v46, %v4311_v46 }
 0x3ff   :  { %v4344_v20 = vpack.c.bf16 %v4246_v42, %v4237_v10 }
 0x400   :  { %4541 = vmatprep.mubr.bf16.mxu1 %v4352_v8 }
 0x401   :  { %4542 = vmatmul.mubr.bf16.gmra.mrb[32].mxu1 %v4351_v35 }
 0x402   :  { %11312 = vmatprep.mubr.msk.bf16.mxu1 %vm12462_vm15, %v16748_v60 }
 0x409   :  { %11313 = vmatmul.mubr.msk.bf16.vlgmr.msra.gmra.mrb[36].mxu1 %vm1485_vm2, %v16769_v30 }
 0x40a   :  { %11316 = vmatprep.mubr.msk.bf16.mxu1 %vm12462_vm15, %v16748_v60 }
 0x411   :  { %11317 = vmatmul.mubr.msk.bf16.gmra.mrb[40].mxu1 %vm1485_vm2, %v4344_v20 }
 0x412   :  { %11320 = vmatprep.mubr.msk.bf16.mxu1 %vm12462_vm15, %v16748_v60 }
 0x419   :  { %11321 = vmatmul.mubr.msk.bf16.gmra.mrb[44].mxu1 %vm1485_vm2, %v15390_v5 }
 0x41a   :  { %11324 = vmatprep.mubr.msk.bf16.mxu1 %vm12462_vm15, %v16748_v60 }
 0x421   :  { %11325 = vmatmul.mubr.msk.bf16.gmra.mrb[48].mxu1 %vm1485_vm2, %v15383_v36  ;;  %v11896_v36 = vld [vmem:[%s16557_s10 + $0x40] sm:$0xff]  }
 0x422   :  { %11328 = vmatprep.mubr.msk.bf16.mxu1 %vm12462_vm15, %v16748_v60  ;;  %v11898_v60 = vld [vmem:[%s16557_s10 + $0x48] sm:$0xff]   ;;  %11168 = vmatprep.subr.bf16.mxu0 %v11896_v36 }
 0x423   :  { %11169 = vmatpush3.bf16.msra.mxu0 %v11897_v55 }
 0x424   :  { %11170 = vmatprep.subr.bf16.mxu0 %v11898_v60 }
 0x427   :  { %11171 = vmatpush3.bf16.msra.mxu0 %v11899_v6 }
 0x428   :  { %11172 = vmatprep.subr.bf16.mxu0 %v11900_v22 }
 0x429   :  { %11329 = vmatmul.mubr.msk.bf16.gmra.mrb[52].mxu1 %vm1485_vm2, %v4353_v16 }
 0x42b   :  { %11173 = vmatpush3.bf16.msra.mxu0 %v11901_v37 }
 0x42c   :  { %11174 = vmatprep.subr.bf16.mxu0 %v11902_v40 }
 0x42f   :  { %11175 = vmatpush3.bf16.msra.mxu0 %v11903_v58 }
 0x430   :  { %11176 = vmatprep.subr.bf16.mxu0 %v11904_v21 }
 0x433   :  { %11177 = vmatpush3.bf16.msra.mxu0 %v11905_v32 }
 0x478   :  { %v11131_v50 = vpop.f32.mrb[16].mxu1 }
 0x479   :  { %v11132_v59 = vpop.f32.mrb[17].mxu1 }
 0x47a   :  { %v11133_v49 = vadd.f32 %v11132_v59, %v11131_v50  ;;  %v11134_v47 = vpop.f32.mrb[18].mxu1 }
 0x47b   :  { %v11135_v1 = vpop.f32.mrb[19].mxu1 }
 0x47c   :  { %v11136_v4 = vadd.f32 %v11135_v1, %v11134_v47 }
 0x495   :  { %v11137_v26 = vpop.f32.mrb[20].mxu1 }
 0x496   :  { %v11138_v5 = vpop.f32.mrb[21].mxu1 }
 0x497   :  { %v11139_v0 = vadd.f32 %v11138_v5, %v11137_v26  ;;  %v11140_v51 = vpop.f32.mrb[22].mxu1 }
 0x498   :  { %v11141_v57 = vpop.f32.mrb[23].mxu1 }
 0x499   :  { %v15534_v12 = vadd.f32 %v11141_v57, %v11140_v51 }
 0x4b8   :  { %v11143_v29 = vpop.f32.mrb[24].mxu1 }
 0x4b9   :  { %v11144_v27 = vpop.f32.mrb[25].mxu1 }
 0x4ba   :  { %v15563_v45 = vadd.f32 %v11144_v27, %v11143_v29  ;;  %v11146_v53 = vpop.f32.mrb[26].mxu1 }
 0x4bb   :  { %v11147_v43 = vpop.f32.mrb[27].mxu1 }
 0x4bc   :  { %v15565_v19 = vadd.f32 %v11147_v43, %v11146_v53 }
 0x4cc   :  { %v11149_v62 = vpop.f32.mrb[28].mxu1 }
 0x4cd   :  { %v11150_v48 = vpop.f32.mrb[29].mxu1 }
 0x4ce   :  { %v15570_v41 = vadd.f32 %v11150_v48, %v11149_v62  ;;  %v11152_v23 = vpop.f32.mrb[30].mxu1 }
 0x4cf   :  { %v11153_v34 = vpop.f32.mrb[31].mxu1 }
 0x4d0   :  { %v15572_v28 = vadd.f32 %v11153_v34, %v11152_v23 }
 0x4d4   :  { %v11155_v7 = vpop.f32.mrb[32].mxu1 }
 0x4d5   :  { %v11156_v44 = vpop.f32.mrb[33].mxu1 }
 0x4d6   :  { %v15574_v17 = vadd.f32 %v11156_v44, %v11155_v7  ;;  %v11158_v24 = vpop.f32.mrb[34].mxu1 }
 0x4d7   :  { %v11159_v3 = vpop.f32.mrb[35].mxu1 }
 0x4dc   :  { %v4583_v33 = vpop.f32.mrb[36].mxu1 }
 0x4dd   :  { %v4584_v63 = vadd.f32 %v11133_v49, %v4583_v33  ;;  %v11314_v61 = vpop.f32.mrb[37].mxu1 }
 0x4de   :  { %v4586_v31 = vpop.f32.mrb[38].mxu1 }
 0x4df   :  { %v4627_v15 = vmul.f32 %v15579_v25, %v4584_v63  ;;  %v4587_v11 = vadd.f32 %v11136_v4, %v4586_v31  ;;  %v11315_v46 = vpop.f32.mrb[39].mxu1 }
 0x4e1   :  { %v4642_v8 = vadd.f32 %v15584_v56, %v4627_v15  ;;  %v4628_v35 = vmul.f32 %v15579_v25, %v4587_v11 }
 0x4e3   :  { %v4651_v2 = vmax.f32 %v4642_v8, 0.0  ;;  %v4643_v18 = vadd.f32 %v15584_v56, %v4628_v35 }
 0x4e4   :  { %v4591_v39 = vpop.f32.mrb[40].mxu1 }
 0x4e5   :  { %v4669_v52 = vcombine.high %v4651_v2, %v4651_v2  ;;  %v15591_v30 = vrot.slane %v4651_v2, %v14232_v13  ;;  %v4652_v9 = vmax.f32 %v4643_v18, 0.0  ;;  %v4592_v42 = vadd.f32 %v11139_v0, %v4591_v39  ;;  %v11318_v54 = vpop.f32.mrb[41].mxu1 }
 0x4e6   :  { %v4594_v14 = vpop.f32.mrb[42].mxu1 }
 0x4e7   :  { %v15594_v10 = vrot.slane %v4669_v52, %v14232_v13  ;;  %v15598_v20 = vcombine.high %v15591_v30, %v15591_v30  ;;  %v4686_v16 = vcombine.high %v4652_v9, %v4652_v9  ;;  %v11319_v50 = vpop.f32.mrb[43].mxu1  ;;  %v10429_v59 = vrot.slane %v15591_v30, 9 }
 0x4e8   :  { %v15602_v49 = vrot.slane %v4652_v9, %v14232_v13  ;;  %v4629_v47 = vmul.f32 %v15579_v25, %v4592_v42  ;;  %v4595_v1 = vadd.f32 %v15534_v12, %v4594_v14 }
 0x4e9   :  { %v15608_v4 = vcombine.high %v15594_v10, %v15594_v10  ;;  %v4865_v26 = vrot.slane %v15594_v10, 7  ;;  %v15614_v0 = vrot.slane %v4686_v16, %v14232_v13  ;;  %v5096_v6 = vcombine.low %v15598_v20, %v15594_v10 }
 0x4ea   :  { %v4869_v51 = vrot.slane %v15602_v49, 7  ;;  %v4644_v57 = vadd.f32 %v15584_v56, %v4629_v47  ;;  %v4630_v36 = vmul.f32 %v15579_v25, %v4595_v1  ;;  %v15621_v12 = vcombine.high %v15602_v49, %v15602_v49 }
 0x4eb   :  { %v15625_v55 = vcombine.high %v15614_v0, %v15614_v0  ;;  %v10431_v60 = vrot.slane %v15614_v0, 9  ;;  %v4945_v22 = vcombine.low %v15608_v4, %v15602_v49  ;;  %v15638_v43 = vrot.slane %v5096_v6, %v14232_v13 }
 0x4ec   :  { %v4653_v37 = vmax.f32 %v4644_v57, 0.0  ;;  %v4645_v40 = vadd.f32 %v15584_v56, %v4630_v36  ;;  %v4599_v29 = vpop.f32.mrb[44].mxu1  ;;  %v4872_v58 = vrot.slane %v15621_v12, 7  ;;  %v5097_v27 = vcombine.low %v15602_v49, %v15621_v12 }
 0x4ed   :  { %v4600_v21 = vadd.f32 %v15563_v45, %v4599_v29  ;;  %v11322_v53 = vpop.f32.mrb[45].mxu1  ;;  %v4961_v32 = vcombine.low %v15614_v0, %v15625_v55  ;;  %v15643_v62 = vrot.slane %v4945_v22, %v14232_v13  ;;  %v4862_v63 = vrot.slane %v15598_v20, 7 }
 0x4ee   :  { %v4703_v48 = vcombine.high %v4653_v37, %v4653_v37  ;;  %v15646_v23 = vrot.slane %v4653_v37, %v14232_v13  ;;  %v4654_v34 = vmax.f32 %v4645_v40, 0.0  ;;  %v4602_v7 = vpop.f32.mrb[46].mxu1  ;;  %v15649_v44 = vrot.slane %v5097_v27, %v14232_v13 }
 0x4ef   :  { %v4631_v45 = vmul.f32 %v15579_v25, %v4600_v21  ;;  %v4603_v24 = vadd.f32 %v15565_v19, %v4602_v7  ;;  %v11323_v3 = vpop.f32.mrb[47].mxu1  ;;  %v15654_v33 = vrot.slane %v4961_v32, %v14232_v13 }
 0x4f0   :  { %v15658_v61 = vrot.slane %v4703_v48, %v14232_v13  ;;  %v15662_v31 = vcombine.high %v15646_v23, %v15646_v23  ;;  %v4720_v11 = vcombine.high %v4654_v34, %v4654_v34  ;;  %v15666_v46 = vrot.slane %v4654_v34, %v14232_v13 }
 0x4f1   :  { %v4646_v19 = vadd.f32 %v15584_v56, %v4631_v45  ;;  %v4632_v8 = vmul.f32 %v15579_v25, %v4603_v24  ;;  %v5113_v35 = vcombine.low %v15625_v55, %v15646_v23  ;;  %v5112_v52 = vcombine.low %v15638_v43, %v15649_v44 }
 0x4f2   :  { %v10432_v2 = vrot.slane %v15662_v31, 9  ;;  %v15674_v18 = vrot.slane %v4720_v11, %v14232_v13  ;;  %v15678_v39 = vcombine.high %v15658_v61, %v15658_v61  ;;  %v15684_v9 = vcombine.high %v15666_v46, %v15666_v46 }
 0x4f3   :  { %v10437_v42 = vrot.slane %v15666_v46, 9  ;;  %v4655_v54 = vmax.f32 %v4646_v19, 0.0  ;;  %v4647_v14 = vadd.f32 %v15584_v56, %v4632_v8  ;;  %v5121_v43 = vrot.slane %v5113_v35, %v14232_v13 }
 0x4f4   :  { %v15690_v16 = vcombine.high %v15674_v18, %v15674_v18  ;;  %v4921_v50 = vrot.slane %v15674_v18, 7  ;;  %v4607_v47 = vpop.f32.mrb[48].mxu1  ;;  %v5114_v57 = vcombine.low %v15658_v61, %v15678_v39  ;;  %v4918_v36 = vrot.slane %v15684_v9, 7 }
 0x4f5   :  { %v5177_v6 = vcombine.low %v15666_v46, %v15684_v9  ;;  %v4737_v22 = vcombine.high %v4655_v54, %v4655_v54  ;;  %v15700_v37 = vrot.slane %v4655_v54, %v14232_v13  ;;  %v11326_v40 = vpop.f32.mrb[49].mxu1  ;;  %v4656_v27 = vmax.f32 %v4647_v14, 0.0  ;;  %v11906_v14 = vld [vmem:[%s16557_s10 + $0x68] sm:$0xff]  }
 0x4f6   :  { %v4608_v21 = vadd.f32 %v15570_v41, %v4607_v47  ;;  %v4610_v53 = vpop.f32.mrb[50].mxu1  ;;  %v15707_v32 = vrot.slane %v4918_v36, 2  ;;  %v5128_v5 = vrot.slane %v5114_v57, %v14232_v13  ;;  %11178 = vmatprep.subr.bf16.mxu0 %v11906_v14  ;;  %v5232_v54 = vcombine.low %v15649_v44, %v5121_v43 }
 0x4f7   :  { %v15710_v48 = vrot.slane %v4737_v22, %v14232_v13  ;;  %v15714_v34 = vcombine.high %v15700_v37, %v15700_v37  ;;  %v16633_v7 = vrot.slane %v15700_v37, 7  ;;  %v11327_v45 = vpop.f32.mrb[51].mxu1  ;;  %v4754_v24 = vcombine.high %v4656_v27, %v4656_v27 }
 0x4f8   :  { %v15718_v41 = vrot.slane %v4656_v27, %v14232_v13  ;;  %v4633_v3 = vmul.f32 %v15579_v25, %v4608_v21  ;;  %v4611_v11 = vadd.f32 %v15572_v28, %v4610_v53  ;;  %v11907_v28 = vld [vmem:[%s16557_s10 + $0x28] sm:$0xff]   ;;  %v5233_v40 = vcombine.low %v15684_v9, %v15674_v18 }
 0x4f9   :  { %v15724_v19 = vcombine.high %v15710_v48, %v15710_v48  ;;  %v15729_v35 = vrot.slane %v16633_v7, 2  ;;  %v15739_v47 = vrot.slane %v4754_v24, %v14232_v13  ;;  %11179 = vmatpush3.bf16.msra.mxu0 %v11907_v28  ;;  %v15758_v1 = vcombine.low %v5121_v43, %v5128_v5 }
 0x4fa   :  { %v15743_v22 = vcombine.high %v15718_v41, %v15718_v41  ;;  %v4648_v27 = vadd.f32 %v15584_v56, %v4633_v3  ;;  %v4634_v45 = vmul.f32 %v15579_v25, %v4611_v11  ;;  %v4962_v57 = vcombine.low %v15662_v31, %v15658_v61 }
 0x4fb   :  { %v15767_v44 = vrot.slane %v5233_v40, %v14232_v13  ;;  %v5184_v28 = vrot.slane %v5177_v6, %v14232_v13  ;;  %v11775_v43 = vpack.i.bf16 %v15758_v1, %v5112_v52  ;;  %v10430_v40 = vrot.slane %v15608_v4, 9 }
 0x4fc   :  { %v4657_v8 = vmax.f32 %v4648_v27, 0.0  ;;  %v4615_v3 = vpop.f32.mrb[52].mxu1  ;;  %v4649_v21 = vadd.f32 %v15584_v56, %v4634_v45  ;;  %v4919_v49 = vsel %vm14256_vm14, %v10437_v42, %v4918_v36  ;;  %v16774_v42 = vrot.slane %v15700_v37, 7 }
 0x4fd   :  { %v4616_v53 = vadd.f32 %v15574_v17, %v4615_v3  ;;  %v11330_v11 = vpop.f32.mrb[53].mxu1  ;;  %v4976_v3 = vrot.slane %v4962_v57, %v14232_v13  ;;  %11776 = vrot.lane.b32.xlu0 %v11775_v43, %s12459_s25  ;;  %v4870_v4 = vsel %vm14256_vm14, %v10430_v40, %v4869_v51 }
 0x4fe   :  { %v4771_v14 = vcombine.high %v4657_v8, %v4657_v8  ;;  %v15764_v27 = vrot.slane %v4657_v8, %v14232_v13  ;;  %v4618_v24 = vpop.f32.mrb[54].mxu1  ;;  %v4658_v15 = vmax.f32 %v4649_v21, 0.0 }
 0x4ff   :  { %v4635_v45 = vmul.f32 %v15579_v25, %v4616_v53  ;;  %v11331_v17 = vpop.f32.mrb[55].mxu1  ;;  %v5241_v24 = vcombine.low %v5128_v5, %v15767_v44  ;;  %v15788_v52 = vcombine.low %v15654_v33, %v4976_v3  ;;  %v11908_v53 = vld [vmem:[%s16557_s10 + $0x70] sm:$0xff]   ;;  %v5264_v5 = vcombine.low %v15690_v16, %v15700_v37 }
 0x500   :  { %v15774_v11 = vrot.slane %v4771_v14, %v14232_v13  ;;  %v15778_v8 = vcombine.high %v15764_v27, %v15764_v27  ;;  %v4788_v6 = vcombine.high %v4658_v15, %v4658_v15  ;;  %v15783_v21 = vrot.slane %v4658_v15, %v14232_v13  ;;  %11180 = vmatprep.subr.bf16.mxu0 %v11908_v53 }
 0x501   :  { %v4650_v25 = vadd.f32 %v15584_v56, %v4635_v45  ;;  %v11770_v14 = vpack.i.bf16 %v5241_v24, %v5232_v54  ;;  %v5176_v15 = vcombine.low %v15643_v62, %v15654_v33  ;;  %v5185_v54 = vcombine.low %v4976_v3, %v5184_v28 }
 0x502   :  { %v15795_v57 = vcombine.high %v15774_v11, %v15774_v11  ;;  %v15801_v43 = vrot.slane %v4788_v6, %v14232_v13  ;;  %v15805_v56 = vcombine.high %v15783_v21, %v15783_v21  ;;  %v4863_v24 = vsel %vm14256_vm14, %v10429_v59, %v4862_v63 }
 0x503   :  { %v4659_v17 = vmax.f32 %v4650_v25, 0.0  ;;  %11771 = vrot.lane.b32.xlu1 %v11770_v14, %s12453_s8  ;;  %v5271_v33 = vrot.slane %v5264_v5, %v14232_v13  ;;  %v11780_v3 = vpack.i.bf16 %v5185_v54, %v5176_v15  ;;  %v4864_v45 = vrot.slane %v4862_v63, 2 }
 0x504   :  { %v15821_v6 = vcombine.high %v15801_v43, %v15801_v43  ;;  %v4871_v5 = vrot.slane %v4869_v51, 2  ;;  %v4922_v51 = vsel %vm14256_vm14, %v15707_v32, %v4921_v50  ;;  %v16775_v50 = vrot.slane %v15690_v16, 9 }
 0x505   :  { %v4805_v53 = vcombine.high %v4659_v17, %v4659_v17  ;;  %v15825_v14 = vrot.slane %v4659_v17, %v14232_v13  ;;  %v5272_v7 = vcombine.low %v5184_v28, %v5271_v33  ;;  %11781 = vrot.lane.b32.xlu0 %v11780_v3, %s12460_s4  ;;  %v4866_v63 = vsel %vm14256_vm14, %v4864_v45, %v4865_v26  ;;  %v11910_v33 = vld [vmem:[%s16557_s10 + $0x78] sm:$0xff]  }
 0x506   :  { %v4925_v59 = vrot.slane %v15821_v6, 7  ;;  %v4876_v28 = vrot.slane %v15625_v55, 7  ;;  %v4873_v26 = vsel %vm14256_vm14, %v4871_v5, %v4872_v58  ;;  %v5016_v46 = vcombine.low %v4863_v24, %v4866_v63 }
 0x507   :  { %v15833_v29 = vrot.slane %v4805_v53, %v14232_v13  ;;  %v15837_v25 = vcombine.high %v15825_v14, %v15825_v14  ;;  %v4928_v17 = vrot.slane %v15825_v14, 7  ;;  %v4883_v53 = vrot.slane %v15658_v61, 7 }
 0x508   :  { %v11790_v10 = vpack.i.bf16 %v5272_v7, %v15788_v52  ;;  %v4877_v12 = vsel %vm14256_vm14, %v10431_v60, %v4876_v28  ;;  %v4878_v55 = vrot.slane %v4876_v28, 2  ;;  %v5017_v18 = vcombine.low %v4870_v4, %v4873_v26 }
 0x509   :  { %v10440_v15 = vrot.slane %v15837_v25, 9  ;;  %v4939_v54 = vrot.slane %v15833_v29, 7  ;;  %v4884_v58 = vsel %vm14256_vm14, %v10432_v2, %v4883_v53  ;;  %v4885_v61 = vrot.slane %v4883_v53, 2 }
 0x50a   :  { %11791 = vrot.lane.b32.xlu1 %v11790_v10, %s12459_s25  ;;  %v5209_v9 = vcombine.low %v4919_v49, %v4922_v51  ;;  %v4933_v0 = vsel %vm14256_vm14, %v16775_v50, %v16774_v42  ;;  %v16776_v60 = vrot.slane %v15646_v23, 7  ;;  %v16777_v2 = vrot.slane %v15678_v39, 7  ;;  %v11909_v39 = vld [vmem:[%s16557_s10 + $0x30] sm:$0xff]   ;;  %v11911_v49 = vld [vmem:[%s16557_s10 + $0x38] sm:$0xff]  }
 0x50b   :  { %v16778_v32 = vrot.slane %v15714_v34, 7  ;;  %v4770_v16 = vcombine.high %v15739_v47, %v15739_v47  ;;  %v5024_v40 = vrot.slane %v5016_v46, %v14232_v13  ;;  %v15903_v23 = vrot.slane %v5017_v18, %v14232_v13  ;;  %11181 = vmatpush3.bf16.msra.mxu0 %v11909_v39 }
 0x50c   :  { %v4880_v31 = vsel %vm14256_vm14, %v4878_v55, %v16776_v60  ;;  %v4887_v36 = vsel %vm14256_vm14, %v4885_v61, %v16777_v2  ;;  %v16779_v4 = vcombine.low %v15724_v19, %v15718_v41  ;;  %v5147_v26 = vcombine.low %v15778_v8, %v15774_v11  ;;  %11182 = vmatprep.subr.bf16.mxu0 %v11910_v33 }
 0x50d   :  { %v4936_v7 = vsel %vm14256_vm14, %v15729_v35, %v16778_v32  ;;  %v5033_v45 = vcombine.low %v4877_v12, %v4880_v31  ;;  %v5034_v24 = vcombine.low %v4884_v58, %v4887_v36  ;;  %v15912_v35 = vrot.slane %v5209_v9, %v14232_v13 }
 0x50e   :  { %v5294_v3 = vcombine.low %v4933_v0, %v4936_v7  ;;  %v5131_v63 = vcombine.low %v15739_v47, %v4770_v16  ;;  %v5138_v5 = vrot.slane %v16779_v4, %v14232_v13  ;;  %v5032_v28 = vcombine.low %v5024_v40, %v15903_v23 }
 0x50f   :  { %v15921_v53 = vrot.slane %v5033_v45, %v14232_v13  ;;  %v15924_v10 = vrot.slane %v5034_v24, %v14232_v13  ;;  %v5148_v55 = vcombine.low %v15783_v21, %v15805_v56  ;;  %v15937_v58 = vcombine.high %v15833_v29, %v15833_v29  ;;  %11183 = vmatpush3.bf16.msra.mxu0 %v11911_v49 }
 0x510   :  { %v5301_v51 = vrot.slane %v5294_v3, %v14232_v13  ;;  %v5145_v12 = vrot.slane %v5131_v63, %v14232_v13  ;;  %v5155_v9 = vrot.slane %v5147_v26, %v14232_v13  ;;  %v5243_v36 = vcombine.low %v15821_v6, %v15825_v14 }
 0x511   :  { %v5049_v61 = vcombine.low %v15921_v53, %v15924_v10  ;;  %v5208_v46 = vcombine.low %v15903_v23, %v15921_v53  ;;  %v5217_v18 = vcombine.low %v15924_v10, %v15912_v35  ;;  %v5162_v0 = vrot.slane %v5148_v55, %v14232_v13 }
 0x512   :  { %v5302_v42 = vcombine.low %v15912_v35, %v5301_v51  ;;  %v5146_v50 = vcombine.low %v5138_v5, %v5145_v12  ;;  %v4942_v60 = vrot.slane %v15937_v58, 7  ;;  %v5242_v2 = vcombine.low %v5145_v12, %v5155_v9 }
 0x513   :  { %v11785_v31 = vpack.i.bf16 %v5049_v61, %v5032_v28  ;;  %v5333_v32 = vcombine.low %v15833_v29, %v15937_v58  ;;  %v5163_v40 = vcombine.low %v5155_v9, %v5162_v0  ;;  %v4890_v45 = vrot.slane %v15724_v19, 7 }
 0x514   :  { %v11795_v7 = vpack.i.bf16 %v5302_v42, %v5049_v61  ;;  %v4897_v24 = vrot.slane %v15739_v47, 7  ;;  %v5250_v39 = vrot.slane %v5243_v36, %v14232_v13  ;;  %v4900_v3 = vrot.slane %v4770_v16, 7 }
 0x515   :  { %11786 = vrot.lane.b32.xlu0 %v11785_v31, %s12453_s8  ;;  %v5340_v33 = vrot.slane %v5333_v32, %v14232_v13  ;;  %v4904_v63 = vrot.slane %v15778_v8, 7  ;;  %v11800_v4 = vpack.i.bf16 %v5163_v40, %v5146_v50  ;;  %v16780_v5 = vrot.slane %v15710_v48, 9 }
 0x516   :  { %11796 = vrot.lane.b32.xlu1 %v11795_v7, %s12460_s4  ;;  %v4892_v26 = vrot.slane %v4890_v45, 2  ;;  %v16781_v49 = vrot.slane %v15743_v22, 9  ;;  %v5251_v12 = vcombine.low %v5162_v0, %v5250_v39  ;;  %v4899_v61 = vrot.slane %v4897_v24, 2 }
 0x517   :  { %v4891_v28 = vsel %vm14256_vm14, %v16780_v5, %v4890_v45  ;;  %v5341_v55 = vcombine.low %v5250_v39, %v5340_v33  ;;  %v16782_v16 = vrot.slane %v15764_v27, 9  ;;  %v16783_v42 = vrot.slane %v15718_v41, 7 }
 0x518   :  { %v4898_v51 = vsel %vm14256_vm14, %v16781_v49, %v4897_v24  ;;  %v4906_v31 = vrot.slane %v4904_v63, 2  ;;  %v10436_v36 = vrot.slane %v15795_v57, 9  ;;  %v16784_v32 = vrot.slane %v15783_v21, 7  ;;  %v16007_v49 = vld [vmem:[%s16557_s10 + $0x80] sm:$0xff]  }
 0x519   :  { %v4905_v9 = vsel %vm14256_vm14, %v16782_v16, %v4904_v63  ;;  %v4894_v50 = vsel %vm14256_vm14, %v4892_v26, %v16783_v42  ;;  %11801 = vrot.lane.b32.xlu0 %v11800_v4, %s12459_s25  ;;  %v15980_v0 = vpack.c.bf16 %v5341_v55, %v5163_v40  ;;  %v11810_v45 = vpack.i.bf16 %v5251_v12, %v5242_v2 }
 0x51a   :  { %v4913_v7 = vrot.slane %v16784_v32, 2  ;;  %v4901_v24 = vsel %vm14256_vm14, %v4899_v61, %v4900_v3  ;;  %v4914_v39 = vrot.slane %v15805_v56, 7  ;;  %v16785_v41 = vrot.slane %v15774_v11, 7  ;;  %11332 = vmatprep.subr.bf16.mxu0 %v16007_v49 }
 0x51b   :  { %v16786_v63 = vmov %v16784_v32  ;;  %v16787_v40 = vrot.slane %v15801_v43, 9  ;;  %v4927_v56 = vrot.slane %v4925_v59, 2  ;;  %11811 = vrot.lane.b32.xlu1 %v11810_v45, %s12453_s8  ;;  %v5050_v3 = vcombine.low %v4891_v28, %v4894_v50 }
 0x51c   :  { %v4908_v33 = vsel %vm14256_vm14, %v4906_v31, %v16785_v41  ;;  %v4912_v5 = vsel %vm14256_vm14, %v10436_v36, %v16786_v63  ;;  %v4915_v11 = vsel %vm14256_vm14, %v4913_v7, %v4914_v39  ;;  %v5051_v4 = vcombine.low %v4898_v51, %v4901_v24 }
 0x51d   :  { %v4926_v2 = vsel %vm14256_vm14, %v16787_v40, %v4925_v59  ;;  %v5067_v26 = vcombine.low %v4905_v9, %v4908_v33  ;;  %v4929_v12 = vsel %vm14256_vm14, %v4927_v56, %v4928_v17  ;;  %v5068_v55 = vcombine.low %v4912_v5, %v4915_v11 }
 0x51e   :  { %v4996_v59 = vcombine.low %v15795_v57, %v15783_v21  ;;  %v16788_v28 = vcombine.low %v15764_v27, %v15778_v8  ;;  %v5058_v61 = vrot.slane %v5050_v3, %v14232_v13  ;;  %v16021_v16 = vrot.slane %v5051_v4, %v14232_v13 }
 0x51f   :  { %v16024_v9 = vrot.slane %v5067_v26, %v14232_v13  ;;  %v5219_v14 = vcombine.low %v4926_v2, %v4929_v12  ;;  %v16028_v17 = vrot.slane %v5068_v55, %v14232_v13  ;;  %v5187_v27 = vcombine.low %v15801_v43, %v15821_v6 }
 0x520   :  { %v5003_v51 = vrot.slane %v16788_v28, %v14232_v13  ;;  %v5010_v21 = vrot.slane %v4996_v59, %v14232_v13  ;;  %v5273_v8 = vcombine.low %v15837_v25, %v15833_v29  ;;  %v5066_v57 = vcombine.low %v5058_v61, %v16021_v16 }
 0x521   :  { %v5218_v42 = vcombine.low %v16021_v16, %v16024_v9  ;;  %v16039_v50 = vrot.slane %v5219_v14, %v14232_v13  ;;  %v4979_v31 = vcombine.low %v15743_v22, %v15739_v47  ;;  %v5083_v36 = vcombine.low %v16024_v9, %v16028_v17 }
 0x522   :  { %v16045_v32 = vcombine.low %v5003_v51, %v5010_v21  ;;  %v5194_v43 = vrot.slane %v5187_v27, %v14232_v13  ;;  %v5280_v6 = vrot.slane %v5273_v8, %v14232_v13  ;;  %v4940_v47 = vsel %vm14256_vm14, %v10440_v15, %v4939_v54 }
 0x523   :  { %v5227_v7 = vcombine.low %v16028_v17, %v16039_v50  ;;  %v16052_v45 = vrot.slane %v4979_v31, %v14232_v13  ;;  %v4941_v22 = vrot.slane %v4939_v54, 2  ;;  %v11805_v24 = vpack.i.bf16 %v5083_v36, %v5066_v57 }
 0x524   :  { %v5281_v39 = vcombine.low %v5194_v43, %v5280_v6  ;;  %v5195_v41 = vcombine.low %v5010_v21, %v5194_v43  ;;  %v16789_v33 = vcombine.low %v15591_v30, %v15598_v20  ;;  %v16790_v29 = vcombine.low %v15710_v48, %v15724_v19 }
 0x525   :  { %v5186_v5 = vcombine.low %v16052_v45, %v5003_v51  ;;  %v4943_v25 = vsel %vm14256_vm14, %v4941_v22, %v4942_v60  ;;  %v5324_v54 = vcombine.low %v15700_v37, %v15714_v34  ;;  %11806 = vrot.lane.b32.xlu0 %v11805_v24, %s12453_s8 }
 0x526   :  { %v4952_v63 = vrot.slane %v16789_v33, %v14232_v13  ;;  %v16075_v15 = vrot.slane %v16790_v29, %v14232_v13  ;;  %v11815_v30 = vpack.i.bf16 %v5281_v39, %v16045_v32  ;;  %v5303_v20 = vcombine.low %v4940_v47, %v4943_v25 }
 0x527   :  { %v11825_v58 = vpack.i.bf16 %v5195_v41, %v5186_v5  ;;  %v5331_v60 = vrot.slane %v5324_v54, %v14232_v13 }
 0x528   :  { %v4960_v40 = vcombine.low %v4952_v63, %v15643_v62  ;;  %v4994_v38 = vcombine.low %v16075_v15, %v16052_v45  ;;  %11816 = vrot.lane.b32.xlu1 %v11815_v30, %s12459_s25  ;;  %v5310_v48 = vrot.slane %v5303_v20, %v14232_v13 }
 0x529   :  { %v5332_v19 = vcombine.low %v15767_v44, %v5331_v60  ;;  %11826 = vrot.lane.b32.xlu0 %v11825_v58, %s12460_s4 }
 0x52a   :  { %v5311_v37 = vcombine.low %v16039_v50, %v5310_v48 }
 0x52b   :  { %v16091_v34 = vpack.c.bf16 %v5332_v19, %v15758_v1 }
 0x52c   :  { %v11820_v62 = vpack.i.bf16 %v5311_v37, %v5083_v36 }
 0x52e   :  { %11821 = vrot.lane.b32.xlu1 %v11820_v62, %s12460_s4 }
 0x56f   :  { %v11777_v2 = vpop.permute.xlu0 %11776 }
 0x570   :  { %v11779_v55 = vunpack.i.h.bf16 %v11777_v2  ;;  %v11778_v44 = vunpack.i.l.bf16 %v11777_v2 }
 0x575   :  { %v11772_v56 = vpop.permute.xlu1 %11771 }
 0x576   :  { %v11774_v4 = vunpack.i.h.bf16 %v11772_v56  ;;  %v11773_v26 = vunpack.i.l.bf16 %v11772_v56 }
 0x577   :  { %v11782_v11 = vpop.permute.xlu0 %11781 }
 0x578   :  { %v5359_v1 = vsel %vm1485_vm2, %v5217_v18, %v11774_v4  ;;  %v5358_v28 = vsel %vm1485_vm2, %v5208_v46, %v11773_v26  ;;  %v11784_v21 = vunpack.i.h.bf16 %v11782_v11  ;;  %v11783_v27 = vunpack.i.l.bf16 %v11782_v11  ;;  %v5721_v4 = vld [vmem:[#allocation5 + $0x20] sm:$0xff]  ;;  %v5718_v26 = vld [vmem:[#allocation5 + $0x8] sm:$0xff] }
 0x57c   :  { %v11792_v3 = vpop.permute.xlu1 %11791 }
 0x57d   :  { %v11794_v12 = vunpack.i.h.bf16 %v11792_v3  ;;  %v11793_v13 = vunpack.i.l.bf16 %v11792_v3  ;;  %v5717_v3 = vld [vmem:[#allocation5] sm:$0xff] }
 0x57f   :  { %v5363_v31 = vsel %vm2118_vm6, %v5359_v1, %v11794_v12  ;;  %v5362_v36 = vsel %vm2118_vm6, %v5358_v28, %v11793_v13  ;;  %v10463_v12 = vcombine.low %v5717_v3, %v5721_v4  ;;  %v10464_v13 = vcombine.high %v5717_v3, %v5721_v4  ;;  %v5782_v3 = vld [vmem:[#allocation5 + $0x208] sm:$0xff] }
 0x580   :  { %v5786_v4 = vld [vmem:[#allocation5 + $0x228] sm:$0xff] }
 0x581   :  { %7253 = vmatprep.subr.bf16.mxu1 %v10464_v13 }
 0x582   :  { %7254 = vmatpush1.bf16.msra.mxu1 %v10463_v12 }
 0x587   :  { %v11787_v59 = vpop.permute.xlu0 %11786 }
 0x588   :  { %v11789_v51 = vunpack.i.h.bf16 %v11787_v59  ;;  %v11788_v61 = vunpack.i.l.bf16 %v11787_v59  ;;  %v11797_v14 = vpop.permute.xlu1 %11796  ;;  %v5729_v59 = vld [vmem:[#allocation5 + $0x60] sm:$0xff] }
 0x589   :  { %v11799_v8 = vunpack.i.h.bf16 %v11797_v14  ;;  %v11798_v57 = vunpack.i.l.bf16 %v11797_v14  ;;  %v5730_v14 = vld [vmem:[#allocation5 + $0x68] sm:$0xff] }
 0x58a   :  { %v5347_v35 = vsel %vm1485_vm2, %v15788_v52, %v11789_v51  ;;  %v5346_v10 = vsel %vm1485_vm2, %v4960_v40, %v11788_v61  ;;  %v11913_v52 = vld [vmem:[%s16557_s10 + $0x88] sm:$0xff]  }
 0x58b   :  { %v5351_v23 = vsel %vm2118_vm6, %v5347_v35, %v11779_v55  ;;  %v5350_v53 = vsel %vm2118_vm6, %v5346_v10, %v11778_v44  ;;  %v5366_v46 = vsel %vm2135_vm7, %v5362_v36, %v11798_v57  ;;  %v5367_v18 = vsel %vm2135_vm7, %v5363_v31, %v11799_v8  ;;  %v11802_v22 = vpop.permute.xlu0 %11801  ;;  %v5722_v55 = vld [vmem:[#allocation5 + $0x28] sm:$0xff]  ;;  %v5725_v44 = vld [vmem:[#allocation5 + $0x40] sm:$0xff] }
 0x58c   :  { %v5355_v43 = vsel %vm2135_vm7, %v5351_v23, %v11784_v21  ;;  %v5354_v6 = vsel %vm2135_vm7, %v5350_v53, %v11783_v27  ;;  %v5371_v45 = vpack.c.bf16 %v5367_v18, %v5366_v46  ;;  %v11803_v60 = vunpack.i.l.bf16 %v11802_v22  ;;  %v5726_v61 = vld [vmem:[#allocation5 + $0x48] sm:$0xff]  ;;  %v5733_v21 = vld [vmem:[#allocation5 + $0x80] sm:$0xff] }
 0x58d   :  { %v5370_v47 = vpack.c.bf16 %v5355_v43, %v5354_v6  ;;  %v11812_v24 = vpop.permute.xlu1 %11811  ;;  %v10465_v1 = vcombine.low %v5718_v26, %v5722_v55  ;;  %v10466_v28 = vcombine.high %v5718_v26, %v5722_v55  ;;  %v10472_v51 = vcombine.high %v5725_v44, %v5729_v59  ;;  %v5734_v8 = vld [vmem:[#allocation5 + $0x88] sm:$0xff]  ;;  %v5741_v10 = vld [vmem:[#allocation5 + $0xc0] sm:$0xff] }
 0x58e   :  { %5522 = vmatprep.mubr.bf16.mxu0 %v5371_v45  ;;  %v11814_v5 = vunpack.i.h.bf16 %v11812_v24  ;;  %v11813_v25 = vunpack.i.l.bf16 %v11812_v24  ;;  %v10474_v27 = vcombine.high %v5726_v61, %v5730_v14  ;;  %v5738_v57 = vld [vmem:[#allocation5 + $0xa8] sm:$0xff]  ;;  %v10473_v31 = vcombine.low %v5726_v61, %v5730_v14  ;;  %v5745_v23 = vld [vmem:[#allocation5 + $0xe0] sm:$0xff] }
 0x58f   :  { %5523 = vmatmul.mubr.bf16.vlgmr.msra.gmra.mrb[32].mxu0 %v5370_v47  ;;  %7255 = vmatprep.subr.bf16.mxu1 %v10472_v51  ;;  %v10482_v35 = vcombine.high %v5734_v8, %v5738_v57  ;;  %v5742_v53 = vld [vmem:[#allocation5 + $0xc8] sm:$0xff]  ;;  %v10481_v43 = vcombine.low %v5734_v8, %v5738_v57  ;;  %v10488_v6 = vcombine.high %v5741_v10, %v5745_v23  ;;  %v5749_v47 = vld [vmem:[#allocation5 + $0x100] sm:$0xff] }
 0x590   :  { %11333 = vmatpush3.bf16.msra.mxu0 %v16007_v49  ;;  %v11804_v49 = vunpack.i.h.bf16 %v11802_v22  ;;  %v5361_v48 = vsel %vm1485_vm2, %v5227_v7, %v11814_v5  ;;  %v5360_v19 = vsel %vm1485_vm2, %v5218_v42, %v11813_v25  ;;  %v5746_v46 = vld [vmem:[#allocation5 + $0xe8] sm:$0xff]  ;;  %v5757_v5 = vld [vmem:[#allocation5 + $0x140] sm:$0xff]  ;;  %v10530_v55 = vcombine.high %v5782_v3, %v5786_v4 }
 0x591   :  { %11334 = vmatprep.subr.bf16.mxu0 %v11913_v52  ;;  %v10490_v45 = vcombine.high %v5742_v53, %v5746_v46  ;;  %v5750_v22 = vld [vmem:[#allocation5 + $0x108] sm:$0xff]  ;;  %v5761_v25 = vld [vmem:[#allocation5 + $0x160] sm:$0xff]  ;;  %v10529_v61 = vcombine.low %v5782_v3, %v5786_v4  ;;  %v10462_v3 = vld [vmem:[%s16559_s12] ss:$0 sm:$0xff] }
 0x592   :  { %v5754_v24 = vld [vmem:[#allocation5 + $0x128] sm:$0xff] }
 0x593   :  { %v5798_v8 = vld [vmem:[#allocation5 + $0x288] sm:$0xff] }
 0x594   :  { %11335 = vmatpush3.bf16.msra.mxu0 %v11913_v52  ;;  %v5753_v52 = vld [vmem:[#allocation5 + $0x120] sm:$0xff]  ;;  %v5802_v57 = vld [vmem:[#allocation5 + $0x2a8] sm:$0xff] }
 0x595   :  { %7335 = vmatprep.subr.bf16.mxu0 %v10466_v28  ;;  %v5794_v28 = vld [vmem:[#allocation5 + $0x268] sm:$0xff] }
 0x597   :  { %v11807_v39 = vpop.permute.xlu0 %11806 }
 0x598   :  { %v11809_v41 = vunpack.i.h.bf16 %v11807_v39  ;;  %v11808_v33 = vunpack.i.l.bf16 %v11807_v39  ;;  %v10487_v39 = vcombine.low %v5741_v10, %v5745_v23  ;;  %v5805_v10 = vld [vmem:[#allocation5 + $0x2c0] sm:$0xff] }
 0x599   :  { %v5809_v23 = vld [vmem:[#allocation5 + $0x2e0] sm:$0xff] }
 0x59a   :  { %v11817_v63 = vpop.permute.xlu1 %11816  ;;  %v5349_v15 = vsel %vm1485_vm2, %v16045_v32, %v11809_v41  ;;  %v5348_v54 = vsel %vm1485_vm2, %v4994_v38, %v11808_v33  ;;  %v10489_v41 = vcombine.low %v5742_v53, %v5746_v46  ;;  %v10496_v33 = vcombine.high %v5749_v47, %v5753_v52  ;;  %v5806_v53 = vld [vmem:[#allocation5 + $0x2c8] sm:$0xff] }
 0x59b   :  { %v11827_v29 = vpop.permute.xlu0 %11826  ;;  %v11819_v30 = vunpack.i.h.bf16 %v11817_v63  ;;  %v11818_v20 = vunpack.i.l.bf16 %v11817_v63  ;;  %v5352_v38 = vsel %vm2118_vm6, %v5348_v54, %v11803_v60  ;;  %v5353_v2 = vsel %vm2118_vm6, %v5349_v15, %v11804_v49  ;;  %v5762_v15 = vld [vmem:[#allocation5 + $0x168] sm:$0xff]  ;;  %v5769_v49 = vld [vmem:[#allocation5 + $0x1a0] sm:$0xff] }
 0x59c   :  { %v11829_v40 = vunpack.i.h.bf16 %v11827_v29  ;;  %v11828_v58 = vunpack.i.l.bf16 %v11827_v29  ;;  %v10498_v63 = vcombine.high %v5750_v22, %v5754_v24  ;;  %v5758_v29 = vld [vmem:[#allocation5 + $0x148] sm:$0xff]  ;;  %v10495_v54 = vcombine.low %v5749_v47, %v5753_v52  ;;  %v5813_v47 = vld [vmem:[#allocation5 + $0x300] sm:$0xff] }
 0x59d   :  { %v5364_v56 = vsel %vm2118_vm6, %v5360_v19, %v11818_v20  ;;  %v5365_v11 = vsel %vm2118_vm6, %v5361_v48, %v11819_v30  ;;  %v10497_v30 = vcombine.low %v5750_v22, %v5754_v24  ;;  %v10504_v20 = vcombine.high %v5757_v5, %v5761_v25  ;;  %v5766_v60 = vld [vmem:[#allocation5 + $0x188] sm:$0xff]  ;;  %v5817_v52 = vld [vmem:[#allocation5 + $0x320] sm:$0xff] }
 0x59e   :  { %v5356_v17 = vsel %vm2135_vm7, %v5352_v38, %v11828_v58  ;;  %v5357_v50 = vsel %vm2135_vm7, %v5353_v2, %v11829_v40  ;;  %v10506_v40 = vcombine.high %v5758_v29, %v5762_v15  ;;  %v5765_v58 = vld [vmem:[#allocation5 + $0x180] sm:$0xff]  ;;  %v5770_v48 = vld [vmem:[#allocation5 + $0x1a8] sm:$0xff]  ;;  %v10503_v19 = vcombine.low %v5757_v5, %v5761_v25 }
 0x59f   :  { %v5373_v42 = vpack.c.bf16 %v5357_v50, %v5356_v17  ;;  %v5773_v38 = vld [vmem:[#allocation5 + $0x1c0] sm:$0xff]  ;;  %v10511_v17 = vcombine.low %v5765_v58, %v5769_v49  ;;  %v10513_v50 = vcombine.low %v5766_v60, %v5770_v48  ;;  %v5810_v46 = vld [vmem:[#allocation5 + $0x2e8] sm:$0xff] }
 0x5a0   :  { %v11822_v37 = vpop.permute.xlu1 %11821  ;;  %v5777_v2 = vld [vmem:[#allocation5 + $0x1e0] sm:$0xff]  ;;  %v5814_v22 = vld [vmem:[#allocation5 + $0x308] sm:$0xff] }
 0x5a1   :  { %v11824_v32 = vunpack.i.h.bf16 %v11822_v37  ;;  %v11823_v62 = vunpack.i.l.bf16 %v11822_v37  ;;  %v10505_v37 = vcombine.low %v5758_v29, %v5762_v15  ;;  %v10519_v26 = vcombine.low %v5773_v38, %v5777_v2  ;;  %v5818_v24 = vld [vmem:[#allocation5 + $0x328] sm:$0xff]  ;;  %v5821_v5 = vld [vmem:[#allocation5 + $0x340] sm:$0xff] }
 0x5a2   :  { %v5825_v25 = vld [vmem:[#allocation5 + $0x360] sm:$0xff]  ;;  %v5822_v29 = vld [vmem:[#allocation5 + $0x348] sm:$0xff] }
 0x5a3   :  { %v5368_v7 = vsel %vm2135_vm7, %v5364_v56, %v11823_v62  ;;  %v5369_v16 = vsel %vm2135_vm7, %v5365_v11, %v11824_v32  ;;  %v10512_v32 = vcombine.high %v5765_v58, %v5769_v49  ;;  %v10514_v62 = vcombine.high %v5766_v60, %v5770_v48  ;;  %v5774_v56 = vld [vmem:[#allocation5 + $0x1c8] sm:$0xff] }
 0x5a4   :  { %v5374_v9 = vpack.c.bf16 %v5369_v16, %v5368_v7  ;;  %v5778_v11 = vld [vmem:[#allocation5 + $0x1e8] sm:$0xff]  ;;  %v10520_v7 = vcombine.high %v5773_v38, %v5777_v2  ;;  %v10567_v58 = vcombine.low %v5821_v5, %v5825_v25 }
 0x5a5   :  { %v10522_v16 = vcombine.high %v5774_v56, %v5778_v11  ;;  %v10521_v12 = vcombine.low %v5774_v56, %v5778_v11  ;;  %v5826_v15 = vld [vmem:[#allocation5 + $0x368] sm:$0xff] }
 0x5a6   :  { %5530 = vmatprep.mubr.bf16.mxu0 %v5374_v9  ;;  %v5781_v9 = vld [vmem:[#allocation5 + $0x200] sm:$0xff]  ;;  %v10569_v49 = vcombine.low %v5822_v29, %v5826_v15 }
 0x5a7   :  { %5531 = vmatmul.mubr.bf16.gmra.mrb[36].mxu0 %v5373_v42  ;;  %v5785_v42 = vld [vmem:[#allocation5 + $0x220] sm:$0xff] }
 0x5a8   :  { %11336 = vmatprep.mubr.msk.bf16.mxu0 %vm1485_vm2, %v16091_v34  ;;  %v5737_v34 = vld [vmem:[#allocation5 + $0xa0] sm:$0xff]  ;;  %v10528_v13 = vcombine.high %v5781_v9, %v5785_v42  ;;  %v10527_v51 = vcombine.low %v5781_v9, %v5785_v42 }
 0x5a9   :  { %v10480_v36 = vcombine.high %v5733_v21, %v5737_v34  ;;  %v10479_v18 = vcombine.low %v5733_v21, %v5737_v34  ;;  %v5801_v34 = vld [vmem:[#allocation5 + $0x2a0] sm:$0xff] }
 0x5af   :  { %11337 = vmatmul.mubr.msk.bf16.vlgmr.msra.gmra.mrb[40].mxu0 %vm1485_vm2, %v15980_v0  ;;  %v10471_v0 = vcombine.low %v5725_v44, %v5729_v59  ;;  %v5789_v44 = vld [vmem:[#allocation5 + $0x240] sm:$0xff] }
 0x5b0   :  { %7336 = vmatpush1.bf16.msra.mxu0 %v10465_v1  ;;  %v5793_v59 = vld [vmem:[#allocation5 + $0x260] sm:$0xff]  ;;  %v5790_v1 = vld [vmem:[#allocation5 + $0x248] sm:$0xff] }
 0x5b1   :  { %7337 = vmatprep.subr.bf16.mxu0 %v10474_v27  ;;  %7256 = vmatpush1.bf16.msra.mxu1 %v10471_v0  ;;  %v10536_v14 = vcombine.high %v5789_v44, %v5793_v59  ;;  %v10538_v21 = vcombine.high %v5790_v1, %v5794_v28  ;;  %v5797_v27 = vld [vmem:[#allocation5 + $0x280] sm:$0xff]  ;;  %v10535_v0 = vcombine.low %v5789_v44, %v5793_v59 }
 0x5b2   :  { %7257 = vmatprep.subr.bf16.mxu1 %v10480_v36  ;;  %v10544_v36 = vcombine.high %v5797_v27, %v5801_v34 }
 0x5b4   :  { %7338 = vmatpush1.bf16.msra.mxu0 %v10473_v31  ;;  %v10537_v31 = vcombine.low %v5790_v1, %v5794_v28 }
 0x5b5   :  { %7339 = vmatprep.subr.bf16.mxu0 %v10482_v35  ;;  %7258 = vmatpush1.bf16.msra.mxu1 %v10479_v18  ;;  %v10546_v35 = vcombine.high %v5798_v8, %v5802_v57  ;;  %v10543_v18 = vcombine.low %v5797_v27, %v5801_v34 }
 0x5b6   :  { %7259 = vmatprep.subr.bf16.mxu1 %v10488_v6  ;;  %v10552_v6 = vcombine.high %v5805_v10, %v5809_v23 }
 0x5b8   :  { %7340 = vmatpush1.bf16.msra.mxu0 %v10481_v43  ;;  %v10545_v43 = vcombine.low %v5798_v8, %v5802_v57  ;;  %v5834_v57 = vld [vmem:[#allocation5 + $0x3a8] sm:$0xff] }
 0x5b9   :  { %7341 = vmatprep.subr.bf16.mxu0 %v10490_v45  ;;  %7260 = vmatpush1.bf16.msra.mxu1 %v10487_v39  ;;  %v10554_v45 = vcombine.high %v5806_v53, %v5810_v46  ;;  %v10551_v39 = vcombine.low %v5805_v10, %v5809_v23 }
 0x5ba   :  { %7261 = vmatprep.subr.bf16.mxu1 %v10496_v33  ;;  %v10560_v33 = vcombine.high %v5813_v47, %v5817_v52 }
 0x5bc   :  { %7342 = vmatpush1.bf16.msra.mxu0 %v10489_v41  ;;  %v10553_v41 = vcombine.low %v5806_v53, %v5810_v46 }
 0x5bd   :  { %7343 = vmatprep.subr.bf16.mxu0 %v10498_v63  ;;  %7262 = vmatpush1.bf16.msra.mxu1 %v10495_v54  ;;  %v10562_v63 = vcombine.high %v5814_v22, %v5818_v24  ;;  %v10559_v54 = vcombine.low %v5813_v47, %v5817_v52 }
 0x5be   :  { %7263 = vmatprep.subr.bf16.mxu1 %v10504_v20  ;;  %v10568_v20 = vcombine.high %v5821_v5, %v5825_v25 }
 0x5c0   :  { %7344 = vmatpush1.bf16.msra.mxu0 %v10497_v30  ;;  %v10561_v30 = vcombine.low %v5814_v22, %v5818_v24 }
 0x5c1   :  { %7345 = vmatprep.subr.bf16.mxu0 %v10506_v40  ;;  %7264 = vmatpush1.bf16.msra.mxu1 %v10503_v19  ;;  %v10570_v40 = vcombine.high %v5822_v29, %v5826_v15 }
 0x5c2   :  { %7265 = vmatprep.subr.bf16.mxu1 %v10512_v32 }
 0x5c4   :  { %7346 = vmatpush1.bf16.msra.mxu0 %v10505_v37 }
 0x5c5   :  { %7347 = vmatprep.subr.bf16.mxu0 %v10514_v62  ;;  %7266 = vmatpush1.bf16.msra.mxu1 %v10511_v17 }
 0x5c6   :  { %7267 = vmatprep.subr.bf16.mxu1 %v10520_v7  ;;  %v10461_v7 = vld [vmem:[%s16558_s11] ss:$0 sm:$0xff] }
 0x5c8   :  { %7348 = vmatpush1.bf16.msra.mxu0 %v10513_v50 }
 0x5c9   :  { %7349 = vmatprep.subr.bf16.mxu0 %v10522_v16  ;;  %7268 = vmatpush1.bf16.msra.mxu1 %v10519_v26 }
 0x5ca   :  { %7269 = vmatprep.subr.bf16.mxu1 %v10528_v13 }
 0x5cc   :  { %7350 = vmatpush1.bf16.msra.mxu0 %v10521_v12 }
 0x5cd   :  { %7351 = vmatprep.subr.bf16.mxu0 %v10530_v55  ;;  %7270 = vmatpush1.bf16.msra.mxu1 %v10527_v51  ;;  %v5829_v51 = vld [vmem:[#allocation5 + $0x380] sm:$0xff] }
 0x5ce   :  { %7271 = vmatprep.subr.bf16.mxu1 %v10536_v14  ;;  %v5830_v14 = vld [vmem:[#allocation5 + $0x388] sm:$0xff] }
 0x5d0   :  { %7352 = vmatpush1.bf16.msra.mxu0 %v10529_v61  ;;  %v5833_v61 = vld [vmem:[#allocation5 + $0x3a0] sm:$0xff] }
 0x5d1   :  { %7353 = vmatprep.subr.bf16.mxu0 %v10538_v21  ;;  %7272 = vmatpush1.bf16.msra.mxu1 %v10535_v0  ;;  %v10575_v34 = vcombine.low %v5829_v51, %v5833_v61  ;;  %v10576_v8 = vcombine.high %v5829_v51, %v5833_v61 }
 0x5d2   :  { %7273 = vmatprep.subr.bf16.mxu1 %v10544_v36  ;;  %v10577_v36 = vcombine.low %v5830_v14, %v5834_v57 }
 0x5d4   :  { %7354 = vmatpush1.bf16.msra.mxu0 %v10537_v31 }
 0x5d5   :  { %7355 = vmatprep.subr.bf16.mxu0 %v10546_v35  ;;  %7274 = vmatpush1.bf16.msra.mxu1 %v10543_v18  ;;  %v10578_v35 = vcombine.high %v5830_v14, %v5834_v57 }
 0x5d6   :  { %7275 = vmatprep.subr.bf16.mxu1 %v10552_v6 }
 0x5d8   :  { %7356 = vmatpush1.bf16.msra.mxu0 %v10545_v43 }
 0x5d9   :  { %7357 = vmatprep.subr.bf16.mxu0 %v10554_v45  ;;  %7276 = vmatpush1.bf16.msra.mxu1 %v10551_v39 }
 0x5da   :  { %7277 = vmatprep.subr.bf16.mxu1 %v10560_v33 }
 0x5dc   :  { %7358 = vmatpush1.bf16.msra.mxu0 %v10553_v41 }
 0x5dd   :  { %7359 = vmatprep.subr.bf16.mxu0 %v10562_v63  ;;  %7278 = vmatpush1.bf16.msra.mxu1 %v10559_v54 }
 0x5de   :  { %7279 = vmatprep.subr.bf16.mxu1 %v10568_v20 }
 0x5e0   :  { %7360 = vmatpush1.bf16.msra.mxu0 %v10561_v30 }
 0x5e1   :  { %7361 = vmatprep.subr.bf16.mxu0 %v10570_v40  ;;  %7280 = vmatpush1.bf16.msra.mxu1 %v10567_v58 }
 0x5e2   :  { %7281 = vmatprep.subr.bf16.mxu1 %v10576_v8 }
 0x5e4   :  { %7362 = vmatpush1.bf16.msra.mxu0 %v10569_v49 }
 0x5e5   :  { %7363 = vmatprep.subr.bf16.mxu0 %v10578_v35  ;;  %7282 = vmatpush1.bf16.msra.mxu1 %v10575_v34  ;;  %v5850_v34 = vld [vmem:[#allocation5 + $0x428] sm:$0xff] }
 0x5e8   :  { %7364 = vmatpush1.bf16.msra.mxu0 %v10577_v36 }
 0x662   :  { %v11184_v60 = vpop.f32.mrb[32].mxu0 }
 0x663   :  { %v11185_v48 = vpop.f32.mrb[33].mxu0 }
 0x664   :  { %v11186_v19 = vadd.f32 %v11185_v48, %v11184_v60  ;;  %v11187_v37 = vpop.f32.mrb[34].mxu0 }
 0x665   :  { %v11188_v32 = vpop.f32.mrb[35].mxu0 }
 0x666   :  { %v11189_v62 = vadd.f32 %v11188_v32, %v11187_v37 }
 0x67a   :  { %v11190_v38 = vpop.f32.mrb[36].mxu0 }
 0x67b   :  { %v11191_v2 = vpop.f32.mrb[37].mxu0 }
 0x67c   :  { %v11192_v56 = vadd.f32 %v11191_v2, %v11190_v38  ;;  %v11193_v11 = vpop.f32.mrb[38].mxu0 }
 0x67d   :  { %v11194_v17 = vpop.f32.mrb[39].mxu0 }
 0x67e   :  { %v11195_v50 = vadd.f32 %v11194_v17, %v11193_v11 }
 0x682   :  { %v11338_v16 = vpop.f32.mrb[40].mxu0 }
 0x683   :  { %v5582_v9 = vadd.f32 %v11338_v16, %v11192_v56  ;;  %v5573_v42 = vpop.f32.mrb[41].mxu0 }
 0x684   :  { %v5574_v4 = vadd.f32 %v11186_v19, %v5573_v42  ;;  %v11339_v26 = vpop.f32.mrb[42].mxu0 }
 0x685   :  { %v5596_v12 = vmul.f32 %v10461_v7, %v5582_v9  ;;  %v5585_v13 = vadd.f32 %v11339_v26, %v11195_v50  ;;  %v5576_v55 = vpop.f32.mrb[43].mxu0 }
 0x686   :  { %v5594_v44 = vmul.f32 %v10461_v7, %v5574_v4  ;;  %v5577_v59 = vadd.f32 %v11189_v62, %v5576_v55  ;;  %v5841_v4 = vld [vmem:[#allocation5 + $0x3e0] sm:$0xff] }
 0x687   :  { %v5606_v1 = vadd.f32 %v10462_v3, %v5596_v12  ;;  %v5597_v28 = vmul.f32 %v10461_v7, %v5585_v13 }
 0x688   :  { %v5604_v21 = vadd.f32 %v10462_v3, %v5594_v44  ;;  %v5595_v27 = vmul.f32 %v10461_v7, %v5577_v59  ;;  %v5838_v44 = vld [vmem:[#allocation5 + $0x3c8] sm:$0xff] }
 0x689   :  { %v16146_v0 = vmax.f32 %v5606_v1, 0.0  ;;  %v5607_v31 = vadd.f32 %v10462_v3, %v5597_v28  ;;  %v5842_v59 = vld [vmem:[#allocation5 + $0x3e8] sm:$0xff]  ;;  %v16196_v1 = vld [vmem:[#allocation5 + $0x400] sm:$0xff] }
 0x68a   :  { %v16148_v10 = vmax.f32 %v5604_v21, 0.0  ;;  %v5605_v23 = vadd.f32 %v10462_v3, %v5595_v27  ;;  %v5837_v3 = vld [vmem:[#allocation5 + $0x3c0] sm:$0xff]  ;;  %v5846_v27 = vld [vmem:[#allocation5 + $0x408] sm:$0xff] }
 0x68b   :  { %v16150_v53 = vmax.f32 %v5607_v31, 0.0  ;;  %v5624_v46 = vrot.slane %v16146_v0, 1  ;;  %v5646_v18 = vrot.slane %v16146_v0, 5  ;;  %v5640_v43 = vrot.slane %v16146_v0, 4  ;;  %v5849_v21 = vld [vmem:[#allocation5 + $0x420] sm:$0xff] }
 0x68c   :  { %v16155_v6 = vmax.f32 %v5605_v23, 0.0  ;;  %v5623_v45 = vrot.slane %v16148_v10, 2  ;;  %v5645_v47 = vrot.slane %v16148_v10, 6  ;;  %v5618_v52 = vrot.slane %v16148_v10, 1 }
 0x68d   :  { %v5639_v22 = vrot.slane %v16148_v10, 5  ;;  %v5684_v24 = vrot.slane %v16150_v53, 4  ;;  %v5629_v39 = vrot.slane %v16148_v10, 3  ;;  %v5630_v41 = vrot.slane %v16146_v0, 2 }
 0x68e   :  { %v5625_v33 = vsel %vm5615_vm1, %v5624_v46, %v5623_v45  ;;  %v5647_v63 = vsel %vm5615_vm1, %v5646_v18, %v5645_v47  ;;  %v5619_v5 = vsel %vm5615_vm1, %v16146_v0, %v5618_v52  ;;  %v5662_v25 = vrot.slane %v16155_v6, 1 }
 0x68f   :  { %v11835_v29 = vpack.i.bf16 %v5625_v33, %v5647_v63  ;;  %v5641_v15 = vsel %vm5615_vm1, %v5640_v43, %v5639_v22  ;;  %v5683_v54 = vrot.slane %v16155_v6, 5  ;;  %v5631_v30 = vsel %vm5615_vm1, %v5630_v41, %v5629_v39 }
 0x690   :  { %v11830_v20 = vpack.i.bf16 %v5619_v5, %v5641_v15  ;;  %v5663_v40 = vsel %vm5615_vm1, %v16150_v53, %v5662_v25  ;;  %v5651_v58 = vrot.slane %v16148_v10, 7  ;;  %v5652_v49 = vrot.slane %v16146_v0, 6 }
 0x691   :  { %11836 = vrot.lane.b32.xlu0 %v11835_v29, %s12459_s25  ;;  %v5685_v60 = vsel %vm5615_vm1, %v5684_v24, %v5683_v54  ;;  %v5673_v48 = vrot.slane %v16155_v6, 3  ;;  %v5674_v19 = vrot.slane %v16150_v53, 2  ;;  %v5695_v37 = vrot.slane %v16155_v6, 7  ;;  %v5853_v29 = vld [vmem:[#allocation5 + $0x440] sm:$0xff] }
 0x692   :  { %11831 = vrot.lane.b32.xlu1 %v11830_v20, %s12453_s8  ;;  %v11845_v32 = vpack.i.bf16 %v5663_v40, %v5685_v60  ;;  %v5653_v62 = vsel %vm5615_vm1, %v5652_v49, %v5651_v58  ;;  %v5696_v38 = vrot.slane %v16150_v53, 6  ;;  %v5667_v2 = vrot.slane %v16155_v6, 2  ;;  %v5857_v20 = vld [vmem:[#allocation5 + $0x460] sm:$0xff]  ;;  %v5854_v40 = vld [vmem:[#allocation5 + $0x448] sm:$0xff] }
 0x693   :  { %v11840_v56 = vpack.i.bf16 %v5631_v30, %v5653_v62  ;;  %v5675_v11 = vsel %vm5615_vm1, %v5674_v19, %v5673_v48  ;;  %v5668_v17 = vrot.slane %v16150_v53, 1  ;;  %v5689_v50 = vrot.slane %v16155_v6, 6  ;;  %v5858_v58 = vld [vmem:[#allocation5 + $0x468] sm:$0xff] }
 0x694   :  { %v5697_v7 = vsel %vm5615_vm1, %v5696_v38, %v5695_v37  ;;  %v5690_v16 = vrot.slane %v16150_v53, 5  ;;  %v5614_v9 = vrot.slane %v16146_v0, 7  ;;  %v5635_v42 = vrot.slane %v16148_v10, 4 }
 0x695   :  { %11846 = vrot.lane.b32.xlu0 %v11845_v32, %s12453_s8  ;;  %v11855_v26 = vpack.i.bf16 %v5675_v11, %v5697_v7  ;;  %v5669_v12 = vsel %vm5615_vm1, %v5668_v17, %v5667_v2  ;;  %v5636_v13 = vrot.slane %v16146_v0, 3  ;;  %v5659_v55 = vrot.slane %v16150_v53, 7  ;;  %v5861_v11 = vld [vmem:[#allocation5 + $0x480] sm:$0xff]  ;;  %v5862_v7 = vld [vmem:[#allocation5 + $0x488] sm:$0xff] }
 0x696   :  { %11841 = vrot.lane.b32.xlu1 %v11840_v56, %s12460_s4  ;;  %v5691_v28 = vsel %vm5615_vm1, %v5690_v16, %v5689_v50  ;;  %v5616_v51 = vsel %vm5615_vm1, %v5614_v9, %v16148_v10  ;;  %v5679_v61 = vrot.slane %v16155_v6, 4  ;;  %v5680_v14 = vrot.slane %v16150_v53, 3  ;;  %v5865_v50 = vld [vmem:[#allocation5 + $0x4a0] sm:$0xff]  ;;  %v5866_v16 = vld [vmem:[#allocation5 + $0x4a8] sm:$0xff] }
 0x697   :  { %v11850_v8 = vpack.i.bf16 %v5669_v12, %v5691_v28  ;;  %v5637_v57 = vsel %vm5615_vm1, %v5636_v13, %v5635_v42  ;;  %v16207_v0 = vsel %vm5615_vm1, %v5659_v55, %v16155_v6  ;;  %v10583_v31 = vcombine.low %v5837_v3, %v5841_v4  ;;  %v5869_v55 = vld [vmem:[#allocation5 + $0x4c0] sm:$0xff] }
 0x698   :  { %v5681_v36 = vsel %vm5615_vm1, %v5680_v14, %v5679_v61  ;;  %v10584_v35 = vcombine.high %v5837_v3, %v5841_v4  ;;  %v10585_v23 = vcombine.low %v5838_v44, %v5842_v59  ;;  %v10586_v10 = vcombine.high %v5838_v44, %v5842_v59  ;;  %v5873_v44 = vld [vmem:[#allocation5 + $0x4e0] sm:$0xff]  ;;  %v5870_v59 = vld [vmem:[#allocation5 + $0x4c8] sm:$0xff] }
 0x699   :  { %11856 = vrot.lane.b32.xlu0 %v11855_v26, %s12460_s4  ;;  %v10591_v53 = vcombine.low %v16196_v1, %v5849_v21  ;;  %v10592_v46 = vcombine.high %v16196_v1, %v5849_v21  ;;  %v10593_v18 = vcombine.low %v5846_v27, %v5850_v34  ;;  %v10594_v43 = vcombine.high %v5846_v27, %v5850_v34  ;;  %v5874_v1 = vld [vmem:[#allocation5 + $0x4e8] sm:$0xff]  ;;  %v5877_v21 = vld [vmem:[#allocation5 + $0x500] sm:$0xff] }
 0x69a   :  { %11851 = vrot.lane.b32.xlu1 %v11850_v8, %s12459_s25  ;;  %7283 = vmatprep.subr.bf16.mxu1 %v10584_v35  ;;  %v10600_v2 = vcombine.high %v5853_v29, %v5857_v20  ;;  %v10602_v56 = vcombine.high %v5854_v40, %v5858_v58  ;;  %v10599_v42 = vcombine.low %v5853_v29, %v5857_v20  ;;  %v5881_v27 = vld [vmem:[#allocation5 + $0x520] sm:$0xff]  ;;  %v5878_v34 = vld [vmem:[#allocation5 + $0x508] sm:$0xff] }
 0x69b   :  { %7365 = vmatprep.subr.bf16.mxu0 %v10586_v10  ;;  %7284 = vmatpush1.bf16.msra.mxu1 %v10583_v31  ;;  %v10601_v3 = vcombine.low %v5854_v40, %v5858_v58  ;;  %v10608_v12 = vcombine.high %v5861_v11, %v5865_v50  ;;  %v10610_v13 = vcombine.high %v5862_v7, %v5866_v16  ;;  %v5882_v8 = vld [vmem:[#allocation5 + $0x528] sm:$0xff]  ;;  %v5889_v10 = vld [vmem:[#allocation5 + $0x560] sm:$0xff] }
 0x69c   :  { %7366 = vmatpush1.bf16.msra.mxu0 %v10585_v23  ;;  %7294 = vmatprep.subr.bf16.mxu1 %v10592_v46  ;;  %v10607_v28 = vcombine.low %v5861_v11, %v5865_v50  ;;  %v10616_v61 = vcombine.high %v5869_v55, %v5873_v44  ;;  %v10618_v14 = vcombine.high %v5870_v59, %v5874_v1  ;;  %v5885_v23 = vld [vmem:[#allocation5 + $0x540] sm:$0xff]  ;;  %v5890_v46 = vld [vmem:[#allocation5 + $0x568] sm:$0xff] }
 0x69d   :  { %7376 = vmatprep.subr.bf16.mxu0 %v10594_v43  ;;  %v10617_v31 = vcombine.low %v5870_v59, %v5874_v1  ;;  %v10626_v35 = vcombine.high %v5878_v34, %v5882_v8  ;;  %v10625_v43 = vcombine.low %v5878_v34, %v5882_v8  ;;  %v5905_v29 = vld [vmem:[#allocation5 + $0x5e0] sm:$0xff]  ;;  %v5930_v59 = vld [vmem:[#allocation5 + $0x6a8] sm:$0xff] }
 0x69e   :  { %v5917_v50 = vld [vmem:[#allocation5 + $0x640] sm:$0xff]  ;;  %v5938_v34 = vld [vmem:[#allocation5 + $0x6e8] sm:$0xff] }
 0x703   :  { %v11837_v6 = vpop.permute.xlu0 %11836 }
 0x704   :  { %v11832_v45 = vpop.permute.xlu1 %11831  ;;  %v11839_v22 = vunpack.i.h.bf16 %v11837_v6  ;;  %v11838_v24 = vunpack.i.l.bf16 %v11837_v6  ;;  %v10632_v6 = vcombine.high %v5885_v23, %v5889_v10 }
 0x705   :  { %v11834_v47 = vunpack.i.h.bf16 %v11832_v45  ;;  %v11833_v52 = vunpack.i.l.bf16 %v11832_v45 }
 0x707   :  { %v5701_v39 = vsel %vm1485_vm2, %v5616_v51, %v11834_v47  ;;  %v5704_v41 = vsel %vm1485_vm2, %v5637_v57, %v11833_v52  ;;  %v16216_v33 = vpop.permute.xlu0 %11846  ;;  %v10609_v51 = vcombine.low %v5862_v7, %v5866_v16  ;;  %v10615_v57 = vcombine.low %v5869_v55, %v5873_v44  ;;  %v5893_v47 = vld [vmem:[#allocation5 + $0x580] sm:$0xff]  ;;  %v5918_v16 = vld [vmem:[#allocation5 + $0x648] sm:$0xff] }
 0x708   :  { %v11842_v63 = vpop.permute.xlu1 %11841  ;;  %v11848_v15 = vunpack.i.l.bf16 %v16216_v33  ;;  %v5702_v54 = vsel %vm2118_vm6, %v5701_v39, %v11839_v22  ;;  %v5705_v30 = vsel %vm2118_vm6, %v5704_v41, %v11838_v24  ;;  %v5897_v52 = vld [vmem:[#allocation5 + $0x5a0] sm:$0xff]  ;;  %v5894_v22 = vld [vmem:[#allocation5 + $0x588] sm:$0xff]  ;;  %v10631_v39 = vcombine.low %v5885_v23, %v5889_v10 }
 0x709   :  { %v11844_v5 = vunpack.i.h.bf16 %v11842_v63  ;;  %v11843_v25 = vunpack.i.l.bf16 %v11842_v63  ;;  %v5898_v24 = vld [vmem:[#allocation5 + $0x5a8] sm:$0xff]  ;;  %v10640_v63 = vcombine.high %v5893_v47, %v5897_v52  ;;  %v5921_v7 = vld [vmem:[#allocation5 + $0x660] sm:$0xff] }
 0x70a   :  { %v5710_v17 = vsel %vm1485_vm2, %v5681_v36, %v11848_v15  ;;  %v10624_v36 = vcombine.high %v5877_v21, %v5881_v27  ;;  %v5902_v15 = vld [vmem:[#allocation5 + $0x5c8] sm:$0xff]  ;;  %v10641_v20 = vcombine.low %v5894_v22, %v5898_v24  ;;  %v5929_v55 = vld [vmem:[#allocation5 + $0x6a0] sm:$0xff]  ;;  %v10663_v1 = vcombine.low %v5917_v50, %v5921_v7 }
 0x70b   :  { %v5703_v49 = vsel %vm2135_vm7, %v5702_v54, %v11844_v5  ;;  %v5706_v60 = vsel %vm2135_vm7, %v5705_v30, %v11843_v25  ;;  %v16223_v48 = vpop.permute.xlu0 %11856  ;;  %v10642_v5 = vcombine.high %v5894_v22, %v5898_v24  ;;  %v5901_v25 = vld [vmem:[#allocation5 + $0x5c0] sm:$0xff]  ;;  %v5906_v54 = vld [vmem:[#allocation5 + $0x5e8] sm:$0xff]  ;;  %v10639_v30 = vcombine.low %v5893_v47, %v5897_v52 }
 0x70c   :  { %v16225_v19 = vpack.c.bf16 %v5703_v49, %v5703_v49  ;;  %v16227_v37 = vpack.c.bf16 %v5706_v60, %v5706_v60  ;;  %v11858_v32 = vunpack.i.l.bf16 %v16223_v48  ;;  %v16230_v62 = vpop.permute.xlu1 %11851  ;;  %v10648_v40 = vcombine.high %v5901_v25, %v5905_v29  ;;  %v5909_v49 = vld [vmem:[#allocation5 + $0x600] sm:$0xff]  ;;  %v5926_v44 = vld [vmem:[#allocation5 + $0x688] sm:$0xff] }
 0x70d   :  { %v11853_v38 = vunpack.i.l.bf16 %v16230_v62  ;;  %v10650_v58 = vcombine.high %v5902_v15, %v5906_v54  ;;  %v5913_v60 = vld [vmem:[#allocation5 + $0x620] sm:$0xff]  ;;  %v5942_v10 = vld [vmem:[#allocation5 + $0x708] sm:$0xff] }
 0x70e   :  { %7285 = vmatprep.mubr.bf16.mxu1 %v16227_v37  ;;  %7367 = vmatprep.mubr.bf16.mxu0 %v16227_v37  ;;  %v10656_v11 = vcombine.high %v5909_v49, %v5913_v60  ;;  %v5945_v23 = vld [vmem:[#allocation5 + $0x720] sm:$0xff]  ;;  %v5950_v52 = vld [vmem:[#allocation5 + $0x748] sm:$0xff] }
 0x70f   :  { %v5711_v9 = vsel %vm2118_vm6, %v5710_v17, %v11853_v38  ;;  %7286 = vmatmul.mubr.bf16.vlgmr.msra.gmra.mrb[56].mxu1 %v16225_v19  ;;  %7368 = vmatmul.mubr.bf16.vlgmr.msra.gmra.mrb[44].mxu0 %v16225_v19  ;;  %v5914_v38 = vld [vmem:[#allocation5 + $0x628] sm:$0xff]  ;;  %v5953_v47 = vld [vmem:[#allocation5 + $0x760] sm:$0xff] }
 0x710   :  { %7295 = vmatpush1.bf16.msra.mxu1 %v10591_v53  ;;  %7377 = vmatpush1.bf16.msra.mxu0 %v10593_v18  ;;  %v5712_v4 = vsel %vm2135_vm7, %v5711_v9, %v11858_v32  ;;  %v5886_v53 = vld [vmem:[#allocation5 + $0x548] sm:$0xff]  ;;  %v10623_v18 = vcombine.low %v5877_v21, %v5881_v27  ;;  %v5937_v21 = vld [vmem:[#allocation5 + $0x6e0] sm:$0xff] }
 0x711   :  { %7296 = vmatprep.subr.bf16.mxu1 %v10600_v2  ;;  %7378 = vmatprep.subr.bf16.mxu0 %v10602_v56  ;;  %v16240_v26 = vpack.c.bf16 %v5712_v4, %v5712_v4  ;;  %v10634_v45 = vcombine.high %v5886_v53, %v5890_v46  ;;  %v10633_v41 = vcombine.low %v5886_v53, %v5890_v46  ;;  %v5910_v32 = vld [vmem:[#allocation5 + $0x608] sm:$0xff] }
 0x712   :  { %v10647_v2 = vcombine.low %v5901_v25, %v5905_v29  ;;  %v10649_v56 = vcombine.low %v5902_v15, %v5906_v54  ;;  %v10658_v17 = vcombine.high %v5910_v32, %v5914_v38  ;;  %v5922_v9 = vld [vmem:[#allocation5 + $0x668] sm:$0xff]  ;;  %v10664_v4 = vcombine.high %v5917_v50, %v5921_v7  ;;  %v5961_v25 = vld [vmem:[#allocation5 + $0x7a0] sm:$0xff]  ;;  %v5719_v7 = vld [vmem:[#allocation5 + $0x10] sm:$0xff] }
 0x713   :  { %7326 = vmatprep.mubr.bf16.mxu1 %v16240_v26  ;;  %7408 = vmatprep.mubr.bf16.mxu0 %v16240_v26  ;;  %v5934_v27 = vld [vmem:[#allocation5 + $0x6c8] sm:$0xff] }
 0x714   :  { %7297 = vmatpush1.bf16.msra.mxu1 %v10599_v42  ;;  %7379 = vmatpush1.bf16.msra.mxu0 %v10601_v3  ;;  %v10655_v42 = vcombine.low %v5909_v49, %v5913_v60  ;;  %v10657_v3 = vcombine.low %v5910_v32, %v5914_v38  ;;  %v5946_v53 = vld [vmem:[#allocation5 + $0x728] sm:$0xff]  ;;  %v11849_v49 = vunpack.i.h.bf16 %v16216_v33  ;;  %v5969_v60 = vld [vmem:[#allocation5 + $0x7e0] sm:$0xff]  ;;  %v5723_v33 = vld [vmem:[#allocation5 + $0x30] sm:$0xff] }
 0x715   :  { %7298 = vmatprep.subr.bf16.mxu1 %v10608_v12  ;;  %7380 = vmatprep.subr.bf16.mxu0 %v10610_v13  ;;  %v10666_v12 = vcombine.high %v5918_v16, %v5922_v9  ;;  %v5925_v13 = vld [vmem:[#allocation5 + $0x680] sm:$0xff]  ;;  %v5954_v22 = vld [vmem:[#allocation5 + $0x768] sm:$0xff] }
 0x716   :  { %v10671_v8 = vcombine.low %v5925_v13, %v5929_v55  ;;  %v5958_v29 = vld [vmem:[#allocation5 + $0x788] sm:$0xff] }
 0x717   :  { %v5962_v15 = vld [vmem:[#allocation5 + $0x7a8] sm:$0xff] }
 0x718   :  { %7299 = vmatpush1.bf16.msra.mxu1 %v10607_v28  ;;  %7381 = vmatpush1.bf16.msra.mxu0 %v10609_v51  ;;  %v10665_v28 = vcombine.low %v5918_v16, %v5922_v9  ;;  %v10672_v51 = vcombine.high %v5925_v13, %v5929_v55  ;;  %v5966_v32 = vld [vmem:[#allocation5 + $0x7c8] sm:$0xff]  ;;  %v5707_v16 = vsel %vm1485_vm2, %v16207_v0, %v11849_v49  ;;  %v11859_v9 = vunpack.i.h.bf16 %v16223_v48  ;;  %v5728_v0 = vld [vmem:[#allocation5 + $0x58] sm:$0xff]  ;;  %v5767_v49 = vld [vmem:[#allocation5 + $0x190] sm:$0xff] }
 0x719   :  { %7300 = vmatprep.subr.bf16.mxu1 %v10616_v61  ;;  %7382 = vmatprep.subr.bf16.mxu0 %v10618_v14  ;;  %v10674_v61 = vcombine.high %v5926_v44, %v5930_v59  ;;  %v5933_v14 = vld [vmem:[#allocation5 + $0x6c0] sm:$0xff]  ;;  %v5970_v38 = vld [vmem:[#allocation5 + $0x7e8] sm:$0xff]  ;;  %v10468_v13 = vcombine.high %v5719_v7, %v5723_v33  ;;  %v10467_v48 = vcombine.low %v5719_v7, %v5723_v33  ;;  %v5779_v7 = vld [vmem:[#allocation5 + $0x1f0] sm:$0xff]  ;;  %vm9964_vm2 = vcmask 525312  }
 0x71a   :  { %v10679_v46 = vcombine.low %v5933_v14, %v5937_v21  ;;  %v10714_v50 = vcombine.high %v5966_v32, %v5970_v38 }
 0x71c   :  { %7301 = vmatpush1.bf16.msra.mxu1 %v10615_v57  ;;  %7383 = vmatpush1.bf16.msra.mxu0 %v10617_v31  ;;  %v10673_v57 = vcombine.low %v5926_v44, %v5930_v59  ;;  %v10680_v31 = vcombine.high %v5933_v14, %v5937_v21  ;;  %v5727_v59 = vld [vmem:[#allocation5 + $0x50] sm:$0xff] }
 0x71d   :  { %7302 = vmatprep.subr.bf16.mxu1 %v10624_v36  ;;  %7384 = vmatprep.subr.bf16.mxu0 %v10626_v35  ;;  %v10682_v36 = vcombine.high %v5934_v27, %v5938_v34  ;;  %v5941_v35 = vld [vmem:[#allocation5 + $0x700] sm:$0xff] }
 0x71e   :  { %v10687_v24 = vcombine.low %v5941_v35, %v5945_v23 }
 0x720   :  { %7303 = vmatpush1.bf16.msra.mxu1 %v10623_v18  ;;  %7385 = vmatpush1.bf16.msra.mxu0 %v10625_v43  ;;  %v10681_v18 = vcombine.low %v5934_v27, %v5938_v34  ;;  %v10688_v43 = vcombine.high %v5941_v35, %v5945_v23  ;;  %v5735_v27 = vld [vmem:[#allocation5 + $0x90] sm:$0xff] }
 0x721   :  { %7304 = vmatprep.subr.bf16.mxu1 %v10632_v6  ;;  %7386 = vmatprep.subr.bf16.mxu0 %v10634_v45  ;;  %v10690_v6 = vcombine.high %v5942_v10, %v5946_v53  ;;  %v5949_v45 = vld [vmem:[#allocation5 + $0x740] sm:$0xff]  ;;  %v5739_v34 = vld [vmem:[#allocation5 + $0xb0] sm:$0xff] }
 0x722   :  { %v10695_v54 = vcombine.low %v5949_v45, %v5953_v47  ;;  %v10484_v35 = vcombine.high %v5735_v27, %v5739_v34 }
 0x724   :  { %7305 = vmatpush1.bf16.msra.mxu1 %v10631_v39  ;;  %7387 = vmatpush1.bf16.msra.mxu0 %v10633_v41  ;;  %v10689_v39 = vcombine.low %v5942_v10, %v5946_v53  ;;  %v10696_v41 = vcombine.high %v5949_v45, %v5953_v47  ;;  %v5743_v10 = vld [vmem:[#allocation5 + $0xd0] sm:$0xff] }
 0x725   :  { %7306 = vmatprep.subr.bf16.mxu1 %v10640_v63  ;;  %7388 = vmatprep.subr.bf16.mxu0 %v10642_v5  ;;  %v10698_v63 = vcombine.high %v5950_v52, %v5954_v22  ;;  %v5957_v5 = vld [vmem:[#allocation5 + $0x780] sm:$0xff]  ;;  %v5747_v53 = vld [vmem:[#allocation5 + $0xf0] sm:$0xff] }
 0x726   :  { %v10492_v45 = vcombine.high %v5743_v10, %v5747_v53 }
 0x728   :  { %7307 = vmatpush1.bf16.msra.mxu1 %v10639_v30  ;;  %7389 = vmatpush1.bf16.msra.mxu0 %v10641_v20  ;;  %v10697_v30 = vcombine.low %v5950_v52, %v5954_v22  ;;  %v10704_v20 = vcombine.high %v5957_v5, %v5961_v25  ;;  %v5751_v52 = vld [vmem:[#allocation5 + $0x110] sm:$0xff] }
 0x729   :  { %7308 = vmatprep.subr.bf16.mxu1 %v10648_v40  ;;  %7390 = vmatprep.subr.bf16.mxu0 %v10650_v58  ;;  %v10706_v40 = vcombine.high %v5958_v29, %v5962_v15  ;;  %v5965_v58 = vld [vmem:[#allocation5 + $0x7c0] sm:$0xff]  ;;  %v5755_v22 = vld [vmem:[#allocation5 + $0x130] sm:$0xff] }
 0x72c   :  { %7309 = vmatpush1.bf16.msra.mxu1 %v10647_v2  ;;  %7391 = vmatpush1.bf16.msra.mxu0 %v10649_v56  ;;  %v11854_v2 = vunpack.i.h.bf16 %v16230_v62  ;;  %v10703_v56 = vcombine.low %v5957_v5, %v5961_v25  ;;  %v10711_v62 = vcombine.low %v5965_v58, %v5969_v60  ;;  %v5759_v25 = vld [vmem:[#allocation5 + $0x150] sm:$0xff] }
 0x72d   :  { %7310 = vmatprep.subr.bf16.mxu1 %v10656_v11  ;;  %7392 = vmatprep.subr.bf16.mxu0 %v10658_v17  ;;  %v10705_v11 = vcombine.low %v5958_v29, %v5962_v15  ;;  %v10712_v17 = vcombine.high %v5965_v58, %v5969_v60  ;;  %v5763_v29 = vld [vmem:[#allocation5 + $0x170] sm:$0xff]  ;;  %v5760_v15 = vld [vmem:[#allocation5 + $0x158] sm:$0xff] }
 0x72e   :  { %v5771_v60 = vld [vmem:[#allocation5 + $0x1b0] sm:$0xff] }
 0x72f   :  { %v10515_v33 = vcombine.low %v5767_v49, %v5771_v60 }
 0x730   :  { %7311 = vmatpush1.bf16.msra.mxu1 %v10655_v42  ;;  %7393 = vmatpush1.bf16.msra.mxu0 %v10657_v3  ;;  %v5720_v42 = vld [vmem:[#allocation5 + $0x18] sm:$0xff] }
 0x731   :  { %7312 = vmatprep.subr.bf16.mxu1 %v10664_v4  ;;  %7394 = vmatprep.subr.bf16.mxu0 %v10666_v12  ;;  %v5724_v3 = vld [vmem:[#allocation5 + $0x38] sm:$0xff]  ;;  %v5708_v4 = vsel %vm2118_vm6, %v5707_v16, %v11854_v2  ;;  %v10713_v12 = vcombine.low %v5966_v32, %v5970_v38  ;;  %v10507_v2 = vcombine.low %v5759_v25, %v5763_v29 }
 0x732   :  { %v10470_v55 = vcombine.high %v5720_v42, %v5724_v3  ;;  %v5709_v44 = vsel %vm2135_vm7, %v5708_v4, %v11859_v9  ;;  %v5768_v32 = vld [vmem:[#allocation5 + $0x198] sm:$0xff] }
 0x733   :  { %v5772_v38 = vld [vmem:[#allocation5 + $0x1b8] sm:$0xff] }
 0x734   :  { %7313 = vmatpush1.bf16.msra.mxu1 %v10663_v1  ;;  %7395 = vmatpush1.bf16.msra.mxu0 %v10665_v28  ;;  %v5731_v1 = vld [vmem:[#allocation5 + $0x70] sm:$0xff]  ;;  %v5732_v28 = vld [vmem:[#allocation5 + $0x78] sm:$0xff] }
 0x735   :  { %7314 = vmatprep.subr.bf16.mxu1 %v10672_v51  ;;  %7396 = vmatprep.subr.bf16.mxu0 %v10674_v61  ;;  %v16251_v51 = vpack.c.bf16 %v5709_v44, %v5709_v44  ;;  %v10469_v61 = vcombine.low %v5720_v42, %v5724_v3  ;;  %v10476_v14 = vcombine.high %v5727_v59, %v5731_v1  ;;  %v5776_v16 = vld [vmem:[#allocation5 + $0x1d8] sm:$0xff] }
 0x736   :  { %v10478_v21 = vcombine.high %v5728_v0, %v5732_v28  ;;  %v5780_v9 = vld [vmem:[#allocation5 + $0x1f8] sm:$0xff]  ;;  %v10517_v42 = vcombine.low %v5768_v32, %v5772_v38 }
 0x737   :  { %v10526_v4 = vcombine.high %v5776_v16, %v5780_v9 }
 0x738   :  { %7315 = vmatpush1.bf16.msra.mxu1 %v10671_v8  ;;  %7397 = vmatpush1.bf16.msra.mxu0 %v10673_v57  ;;  %v5736_v8 = vld [vmem:[#allocation5 + $0x98] sm:$0xff] }
 0x739   :  { %7316 = vmatprep.subr.bf16.mxu1 %v10680_v31  ;;  %7398 = vmatprep.subr.bf16.mxu0 %v10682_v36  ;;  %v5740_v57 = vld [vmem:[#allocation5 + $0xb8] sm:$0xff]  ;;  %v10475_v31 = vcombine.low %v5727_v59, %v5731_v1  ;;  %v10477_v36 = vcombine.low %v5728_v0, %v5732_v28  ;;  %v10525_v59 = vcombine.low %v5776_v16, %v5780_v9  ;;  %v5791_v28 = vld [vmem:[#allocation5 + $0x250] sm:$0xff] }
 0x73a   :  { %v10486_v23 = vcombine.high %v5736_v8, %v5740_v57  ;;  %v5839_v9 = vld [vmem:[#allocation5 + $0x3d0] sm:$0xff] }
 0x73c   :  { %7317 = vmatpush1.bf16.msra.mxu1 %v10679_v46  ;;  %7399 = vmatpush1.bf16.msra.mxu0 %v10681_v18  ;;  %v5744_v46 = vld [vmem:[#allocation5 + $0xd8] sm:$0xff] }
 0x73d   :  { %7318 = vmatprep.subr.bf16.mxu1 %v10688_v43  ;;  %7400 = vmatprep.subr.bf16.mxu0 %v10690_v6  ;;  %v5748_v18 = vld [vmem:[#allocation5 + $0xf8] sm:$0xff]  ;;  %v10483_v43 = vcombine.low %v5735_v27, %v5739_v34  ;;  %v10485_v6 = vcombine.low %v5736_v8, %v5740_v57  ;;  %v5799_v57 = vld [vmem:[#allocation5 + $0x290] sm:$0xff] }
 0x73e   :  { %v10494_v47 = vcombine.high %v5744_v46, %v5748_v18 }
 0x740   :  { %7319 = vmatpush1.bf16.msra.mxu1 %v10687_v24  ;;  %7401 = vmatpush1.bf16.msra.mxu0 %v10689_v39  ;;  %v5756_v24 = vld [vmem:[#allocation5 + $0x138] sm:$0xff]  ;;  %v10491_v39 = vcombine.low %v5743_v10, %v5747_v53 }
 0x741   :  { %7320 = vmatprep.subr.bf16.mxu1 %v10696_v41  ;;  %7402 = vmatprep.subr.bf16.mxu0 %v10698_v63  ;;  %v10493_v41 = vcombine.low %v5744_v46, %v5748_v18  ;;  %v10500_v63 = vcombine.high %v5751_v52, %v5755_v22  ;;  %v5807_v18 = vld [vmem:[#allocation5 + $0x2d0] sm:$0xff] }
 0x744   :  { %7321 = vmatpush1.bf16.msra.mxu1 %v10695_v54  ;;  %7403 = vmatpush1.bf16.msra.mxu0 %v10697_v30  ;;  %v5764_v54 = vld [vmem:[#allocation5 + $0x178] sm:$0xff]  ;;  %v10499_v30 = vcombine.low %v5751_v52, %v5755_v22 }
 0x745   :  { %7322 = vmatprep.subr.bf16.mxu1 %v10704_v20  ;;  %7404 = vmatprep.subr.bf16.mxu0 %v10706_v40  ;;  %v10508_v40 = vcombine.high %v5759_v25, %v5763_v29  ;;  %v10510_v58 = vcombine.high %v5760_v15, %v5764_v54 }
 0x748   :  { %7323 = vmatpush1.bf16.msra.mxu1 %v10703_v56  ;;  %7405 = vmatpush1.bf16.msra.mxu0 %v10705_v11  ;;  %v10509_v56 = vcombine.low %v5760_v15, %v5764_v54  ;;  %v10516_v11 = vcombine.high %v5767_v49, %v5771_v60  ;;  %v5823_v54 = vld [vmem:[#allocation5 + $0x350] sm:$0xff] }
 0x749   :  { %7324 = vmatprep.subr.bf16.mxu1 %v10712_v17  ;;  %7406 = vmatprep.subr.bf16.mxu0 %v10714_v50  ;;  %v10518_v17 = vcombine.high %v5768_v32, %v5772_v38  ;;  %v5775_v50 = vld [vmem:[#allocation5 + $0x1d0] sm:$0xff] }
 0x74a   :  { %v10524_v3 = vcombine.high %v5775_v50, %v5779_v7  ;;  %v10523_v44 = vcombine.low %v5775_v50, %v5779_v7  ;;  %v5831_v38 = vld [vmem:[#allocation5 + $0x390] sm:$0xff] }
 0x74c   :  { %7325 = vmatpush1.bf16.msra.mxu1 %v10711_v62  ;;  %7407 = vmatpush1.bf16.msra.mxu0 %v10713_v12  ;;  %v5783_v62 = vld [vmem:[#allocation5 + $0x210] sm:$0xff] }
 0x74d   :  { %7417 = vmatprep.subr.bf16.mxu1 %v10468_v13  ;;  %7499 = vmatprep.subr.bf16.mxu0 %v10470_v55  ;;  %v5787_v12 = vld [vmem:[#allocation5 + $0x230] sm:$0xff]  ;;  %v5784_v13 = vld [vmem:[#allocation5 + $0x218] sm:$0xff] }
 0x74e   :  { %v5788_v55 = vld [vmem:[#allocation5 + $0x238] sm:$0xff]  ;;  %v10532_v1 = vcombine.high %v5783_v62, %v5787_v12 }
 0x74f   :  { %7327 = vmatmul.mubr.bf16.vlgmr.msra.gmra.mrb[56].mxu1 %v16251_v51  ;;  %7409 = vmatmul.mubr.bf16.vlgmr.msra.gmra.mrb[44].mxu0 %v16251_v51  ;;  %v10534_v0 = vcombine.high %v5784_v13, %v5788_v55  ;;  %v10533_v27 = vcombine.low %v5784_v13, %v5788_v55  ;;  %v5847_v55 = vld [vmem:[#allocation5 + $0x410] sm:$0xff] }
 0x750   :  { %7418 = vmatpush1.bf16.msra.mxu1 %v10467_v48  ;;  %7449 = vmatprep.mubr.bf16.mxu1 %v16227_v37  ;;  %v5795_v48 = vld [vmem:[#allocation5 + $0x270] sm:$0xff] }
 0x751   :  { %7500 = vmatpush1.bf16.msra.mxu0 %v10469_v61  ;;  %7531 = vmatprep.mubr.bf16.mxu0 %v16227_v37  ;;  %v5752_v37 = vld [vmem:[#allocation5 + $0x118] sm:$0xff]  ;;  %v10540_v34 = vcombine.high %v5791_v28, %v5795_v48 }
 0x752   :  { %7419 = vmatprep.subr.bf16.mxu1 %v10476_v14  ;;  %7501 = vmatprep.subr.bf16.mxu0 %v10478_v21  ;;  %v10502_v5 = vcombine.high %v5752_v37, %v5756_v24  ;;  %v10501_v20 = vcombine.low %v5752_v37, %v5756_v24  ;;  %v5792_v61 = vld [vmem:[#allocation5 + $0x258] sm:$0xff]  ;;  %v10531_v21 = vcombine.low %v5783_v62, %v5787_v12  ;;  %v5815_v24 = vld [vmem:[#allocation5 + $0x310] sm:$0xff] }
 0x753   :  { %v5796_v14 = vld [vmem:[#allocation5 + $0x278] sm:$0xff] }
 0x754   :  { %7420 = vmatpush1.bf16.msra.mxu1 %v10475_v31  ;;  %v10542_v8 = vcombine.high %v5792_v61, %v5796_v14  ;;  %v5803_v31 = vld [vmem:[#allocation5 + $0x2b0] sm:$0xff]  ;;  %v10541_v10 = vcombine.low %v5792_v61, %v5796_v14 }
 0x755   :  { %7502 = vmatpush1.bf16.msra.mxu0 %v10477_v36  ;;  %7421 = vmatprep.subr.bf16.mxu1 %v10484_v35  ;;  %v5800_v36 = vld [vmem:[#allocation5 + $0x298] sm:$0xff]  ;;  %v10548_v53 = vcombine.high %v5799_v57, %v5803_v31  ;;  %v5855_v14 = vld [vmem:[#allocation5 + $0x450] sm:$0xff] }
 0x756   :  { %7503 = vmatprep.subr.bf16.mxu0 %v10486_v23  ;;  %v5804_v35 = vld [vmem:[#allocation5 + $0x2b8] sm:$0xff]  ;;  %v10539_v23 = vcombine.low %v5791_v28, %v5795_v48 }
 0x757   :  { %v10550_v46 = vcombine.high %v5800_v36, %v5804_v35  ;;  %v10549_v52 = vcombine.low %v5800_v36, %v5804_v35  ;;  %v5863_v36 = vld [vmem:[#allocation5 + $0x490] sm:$0xff] }
 0x758   :  { %7422 = vmatpush1.bf16.msra.mxu1 %v10483_v43  ;;  %v5811_v43 = vld [vmem:[#allocation5 + $0x2f0] sm:$0xff] }
 0x759   :  { %7504 = vmatpush1.bf16.msra.mxu0 %v10485_v6  ;;  %7423 = vmatprep.subr.bf16.mxu1 %v10492_v45  ;;  %v5808_v6 = vld [vmem:[#allocation5 + $0x2d8] sm:$0xff]  ;;  %v10556_v22 = vcombine.high %v5807_v18, %v5811_v43  ;;  %v5867_v35 = vld [vmem:[#allocation5 + $0x4b0] sm:$0xff] }
 0x75a   :  { %7505 = vmatprep.subr.bf16.mxu0 %v10494_v47  ;;  %v5812_v45 = vld [vmem:[#allocation5 + $0x2f8] sm:$0xff]  ;;  %v10547_v47 = vcombine.low %v5799_v57, %v5803_v31 }
 0x75b   :  { %v10558_v37 = vcombine.high %v5808_v6, %v5812_v45  ;;  %v10557_v25 = vcombine.low %v5808_v6, %v5812_v45  ;;  %v5871_v45 = vld [vmem:[#allocation5 + $0x4d0] sm:$0xff] }
 0x75c   :  { %7424 = vmatpush1.bf16.msra.mxu1 %v10491_v39  ;;  %v5819_v39 = vld [vmem:[#allocation5 + $0x330] sm:$0xff] }
 0x75d   :  { %7506 = vmatpush1.bf16.msra.mxu0 %v10493_v41  ;;  %7425 = vmatprep.subr.bf16.mxu1 %v10500_v63  ;;  %v5816_v41 = vld [vmem:[#allocation5 + $0x318] sm:$0xff]  ;;  %v10564_v29 = vcombine.high %v5815_v24, %v5819_v39 }
 0x75e   :  { %7507 = vmatprep.subr.bf16.mxu0 %v10502_v5  ;;  %v5820_v63 = vld [vmem:[#allocation5 + $0x338] sm:$0xff]  ;;  %v10555_v5 = vcombine.low %v5807_v18, %v5811_v43  ;;  %v10612_v43 = vcombine.high %v5863_v36, %v5867_v35 }
 0x75f   :  { %v10566_v15 = vcombine.high %v5816_v41, %v5820_v63  ;;  %v10565_v49 = vcombine.low %v5816_v41, %v5820_v63  ;;  %v5879_v41 = vld [vmem:[#allocation5 + $0x510] sm:$0xff] }
 0x760   :  { %7426 = vmatpush1.bf16.msra.mxu1 %v10499_v30  ;;  %v5827_v30 = vld [vmem:[#allocation5 + $0x370] sm:$0xff] }
 0x761   :  { %7508 = vmatpush1.bf16.msra.mxu0 %v10501_v20  ;;  %7427 = vmatprep.subr.bf16.mxu1 %v10508_v40  ;;  %v5824_v20 = vld [vmem:[#allocation5 + $0x358] sm:$0xff]  ;;  %v10572_v60 = vcombine.high %v5823_v54, %v5827_v30  ;;  %v5883_v63 = vld [vmem:[#allocation5 + $0x530] sm:$0xff] }
 0x762   :  { %7509 = vmatprep.subr.bf16.mxu0 %v10510_v58  ;;  %v5828_v40 = vld [vmem:[#allocation5 + $0x378] sm:$0xff]  ;;  %v10563_v58 = vcombine.low %v5815_v24, %v5819_v39 }
 0x763   :  { %v10574_v32 = vcombine.high %v5824_v20, %v5828_v40  ;;  %v10573_v50 = vcombine.low %v5824_v20, %v5828_v40  ;;  %v5891_v20 = vld [vmem:[#allocation5 + $0x570] sm:$0xff]  ;;  %v5888_v40 = vld [vmem:[#allocation5 + $0x558] sm:$0xff] }
 0x764   :  { %7428 = vmatpush1.bf16.msra.mxu1 %v10507_v2  ;;  %v5835_v2 = vld [vmem:[#allocation5 + $0x3b0] sm:$0xff] }
 0x765   :  { %7510 = vmatpush1.bf16.msra.mxu0 %v10509_v56  ;;  %7429 = vmatprep.subr.bf16.mxu1 %v10516_v11  ;;  %v5832_v56 = vld [vmem:[#allocation5 + $0x398] sm:$0xff]  ;;  %v10580_v7 = vcombine.high %v5831_v38, %v5835_v2 }
 0x766   :  { %7511 = vmatprep.subr.bf16.mxu0 %v10518_v17  ;;  %v5836_v11 = vld [vmem:[#allocation5 + $0x3b8] sm:$0xff]  ;;  %v10571_v17 = vcombine.low %v5823_v54, %v5827_v30  ;;  %v5887_v30 = vld [vmem:[#allocation5 + $0x550] sm:$0xff] }
 0x767   :  { %v10582_v16 = vcombine.high %v5832_v56, %v5836_v11  ;;  %v10581_v62 = vcombine.low %v5832_v56, %v5836_v11  ;;  %v5899_v56 = vld [vmem:[#allocation5 + $0x5b0] sm:$0xff]  ;;  %v5896_v11 = vld [vmem:[#allocation5 + $0x598] sm:$0xff] }
 0x768   :  { %7430 = vmatpush1.bf16.msra.mxu1 %v10515_v33  ;;  %v5843_v33 = vld [vmem:[#allocation5 + $0x3f0] sm:$0xff] }
 0x769   :  { %7512 = vmatpush1.bf16.msra.mxu0 %v10517_v42  ;;  %7431 = vmatprep.subr.bf16.mxu1 %v10524_v3  ;;  %v5840_v42 = vld [vmem:[#allocation5 + $0x3d8] sm:$0xff]  ;;  %v10588_v12 = vcombine.high %v5839_v9, %v5843_v33 }
 0x76a   :  { %7513 = vmatprep.subr.bf16.mxu0 %v10526_v4  ;;  %v5844_v3 = vld [vmem:[#allocation5 + $0x3f8] sm:$0xff]  ;;  %v10579_v4 = vcombine.low %v5831_v38, %v5835_v2  ;;  %v5895_v2 = vld [vmem:[#allocation5 + $0x590] sm:$0xff] }
 0x76b   :  { %v10590_v13 = vcombine.high %v5840_v42, %v5844_v3  ;;  %v10589_v28 = vcombine.low %v5840_v42, %v5844_v3  ;;  %v5907_v42 = vld [vmem:[#allocation5 + $0x5f0] sm:$0xff]  ;;  %v5904_v3 = vld [vmem:[#allocation5 + $0x5d8] sm:$0xff] }
 0x76c   :  { %7432 = vmatpush1.bf16.msra.mxu1 %v10523_v44  ;;  %v5851_v44 = vld [vmem:[#allocation5 + $0x430] sm:$0xff] }
 0x76d   :  { %7514 = vmatpush1.bf16.msra.mxu0 %v10525_v59  ;;  %7433 = vmatprep.subr.bf16.mxu1 %v10532_v1  ;;  %v5848_v59 = vld [vmem:[#allocation5 + $0x418] sm:$0xff]  ;;  %v10596_v48 = vcombine.high %v5847_v55, %v5851_v44 }
 0x76e   :  { %7515 = vmatprep.subr.bf16.mxu0 %v10534_v0  ;;  %v5852_v1 = vld [vmem:[#allocation5 + $0x438] sm:$0xff]  ;;  %v10587_v0 = vcombine.low %v5839_v9, %v5843_v33  ;;  %v5903_v33 = vld [vmem:[#allocation5 + $0x5d0] sm:$0xff] }
 0x76f   :  { %v10598_v61 = vcombine.high %v5848_v59, %v5852_v1  ;;  %v10597_v57 = vcombine.low %v5848_v59, %v5852_v1  ;;  %v5915_v59 = vld [vmem:[#allocation5 + $0x630] sm:$0xff]  ;;  %v5912_v1 = vld [vmem:[#allocation5 + $0x618] sm:$0xff] }
 0x770   :  { %7434 = vmatpush1.bf16.msra.mxu1 %v10531_v21  ;;  %v5859_v21 = vld [vmem:[#allocation5 + $0x470] sm:$0xff] }
 0x771   :  { %7516 = vmatpush1.bf16.msra.mxu0 %v10533_v27  ;;  %7435 = vmatprep.subr.bf16.mxu1 %v10540_v34  ;;  %v10595_v27 = vcombine.low %v5847_v55, %v5851_v44  ;;  %v5856_v34 = vld [vmem:[#allocation5 + $0x458] sm:$0xff]  ;;  %v10604_v31 = vcombine.high %v5855_v14, %v5859_v21  ;;  %v5911_v44 = vld [vmem:[#allocation5 + $0x610] sm:$0xff] }
 0x772   :  { %7517 = vmatprep.subr.bf16.mxu0 %v10542_v8  ;;  %v5860_v8 = vld [vmem:[#allocation5 + $0x478] sm:$0xff] }
 0x773   :  { %v10605_v18 = vcombine.low %v5856_v34, %v5860_v8 }
 0x774   :  { %7436 = vmatpush1.bf16.msra.mxu1 %v10539_v23  ;;  %v10606_v23 = vcombine.high %v5856_v34, %v5860_v8  ;;  %v5920_v34 = vld [vmem:[#allocation5 + $0x658] sm:$0xff] }
 0x775   :  { %7518 = vmatpush1.bf16.msra.mxu0 %v10541_v10  ;;  %7437 = vmatprep.subr.bf16.mxu1 %v10548_v53  ;;  %v5864_v10 = vld [vmem:[#allocation5 + $0x498] sm:$0xff] }
 0x776   :  { %7519 = vmatprep.subr.bf16.mxu0 %v10550_v46  ;;  %v5868_v53 = vld [vmem:[#allocation5 + $0x4b8] sm:$0xff]  ;;  %v10603_v46 = vcombine.low %v5855_v14, %v5859_v21  ;;  %v5919_v21 = vld [vmem:[#allocation5 + $0x650] sm:$0xff] }
 0x777   :  { %v10614_v6 = vcombine.high %v5864_v10, %v5868_v53  ;;  %v5924_v8 = vld [vmem:[#allocation5 + $0x678] sm:$0xff] }
 0x778   :  { %7438 = vmatpush1.bf16.msra.mxu1 %v10547_v47  ;;  %v5875_v47 = vld [vmem:[#allocation5 + $0x4f0] sm:$0xff] }
 0x779   :  { %7520 = vmatpush1.bf16.msra.mxu0 %v10549_v52  ;;  %7439 = vmatprep.subr.bf16.mxu1 %v10556_v22  ;;  %v5872_v52 = vld [vmem:[#allocation5 + $0x4d8] sm:$0xff]  ;;  %v10620_v24 = vcombine.high %v5871_v45, %v5875_v47 }
 0x77a   :  { %7521 = vmatprep.subr.bf16.mxu0 %v10558_v37  ;;  %v5876_v22 = vld [vmem:[#allocation5 + $0x4f8] sm:$0xff]  ;;  %v10611_v37 = vcombine.low %v5863_v36, %v5867_v35  ;;  %v10670_v35 = vcombine.high %v5920_v34, %v5924_v8 }
 0x77b   :  { %v10622_v39 = vcombine.high %v5872_v52, %v5876_v22 }
 0x77c   :  { %7440 = vmatpush1.bf16.msra.mxu1 %v10555_v5  ;;  %v5880_v5 = vld [vmem:[#allocation5 + $0x518] sm:$0xff] }
 0x77d   :  { %7522 = vmatpush1.bf16.msra.mxu0 %v10557_v25  ;;  %7441 = vmatprep.subr.bf16.mxu1 %v10564_v29  ;;  %v5884_v25 = vld [vmem:[#allocation5 + $0x538] sm:$0xff]  ;;  %v10621_v29 = vcombine.low %v5872_v52, %v5876_v22  ;;  %v5939_v52 = vld [vmem:[#allocation5 + $0x6f0] sm:$0xff] }
 0x77e   :  { %7523 = vmatprep.subr.bf16.mxu0 %v10566_v15  ;;  %v10628_v15 = vcombine.high %v5879_v41, %v5883_v63  ;;  %v10630_v54 = vcombine.high %v5880_v5, %v5884_v25  ;;  %v5936_v22 = vld [vmem:[#allocation5 + $0x6d8] sm:$0xff] }
 0x780   :  { %7442 = vmatpush1.bf16.msra.mxu1 %v10563_v58  ;;  %v5892_v58 = vld [vmem:[#allocation5 + $0x578] sm:$0xff] }
 0x781   :  { %7524 = vmatpush1.bf16.msra.mxu0 %v10565_v49  ;;  %7443 = vmatprep.subr.bf16.mxu1 %v10572_v60  ;;  %v10627_v49 = vcombine.low %v5879_v41, %v5883_v63  ;;  %v10629_v60 = vcombine.low %v5880_v5, %v5884_v25  ;;  %v10638_v38 = vcombine.high %v5888_v40, %v5892_v58  ;;  %v5943_v63 = vld [vmem:[#allocation5 + $0x710] sm:$0xff]  ;;  %v5944_v25 = vld [vmem:[#allocation5 + $0x718] sm:$0xff] }
 0x782   :  { %7525 = vmatprep.subr.bf16.mxu0 %v10574_v32  ;;  %v10636_v32 = vcombine.high %v5887_v30, %v5891_v20  ;;  %v5947_v5 = vld [vmem:[#allocation5 + $0x730] sm:$0xff] }
 0x784   :  { %7444 = vmatpush1.bf16.msra.mxu1 %v10571_v17  ;;  %v5900_v17 = vld [vmem:[#allocation5 + $0x5b8] sm:$0xff] }
 0x785   :  { %7526 = vmatpush1.bf16.msra.mxu0 %v10573_v50  ;;  %7445 = vmatprep.subr.bf16.mxu1 %v10580_v7  ;;  %v10635_v50 = vcombine.low %v5887_v30, %v5891_v20  ;;  %v10637_v7 = vcombine.low %v5888_v40, %v5892_v58  ;;  %v10646_v9 = vcombine.high %v5896_v11, %v5900_v17  ;;  %v5951_v20 = vld [vmem:[#allocation5 + $0x750] sm:$0xff]  ;;  %v5952_v58 = vld [vmem:[#allocation5 + $0x758] sm:$0xff] }
 0x786   :  { %7527 = vmatprep.subr.bf16.mxu0 %v10582_v16  ;;  %v10644_v16 = vcombine.high %v5895_v2, %v5899_v56  ;;  %v5955_v40 = vld [vmem:[#allocation5 + $0x770] sm:$0xff] }
 0x788   :  { %7446 = vmatpush1.bf16.msra.mxu1 %v10579_v4  ;;  %v5908_v4 = vld [vmem:[#allocation5 + $0x5f8] sm:$0xff] }
 0x789   :  { %7528 = vmatpush1.bf16.msra.mxu0 %v10581_v62  ;;  %7447 = vmatprep.subr.bf16.mxu1 %v10588_v12  ;;  %v10643_v62 = vcombine.low %v5895_v2, %v5899_v56  ;;  %v10645_v12 = vcombine.low %v5896_v11, %v5900_v17  ;;  %v10654_v55 = vcombine.high %v5904_v3, %v5908_v4  ;;  %v5959_v56 = vld [vmem:[#allocation5 + $0x790] sm:$0xff]  ;;  %v5960_v17 = vld [vmem:[#allocation5 + $0x798] sm:$0xff] }
 0x78a   :  { %7529 = vmatprep.subr.bf16.mxu0 %v10590_v13  ;;  %v10652_v13 = vcombine.high %v5903_v33, %v5907_v42  ;;  %v5963_v11 = vld [vmem:[#allocation5 + $0x7b0] sm:$0xff] }
 0x78c   :  { %7448 = vmatpush1.bf16.msra.mxu1 %v10587_v0  ;;  %v5916_v0 = vld [vmem:[#allocation5 + $0x638] sm:$0xff] }
 0x78d   :  { %7530 = vmatpush1.bf16.msra.mxu0 %v10589_v28  ;;  %7458 = vmatprep.subr.bf16.mxu1 %v10596_v48  ;;  %v10651_v28 = vcombine.low %v5903_v33, %v5907_v42  ;;  %v10653_v48 = vcombine.low %v5904_v3, %v5908_v4  ;;  %v10662_v14 = vcombine.high %v5912_v1, %v5916_v0  ;;  %v5967_v42 = vld [vmem:[#allocation5 + $0x7d0] sm:$0xff]  ;;  %v5968_v4 = vld [vmem:[#allocation5 + $0x7d8] sm:$0xff] }
 0x78e   :  { %7540 = vmatprep.subr.bf16.mxu0 %v10598_v61  ;;  %v10660_v61 = vcombine.high %v5911_v44, %v5915_v59  ;;  %v5971_v3 = vld [vmem:[#allocation5 + $0x7f0] sm:$0xff] }
 0x78f   :  { %7450 = vmatmul.mubr.bf16.vlgmr.msra.gmra.mrb[60].mxu1 %v16225_v19 }
 0x790   :  { %7532 = vmatmul.mubr.bf16.vlgmr.msra.gmra.mrb[48].mxu0 %v16225_v19  ;;  %7459 = vmatpush1.bf16.msra.mxu1 %v10595_v27  ;;  %v10613_v19 = vcombine.low %v5864_v10, %v5868_v53  ;;  %v5923_v27 = vld [vmem:[#allocation5 + $0x670] sm:$0xff]  ;;  %v5928_v53 = vld [vmem:[#allocation5 + $0x698] sm:$0xff] }
 0x791   :  { %7490 = vmatprep.mubr.bf16.mxu1 %v16240_v26  ;;  %7541 = vmatpush1.bf16.msra.mxu0 %v10597_v57  ;;  %v10659_v57 = vcombine.low %v5911_v44, %v5915_v59  ;;  %v10668_v36 = vcombine.high %v5919_v21, %v5923_v27  ;;  %v5931_v10 = vld [vmem:[#allocation5 + $0x6b0] sm:$0xff]  ;;  %v10715_v59 = vcombine.low %v5967_v42, %v5971_v3 }
 0x792   :  { %7572 = vmatprep.mubr.bf16.mxu0 %v16240_v26  ;;  %7460 = vmatprep.subr.bf16.mxu1 %v10604_v31  ;;  %v10619_v26 = vcombine.low %v5871_v45, %v5875_v47  ;;  %v10661_v31 = vcombine.low %v5912_v1, %v5916_v0  ;;  %v5935_v47 = vld [vmem:[#allocation5 + $0x6d0] sm:$0xff] }
 0x793   :  { %7542 = vmatprep.subr.bf16.mxu0 %v10606_v23  ;;  %v5927_v23 = vld [vmem:[#allocation5 + $0x690] sm:$0xff] }
 0x794   :  { %7461 = vmatpush1.bf16.msra.mxu1 %v10603_v46  ;;  %v5932_v46 = vld [vmem:[#allocation5 + $0x6b8] sm:$0xff]  ;;  %v11916_v0 = vld [vmem:[#allocation8 + $0x4] ss:$16 sps:$4 sm:$0xff]  }
 0x795   :  { %7543 = vmatpush1.bf16.msra.mxu0 %v10605_v18  ;;  %7462 = vmatprep.subr.bf16.mxu1 %v10612_v43  ;;  %v10667_v18 = vcombine.low %v5919_v21, %v5923_v27  ;;  %v10669_v43 = vcombine.low %v5920_v34, %v5924_v8  ;;  %v10678_v45 = vcombine.high %v5928_v53, %v5932_v46  ;;  %v11925_v21 = vld [vmem:[#allocation8 + $0x2c] ss:$16 sps:$4 sm:$0xff]   ;;  %v11920_v27 = vld [vmem:[#allocation8 + $0x20] ss:$16 sps:$4 sm:$0xff]   ;;  %v11923_v34 = vld [vmem:[#allocation8 + $0x28] ss:$16 sps:$4 sm:$0xff]  }
 0x796   :  { %7544 = vmatprep.subr.bf16.mxu0 %v10614_v6  ;;  %v10676_v6 = vcombine.high %v5927_v23, %v5931_v10  ;;  %v11928_v8 = vld [vmem:[#allocation8 + $0x44] ss:$16 sps:$4 sm:$0xff]  }
 0x798   :  { %7463 = vmatpush1.bf16.msra.mxu1 %v10611_v37  ;;  %v5940_v37 = vld [vmem:[#allocation5 + $0x6f8] sm:$0xff] }
 0x799   :  { %7545 = vmatpush1.bf16.msra.mxu0 %v10613_v19  ;;  %7464 = vmatprep.subr.bf16.mxu1 %v10620_v24  ;;  %v10675_v19 = vcombine.low %v5927_v23, %v5931_v10  ;;  %v10677_v24 = vcombine.low %v5928_v53, %v5932_v46  ;;  %v10686_v41 = vcombine.high %v5936_v22, %v5940_v37  ;;  %v11937_v23 = vld [vmem:[#allocation8 + $0x6c] ss:$16 sps:$4 sm:$0xff]   ;;  %v11932_v10 = vld [vmem:[#allocation8 + $0x60] ss:$16 sps:$4 sm:$0xff]   ;;  %v11940_v53 = vld [vmem:[#allocation8 + $0x84] ss:$16 sps:$4 sm:$0xff]  }
 0x79a   :  { %7546 = vmatprep.subr.bf16.mxu0 %v10622_v39  ;;  %v10684_v39 = vcombine.high %v5935_v47, %v5939_v52  ;;  %v11943_v46 = vld [vmem:[#allocation8 + $0x8c] ss:$16 sps:$4 sm:$0xff]  }
 0x79c   :  { %7465 = vmatpush1.bf16.msra.mxu1 %v10619_v26  ;;  %v5948_v26 = vld [vmem:[#allocation5 + $0x738] sm:$0xff] }
 0x79d   :  { %7547 = vmatpush1.bf16.msra.mxu0 %v10621_v29  ;;  %7466 = vmatprep.subr.bf16.mxu1 %v10628_v15  ;;  %v10683_v29 = vcombine.low %v5935_v47, %v5939_v52  ;;  %v10685_v15 = vcombine.low %v5936_v22, %v5940_v37  ;;  %v10694_v30 = vcombine.high %v5944_v25, %v5948_v26  ;;  %v11944_v47 = vld [vmem:[#allocation8 + $0xa0] ss:$16 sps:$4 sm:$0xff]   ;;  %v11947_v52 = vld [vmem:[#allocation8 + $0xa8] ss:$16 sps:$4 sm:$0xff]   ;;  %v11952_v22 = vld [vmem:[#allocation8 + $0xc4] ss:$16 sps:$4 sm:$0xff]  }
 0x79e   :  { %7548 = vmatprep.subr.bf16.mxu0 %v10630_v54  ;;  %v10692_v54 = vcombine.high %v5943_v63, %v5947_v5  ;;  %v11955_v37 = vld [vmem:[#allocation8 + $0xcc] ss:$16 sps:$4 sm:$0xff]  }
 0x7a0   :  { %7467 = vmatpush1.bf16.msra.mxu1 %v10627_v49  ;;  %v5956_v49 = vld [vmem:[#allocation5 + $0x778] sm:$0xff] }
 0x7a1   :  { %7549 = vmatpush1.bf16.msra.mxu0 %v10629_v60  ;;  %7468 = vmatprep.subr.bf16.mxu1 %v10636_v32  ;;  %v10691_v60 = vcombine.low %v5943_v63, %v5947_v5  ;;  %v10693_v32 = vcombine.low %v5944_v25, %v5948_v26  ;;  %v10702_v2 = vcombine.high %v5952_v58, %v5956_v49  ;;  %v11956_v63 = vld [vmem:[#allocation8 + $0xe0] ss:$16 sps:$4 sm:$0xff]   ;;  %v11959_v5 = vld [vmem:[#allocation8 + $0xe8] ss:$16 sps:$4 sm:$0xff]   ;;  %v11964_v25 = vld [vmem:[#allocation8 + $0x104] ss:$16 sps:$4 sm:$0xff]  }
 0x7a2   :  { %7550 = vmatprep.subr.bf16.mxu0 %v10638_v38  ;;  %v10700_v38 = vcombine.high %v5951_v20, %v5955_v40  ;;  %v11967_v26 = vld [vmem:[#allocation8 + $0x10c] ss:$16 sps:$4 sm:$0xff]  }
 0x7a4   :  { %7469 = vmatpush1.bf16.msra.mxu1 %v10635_v50  ;;  %v5964_v50 = vld [vmem:[#allocation5 + $0x7b8] sm:$0xff] }
 0x7a5   :  { %7551 = vmatpush1.bf16.msra.mxu0 %v10637_v7  ;;  %7470 = vmatprep.subr.bf16.mxu1 %v10644_v16  ;;  %v10699_v7 = vcombine.low %v5951_v20, %v5955_v40  ;;  %v10701_v16 = vcombine.low %v5952_v58, %v5956_v49  ;;  %v10710_v33 = vcombine.high %v5960_v17, %v5964_v50  ;;  %v11968_v20 = vld [vmem:[#allocation8 + $0x120] ss:$16 sps:$4 sm:$0xff]   ;;  %v11971_v40 = vld [vmem:[#allocation8 + $0x128] ss:$16 sps:$4 sm:$0xff]   ;;  %v11976_v58 = vld [vmem:[#allocation8 + $0x144] ss:$16 sps:$4 sm:$0xff]  }
 0x7a6   :  { %7552 = vmatprep.subr.bf16.mxu0 %v10646_v9  ;;  %v10708_v9 = vcombine.high %v5959_v56, %v5963_v11  ;;  %v11979_v49 = vld [vmem:[#allocation8 + $0x14c] ss:$16 sps:$4 sm:$0xff]  }
 0x7a8   :  { %7471 = vmatpush1.bf16.msra.mxu1 %v10643_v62  ;;  %v5972_v62 = vld [vmem:[#allocation5 + $0x7f8] sm:$0xff] }
 0x7a9   :  { %7553 = vmatpush1.bf16.msra.mxu0 %v10645_v12  ;;  %7472 = vmatprep.subr.bf16.mxu1 %v10652_v13  ;;  %v10707_v12 = vcombine.low %v5959_v56, %v5963_v11  ;;  %v10709_v13 = vcombine.low %v5960_v17, %v5964_v50  ;;  %v10718_v44 = vcombine.high %v5968_v4, %v5972_v62  ;;  %v11980_v56 = vld [vmem:[#allocation8 + $0x160] ss:$16 sps:$4 sm:$0xff]   ;;  %v11983_v11 = vld [vmem:[#allocation8 + $0x168] ss:$16 sps:$4 sm:$0xff]   ;;  %v11988_v17 = vld [vmem:[#allocation8 + $0x184] ss:$16 sps:$4 sm:$0xff]  }
 0x7aa   :  { %7554 = vmatprep.subr.bf16.mxu0 %v10654_v55  ;;  %v10716_v55 = vcombine.high %v5967_v42, %v5971_v3  ;;  %v10717_v1 = vcombine.low %v5968_v4, %v5972_v62  ;;  %v11991_v50 = vld [vmem:[#allocation8 + $0x18c] ss:$16 sps:$4 sm:$0xff]   ;;  %v11992_v42 = vld [vmem:[#allocation8 + $0x1a0] ss:$16 sps:$4 sm:$0xff]   ;;  %v11995_v3 = vld [vmem:[#allocation8 + $0x1a8] ss:$16 sps:$4 sm:$0xff]  }
 0x7ab   :  { %v12000_v4 = vld [vmem:[#allocation8 + $0x1c4] ss:$16 sps:$4 sm:$0xff]   ;;  %v12003_v62 = vld [vmem:[#allocation8 + $0x1cc] ss:$16 sps:$4 sm:$0xff]  }
 0x7ac   :  { %7473 = vmatpush1.bf16.msra.mxu1 %v10651_v28  ;;  %v11919_v28 = vld [vmem:[#allocation8 + $0xc] ss:$16 sps:$4 sm:$0xff]  }
 0x7ad   :  { %7555 = vmatpush1.bf16.msra.mxu0 %v10653_v48  ;;  %7474 = vmatprep.subr.bf16.mxu1 %v10660_v61  ;;  %v11914_v48 = vld [vmem:[#allocation8] ss:$16 sps:$4 sm:$0xff]   ;;  %v11917_v61 = vld [vmem:[#allocation8 + $0x8] ss:$16 sps:$4 sm:$0xff]  }
 0x7ae   :  { %7556 = vmatprep.subr.bf16.mxu0 %v10662_v14  ;;  %v11922_v14 = vld [vmem:[#allocation8 + $0x24] ss:$16 sps:$4 sm:$0xff]  }
 0x7b0   :  { %7475 = vmatpush1.bf16.msra.mxu1 %v10659_v57  ;;  %v11931_v57 = vld [vmem:[#allocation8 + $0x4c] ss:$16 sps:$4 sm:$0xff]  }
 0x7b1   :  { %7557 = vmatpush1.bf16.msra.mxu0 %v10661_v31  ;;  %7476 = vmatprep.subr.bf16.mxu1 %v10668_v36  ;;  %v11926_v31 = vld [vmem:[#allocation8 + $0x40] ss:$16 sps:$4 sm:$0xff]   ;;  %v11929_v36 = vld [vmem:[#allocation8 + $0x48] ss:$16 sps:$4 sm:$0xff]  }
 0x7b2   :  { %7558 = vmatprep.subr.bf16.mxu0 %v10670_v35  ;;  %v11934_v35 = vld [vmem:[#allocation8 + $0x64] ss:$16 sps:$4 sm:$0xff]  }
 0x7b4   :  { %7477 = vmatpush1.bf16.msra.mxu1 %v10667_v18  ;;  %v11938_v18 = vld [vmem:[#allocation8 + $0x80] ss:$16 sps:$4 sm:$0xff]  }
 0x7b5   :  { %7559 = vmatpush1.bf16.msra.mxu0 %v10669_v43  ;;  %7478 = vmatprep.subr.bf16.mxu1 %v10676_v6  ;;  %v11941_v43 = vld [vmem:[#allocation8 + $0x88] ss:$16 sps:$4 sm:$0xff]   ;;  %v11946_v6 = vld [vmem:[#allocation8 + $0xa4] ss:$16 sps:$4 sm:$0xff]  }
 0x7b6   :  { %7560 = vmatprep.subr.bf16.mxu0 %v10678_v45  ;;  %v11949_v45 = vld [vmem:[#allocation8 + $0xac] ss:$16 sps:$4 sm:$0xff]  }
 0x7b8   :  { %7479 = vmatpush1.bf16.msra.mxu1 %v10675_v19  ;;  %v11950_v19 = vld [vmem:[#allocation8 + $0xc0] ss:$16 sps:$4 sm:$0xff]  }
 0x7b9   :  { %7561 = vmatpush1.bf16.msra.mxu0 %v10677_v24  ;;  %7480 = vmatprep.subr.bf16.mxu1 %v10684_v39  ;;  %v11953_v24 = vld [vmem:[#allocation8 + $0xc8] ss:$16 sps:$4 sm:$0xff]   ;;  %v11958_v39 = vld [vmem:[#allocation8 + $0xe4] ss:$16 sps:$4 sm:$0xff]  }
 0x7ba   :  { %7562 = vmatprep.subr.bf16.mxu0 %v10686_v41  ;;  %v11961_v41 = vld [vmem:[#allocation8 + $0xec] ss:$16 sps:$4 sm:$0xff]  }
 0x7bc   :  { %7481 = vmatpush1.bf16.msra.mxu1 %v10683_v29  ;;  %v11962_v29 = vld [vmem:[#allocation8 + $0x100] ss:$16 sps:$4 sm:$0xff]  }
 0x7bd   :  { %7563 = vmatpush1.bf16.msra.mxu0 %v10685_v15  ;;  %7482 = vmatprep.subr.bf16.mxu1 %v10692_v54  ;;  %v11965_v15 = vld [vmem:[#allocation8 + $0x108] ss:$16 sps:$4 sm:$0xff]   ;;  %v11970_v54 = vld [vmem:[#allocation8 + $0x124] ss:$16 sps:$4 sm:$0xff]  }
 0x7be   :  { %7564 = vmatprep.subr.bf16.mxu0 %v10694_v30  ;;  %v11973_v30 = vld [vmem:[#allocation8 + $0x12c] ss:$16 sps:$4 sm:$0xff]  }
 0x7c0   :  { %7483 = vmatpush1.bf16.msra.mxu1 %v10691_v60  ;;  %v11974_v60 = vld [vmem:[#allocation8 + $0x140] ss:$16 sps:$4 sm:$0xff]  }
 0x7c1   :  { %7565 = vmatpush1.bf16.msra.mxu0 %v10693_v32  ;;  %7484 = vmatprep.subr.bf16.mxu1 %v10700_v38  ;;  %v11977_v32 = vld [vmem:[#allocation8 + $0x148] ss:$16 sps:$4 sm:$0xff]   ;;  %v11982_v38 = vld [vmem:[#allocation8 + $0x164] ss:$16 sps:$4 sm:$0xff]  }
 0x7c2   :  { %7566 = vmatprep.subr.bf16.mxu0 %v10702_v2  ;;  %v11985_v2 = vld [vmem:[#allocation8 + $0x16c] ss:$16 sps:$4 sm:$0xff]  }
 0x7c4   :  { %7485 = vmatpush1.bf16.msra.mxu1 %v10699_v7  ;;  %v11986_v7 = vld [vmem:[#allocation8 + $0x180] ss:$16 sps:$4 sm:$0xff]  }
 0x7c5   :  { %7567 = vmatpush1.bf16.msra.mxu0 %v10701_v16  ;;  %7486 = vmatprep.subr.bf16.mxu1 %v10708_v9  ;;  %v11989_v16 = vld [vmem:[#allocation8 + $0x188] ss:$16 sps:$4 sm:$0xff]   ;;  %v11994_v9 = vld [vmem:[#allocation8 + $0x1a4] ss:$16 sps:$4 sm:$0xff]  }
 0x7c6   :  { %7568 = vmatprep.subr.bf16.mxu0 %v10710_v33  ;;  %v11997_v33 = vld [vmem:[#allocation8 + $0x1ac] ss:$16 sps:$4 sm:$0xff]  }
 0x7c8   :  { %7487 = vmatpush1.bf16.msra.mxu1 %v10707_v12  ;;  %v11998_v12 = vld [vmem:[#allocation8 + $0x1c0] ss:$16 sps:$4 sm:$0xff]  }
 0x7c9   :  { %7569 = vmatpush1.bf16.msra.mxu0 %v10709_v13  ;;  %7488 = vmatprep.subr.bf16.mxu1 %v10716_v55  ;;  %v12001_v13 = vld [vmem:[#allocation8 + $0x1c8] ss:$16 sps:$4 sm:$0xff]   ;;  %v12006_v55 = vld [vmem:[#allocation8 + $0x1e4] ss:$16 sps:$4 sm:$0xff]  }
 0x7ca   :  { %7570 = vmatprep.subr.bf16.mxu0 %v10718_v44  ;;  %v12009_v44 = vld [vmem:[#allocation8 + $0x1ec] ss:$16 sps:$4 sm:$0xff]  }
 0x7cc   :  { %7489 = vmatpush1.bf16.msra.mxu1 %v10715_v59  ;;  %v12004_v59 = vld [vmem:[#allocation8 + $0x1e0] ss:$16 sps:$4 sm:$0xff]  }
 0x7cd   :  { %7571 = vmatpush1.bf16.msra.mxu0 %v10717_v1  ;;  %9233 = vmatprep.subr.bf16.mxu1 %v11916_v0  ;;  %v12007_v1 = vld [vmem:[#allocation8 + $0x1e8] ss:$16 sps:$4 sm:$0xff]   ;;  %v12012_v0 = vld [vmem:[#allocation8 + $0x204] ss:$16 sps:$4 sm:$0xff]  }
 0x7ce   :  { %9397 = vmatprep.subr.bf16.mxu0 %v11919_v28  ;;  %v12015_v28 = vld [vmem:[#allocation8 + $0x20c] ss:$16 sps:$4 sm:$0xff]  }
 0x7cf   :  { %7491 = vmatmul.mubr.bf16.vlgmr.msra.gmra.mrb[60].mxu1 %v16251_v51 }
 0x7d0   :  { %7573 = vmatmul.mubr.bf16.vlgmr.msra.gmra.mrb[48].mxu0 %v16251_v51  ;;  %9234 = vmatpush1.bf16.msra.mxu1 %v11914_v48  ;;  %v11935_v51 = vld [vmem:[#allocation8 + $0x68] ss:$16 sps:$4 sm:$0xff]   ;;  %v16266_v48 = vld [vmem:[%s16561_s14] sm:$0xff] }
 0x7d1   :  { %9398 = vmatpush1.bf16.msra.mxu0 %v11917_v61  ;;  %9235 = vmatprep.subr.bf16.mxu1 %v11922_v14  ;;  %v16271_v61 = vld [vmem:[%s16562_s15] sm:$0xff] }
 0x7d2   :  { %9399 = vmatprep.subr.bf16.mxu0 %v11925_v21  ;;  %v16791_v14 = vld [vmem:[#allocation17_spill] sm:$0xff] }
 0x7d3   :  { %v7586_v21 = vrot.slane %v16266_v48, %v16791_v14 }
 0x7d4   :  { %9236 = vmatpush1.bf16.msra.mxu1 %v11920_v27  ;;  %v16792_v27 = vld [vmem:[#allocation15_spill] sm:$0xff] }
 0x7d5   :  { %9400 = vmatpush1.bf16.msra.mxu0 %v11923_v34  ;;  %9237 = vmatprep.subr.bf16.mxu1 %v11928_v8  ;;  %v7590_v34 = vrot.slane %v16266_v48, %v16792_v27  ;;  %v16793_v8 = vld [vmem:[#allocation21_spill] sm:$0xff] }
 0x7d6   :  { %9401 = vmatprep.subr.bf16.mxu0 %v11931_v57  ;;  %v7598_v57 = vrot.slane %v16266_v48, %v16793_v8 }
 0x7d8   :  { %9238 = vmatpush1.bf16.msra.mxu1 %v11926_v31  ;;  %v7636_v31 = vrot.slane %v16271_v61, %v16791_v14 }
 0x7d9   :  { %9402 = vmatpush1.bf16.msra.mxu0 %v11929_v36  ;;  %9239 = vmatprep.subr.bf16.mxu1 %v11934_v35 }
 0x7da   :  { %9403 = vmatprep.subr.bf16.mxu0 %v11937_v23  ;;  %v7640_v23 = vrot.slane %v16271_v61, %v16792_v27 }
 0x7dc   :  { %9240 = vmatpush1.bf16.msra.mxu1 %v11932_v10  ;;  %v7648_v10 = vrot.slane %v16271_v61, %v16793_v8 }
 0x7dd   :  { %9404 = vmatpush1.bf16.msra.mxu0 %v11935_v51  ;;  %9241 = vmatprep.subr.bf16.mxu1 %v11940_v53 }
 0x7de   :  { %9405 = vmatprep.subr.bf16.mxu0 %v11943_v46 }
 0x7e0   :  { %9242 = vmatpush1.bf16.msra.mxu1 %v11938_v18 }
 0x7e1   :  { %9406 = vmatpush1.bf16.msra.mxu0 %v11941_v43  ;;  %9243 = vmatprep.subr.bf16.mxu1 %v11946_v6 }
 0x7e2   :  { %9407 = vmatprep.subr.bf16.mxu0 %v11949_v45 }
 0x7e4   :  { %9244 = vmatpush1.bf16.msra.mxu1 %v11944_v47 }
 0x7e5   :  { %9408 = vmatpush1.bf16.msra.mxu0 %v11947_v52  ;;  %9245 = vmatprep.subr.bf16.mxu1 %v11952_v22 }
 0x7e6   :  { %9409 = vmatprep.subr.bf16.mxu0 %v11955_v37 }
 0x7e8   :  { %9246 = vmatpush1.bf16.msra.mxu1 %v11950_v19 }
 0x7e9   :  { %9410 = vmatpush1.bf16.msra.mxu0 %v11953_v24  ;;  %9247 = vmatprep.subr.bf16.mxu1 %v11958_v39 }
 0x7ea   :  { %9411 = vmatprep.subr.bf16.mxu0 %v11961_v41 }
 0x7ec   :  { %9248 = vmatpush1.bf16.msra.mxu1 %v11956_v63 }
 0x7ed   :  { %9412 = vmatpush1.bf16.msra.mxu0 %v11959_v5  ;;  %9249 = vmatprep.subr.bf16.mxu1 %v11964_v25  ;;  %v12010_v5 = vld [vmem:[#allocation8 + $0x200] ss:$16 sps:$4 sm:$0xff]   ;;  %v12013_v25 = vld [vmem:[#allocation8 + $0x208] ss:$16 sps:$4 sm:$0xff]  }
 0x7ee   :  { %9413 = vmatprep.subr.bf16.mxu0 %v11967_v26 }
 0x7f0   :  { %9250 = vmatpush1.bf16.msra.mxu1 %v11962_v29  ;;  %v12018_v29 = vld [vmem:[#allocation8 + $0x224] ss:$16 sps:$4 sm:$0xff]  }
 0x7f1   :  { %9414 = vmatpush1.bf16.msra.mxu0 %v11965_v15  ;;  %9251 = vmatprep.subr.bf16.mxu1 %v11970_v54  ;;  %v12021_v15 = vld [vmem:[#allocation8 + $0x22c] ss:$16 sps:$4 sm:$0xff]  }
 0x7f2   :  { %9415 = vmatprep.subr.bf16.mxu0 %v11973_v30  ;;  %v12016_v30 = vld [vmem:[#allocation8 + $0x220] ss:$16 sps:$4 sm:$0xff]  }
 0x7f4   :  { %9252 = vmatpush1.bf16.msra.mxu1 %v11968_v20  ;;  %v12019_v20 = vld [vmem:[#allocation8 + $0x228] ss:$16 sps:$4 sm:$0xff]  }
 0x7f5   :  { %9416 = vmatpush1.bf16.msra.mxu0 %v11971_v40  ;;  %9253 = vmatprep.subr.bf16.mxu1 %v11976_v58  ;;  %v12024_v40 = vld [vmem:[#allocation8 + $0x244] ss:$16 sps:$4 sm:$0xff]   ;;  %v12027_v58 = vld [vmem:[#allocation8 + $0x24c] ss:$16 sps:$4 sm:$0xff]  }
 0x7f6   :  { %9417 = vmatprep.subr.bf16.mxu0 %v11979_v49  ;;  %v12022_v49 = vld [vmem:[#allocation8 + $0x240] ss:$16 sps:$4 sm:$0xff]  }
 0x7f8   :  { %9254 = vmatpush1.bf16.msra.mxu1 %v11974_v60  ;;  %v12025_v60 = vld [vmem:[#allocation8 + $0x248] ss:$16 sps:$4 sm:$0xff]  }
 0x7f9   :  { %9418 = vmatpush1.bf16.msra.mxu0 %v11977_v32  ;;  %9255 = vmatprep.subr.bf16.mxu1 %v11982_v38  ;;  %v12030_v32 = vld [vmem:[#allocation8 + $0x264] ss:$16 sps:$4 sm:$0xff]   ;;  %v12033_v38 = vld [vmem:[#allocation8 + $0x26c] ss:$16 sps:$4 sm:$0xff]  }
 0x7fa   :  { %9419 = vmatprep.subr.bf16.mxu0 %v11985_v2  ;;  %v12028_v2 = vld [vmem:[#allocation8 + $0x260] ss:$16 sps:$4 sm:$0xff]  }
 0x7fc   :  { %9256 = vmatpush1.bf16.msra.mxu1 %v11980_v56  ;;  %v12031_v56 = vld [vmem:[#allocation8 + $0x268] ss:$16 sps:$4 sm:$0xff]  }
 0x7fd   :  { %9420 = vmatpush1.bf16.msra.mxu0 %v11983_v11  ;;  %9257 = vmatprep.subr.bf16.mxu1 %v11988_v17  ;;  %v12036_v11 = vld [vmem:[#allocation8 + $0x284] ss:$16 sps:$4 sm:$0xff]   ;;  %v12039_v17 = vld [vmem:[#allocation8 + $0x28c] ss:$16 sps:$4 sm:$0xff]  }
 0x7fe   :  { %9421 = vmatprep.subr.bf16.mxu0 %v11991_v50  ;;  %v12034_v50 = vld [vmem:[#allocation8 + $0x280] ss:$16 sps:$4 sm:$0xff]  }
 0x800   :  { %9258 = vmatpush1.bf16.msra.mxu1 %v11986_v7  ;;  %v12037_v7 = vld [vmem:[#allocation8 + $0x288] ss:$16 sps:$4 sm:$0xff]  }
 0x801   :  { %9422 = vmatpush1.bf16.msra.mxu0 %v11989_v16  ;;  %9259 = vmatprep.subr.bf16.mxu1 %v11994_v9  ;;  %v12042_v16 = vld [vmem:[#allocation8 + $0x2a4] ss:$16 sps:$4 sm:$0xff]   ;;  %v12045_v9 = vld [vmem:[#allocation8 + $0x2ac] ss:$16 sps:$4 sm:$0xff]  }
 0x802   :  { %9423 = vmatprep.subr.bf16.mxu0 %v11997_v33  ;;  %v12040_v33 = vld [vmem:[#allocation8 + $0x2a0] ss:$16 sps:$4 sm:$0xff]  }
 0x804   :  { %9260 = vmatpush1.bf16.msra.mxu1 %v11992_v42  ;;  %v12043_v42 = vld [vmem:[#allocation8 + $0x2a8] ss:$16 sps:$4 sm:$0xff]  }
 0x805   :  { %9424 = vmatpush1.bf16.msra.mxu0 %v11995_v3  ;;  %9261 = vmatprep.subr.bf16.mxu1 %v12000_v4  ;;  %v12048_v3 = vld [vmem:[#allocation8 + $0x2c4] ss:$16 sps:$4 sm:$0xff]   ;;  %v12051_v4 = vld [vmem:[#allocation8 + $0x2cc] ss:$16 sps:$4 sm:$0xff]  }
 0x806   :  { %9425 = vmatprep.subr.bf16.mxu0 %v12003_v62  ;;  %v12046_v62 = vld [vmem:[#allocation8 + $0x2c0] ss:$16 sps:$4 sm:$0xff]  }
 0x808   :  { %9262 = vmatpush1.bf16.msra.mxu1 %v11998_v12  ;;  %v12049_v12 = vld [vmem:[#allocation8 + $0x2c8] ss:$16 sps:$4 sm:$0xff]  }
 0x809   :  { %9426 = vmatpush1.bf16.msra.mxu0 %v12001_v13  ;;  %9263 = vmatprep.subr.bf16.mxu1 %v12006_v55  ;;  %v12054_v13 = vld [vmem:[#allocation8 + $0x2e4] ss:$16 sps:$4 sm:$0xff]   ;;  %v12057_v55 = vld [vmem:[#allocation8 + $0x2ec] ss:$16 sps:$4 sm:$0xff]  }
 0x80a   :  { %9427 = vmatprep.subr.bf16.mxu0 %v12009_v44  ;;  %v12052_v44 = vld [vmem:[#allocation8 + $0x2e0] ss:$16 sps:$4 sm:$0xff]  }
 0x80c   :  { %9264 = vmatpush1.bf16.msra.mxu1 %v12004_v59  ;;  %v12055_v59 = vld [vmem:[#allocation8 + $0x2e8] ss:$16 sps:$4 sm:$0xff]  }
 0x80d   :  { %9428 = vmatpush1.bf16.msra.mxu0 %v12007_v1  ;;  %9274 = vmatprep.subr.bf16.mxu1 %v12012_v0  ;;  %v12060_v1 = vld [vmem:[#allocation8 + $0x304] ss:$16 sps:$4 sm:$0xff]   ;;  %v12063_v0 = vld [vmem:[#allocation8 + $0x30c] ss:$16 sps:$4 sm:$0xff]  }
 0x80e   :  { %9438 = vmatprep.subr.bf16.mxu0 %v12015_v28  ;;  %v12058_v28 = vld [vmem:[#allocation8 + $0x300] ss:$16 sps:$4 sm:$0xff]  }
 0x822   :  { %v7328_v36 = vpop.f32.mrb[56].mxu1  ;;  %v16281_v35 = vpop.f32.mrb[44].mxu0 }
 0x823   :  { %v7623_v51 = vmul.f32 %v7586_v21, %v7328_v36  ;;  %v7330_v53 = vpop.f32.mrb[57].mxu1  ;;  %v7412_v46 = vpop.f32.mrb[45].mxu0  ;;  %v12061_v21 = vld [vmem:[#allocation8 + $0x308] ss:$16 sps:$4 sm:$0xff]  }
 0x824   :  { %v7624_v18 = vmul.f32 %v7590_v34, %v7330_v53  ;;  %v7626_v43 = vmul.f32 %v7598_v57, %v7412_v46  ;;  %v7332_v6 = vpop.f32.mrb[58].mxu1  ;;  %v7414_v45 = vpop.f32.mrb[46].mxu0  ;;  %v12066_v34 = vld [vmem:[#allocation8 + $0x324] ss:$16 sps:$4 sm:$0xff]   ;;  %v12069_v57 = vld [vmem:[#allocation8 + $0x32c] ss:$16 sps:$4 sm:$0xff]  }
 0x825   :  { %v7673_v47 = vadd.f32 %v7636_v31, %v7623_v51  ;;  %v7333_v52 = vpop.f32.mrb[59].mxu1  ;;  %v7415_v22 = vpop.f32.mrb[47].mxu0  ;;  %v12064_v31 = vld [vmem:[#allocation8 + $0x320] ss:$16 sps:$4 sm:$0xff]   ;;  %v12067_v36 = vld [vmem:[#allocation8 + $0x328] ss:$16 sps:$4 sm:$0xff]  }
 0x826   :  { %v7674_v37 = vadd.f32 %v7640_v23, %v7624_v18  ;;  %v7676_v19 = vadd.f32 %v7648_v10, %v7626_v43  ;;  %v12072_v23 = vld [vmem:[#allocation8 + $0x344] ss:$16 sps:$4 sm:$0xff]   ;;  %v12075_v10 = vld [vmem:[#allocation8 + $0x34c] ss:$16 sps:$4 sm:$0xff]   ;;  %v12070_v51 = vld [vmem:[#allocation8 + $0x340] ss:$16 sps:$4 sm:$0xff]  }
 0x827   :  { %v7681_v24 = vmax.f32 %v7673_v47, 0.0  ;;  %v12073_v53 = vld [vmem:[#allocation8 + $0x348] ss:$16 sps:$4 sm:$0xff]   ;;  %v12078_v46 = vld [vmem:[#allocation8 + $0x364] ss:$16 sps:$4 sm:$0xff]  }
 0x828   :  { %v7682_v39 = vmax.f32 %v7674_v37, 0.0  ;;  %v7684_v41 = vmax.f32 %v7676_v19, 0.0  ;;  %v12081_v18 = vld [vmem:[#allocation8 + $0x36c] ss:$16 sps:$4 sm:$0xff]   ;;  %v12076_v43 = vld [vmem:[#allocation8 + $0x360] ss:$16 sps:$4 sm:$0xff]  }
 0x829   :  { %v7689_v26 = vpack.c.bf16 %v7681_v24, %v7681_v24  ;;  %v12079_v6 = vld [vmem:[#allocation8 + $0x368] ss:$16 sps:$4 sm:$0xff]   ;;  %v12084_v45 = vld [vmem:[#allocation8 + $0x384] ss:$16 sps:$4 sm:$0xff]   ;;  %v12087_v47 = vld [vmem:[#allocation8 + $0x38c] ss:$16 sps:$4 sm:$0xff]  }
 0x82a   :  { %v7690_v63 = vpack.c.bf16 %v7682_v39, %v7682_v39  ;;  %v7692_v54 = vpack.c.bf16 %v7684_v41, %v7684_v41  ;;  %v12082_v52 = vld [vmem:[#allocation8 + $0x380] ss:$16 sps:$4 sm:$0xff]   ;;  %v12085_v22 = vld [vmem:[#allocation8 + $0x388] ss:$16 sps:$4 sm:$0xff]   ;;  %v12090_v24 = vld [vmem:[#allocation8 + $0x3a4] ss:$16 sps:$4 sm:$0xff]  }
 0x82b   :  { %v16794_v37 = vld [vmem:[#allocation16_spill] sm:$0xff]  ;;  %v12093_v39 = vld [vmem:[#allocation8 + $0x3ac] ss:$16 sps:$4 sm:$0xff]  }
 0x82c   :  { %9265 = vmatprep.mubr.bf16.mxu1 %v7690_v63  ;;  %9429 = vmatprep.mubr.bf16.mxu0 %v7690_v63  ;;  %v7594_v19 = vrot.slane %v16266_v48, %v16794_v37  ;;  %v12088_v41 = vld [vmem:[#allocation8 + $0x3a0] ss:$16 sps:$4 sm:$0xff]   ;;  %v12091_v63 = vld [vmem:[#allocation8 + $0x3a8] ss:$16 sps:$4 sm:$0xff]  }
 0x82d   :  { %9266 = vmatmul.mubr.bf16.vlgmr.msra.gmra.mrb[64].mxu1 %v7689_v26  ;;  %9430 = vmatmul.mubr.bf16.vlgmr.msra.gmra.mrb[52].mxu0 %v7689_v26  ;;  %v12096_v26 = vld [vmem:[#allocation8 + $0x3c4] ss:$16 sps:$4 sm:$0xff]  }
 0x82e   :  { %9275 = vmatpush1.bf16.msra.mxu1 %v12010_v5  ;;  %9439 = vmatpush1.bf16.msra.mxu0 %v12013_v25  ;;  %v7625_v5 = vmul.f32 %v7594_v19, %v16281_v35  ;;  %v7644_v25 = vrot.slane %v16271_v61, %v16794_v37  ;;  %v12103_v35 = vld [vmem:[#allocation8 + $0x3e8] ss:$16 sps:$4 sm:$0xff]   ;;  %v12168_v19 = vld [vmem:[#allocation8 + $0x544] ss:$16 sps:$4 sm:$0xff]  }
 0x82f   :  { %9306 = vmatprep.mubr.bf16.mxu1 %v7692_v54  ;;  %9470 = vmatprep.mubr.bf16.mxu0 %v7692_v54  ;;  %v12097_v54 = vld [vmem:[#allocation8 + $0x3c8] ss:$16 sps:$4 sm:$0xff]  }
 0x830   :  { %9276 = vmatprep.subr.bf16.mxu1 %v12018_v29  ;;  %9440 = vmatprep.subr.bf16.mxu0 %v12021_v15  ;;  %v12099_v29 = vld [vmem:[#allocation8 + $0x3cc] ss:$16 sps:$4 sm:$0xff]   ;;  %v12094_v15 = vld [vmem:[#allocation8 + $0x3c0] ss:$16 sps:$4 sm:$0xff]  }
 0x832   :  { %9277 = vmatpush1.bf16.msra.mxu1 %v12016_v30  ;;  %9441 = vmatpush1.bf16.msra.mxu0 %v12019_v20  ;;  %v7675_v30 = vadd.f32 %v7644_v25, %v7625_v5  ;;  %v12102_v20 = vld [vmem:[#allocation8 + $0x3e4] ss:$16 sps:$4 sm:$0xff]   ;;  %v12177_v5 = vld [vmem:[#allocation8 + $0x56c] ss:$16 sps:$4 sm:$0xff]   ;;  %v12172_v25 = vld [vmem:[#allocation8 + $0x560] ss:$16 sps:$4 sm:$0xff]  }
 0x833   :  { %9278 = vmatprep.subr.bf16.mxu1 %v12024_v40  ;;  %9442 = vmatprep.subr.bf16.mxu0 %v12027_v58  ;;  %v12105_v40 = vld [vmem:[#allocation8 + $0x3ec] ss:$16 sps:$4 sm:$0xff]   ;;  %v12100_v58 = vld [vmem:[#allocation8 + $0x3e0] ss:$16 sps:$4 sm:$0xff]  }
 0x836   :  { %9279 = vmatpush1.bf16.msra.mxu1 %v12022_v49  ;;  %9443 = vmatpush1.bf16.msra.mxu0 %v12025_v60  ;;  %v7683_v49 = vmax.f32 %v7675_v30, 0.0  ;;  %v12108_v60 = vld [vmem:[#allocation8 + $0x404] ss:$16 sps:$4 sm:$0xff]   ;;  %v12181_v30 = vld [vmem:[#allocation8 + $0x588] ss:$16 sps:$4 sm:$0xff]  }
 0x837   :  { %9280 = vmatprep.subr.bf16.mxu1 %v12030_v32  ;;  %9444 = vmatprep.subr.bf16.mxu0 %v12033_v38  ;;  %v12111_v32 = vld [vmem:[#allocation8 + $0x40c] ss:$16 sps:$4 sm:$0xff]   ;;  %v12106_v38 = vld [vmem:[#allocation8 + $0x400] ss:$16 sps:$4 sm:$0xff]  }
 0x83a   :  { %9281 = vmatpush1.bf16.msra.mxu1 %v12028_v2  ;;  %9445 = vmatpush1.bf16.msra.mxu0 %v12031_v56  ;;  %v12109_v2 = vld [vmem:[#allocation8 + $0x408] ss:$16 sps:$4 sm:$0xff]   ;;  %v7691_v56 = vpack.c.bf16 %v7683_v49, %v7683_v49 }
 0x83b   :  { %9282 = vmatprep.subr.bf16.mxu1 %v12036_v11  ;;  %9446 = vmatprep.subr.bf16.mxu0 %v12039_v17  ;;  %v12114_v11 = vld [vmem:[#allocation8 + $0x424] ss:$16 sps:$4 sm:$0xff]   ;;  %v12117_v17 = vld [vmem:[#allocation8 + $0x42c] ss:$16 sps:$4 sm:$0xff]  }
 0x83c   :  { %v16795_v49 = vld [vmem:[#allocation18_spill] sm:$0xff] }
 0x83e   :  { %9283 = vmatpush1.bf16.msra.mxu1 %v12034_v50  ;;  %9447 = vmatpush1.bf16.msra.mxu0 %v12037_v7  ;;  %v12112_v50 = vld [vmem:[#allocation8 + $0x420] ss:$16 sps:$4 sm:$0xff]   ;;  %v12115_v7 = vld [vmem:[#allocation8 + $0x428] ss:$16 sps:$4 sm:$0xff]  }
 0x83f   :  { %9284 = vmatprep.subr.bf16.mxu1 %v12042_v16  ;;  %9448 = vmatprep.subr.bf16.mxu0 %v12045_v9  ;;  %v12120_v16 = vld [vmem:[#allocation8 + $0x444] ss:$16 sps:$4 sm:$0xff]   ;;  %v12123_v9 = vld [vmem:[#allocation8 + $0x44c] ss:$16 sps:$4 sm:$0xff]  }
 0x842   :  { %9285 = vmatpush1.bf16.msra.mxu1 %v12040_v33  ;;  %9449 = vmatpush1.bf16.msra.mxu0 %v12043_v42  ;;  %v12118_v33 = vld [vmem:[#allocation8 + $0x440] ss:$16 sps:$4 sm:$0xff]   ;;  %v12121_v42 = vld [vmem:[#allocation8 + $0x448] ss:$16 sps:$4 sm:$0xff]  }
 0x843   :  { %9286 = vmatprep.subr.bf16.mxu1 %v12048_v3  ;;  %9450 = vmatprep.subr.bf16.mxu0 %v12051_v4  ;;  %v12126_v3 = vld [vmem:[#allocation8 + $0x464] ss:$16 sps:$4 sm:$0xff]   ;;  %v12129_v4 = vld [vmem:[#allocation8 + $0x46c] ss:$16 sps:$4 sm:$0xff]  }
 0x846   :  { %9287 = vmatpush1.bf16.msra.mxu1 %v12046_v62  ;;  %9451 = vmatpush1.bf16.msra.mxu0 %v12049_v12  ;;  %v12124_v62 = vld [vmem:[#allocation8 + $0x460] ss:$16 sps:$4 sm:$0xff]   ;;  %v12127_v12 = vld [vmem:[#allocation8 + $0x468] ss:$16 sps:$4 sm:$0xff]  }
 0x847   :  { %9288 = vmatprep.subr.bf16.mxu1 %v12054_v13  ;;  %9452 = vmatprep.subr.bf16.mxu0 %v12057_v55  ;;  %v12132_v13 = vld [vmem:[#allocation8 + $0x484] ss:$16 sps:$4 sm:$0xff]   ;;  %v12135_v55 = vld [vmem:[#allocation8 + $0x48c] ss:$16 sps:$4 sm:$0xff]  }
 0x84a   :  { %9289 = vmatpush1.bf16.msra.mxu1 %v12052_v44  ;;  %9453 = vmatpush1.bf16.msra.mxu0 %v12055_v59  ;;  %v12130_v44 = vld [vmem:[#allocation8 + $0x480] ss:$16 sps:$4 sm:$0xff]   ;;  %v12133_v59 = vld [vmem:[#allocation8 + $0x488] ss:$16 sps:$4 sm:$0xff]  }
 0x84b   :  { %9290 = vmatprep.subr.bf16.mxu1 %v12060_v1  ;;  %9454 = vmatprep.subr.bf16.mxu0 %v12063_v0  ;;  %v12138_v1 = vld [vmem:[#allocation8 + $0x4a4] ss:$16 sps:$4 sm:$0xff]   ;;  %v12141_v0 = vld [vmem:[#allocation8 + $0x4ac] ss:$16 sps:$4 sm:$0xff]  }
 0x84e   :  { %9291 = vmatpush1.bf16.msra.mxu1 %v12058_v28  ;;  %9455 = vmatpush1.bf16.msra.mxu0 %v12061_v21  ;;  %v12136_v28 = vld [vmem:[#allocation8 + $0x4a0] ss:$16 sps:$4 sm:$0xff]   ;;  %v12139_v21 = vld [vmem:[#allocation8 + $0x4a8] ss:$16 sps:$4 sm:$0xff]  }
 0x84f   :  { %9292 = vmatprep.subr.bf16.mxu1 %v12066_v34  ;;  %9456 = vmatprep.subr.bf16.mxu0 %v12069_v57  ;;  %v12144_v34 = vld [vmem:[#allocation8 + $0x4c4] ss:$16 sps:$4 sm:$0xff]   ;;  %v12147_v57 = vld [vmem:[#allocation8 + $0x4cc] ss:$16 sps:$4 sm:$0xff]  }
 0x852   :  { %9293 = vmatpush1.bf16.msra.mxu1 %v12064_v31  ;;  %9457 = vmatpush1.bf16.msra.mxu0 %v12067_v36  ;;  %v12142_v31 = vld [vmem:[#allocation8 + $0x4c0] ss:$16 sps:$4 sm:$0xff]   ;;  %v12145_v36 = vld [vmem:[#allocation8 + $0x4c8] ss:$16 sps:$4 sm:$0xff]  }
 0x853   :  { %9294 = vmatprep.subr.bf16.mxu1 %v12072_v23  ;;  %9458 = vmatprep.subr.bf16.mxu0 %v12075_v10  ;;  %v12150_v23 = vld [vmem:[#allocation8 + $0x4e4] ss:$16 sps:$4 sm:$0xff]   ;;  %v12153_v10 = vld [vmem:[#allocation8 + $0x4ec] ss:$16 sps:$4 sm:$0xff]  }
 0x856   :  { %9295 = vmatpush1.bf16.msra.mxu1 %v12070_v51  ;;  %9459 = vmatpush1.bf16.msra.mxu0 %v12073_v53  ;;  %v12148_v51 = vld [vmem:[#allocation8 + $0x4e0] ss:$16 sps:$4 sm:$0xff]   ;;  %v12151_v53 = vld [vmem:[#allocation8 + $0x4e8] ss:$16 sps:$4 sm:$0xff]  }
 0x857   :  { %9296 = vmatprep.subr.bf16.mxu1 %v12078_v46  ;;  %9460 = vmatprep.subr.bf16.mxu0 %v12081_v18  ;;  %v12156_v46 = vld [vmem:[#allocation8 + $0x504] ss:$16 sps:$4 sm:$0xff]   ;;  %v12159_v18 = vld [vmem:[#allocation8 + $0x50c] ss:$16 sps:$4 sm:$0xff]  }
 0x85a   :  { %9297 = vmatpush1.bf16.msra.mxu1 %v12076_v43  ;;  %9461 = vmatpush1.bf16.msra.mxu0 %v12079_v6  ;;  %v12154_v43 = vld [vmem:[#allocation8 + $0x500] ss:$16 sps:$4 sm:$0xff]   ;;  %v12157_v6 = vld [vmem:[#allocation8 + $0x508] ss:$16 sps:$4 sm:$0xff]  }
 0x85b   :  { %9298 = vmatprep.subr.bf16.mxu1 %v12084_v45  ;;  %9462 = vmatprep.subr.bf16.mxu0 %v12087_v47  ;;  %v12162_v45 = vld [vmem:[#allocation8 + $0x524] ss:$16 sps:$4 sm:$0xff]   ;;  %v12165_v47 = vld [vmem:[#allocation8 + $0x52c] ss:$16 sps:$4 sm:$0xff]  }
 0x85e   :  { %9299 = vmatpush1.bf16.msra.mxu1 %v12082_v52  ;;  %9463 = vmatpush1.bf16.msra.mxu0 %v12085_v22  ;;  %v12160_v52 = vld [vmem:[#allocation8 + $0x520] ss:$16 sps:$4 sm:$0xff]   ;;  %v12163_v22 = vld [vmem:[#allocation8 + $0x528] ss:$16 sps:$4 sm:$0xff]  }
 0x85f   :  { %9300 = vmatprep.subr.bf16.mxu1 %v12090_v24  ;;  %9464 = vmatprep.subr.bf16.mxu0 %v12093_v39  ;;  %v12171_v24 = vld [vmem:[#allocation8 + $0x54c] ss:$16 sps:$4 sm:$0xff]   ;;  %v12166_v39 = vld [vmem:[#allocation8 + $0x540] ss:$16 sps:$4 sm:$0xff]  }
 0x862   :  { %9301 = vmatpush1.bf16.msra.mxu1 %v12088_v41  ;;  %9465 = vmatpush1.bf16.msra.mxu0 %v12091_v63  ;;  %v12169_v41 = vld [vmem:[#allocation8 + $0x548] ss:$16 sps:$4 sm:$0xff]   ;;  %v12174_v63 = vld [vmem:[#allocation8 + $0x564] ss:$16 sps:$4 sm:$0xff]  }
 0x863   :  { %9302 = vmatprep.subr.bf16.mxu1 %v12096_v26  ;;  %9466 = vmatprep.subr.bf16.mxu0 %v12099_v29  ;;  %v12175_v26 = vld [vmem:[#allocation8 + $0x568] ss:$16 sps:$4 sm:$0xff]   ;;  %v12180_v29 = vld [vmem:[#allocation8 + $0x584] ss:$16 sps:$4 sm:$0xff]  }
 0x866   :  { %9303 = vmatpush1.bf16.msra.mxu1 %v12094_v15  ;;  %9467 = vmatpush1.bf16.msra.mxu0 %v12097_v54  ;;  %v12183_v15 = vld [vmem:[#allocation8 + $0x58c] ss:$16 sps:$4 sm:$0xff]   ;;  %v12178_v54 = vld [vmem:[#allocation8 + $0x580] ss:$16 sps:$4 sm:$0xff]  }
 0x867   :  { %9304 = vmatprep.subr.bf16.mxu1 %v12102_v20  ;;  %9468 = vmatprep.subr.bf16.mxu0 %v12105_v40  ;;  %v12186_v20 = vld [vmem:[#allocation8 + $0x5a4] ss:$16 sps:$4 sm:$0xff]   ;;  %v12189_v40 = vld [vmem:[#allocation8 + $0x5ac] ss:$16 sps:$4 sm:$0xff]  }
 0x86a   :  { %9305 = vmatpush1.bf16.msra.mxu1 %v12100_v58  ;;  %9469 = vmatpush1.bf16.msra.mxu0 %v12103_v35  ;;  %v12184_v58 = vld [vmem:[#allocation8 + $0x5a0] ss:$16 sps:$4 sm:$0xff]   ;;  %v12187_v35 = vld [vmem:[#allocation8 + $0x5a8] ss:$16 sps:$4 sm:$0xff]  }
 0x86b   :  { %9315 = vmatprep.subr.bf16.mxu1 %v12108_v60  ;;  %9479 = vmatprep.subr.bf16.mxu0 %v12111_v32  ;;  %v7602_v60 = vrot.slane %v16266_v48, %v16795_v49  ;;  %v12192_v32 = vld [vmem:[#allocation8 + $0x5c4] ss:$16 sps:$4 sm:$0xff]  }
 0x86d   :  { %9307 = vmatmul.mubr.bf16.vlgmr.msra.gmra.mrb[64].mxu1 %v7691_v56  ;;  %9471 = vmatmul.mubr.bf16.vlgmr.msra.gmra.mrb[52].mxu0 %v7691_v56 }
 0x86e   :  { %9316 = vmatpush1.bf16.msra.mxu1 %v12106_v38  ;;  %9480 = vmatpush1.bf16.msra.mxu0 %v12109_v2  ;;  %v12195_v38 = vld [vmem:[#allocation8 + $0x5cc] ss:$16 sps:$4 sm:$0xff]  }
 0x86f   :  { %9317 = vmatprep.subr.bf16.mxu1 %v12114_v11  ;;  %9481 = vmatprep.subr.bf16.mxu0 %v12117_v17  ;;  %v16796_v2 = vld [vmem:[#allocation19_spill] sm:$0xff]  ;;  %v7652_v11 = vrot.slane %v16271_v61, %v16795_v49  ;;  %v16797_v17 = vld [vmem:[#allocation20_spill] sm:$0xff] }
 0x870   :  { %v7606_v56 = vrot.slane %v16266_v48, %v16796_v2  ;;  %v12237_v49 = vld [vmem:[#allocation8 + $0x6ac] ss:$16 sps:$4 sm:$0xff]  }
 0x872   :  { %9318 = vmatpush1.bf16.msra.mxu1 %v12112_v50  ;;  %9482 = vmatpush1.bf16.msra.mxu0 %v12115_v7  ;;  %v7614_v50 = vrot.slane %v16266_v48, %v16797_v17 }
 0x873   :  { %9319 = vmatprep.subr.bf16.mxu1 %v12120_v16  ;;  %9483 = vmatprep.subr.bf16.mxu0 %v12123_v9  ;;  %v7656_v16 = vrot.slane %v16271_v61, %v16796_v2  ;;  %v12190_v9 = vld [vmem:[#allocation8 + $0x5c0] ss:$16 sps:$4 sm:$0xff]   ;;  %v12243_v2 = vld [vmem:[#allocation8 + $0x6cc] ss:$16 sps:$4 sm:$0xff]  }
 0x876   :  { %9320 = vmatpush1.bf16.msra.mxu1 %v12118_v33  ;;  %9484 = vmatpush1.bf16.msra.mxu0 %v12121_v42  ;;  %v12193_v33 = vld [vmem:[#allocation8 + $0x5c8] ss:$16 sps:$4 sm:$0xff]  }
 0x877   :  { %9321 = vmatprep.subr.bf16.mxu1 %v12126_v3  ;;  %9485 = vmatprep.subr.bf16.mxu0 %v12129_v4 }
 0x87a   :  { %9322 = vmatpush1.bf16.msra.mxu1 %v12124_v62  ;;  %9486 = vmatpush1.bf16.msra.mxu0 %v12127_v12  ;;  %v7664_v62 = vrot.slane %v16271_v61, %v16797_v17  ;;  %v12198_v12 = vld [vmem:[#allocation8 + $0x5e4] ss:$16 sps:$4 sm:$0xff]  }
 0x87b   :  { %9323 = vmatprep.subr.bf16.mxu1 %v12132_v13  ;;  %9487 = vmatprep.subr.bf16.mxu0 %v12135_v55  ;;  %v12201_v13 = vld [vmem:[#allocation8 + $0x5ec] ss:$16 sps:$4 sm:$0xff]   ;;  %v12246_v17 = vld [vmem:[#allocation8 + $0x6e4] ss:$16 sps:$4 sm:$0xff]  }
 0x87e   :  { %9324 = vmatpush1.bf16.msra.mxu1 %v12130_v44  ;;  %9488 = vmatpush1.bf16.msra.mxu0 %v12133_v59 }
 0x87f   :  { %9325 = vmatprep.subr.bf16.mxu1 %v12138_v1  ;;  %9489 = vmatprep.subr.bf16.mxu0 %v12141_v0 }
 0x882   :  { %9326 = vmatpush1.bf16.msra.mxu1 %v12136_v28  ;;  %9490 = vmatpush1.bf16.msra.mxu0 %v12139_v21 }
 0x883   :  { %9327 = vmatprep.subr.bf16.mxu1 %v12144_v34  ;;  %9491 = vmatprep.subr.bf16.mxu0 %v12147_v57 }
 0x886   :  { %9328 = vmatpush1.bf16.msra.mxu1 %v12142_v31  ;;  %9492 = vmatpush1.bf16.msra.mxu0 %v12145_v36  ;;  %v12196_v31 = vld [vmem:[#allocation8 + $0x5e0] ss:$16 sps:$4 sm:$0xff]   ;;  %v12199_v36 = vld [vmem:[#allocation8 + $0x5e8] ss:$16 sps:$4 sm:$0xff]  }
 0x887   :  { %9329 = vmatprep.subr.bf16.mxu1 %v12150_v23  ;;  %9493 = vmatprep.subr.bf16.mxu0 %v12153_v10 }
 0x88a   :  { %9330 = vmatpush1.bf16.msra.mxu1 %v12148_v51  ;;  %9494 = vmatpush1.bf16.msra.mxu0 %v12151_v53  ;;  %v12204_v51 = vld [vmem:[#allocation8 + $0x604] ss:$16 sps:$4 sm:$0xff]   ;;  %v12207_v53 = vld [vmem:[#allocation8 + $0x60c] ss:$16 sps:$4 sm:$0xff]  }
 0x88b   :  { %9331 = vmatprep.subr.bf16.mxu1 %v12156_v46  ;;  %9495 = vmatprep.subr.bf16.mxu0 %v12159_v18 }
 0x88e   :  { %9332 = vmatpush1.bf16.msra.mxu1 %v12154_v43  ;;  %9496 = vmatpush1.bf16.msra.mxu0 %v12157_v6  ;;  %v12202_v6 = vld [vmem:[#allocation8 + $0x600] ss:$16 sps:$4 sm:$0xff]  }
 0x88f   :  { %9333 = vmatprep.subr.bf16.mxu1 %v12162_v45  ;;  %9497 = vmatprep.subr.bf16.mxu0 %v12165_v47  ;;  %v12205_v45 = vld [vmem:[#allocation8 + $0x608] ss:$16 sps:$4 sm:$0xff]  }
 0x892   :  { %9334 = vmatpush1.bf16.msra.mxu1 %v12160_v52  ;;  %9498 = vmatpush1.bf16.msra.mxu0 %v12163_v22  ;;  %v12210_v52 = vld [vmem:[#allocation8 + $0x624] ss:$16 sps:$4 sm:$0xff]   ;;  %v12213_v22 = vld [vmem:[#allocation8 + $0x62c] ss:$16 sps:$4 sm:$0xff]  }
 0x893   :  { %9335 = vmatprep.subr.bf16.mxu1 %v12168_v19  ;;  %9499 = vmatprep.subr.bf16.mxu0 %v12171_v24  ;;  %v12208_v24 = vld [vmem:[#allocation8 + $0x620] ss:$16 sps:$4 sm:$0xff]  }
 0x896   :  { %9336 = vmatpush1.bf16.msra.mxu1 %v12166_v39  ;;  %9500 = vmatpush1.bf16.msra.mxu0 %v12169_v41  ;;  %v12211_v39 = vld [vmem:[#allocation8 + $0x628] ss:$16 sps:$4 sm:$0xff]   ;;  %v12216_v41 = vld [vmem:[#allocation8 + $0x644] ss:$16 sps:$4 sm:$0xff]  }
 0x897   :  { %9337 = vmatprep.subr.bf16.mxu1 %v12174_v63  ;;  %9501 = vmatprep.subr.bf16.mxu0 %v12177_v5  ;;  %v12219_v63 = vld [vmem:[#allocation8 + $0x64c] ss:$16 sps:$4 sm:$0xff]   ;;  %v12214_v5 = vld [vmem:[#allocation8 + $0x640] ss:$16 sps:$4 sm:$0xff]  }
 0x89a   :  { %9338 = vmatpush1.bf16.msra.mxu1 %v12172_v25  ;;  %9502 = vmatpush1.bf16.msra.mxu0 %v12175_v26  ;;  %v12217_v25 = vld [vmem:[#allocation8 + $0x648] ss:$16 sps:$4 sm:$0xff]   ;;  %v12222_v26 = vld [vmem:[#allocation8 + $0x664] ss:$16 sps:$4 sm:$0xff]  }
 0x89b   :  { %9339 = vmatprep.subr.bf16.mxu1 %v12180_v29  ;;  %9503 = vmatprep.subr.bf16.mxu0 %v12183_v15  ;;  %v12225_v29 = vld [vmem:[#allocation8 + $0x66c] ss:$16 sps:$4 sm:$0xff]   ;;  %v12220_v15 = vld [vmem:[#allocation8 + $0x660] ss:$16 sps:$4 sm:$0xff]  }
 0x89e   :  { %9340 = vmatpush1.bf16.msra.mxu1 %v12178_v54  ;;  %9504 = vmatpush1.bf16.msra.mxu0 %v12181_v30  ;;  %v12223_v54 = vld [vmem:[#allocation8 + $0x668] ss:$16 sps:$4 sm:$0xff]   ;;  %v12228_v30 = vld [vmem:[#allocation8 + $0x684] ss:$16 sps:$4 sm:$0xff]  }
 0x89f   :  { %9341 = vmatprep.subr.bf16.mxu1 %v12186_v20  ;;  %9505 = vmatprep.subr.bf16.mxu0 %v12189_v40  ;;  %v12231_v20 = vld [vmem:[#allocation8 + $0x68c] ss:$16 sps:$4 sm:$0xff]   ;;  %v12226_v40 = vld [vmem:[#allocation8 + $0x680] ss:$16 sps:$4 sm:$0xff]  }
 0x8a2   :  { %9342 = vmatpush1.bf16.msra.mxu1 %v12184_v58  ;;  %9506 = vmatpush1.bf16.msra.mxu0 %v12187_v35  ;;  %v7492_v7 = vpop.f32.mrb[60].mxu1  ;;  %v12229_v58 = vld [vmem:[#allocation8 + $0x688] ss:$16 sps:$4 sm:$0xff]   ;;  %v12234_v35 = vld [vmem:[#allocation8 + $0x6a4] ss:$16 sps:$4 sm:$0xff]  }
 0x8a3   :  { %v7627_v42 = vmul.f32 %v7602_v60, %v7492_v7  ;;  %v16302_v3 = vpop.f32.mrb[48].mxu0  ;;  %v7494_v4 = vpop.f32.mrb[61].mxu1  ;;  %9343 = vmatprep.subr.bf16.mxu1 %v12192_v32  ;;  %9507 = vmatprep.subr.bf16.mxu0 %v12195_v38  ;;  %v12232_v60 = vld [vmem:[#allocation8 + $0x6a0] ss:$16 sps:$4 sm:$0xff]   ;;  %v12235_v32 = vld [vmem:[#allocation8 + $0x6a8] ss:$16 sps:$4 sm:$0xff]  }
 0x8a4   :  { %v7628_v55 = vmul.f32 %v7606_v56, %v7494_v4  ;;  %v7576_v44 = vpop.f32.mrb[49].mxu0  ;;  %v7496_v59 = vpop.f32.mrb[62].mxu1  ;;  %v12240_v38 = vld [vmem:[#allocation8 + $0x6c4] ss:$16 sps:$4 sm:$0xff]   ;;  %v12238_v56 = vld [vmem:[#allocation8 + $0x6c0] ss:$16 sps:$4 sm:$0xff]  }
 0x8a5   :  { %v7677_v1 = vadd.f32 %v7652_v11, %v7627_v42  ;;  %v7630_v0 = vmul.f32 %v7614_v50, %v7576_v44  ;;  %v7578_v28 = vpop.f32.mrb[50].mxu0  ;;  %v7497_v21 = vpop.f32.mrb[63].mxu1  ;;  %v12241_v11 = vld [vmem:[#allocation8 + $0x6c8] ss:$16 sps:$4 sm:$0xff]   ;;  %v12249_v50 = vld [vmem:[#allocation8 + $0x6ec] ss:$16 sps:$4 sm:$0xff]  }
 0x8a6   :  { %v7678_v34 = vadd.f32 %v7656_v16, %v7628_v55  ;;  %v7579_v57 = vpop.f32.mrb[51].mxu0  ;;  %9344 = vmatpush1.bf16.msra.mxu1 %v12190_v9  ;;  %9508 = vmatpush1.bf16.msra.mxu0 %v12193_v33  ;;  %v12244_v7 = vld [vmem:[#allocation8 + $0x6e0] ss:$16 sps:$4 sm:$0xff]   ;;  %v12247_v16 = vld [vmem:[#allocation8 + $0x6e8] ss:$16 sps:$4 sm:$0xff]  }
 0x8a7   :  { %v7685_v23 = vmax.f32 %v7677_v1, 0.0  ;;  %v7680_v10 = vadd.f32 %v7664_v62, %v7630_v0  ;;  %9345 = vmatprep.subr.bf16.mxu1 %v12198_v12  ;;  %9509 = vmatprep.subr.bf16.mxu0 %v12201_v13  ;;  %v12252_v9 = vld [vmem:[#allocation8 + $0x704] ss:$16 sps:$4 sm:$0xff]   ;;  %v12255_v33 = vld [vmem:[#allocation8 + $0x70c] ss:$16 sps:$4 sm:$0xff]  }
 0x8a8   :  { %v7686_v46 = vmax.f32 %v7678_v34, 0.0  ;;  %v12250_v42 = vld [vmem:[#allocation8 + $0x700] ss:$16 sps:$4 sm:$0xff]   ;;  %v12253_v4 = vld [vmem:[#allocation8 + $0x708] ss:$16 sps:$4 sm:$0xff]  }
 0x8a9   :  { %v7688_v18 = vmax.f32 %v7680_v10, 0.0  ;;  %v7693_v47 = vpack.c.bf16 %v7685_v23, %v7685_v23  ;;  %v12258_v62 = vld [vmem:[#allocation8 + $0x724] ss:$16 sps:$4 sm:$0xff]   ;;  %v12261_v12 = vld [vmem:[#allocation8 + $0x72c] ss:$16 sps:$4 sm:$0xff]  }
 0x8aa   :  { %v7694_v43 = vpack.c.bf16 %v7686_v46, %v7686_v46  ;;  %9346 = vmatpush1.bf16.msra.mxu1 %v12196_v31  ;;  %9510 = vmatpush1.bf16.msra.mxu0 %v12199_v36  ;;  %v12256_v13 = vld [vmem:[#allocation8 + $0x720] ss:$16 sps:$4 sm:$0xff]   ;;  %v12259_v55 = vld [vmem:[#allocation8 + $0x728] ss:$16 sps:$4 sm:$0xff]   ;;  %v12264_v44 = vld [vmem:[#allocation8 + $0x744] ss:$16 sps:$4 sm:$0xff]  }
 0x8ab   :  { %9356 = vmatprep.subr.bf16.mxu1 %v12204_v51  ;;  %9520 = vmatprep.subr.bf16.mxu0 %v12207_v53  ;;  %v7696_v19 = vpack.c.bf16 %v7688_v18, %v7688_v18  ;;  %v12267_v59 = vld [vmem:[#allocation8 + $0x74c] ss:$16 sps:$4 sm:$0xff]   ;;  %v12262_v1 = vld [vmem:[#allocation8 + $0x740] ss:$16 sps:$4 sm:$0xff]   ;;  %v12265_v0 = vld [vmem:[#allocation8 + $0x748] ss:$16 sps:$4 sm:$0xff]  }
 0x8ac   :  { %9347 = vmatprep.mubr.bf16.mxu1 %v7694_v43  ;;  %9511 = vmatprep.mubr.bf16.mxu0 %v7694_v43  ;;  %v12270_v28 = vld [vmem:[#allocation8 + $0x764] ss:$16 sps:$4 sm:$0xff]   ;;  %v12273_v21 = vld [vmem:[#allocation8 + $0x76c] ss:$16 sps:$4 sm:$0xff]   ;;  %v12268_v34 = vld [vmem:[#allocation8 + $0x760] ss:$16 sps:$4 sm:$0xff]  }
 0x8ad   :  { %9348 = vmatmul.mubr.bf16.vlgmr.msra.gmra.mrb[64].mxu1 %v7693_v47  ;;  %9512 = vmatmul.mubr.bf16.vlgmr.msra.gmra.mrb[52].mxu0 %v7693_v47  ;;  %v12271_v57 = vld [vmem:[#allocation8 + $0x768] ss:$16 sps:$4 sm:$0xff]   ;;  %v12276_v31 = vld [vmem:[#allocation8 + $0x784] ss:$16 sps:$4 sm:$0xff]   ;;  %v12279_v36 = vld [vmem:[#allocation8 + $0x78c] ss:$16 sps:$4 sm:$0xff]  }
 0x8ae   :  { %9357 = vmatpush1.bf16.msra.mxu1 %v12202_v6  ;;  %9521 = vmatpush1.bf16.msra.mxu0 %v12205_v45  ;;  %v12274_v23 = vld [vmem:[#allocation8 + $0x780] ss:$16 sps:$4 sm:$0xff]   ;;  %v12277_v10 = vld [vmem:[#allocation8 + $0x788] ss:$16 sps:$4 sm:$0xff]   ;;  %v12282_v46 = vld [vmem:[#allocation8 + $0x7a4] ss:$16 sps:$4 sm:$0xff]  }
 0x8af   :  { %9388 = vmatprep.mubr.bf16.mxu1 %v7696_v19  ;;  %9552 = vmatprep.mubr.bf16.mxu0 %v7696_v19  ;;  %v16798_v51 = vld [vmem:[#allocation22_spill] sm:$0xff]  ;;  %v12285_v18 = vld [vmem:[#allocation8 + $0x7ac] ss:$16 sps:$4 sm:$0xff]  }
 0x8b0   :  { %9358 = vmatprep.subr.bf16.mxu1 %v12210_v52  ;;  %9522 = vmatprep.subr.bf16.mxu0 %v12213_v22  ;;  %v7610_v53 = vrot.slane %v16266_v48, %v16798_v51  ;;  %v12280_v43 = vld [vmem:[#allocation8 + $0x7a0] ss:$16 sps:$4 sm:$0xff]   ;;  %v12283_v6 = vld [vmem:[#allocation8 + $0x7a8] ss:$16 sps:$4 sm:$0xff]   ;;  %v7660_v47 = vrot.slane %v16271_v61, %v16798_v51  ;;  %v12288_v52 = vld [vmem:[#allocation8 + $0x7c4] ss:$16 sps:$4 sm:$0xff]  }
 0x8b1   :  { %v12291_v22 = vld [vmem:[#allocation8 + $0x7cc] ss:$16 sps:$4 sm:$0xff]   ;;  %v12286_v48 = vld [vmem:[#allocation8 + $0x7c0] ss:$16 sps:$4 sm:$0xff]   ;;  %v12289_v19 = vld [vmem:[#allocation8 + $0x7c8] ss:$16 sps:$4 sm:$0xff]  }
 0x8b2   :  { %9359 = vmatpush1.bf16.msra.mxu1 %v12208_v24  ;;  %9523 = vmatpush1.bf16.msra.mxu0 %v12211_v39  ;;  %v7629_v45 = vmul.f32 %v7610_v53, %v16302_v3  ;;  %v12294_v39 = vld [vmem:[#allocation8 + $0x7e4] ss:$16 sps:$4 sm:$0xff]   ;;  %v12295_v3 = vld [vmem:[#allocation8 + $0x7e8] ss:$16 sps:$4 sm:$0xff]  }
 0x8b3   :  { %9360 = vmatprep.subr.bf16.mxu1 %v12216_v41  ;;  %9524 = vmatprep.subr.bf16.mxu0 %v12219_v63  ;;  %v12297_v41 = vld [vmem:[#allocation8 + $0x7ec] ss:$16 sps:$4 sm:$0xff]   ;;  %v12292_v63 = vld [vmem:[#allocation8 + $0x7e0] ss:$16 sps:$4 sm:$0xff]  }
 0x8b4   :  { %v7679_v24 = vadd.f32 %v7660_v47, %v7629_v45  ;;  %v12298_v61 = vld [vmem:[%s16566_s19 + $0x40] sm:$0xff]  }
 0x8b6   :  { %9361 = vmatpush1.bf16.msra.mxu1 %v12214_v5  ;;  %9525 = vmatpush1.bf16.msra.mxu0 %v12217_v25  ;;  %v7687_v5 = vmax.f32 %v7679_v24, 0.0  ;;  %v12299_v25 = vld [vmem:[%s16566_s19 + $0xc0] sm:$0xff]  }
 0x8b7   :  { %9362 = vmatprep.subr.bf16.mxu1 %v12222_v26  ;;  %9526 = vmatprep.subr.bf16.mxu0 %v12225_v29  ;;  %v12300_v26 = vld [vmem:[%s16566_s19] sm:$0xff]  }
 0x8b8   :  { %v12301_v29 = vld [vmem:[%s16566_s19 + $0x80] sm:$0xff]  }
 0x8ba   :  { %9363 = vmatpush1.bf16.msra.mxu1 %v12220_v15  ;;  %9527 = vmatpush1.bf16.msra.mxu0 %v12223_v54  ;;  %v7695_v15 = vpack.c.bf16 %v7687_v5, %v7687_v5  ;;  %v12302_v54 = vld [vmem:[%s16566_s19 + $0x48] sm:$0xff]  }
 0x8bb   :  { %9364 = vmatprep.subr.bf16.mxu1 %v12228_v30  ;;  %9528 = vmatprep.subr.bf16.mxu0 %v12231_v20  ;;  %v12303_v30 = vld [vmem:[%s16566_s19 + $0xc8] sm:$0xff]  }
 0x8bc   :  { %v12304_v20 = vld [vmem:[%s16566_s19 + $0x8] sm:$0xff]  }
 0x8be   :  { %9365 = vmatpush1.bf16.msra.mxu1 %v12226_v40  ;;  %9529 = vmatpush1.bf16.msra.mxu0 %v12229_v58  ;;  %v12305_v40 = vld [vmem:[%s16566_s19 + $0x88] sm:$0xff]   ;;  %v12306_v58 = vld [vmem:[%s16566_s19 + $0x50] sm:$0xff]  }
 0x8bf   :  { %9366 = vmatprep.subr.bf16.mxu1 %v12234_v35  ;;  %9530 = vmatprep.subr.bf16.mxu0 %v12237_v49  ;;  %v12307_v35 = vld [vmem:[%s16566_s19 + $0xd0] sm:$0xff]  }
 0x8c0   :  { %v12308_v49 = vld [vmem:[%s16566_s19 + $0x10] sm:$0xff]  }
 0x8c2   :  { %9367 = vmatpush1.bf16.msra.mxu1 %v12232_v60  ;;  %9531 = vmatpush1.bf16.msra.mxu0 %v12235_v32  ;;  %v12309_v60 = vld [vmem:[%s16566_s19 + $0x90] sm:$0xff]   ;;  %v12310_v32 = vld [vmem:[%s16566_s19 + $0x58] sm:$0xff]  }
 0x8c3   :  { %9368 = vmatprep.subr.bf16.mxu1 %v12240_v38  ;;  %9532 = vmatprep.subr.bf16.mxu0 %v12243_v2  ;;  %v12311_v38 = vld [vmem:[%s16566_s19 + $0xd8] sm:$0xff]  }
 0x8c4   :  { %v12312_v2 = vld [vmem:[%s16566_s19 + $0x18] sm:$0xff]  }
 0x8c6   :  { %9369 = vmatpush1.bf16.msra.mxu1 %v12238_v56  ;;  %9533 = vmatpush1.bf16.msra.mxu0 %v12241_v11  ;;  %v12313_v56 = vld [vmem:[%s16566_s19 + $0x98] sm:$0xff]   ;;  %v12314_v11 = vld [vmem:[%s16566_s19 + $0x60] sm:$0xff]  }
 0x8c7   :  { %9370 = vmatprep.subr.bf16.mxu1 %v12246_v17  ;;  %9534 = vmatprep.subr.bf16.mxu0 %v12249_v50  ;;  %v12315_v17 = vld [vmem:[%s16566_s19 + $0xe0] sm:$0xff]  }
 0x8c8   :  { %v12316_v50 = vld [vmem:[%s16566_s19 + $0x20] sm:$0xff]  }
 0x8ca   :  { %9371 = vmatpush1.bf16.msra.mxu1 %v12244_v7  ;;  %9535 = vmatpush1.bf16.msra.mxu0 %v12247_v16  ;;  %v12317_v7 = vld [vmem:[%s16566_s19 + $0xa0] sm:$0xff]   ;;  %v12318_v16 = vld [vmem:[%s16566_s19 + $0x68] sm:$0xff]  }
 0x8cb   :  { %9372 = vmatprep.subr.bf16.mxu1 %v12252_v9  ;;  %9536 = vmatprep.subr.bf16.mxu0 %v12255_v33  ;;  %v12319_v9 = vld [vmem:[%s16566_s19 + $0xe8] sm:$0xff]  }
 0x8cc   :  { %v12320_v33 = vld [vmem:[%s16566_s19 + $0x28] sm:$0xff]  }
 0x8ce   :  { %9373 = vmatpush1.bf16.msra.mxu1 %v12250_v42  ;;  %9537 = vmatpush1.bf16.msra.mxu0 %v12253_v4  ;;  %v12321_v42 = vld [vmem:[%s16566_s19 + $0xa8] sm:$0xff]   ;;  %v12322_v4 = vld [vmem:[%s16566_s19 + $0x70] sm:$0xff]  }
 0x8cf   :  { %9374 = vmatprep.subr.bf16.mxu1 %v12258_v62  ;;  %9538 = vmatprep.subr.bf16.mxu0 %v12261_v12  ;;  %v12323_v62 = vld [vmem:[%s16566_s19 + $0xf0] sm:$0xff]  }
 0x8d0   :  { %v12324_v12 = vld [vmem:[%s16566_s19 + $0x30] sm:$0xff]  }
 0x8d2   :  { %9375 = vmatpush1.bf16.msra.mxu1 %v12256_v13  ;;  %9539 = vmatpush1.bf16.msra.mxu0 %v12259_v55  ;;  %v12325_v13 = vld [vmem:[%s16566_s19 + $0xb0] sm:$0xff]   ;;  %v12326_v55 = vld [vmem:[%s16566_s19 + $0x78] sm:$0xff]  }
 0x8d3   :  { %9376 = vmatprep.subr.bf16.mxu1 %v12264_v44  ;;  %9540 = vmatprep.subr.bf16.mxu0 %v12267_v59  ;;  %v12327_v44 = vld [vmem:[%s16566_s19 + $0xf8] sm:$0xff]  }
 0x8d4   :  { %v12328_v59 = vld [vmem:[%s16566_s19 + $0x38] sm:$0xff]  }
 0x8d6   :  { %9377 = vmatpush1.bf16.msra.mxu1 %v12262_v1  ;;  %9541 = vmatpush1.bf16.msra.mxu0 %v12265_v0  ;;  %v12329_v1 = vld [vmem:[%s16566_s19 + $0xb8] sm:$0xff]   ;;  %v12330_v0 = vld [vmem:[%s16568_s21 + $0x40] sm:$0xff]  }
 0x8d7   :  { %9378 = vmatprep.subr.bf16.mxu1 %v12270_v28  ;;  %9542 = vmatprep.subr.bf16.mxu0 %v12273_v21  ;;  %v12331_v28 = vld [vmem:[%s16568_s21 + $0xc0] sm:$0xff]  }
 0x8d8   :  { %v9561_v21 = vld [vmem:[%s16564_s17] sm:$0xf] }
 0x8da   :  { %9379 = vmatpush1.bf16.msra.mxu1 %v12268_v34  ;;  %9543 = vmatpush1.bf16.msra.mxu0 %v12271_v57  ;;  %v9587_v34 = vld [vmem:[%s16565_s18] sm:$0xf]  ;;  %v9566_v57 = vrot.slane %v9561_v21, %v16791_v14 }
 0x8db   :  { %9380 = vmatprep.subr.bf16.mxu1 %v12276_v31  ;;  %9544 = vmatprep.subr.bf16.mxu0 %v12279_v36  ;;  %v9574_v31 = vrot.slane %v9561_v21, %v16794_v37  ;;  %v9570_v36 = vrot.slane %v9561_v21, %v16792_v27  ;;  %v9600_v51 = vrot.slane %v9587_v34, %v16794_v37 }
 0x8de   :  { %9381 = vmatpush1.bf16.msra.mxu1 %v12274_v23  ;;  %9545 = vmatpush1.bf16.msra.mxu0 %v12277_v10  ;;  %v9578_v23 = vrot.slane %v9561_v21, %v16793_v8  ;;  %v9592_v10 = vrot.slane %v9587_v34, %v16791_v14 }
 0x8df   :  { %9382 = vmatprep.subr.bf16.mxu1 %v12282_v46  ;;  %9546 = vmatprep.subr.bf16.mxu0 %v12285_v18  ;;  %v9596_v18 = vrot.slane %v9587_v34, %v16792_v27 }
 0x8e2   :  { %9383 = vmatpush1.bf16.msra.mxu1 %v12280_v43  ;;  %9547 = vmatpush1.bf16.msra.mxu0 %v12283_v6  ;;  %v9604_v43 = vrot.slane %v9587_v34, %v16793_v8 }
 0x8e3   :  { %9384 = vmatprep.subr.bf16.mxu1 %v12288_v52  ;;  %9548 = vmatprep.subr.bf16.mxu0 %v12291_v22 }
 0x8e6   :  { %9385 = vmatpush1.bf16.msra.mxu1 %v12286_v48  ;;  %9549 = vmatpush1.bf16.msra.mxu0 %v12289_v19 }
 0x8e7   :  { %9386 = vmatprep.subr.bf16.mxu1 %v12294_v39  ;;  %9550 = vmatprep.subr.bf16.mxu0 %v12297_v41 }
 0x8ea   :  { %9387 = vmatpush1.bf16.msra.mxu1 %v12292_v63  ;;  %9551 = vmatpush1.bf16.msra.mxu0 %v12295_v3 }
 0x8eb   :  { %11200 = vmatprep.subr.bf16.mxu1 %v12298_v61  ;;  %11222 = vmatprep.subr.bf16.mxu0 %v12299_v25 }
 0x8ed   :  { %9389 = vmatmul.mubr.bf16.vlgmr.msra.gmra.mrb[64].mxu1 %v7695_v15  ;;  %9553 = vmatmul.mubr.bf16.vlgmr.msra.gmra.mrb[52].mxu0 %v7695_v15  ;;  %v12333_v15 = vld [vmem:[%s16568_s21 + $0x80] sm:$0xff]  }
 0x8ee   :  { %11201 = vmatpush3.bf16.msra.mxu1 %v12300_v26  ;;  %11223 = vmatpush3.bf16.msra.mxu0 %v12301_v29  ;;  %v12332_v29 = vld [vmem:[%s16568_s21] sm:$0xff]  }
 0x8ef   :  { %11202 = vmatprep.subr.bf16.mxu1 %v12302_v54  ;;  %11224 = vmatprep.subr.bf16.mxu0 %v12303_v30 }
 0x8f2   :  { %11203 = vmatpush3.bf16.msra.mxu1 %v12304_v20  ;;  %11225 = vmatpush3.bf16.msra.mxu0 %v12305_v40  ;;  %v12334_v20 = vld [vmem:[%s16568_s21 + $0x48] sm:$0xff]  }
 0x8f3   :  { %11204 = vmatprep.subr.bf16.mxu1 %v12306_v58  ;;  %11226 = vmatprep.subr.bf16.mxu0 %v12307_v35  ;;  %v12335_v40 = vld [vmem:[%s16568_s21 + $0xc8] sm:$0xff]  }
 0x8f4   :  { %v12336_v58 = vld [vmem:[%s16568_s21 + $0x8] sm:$0xff]  }
 0x8f5   :  { %v12337_v35 = vld [vmem:[%s16568_s21 + $0x88] sm:$0xff]  }
 0x8f6   :  { %11205 = vmatpush3.bf16.msra.mxu1 %v12308_v49  ;;  %11227 = vmatpush3.bf16.msra.mxu0 %v12309_v60  ;;  %v12338_v49 = vld [vmem:[%s16568_s21 + $0x50] sm:$0xff]  }
 0x8f7   :  { %11206 = vmatprep.subr.bf16.mxu1 %v12310_v32  ;;  %11228 = vmatprep.subr.bf16.mxu0 %v12311_v38  ;;  %v12339_v60 = vld [vmem:[%s16568_s21 + $0xd0] sm:$0xff]  }
 0x8f8   :  { %v12340_v32 = vld [vmem:[%s16568_s21 + $0x10] sm:$0xff]  }
 0x8f9   :  { %v12341_v38 = vld [vmem:[%s16568_s21 + $0x90] sm:$0xff]  }
 0x8fa   :  { %11207 = vmatpush3.bf16.msra.mxu1 %v12312_v2  ;;  %11229 = vmatpush3.bf16.msra.mxu0 %v12313_v56  ;;  %v12342_v2 = vld [vmem:[%s16568_s21 + $0x58] sm:$0xff]  }
 0x8fb   :  { %11208 = vmatprep.subr.bf16.mxu1 %v12314_v11  ;;  %11230 = vmatprep.subr.bf16.mxu0 %v12315_v17  ;;  %v12343_v56 = vld [vmem:[%s16568_s21 + $0xd8] sm:$0xff]  }
 0x8fc   :  { %v12344_v11 = vld [vmem:[%s16568_s21 + $0x18] sm:$0xff]  }
 0x8fd   :  { %v12345_v17 = vld [vmem:[%s16568_s21 + $0x98] sm:$0xff]  }
 0x8fe   :  { %11209 = vmatpush3.bf16.msra.mxu1 %v12316_v50  ;;  %11231 = vmatpush3.bf16.msra.mxu0 %v12317_v7  ;;  %v12346_v50 = vld [vmem:[%s16568_s21 + $0x60] sm:$0xff]  }
 0x8ff   :  { %11210 = vmatprep.subr.bf16.mxu1 %v12318_v16  ;;  %11232 = vmatprep.subr.bf16.mxu0 %v12319_v9  ;;  %v12347_v7 = vld [vmem:[%s16568_s21 + $0xe0] sm:$0xff]  }
 0x900   :  { %v12348_v16 = vld [vmem:[%s16568_s21 + $0x20] sm:$0xff]  }
 0x901   :  { %v12349_v9 = vld [vmem:[%s16568_s21 + $0xa0] sm:$0xff]  }
 0x902   :  { %11211 = vmatpush3.bf16.msra.mxu1 %v12320_v33  ;;  %11233 = vmatpush3.bf16.msra.mxu0 %v12321_v42  ;;  %v12350_v33 = vld [vmem:[%s16568_s21 + $0x68] sm:$0xff]  }
 0x903   :  { %11212 = vmatprep.subr.bf16.mxu1 %v12322_v4  ;;  %11234 = vmatprep.subr.bf16.mxu0 %v12323_v62  ;;  %v12351_v42 = vld [vmem:[%s16568_s21 + $0xe8] sm:$0xff]  }
 0x904   :  { %v12352_v4 = vld [vmem:[%s16568_s21 + $0x28] sm:$0xff]  }
 0x905   :  { %v12353_v62 = vld [vmem:[%s16568_s21 + $0xa8] sm:$0xff]  }
 0x906   :  { %11213 = vmatpush3.bf16.msra.mxu1 %v12324_v12  ;;  %11235 = vmatpush3.bf16.msra.mxu0 %v12325_v13  ;;  %v12354_v12 = vld [vmem:[%s16568_s21 + $0x70] sm:$0xff]  }
 0x907   :  { %11214 = vmatprep.subr.bf16.mxu1 %v12326_v55  ;;  %11236 = vmatprep.subr.bf16.mxu0 %v12327_v44  ;;  %v12355_v13 = vld [vmem:[%s16568_s21 + $0xf0] sm:$0xff]  }
 0x908   :  { %v12356_v55 = vld [vmem:[%s16568_s21 + $0x30] sm:$0xff]  }
 0x909   :  { %v12357_v44 = vld [vmem:[%s16568_s21 + $0xb0] sm:$0xff]  }
 0x90a   :  { %11215 = vmatpush3.bf16.msra.mxu1 %v12328_v59  ;;  %11237 = vmatpush3.bf16.msra.mxu0 %v12329_v1  ;;  %v12358_v59 = vld [vmem:[%s16568_s21 + $0x78] sm:$0xff]  }
 0x90b   :  { %11244 = vmatprep.subr.bf16.mxu1 %v12330_v0  ;;  %11266 = vmatprep.subr.bf16.mxu0 %v12331_v28  ;;  %v12359_v1 = vld [vmem:[%s16568_s21 + $0xf8] sm:$0xff]  }
 0x90c   :  { %v12360_v0 = vld [vmem:[%s16568_s21 + $0x38] sm:$0xff]  }
 0x90d   :  { %v12361_v28 = vld [vmem:[%s16568_s21 + $0xb8] sm:$0xff]  }
 0x9c0   :  { %v9390_v53 = vpop.f32.mrb[64].mxu1  ;;  %v9554_v46 = vpop.f32.mrb[52].mxu0 }
 0x9c1   :  { %v9583_v6 = vmul.f32 %v9566_v57, %v9390_v53  ;;  %v9585_v45 = vmul.f32 %v9574_v31, %v9554_v46  ;;  %v9392_v47 = vpop.f32.mrb[65].mxu1  ;;  %v9556_v52 = vpop.f32.mrb[53].mxu0  ;;  %v10975_v57 = vld [vmem:[%s16567_s20] ss:$0 sm:$0xff] }
 0x9c2   :  { %v9584_v22 = vmul.f32 %v9570_v36, %v9392_v47  ;;  %v9586_v48 = vmul.f32 %v9578_v23, %v9556_v52  ;;  %v9394_v19 = vpop.f32.mrb[66].mxu1  ;;  %v9558_v24 = vpop.f32.mrb[54].mxu0 }
 0x9c3   :  { %v9609_v39 = vadd.f32 %v9592_v10, %v9583_v6  ;;  %v9611_v41 = vadd.f32 %v9600_v51, %v9585_v45  ;;  %v9395_v63 = vpop.f32.mrb[67].mxu1  ;;  %v9559_v14 = vpop.f32.mrb[55].mxu0 }
 0x9c4   :  { %v9610_v3 = vadd.f32 %v9596_v18, %v9584_v22  ;;  %v9612_v37 = vadd.f32 %v9604_v43, %v9586_v48  ;;  %v11008_v22 = vld [vmem:[#allocation4] ss:$0 sm:$0xff] }
 0x9c5   :  { %v9613_v5 = vmax.f32 %v9609_v39, 0.0  ;;  %v9615_v61 = vmax.f32 %v9611_v41, 0.0 }
 0x9c6   :  { %v9614_v25 = vmax.f32 %v9610_v3, 0.0  ;;  %v9616_v27 = vmax.f32 %v9612_v37, 0.0 }
 0x9c7   :  { %v16433_v54 = vpack.c.bf16 %v9613_v5, %v9613_v5  ;;  %v16435_v30 = vpack.c.bf16 %v9615_v61, %v9615_v61 }
 0x9c8   :  { %v9618_v26 = vpack.c.bf16 %v9614_v25, %v9614_v25  ;;  %v9620_v8 = vpack.c.bf16 %v9616_v27, %v9616_v27 }
 0x9ca   :  { %9916 = vmatprep.mubr.bf16.mxu1 %v9618_v26  ;;  %9956 = vmatprep.mubr.bf16.mxu0 %v9620_v8 }
 0x9cb   :  { %9917 = vmatmul.mubr.bf16.vlgmr.msra.gmra.mrb[68].mxu1 %v16433_v54  ;;  %9957 = vmatmul.mubr.bf16.vlgmr.msra.gmra.mrb[56].mxu0 %v16435_v30 }
 0x9cc   :  { %11245 = vmatpush3.bf16.msra.mxu1 %v12332_v29  ;;  %11267 = vmatpush3.bf16.msra.mxu0 %v12333_v15 }
 0x9cd   :  { %10273 = vmatprep.mubr.bf16.mxu1 %v9618_v26  ;;  %10313 = vmatprep.mubr.bf16.mxu0 %v9620_v8 }
 0x9ce   :  { %11246 = vmatprep.subr.bf16.mxu1 %v12334_v20  ;;  %11268 = vmatprep.subr.bf16.mxu0 %v12335_v40 }
 0x9d0   :  { %11247 = vmatpush3.bf16.msra.mxu1 %v12336_v58  ;;  %11269 = vmatpush3.bf16.msra.mxu0 %v12337_v35 }
 0x9d1   :  { %11248 = vmatprep.subr.bf16.mxu1 %v12338_v49  ;;  %11270 = vmatprep.subr.bf16.mxu0 %v12339_v60 }
 0x9d4   :  { %11249 = vmatpush3.bf16.msra.mxu1 %v12340_v32  ;;  %11271 = vmatpush3.bf16.msra.mxu0 %v12341_v38 }
 0x9d5   :  { %11250 = vmatprep.subr.bf16.mxu1 %v12342_v2  ;;  %11272 = vmatprep.subr.bf16.mxu0 %v12343_v56 }
 0x9d8   :  { %11251 = vmatpush3.bf16.msra.mxu1 %v12344_v11  ;;  %11273 = vmatpush3.bf16.msra.mxu0 %v12345_v17 }
 0x9d9   :  { %11252 = vmatprep.subr.bf16.mxu1 %v12346_v50  ;;  %11274 = vmatprep.subr.bf16.mxu0 %v12347_v7 }
 0x9dc   :  { %11253 = vmatpush3.bf16.msra.mxu1 %v12348_v16  ;;  %11275 = vmatpush3.bf16.msra.mxu0 %v12349_v9 }
 0x9dd   :  { %11254 = vmatprep.subr.bf16.mxu1 %v12350_v33  ;;  %11276 = vmatprep.subr.bf16.mxu0 %v12351_v42 }
 0x9e0   :  { %11255 = vmatpush3.bf16.msra.mxu1 %v12352_v4  ;;  %11277 = vmatpush3.bf16.msra.mxu0 %v12353_v62 }
 0x9e1   :  { %11256 = vmatprep.subr.bf16.mxu1 %v12354_v12  ;;  %11278 = vmatprep.subr.bf16.mxu0 %v12355_v13 }
 0x9e4   :  { %11257 = vmatpush3.bf16.msra.mxu1 %v12356_v55  ;;  %11279 = vmatpush3.bf16.msra.mxu0 %v12357_v44 }
 0x9e5   :  { %11258 = vmatprep.subr.bf16.mxu1 %v12358_v59  ;;  %11280 = vmatprep.subr.bf16.mxu0 %v12359_v1 }
 0x9e8   :  { %11259 = vmatpush3.bf16.msra.mxu1 %v12360_v0  ;;  %11281 = vmatpush3.bf16.msra.mxu0 %v12361_v28 }
 0x9eb   :  { %10274 = vmatmul.mubr.bf16.vlgmr.msra.gmra.mrb[72].mxu1 %v16433_v54  ;;  %10314 = vmatmul.mubr.bf16.vlgmr.msra.gmra.mrb[60].mxu0 %v16435_v30 }
 0xa9e   :  { %v11216_v21 = vpop.f32.mrb[68].mxu1  ;;  %v11238_v34 = vpop.f32.mrb[56].mxu0 }
 0xa9f   :  { %v11217_v31 = vpop.f32.mrb[69].mxu1  ;;  %v11239_v36 = vpop.f32.mrb[57].mxu0 }
 0xaa0   :  { %v11218_v23 = vadd.f32 %v11217_v31, %v11216_v21  ;;  %v11240_v10 = vadd.f32 %v11239_v36, %v11238_v34  ;;  %v11219_v51 = vpop.f32.mrb[70].mxu1  ;;  %v11241_v53 = vpop.f32.mrb[58].mxu0 }
 0xaa1   :  { %v11220_v46 = vpop.f32.mrb[71].mxu1  ;;  %v11242_v18 = vpop.f32.mrb[59].mxu0 }
 0xaa2   :  { %v9919_v43 = vadd.f32 %v11218_v23, %v10975_v57 }
 0xaa4   :  { %v9959_v6 = vadd.f32 %v11240_v10, %v9919_v43 }
 0xaa6   :  { %v9965_v45 = vsel %vm9964_vm2, %v9959_v6, -inf }
 0xaa7   :  { %9966 = vmax.xlane.f32.xlu1 %v9965_v45 }
 0xabe   :  { %v11260_v47 = vpop.f32.mrb[72].mxu1  ;;  %v11282_v52 = vpop.f32.mrb[60].mxu0 }
 0xabf   :  { %v11261_v48 = vpop.f32.mrb[73].mxu1  ;;  %v11283_v19 = vpop.f32.mrb[61].mxu0 }
 0xac0   :  { %v11262_v24 = vadd.f32 %v11261_v48, %v11260_v47  ;;  %v11284_v39 = vadd.f32 %v11283_v19, %v11282_v52  ;;  %v11263_v41 = vpop.f32.mrb[74].mxu1  ;;  %v11285_v63 = vpop.f32.mrb[62].mxu0 }
 0xac1   :  { %v11264_v14 = vpop.f32.mrb[75].mxu1  ;;  %v11286_v3 = vpop.f32.mrb[63].mxu0 }
 0xac2   :  { %v10276_v37 = vadd.f32 %v11262_v24, %v11008_v22 }
 0xac4   :  { %v10316_v5 = vadd.f32 %v11284_v39, %v10276_v37 }
 0xac6   :  { %12362 = vtanh.f32 %v10316_v5 }
 0xad0   :  { %v12363_v61 = vpop.eup %12362 }
 0xad1   :  { %10322 = vst.msk [vmem:[%s16571_s24] sm:$0x3] %vm110_vm0, %v12363_v61 }
 0xb34   :  { %v9967_v25 = vpop.xlane.xlu1 %9966 }
 0xb35   :  { %v9968_v27 = vsub.f32 %v9959_v6, %v9967_v25 }
 0xb37   :  { %v9969_v26 = vmul.f32 1.442695, %v9968_v27 }
 0xb39   :  { %12364 = vpow2.f32 %v9969_v26 }
 0xb43   :  { %v12365_v8 = vpop.eup %12364 }
 0xb44   :  { %v9971_v29 = vsel %vm9964_vm2, %v12365_v8, 0.0 }
 0xb45   :  { %9972 = vadd.xlane.f32.xlu0 %v9971_v29 }
 0xbd2   :  { %v9973_v15 = vpop.xlane.xlu0 %9972 }
 0xbd3   :  { %12366 = vlog2.f32 %v9973_v15 }
 0xbdd   :  { %v12367_v54 = vpop.eup %12366 }
 0xbde   :  { %v9975_v30 = vmul.f32 0.6931472, %v12367_v54 }
 0xbe0   :  { %v9976_v20 = vsub.f32 %v9968_v27, %v9975_v30 }
 0xbe2   :  { %9977 = vst.msk [vmem:[#allocation10] sm:$0x3] %vm9964_vm2, %v9976_v20 }
 0xbe3   :  { %12434 = shalt.err (!%p12431_p6)
}
 0xbe4   :  { %s12435_s30 = scalar_lea.hbm %s16570_s23, 32 }
 0xbe5   :  { %p12436_p7 = scmp.ne.s32.totalorder %s16570_s23, %s12435_s30  ;;  %p12439_p8 = scmp.lt.u32.totalorder %s12435_s30, %s16570_s23 }
 0xbe7   :  { %p12441_p9 = pnand %p12439_p8, %p12436_p7 }
 0xbe9   :  { %12444 = shalt.err (!%p12441_p9)
}
 0xbea   :  { %10332 = dma.vmem_to_hbm [thread:$0]  %s10330_s16, 32, %s16570_s23, [#allocation7]  }
 0xbeb   :  { %12449 = dma.done.wait [#allocation7], 32  }
 0xbec   :  { %12450 = vsyncadd [#allocation7], 4294967264 }
 0xbed   :  { %10340 = vsyncpa [#allocation6], 1 }
 0xbee   :  { %10341 = vsyncpa [#allocation9], 1 }
 0xbef   :  { %10342 = vsyncpa [#allocation7], 1 }

</bundles_post_ra>
